<compile_context>
chip_gen: v6e
topology: v6e:2x2x1
jax: 0.10.0
libtpu: 0.0.40
codegen_flags: <defaults>
</compile_context>

<pallas_src>
import numpy as np
import jax
import jax.numpy as jnp
from jax import lax
from jax.experimental import pallas as pl
from jax.experimental.pallas import tpu as pltpu


def _divisor_at_most(n, k):
    """Largest divisor of n that is <= k (n >= 1, result >= 1)."""
    k = max(1, min(n, k))
    while n % k:
        k -= 1
    return k


def _pick_blocking(Cg, H, W, U):
    """Pick (CCH, UB): channel-chunk size and u-block size from the vreg budget.

    Live state per inner iteration: x1 chunk (CCH planes) + x2 chunk (CCH planes)
    + UB accumulators + ~1 temp; each (H, W) f32 plane = ceil(H/8)*ceil(W/128)
    vregs.  Keep that under ~40 of the 64 vregs to avoid spills.
    """
    vpp = max(1, -(-H // 8)) * max(1, -(-W // 128))  # vregs per (H, W) f32 plane
    budget = 40
    for ub_try in (3, 2, 1):
        cap = (budget // vpp - ub_try - 1) // 2
        if cap >= 1 or ub_try == 1:
            UB = max(1, min(ub_try, U))
            CCH = _divisor_at_most(Cg, max(1, cap))
            return CCH, UB
    return 1, 1


def _make_cost_volume_kernel(dilations, R, Cg, H, W, CCH, UB, use_relu, precast_x1):
    """One grid step handles one (batch, group, dilation) triple.

    refs:
      x1_ref  : VMEM (1, Cg, H, W)            -- one batch*group slice of x1
      x2_ref  : VMEM (1, Cg, H, W)            -- same slice of x2 (unpadded)
      o_ref   : VMEM (1, U, U, H, W)          -- cost for this (b, g, dilation)
      xsh_ref : VMEM (Cg, H+2*R*max_dil, W)   -- f32 x-shifted staging window
      x1f_ref : VMEM (Cg, H, W) f32           -- pre-cast x1 (only if input != f32)
    """
    U = 2 * R + 1
    n_chunks = Cg // CCH
    f32 = jnp.float32

    def kernel(x1_ref, x2_ref, o_ref, xsh_ref, *opt):
        x1f_ref = opt[0] if precast_x1 else None

        if precast_x1:
            # Hoist the dtype convert out of the hot loop: one cast per grid step,
            # amortized over the D*U*U accumulation work.
            x1f_ref[...] = x1_ref[0].astype(f32)

        def load_x1(c0):
            if precast_x1:
                return x1f_ref[pl.ds(c0, CCH), :, :]
            return x1_ref[0, pl.ds(c0, CCH), :, :]  # f32 inputs: no convert needed

        d_idx = pl.program_id(2)

        for di, dil in enumerate(dilations):
            # Specialize the whole body per dilation (dilations are compile-time):
            # all shift offsets below are static, sized to THIS dilation's window.
            @pl.when(d_idx == di)
            def _dilation_branch(dil=dil):
                P = R * dil  # per-dilation window half-extent

                # zero the top/bottom border rows of the staging window (once per
                # grid step; rows beyond this dilation's window are never read)
                if P > 0:
                    zrows = jnp.zeros((Cg, P, W), f32)
                    xsh_ref[:, pl.ds(0, P), :] = zrows
                    xsh_ref[:, pl.ds(P + H, P), :] = zrows

                for v in range(U):
                    dx = (v - R) * dil
                    dlo = min(W, max(0, -dx))          # first valid dest column
                    dhi = max(0, min(W, W - dx))       # one past last valid column
                    width = dhi - dlo

                    # stage xsh[c, P + y, x] = x2[c, y, x + dx]  (0 where OOB)
                    if width <= 0:
                        xsh_ref[:, pl.ds(P, H), :] = jnp.zeros((Cg, H, W), f32)
                    else:
                        if dlo > 0:
                            xsh_ref[:, pl.ds(P, H), pl.ds(0, dlo)] = (
                                jnp.zeros((Cg, H, dlo), f32))
                        if dhi < W:
                            xsh_ref[:, pl.ds(P, H), pl.ds(dhi, W - dhi)] = (
                                jnp.zeros((Cg, H, W - dhi), f32))
                        xsh_ref[:, pl.ds(P, H), pl.ds(dlo, width)] = (
                            x2_ref[0, :, :, pl.ds(dlo + dx, width)].astype(f32))

                    # u-blocked, channel-chunked accumulation: each x1 chunk load is
                    # reused by UB shifts; accumulators stay in vregs across chunks.
                    for ub0 in range(0, U, UB):
                        ublk = min(UB, U - ub0)
                        row_offs = tuple((ub0 + j) * dil for j in range(ublk))

                        def chunk_body(ci, accs, row_offs=row_offs, ublk=ublk):
                            c0 = ci * CCH
                            x1c = load_x1(c0)
                            out = []
                            for j in range(ublk):
                                x2c = xsh_ref[pl.ds(c0, CCH),
                                              pl.ds(row_offs[j], H), :]
                                out.append(accs[j] + jnp.sum(x1c * x2c, axis=0))
                            return tuple(out)

                        init = tuple(jnp.zeros((H, W), f32) for _ in range(ublk))
                        if n_chunks == 1:
                            accs = chunk_body(0, init)
                        else:
                            accs = lax.fori_loop(
                                0, n_chunks, chunk_body, init,
                                unroll=2 if n_chunks % 2 == 0 else 1)

                        for j in range(ublk):
                            acc = accs[j]
                            if use_relu:
                                acc = jnp.where(acc >= 0.0, acc, 0.1 * acc)
                            o_ref[0, ub0 + j, v, :, :] = acc.astype(o_ref.dtype)

    return kernel


def matryoshka_dilated_cost_volume(
    x1,
    x2,
    *,
    num_groups=1,
    max_displacement=4,
    stride=1,
    dilations=(1, 2, 3, 5, 9, 16),
    use_relu=False,
):
    assert stride == 1  # TODO(synk): spatial-sampler stride != 1 not implemented
    B, C, H, W = x1.shape
    G = int(num_groups)
    assert C % G == 0
    Cg = C // G
    dilations = tuple(int(d) for d in dilations)
    D = len(dilations)
    R = int(max_displacement)
    U = 2 * R + 1
    Hwin_max = H + 2 * R * max(dilations)

    # group reshape (same as x.view(b*g, c//g, h, w) in PyTorch) -- free.
    x1g = x1.reshape(B * G, Cg, H, W)
    x2g = x2.reshape(B * G, Cg, H, W)

    CCH, UB = _pick_blocking(Cg, H, W, U)
    precast_x1 = (x1.dtype != jnp.float32)

    kernel = _make_cost_volume_kernel(
        dilations, R, Cg, H, W, CCH, UB, use_relu, precast_x1)

    itemsize = jnp.dtype(x1.dtype).itemsize
    flops = 2 * B * G * Cg * H * W * D * U * U
    bytes_accessed = (x1g.size + x2g.size + B * G * D * U * U * H * W) * itemsize

    scratch_shapes = [pltpu.VMEM((Cg, Hwin_max, W), jnp.float32)]
    if precast_x1:
        scratch_shapes.append(pltpu.VMEM((Cg, H, W), jnp.float32))

    # Real VMEM footprint (double-buffered blocks + scratch) with margin; do NOT
    # blanket-request 64 MiB (that is v7x's entire per-core VMEM).
    vmem_bytes = (
        2 * 2 * Cg * H * W * itemsize           # x1, x2 blocks, double-buffered
        + 2 * U * U * H * W * itemsize          # output block, double-buffered
        + Cg * Hwin_max * W * 4                 # x-shift staging scratch
        + (Cg * H * W * 4 if precast_x1 else 0))
    vmem_limit = int(min(max(vmem_bytes * 3 // 2 + (4 << 20), 32 << 20), 112 << 20))

    out = pl.pallas_call(
        kernel,
        out_shape=jax.ShapeDtypeStruct((B * D * G, U, U, H, W), x1.dtype),
        grid_spec=pltpu.PrefetchScalarGridSpec(
            num_scalar_prefetch=0,
            grid=(B, G, D),
            in_specs=[
                pl.BlockSpec((1, Cg, H, W), lambda b, g, d: (b * G + g, 0, 0, 0)),
                pl.BlockSpec((1, Cg, H, W), lambda b, g, d: (b * G + g, 0, 0, 0)),
            ],
            # flat output row = (b*D + d)*G + g  ==  PyTorch concat order d*G + g
            out_specs=pl.BlockSpec(
                (1, U, U, H, W),
                lambda b, g, d: ((b * D + d) * G + g, 0, 0, 0, 0)),
            scratch_shapes=scratch_shapes,
        ),
        compiler_params=pltpu.CompilerParams(
            # every (b, g, d) step is independent (no cross-step scratch reuse),
            # so all axes can be sharded across TensorCores (v7x megacore).
            dimension_semantics=("parallel", "parallel", "parallel"),
            vmem_limit_bytes=vmem_limit,
        ),
        cost_estimate=pl.CostEstimate(
            flops=int(flops), transcendentals=0,
            bytes_accessed=int(bytes_accessed)),
    )(x1g, x2g)

    # (B*D*G, U, U, H, W) -> (B, D*G, U, U, H, W): pure reshape, dim-1 index is
    # exactly d*G + g as in the PyTorch concat.
    return out.reshape(B, D * G, U, U, H, W)


def get_relative_offsets(dilations, max_displacement):
    # mirrors the module's registered (unused-in-forward) `offsets` buffer
    R = max_displacement
    return np.asarray(
        [np.arange(-R, R + 1) * d for d in dilations], dtype=np.float32)


def _reference(x1, x2, num_groups, max_displacement, dilations, use_relu):
    # pure-JAX reference of the PyTorch forward, for verification
    B, C, H, W = x1.shape
    G = num_groups
    Cg = C // G
    R = max_displacement
    U = 2 * R + 1
    x1g = x1.reshape(B, G, Cg, H, W)
    x2g = x2.reshape(B, G, Cg, H, W)
    outs = []
    for d in dilations:
        P = R * d
        x2p = jnp.pad(x2g, ((0, 0), (0, 0), (0, 0), (P, P), (P, P)))
        cost = jnp.zeros((B, G, U, U, H, W), x1.dtype)
        for u in range(U):
            for v in range(U):
                y0 = P + (u - R) * d
                x0 = P + (v - R) * d
                x2s = x2p[:, :, :, y0:y0 + H, x0:x0 + W]
                cost = cost.at[:, :, u, v].set(jnp.sum(x1g * x2s, axis=2))
        outs.append(cost)
    cost = jnp.concatenate(outs, axis=1)
    if use_relu:
        cost = jnp.where(cost >= 0, cost, 0.1 * cost)
    return cost


if __name__ == "__main__":
    key = jax.random.PRNGKey(0)
    k1, k2, k3, k4, k5, k6 = jax.random.split(key, 6)

    _ = get_relative_offsets((1, 2, 3), 2)  # module buffer (unused in forward)

    # config 1: single group, leaky-relu, U=5 with UB=3 -> ragged u-blocks
    B, C, H, W = 2, 4, 16, 16
    x1 = jax.random.normal(k1, (B, C, H, W), dtype=jnp.float32)
    x2 = jax.random.normal(k2, (B, C, H, W), dtype=jnp.float32)
    cost = matryoshka_dilated_cost_volume(
        x1, x2, num_groups=1, max_displacement=2, stride=1,
        dilations=(1, 2, 3), use_relu=True)
    cost = jax.block_until_ready(cost)
    ref = _reference(x1, x2, 1, 2, (1, 2, 3), True)
    assert cost.shape == (B, 3, 5, 5, H, W)
    np.testing.assert_allclose(np.asarray(cost), np.asarray(ref),
                               rtol=1e-5, atol=1e-5)

    # config 2: two groups, no relu (validates the d*G+g output ordering)
    cost2 = matryoshka_dilated_cost_volume(
        x1, x2, num_groups=2, max_displacement=1, stride=1,
        dilations=(1, 3), use_relu=False)
    cost2 = jax.block_until_ready(cost2)
    ref2 = _reference(x1, x2, 2, 1, (1, 3), False)
    assert cost2.shape == (B, 4, 3, 3, H, W)
    np.testing.assert_allclose(np.asarray(cost2), np.asarray(ref2),
                               rtol=1e-5, atol=1e-5)

    # config 3: more channels -> multi-chunk fori_loop path; dilation 8 with W=16
    # makes some shifts fully out of range (zero branch); B*G == 1.
    x3 = jax.random.normal(k3, (1, 32, 16, 16), dtype=jnp.float32)
    x4 = jax.random.normal(k4, (1, 32, 16, 16), dtype=jnp.float32)
    cost3 = matryoshka_dilated_cost_volume(
        x3, x4, num_groups=1, max_displacement=2, stride=1,
        dilations=(1, 2, 8), use_relu=False)
    cost3 = jax.block_until_ready(cost3)
    ref3 = _reference(x3, x4, 1, 2, (1, 2, 8), False)
    assert cost3.shape == (1, 3, 5, 5, 16, 16)
    np.testing.assert_allclose(np.asarray(cost3), np.asarray(ref3),
                               rtol=1e-5, atol=1e-5)

    # config 4: bf16 inputs -> exercises the pre-cast x1 scratch path
    x5 = jax.random.normal(k5, (1, 8, 16, 16), dtype=jnp.float32)
    x6 = jax.random.normal(k6, (1, 8, 16, 16), dtype=jnp.float32)
    x5b = x5.astype(jnp.bfloat16)
    x6b = x6.astype(jnp.bfloat16)
    cost4 = matryoshka_dilated_cost_volume(
        x5b, x6b, num_groups=1, max_displacement=1, stride=1,
        dilations=(1, 2), use_relu=True)
    cost4 = jax.block_until_ready(cost4)
    ref4 = _reference(x5b.astype(jnp.float32), x6b.astype(jnp.float32),
                      1, 1, (1, 2), True)
    assert cost4.shape == (1, 2, 3, 3, 16, 16)
    np.testing.assert_allclose(np.asarray(cost4, dtype=np.float32),
                               np.asarray(ref4), rtol=1e-2, atol=1e-2)

    print("KERNEL_OK")
</pallas_src>

<mosaic_0001>
module attributes {stable_mosaic.version = 11 : i64} {
  func.func @kernel(%arg0: i32, %arg1: i32, %arg2: i32, %arg3: memref<1x4x16x16xf32, #tpu.memory_space<vmem>>, %arg4: memref<1x4x16x16xf32, #tpu.memory_space<vmem>>, %arg5: memref<1x5x5x16x16xf32, #tpu.memory_space<vmem>>, %arg6: memref<4x28x16xf32, #tpu.memory_space<vmem>>) attributes {dimension_semantics = [#tpu.dimension_semantics<parallel>, #tpu.dimension_semantics<parallel>, #tpu.dimension_semantics<parallel>], iteration_bounds = array<i64: 2, 1, 3>, scalar_prefetch = 0 : i64, scratch_operands = 1 : i64, tpu.core_type = #tpu.core_type<tc>, window_params = [{transform_indices = @transform_0, window_bounds = array<i64: 1, 4, 16, 16>}, {transform_indices = @transform_1, window_bounds = array<i64: 1, 4, 16, 16>}, {transform_indices = @transform_2, window_bounds = array<i64: 1, 5, 5, 16, 16>}]} {
    %c0_i32 = arith.constant 0 : i32
    %0 = arith.cmpi eq, %arg2, %c0_i32 : i32
    %1 = arith.extui %0 : i1 to i32
    %c0_i32_0 = arith.constant 0 : i32
    %2 = arith.cmpi ne, %1, %c0_i32_0 : i32
    scf.if %2 {
      %cst = arith.constant 0.000000e+00 : f32
      %9 = vector.broadcast %cst : f32 to vector<4x2x16xf32>
      %c0 = arith.constant 0 : index
      %c0_3 = arith.constant 0 : index
      %c0_4 = arith.constant 0 : index
      %10 = vector.load %arg6[%c0, %c0_3, %c0_4] : memref<4x28x16xf32, #tpu.memory_space<vmem>>, vector<4x2x16xf32>
      tpu.vector_store %arg6[%c0, %c0_3, %c0_4], %9 {strides = array<i32>} : memref<4x28x16xf32, #tpu.memory_space<vmem>>, vector<4x2x16xf32>,
      %c0_5 = arith.constant 0 : index
      %c18 = arith.constant 18 : index
      %c0_6 = arith.constant 0 : index
      %11 = vector.load %arg6[%c0_5, %c18, %c0_6] : memref<4x28x16xf32, #tpu.memory_space<vmem>>, vector<4x2x16xf32>
      tpu.vector_store %arg6[%c0_5, %c18, %c0_6], %9 {strides = array<i32>} : memref<4x28x16xf32, #tpu.memory_space<vmem>>, vector<4x2x16xf32>,
      %cst_7 = arith.constant 0.000000e+00 : f32
      %12 = vector.broadcast %cst_7 : f32 to vector<4x16x2xf32>
      %c0_8 = arith.constant 0 : index
      %c2 = arith.constant 2 : index
      %c0_9 = arith.constant 0 : index
      %13 = vector.load %arg6[%c0_8, %c2, %c0_9] : memref<4x28x16xf32, #tpu.memory_space<vmem>>, vector<4x16x2xf32>
      tpu.vector_store %arg6[%c0_8, %c2, %c0_9], %12 {strides = array<i32>} : memref<4x28x16xf32, #tpu.memory_space<vmem>>, vector<4x16x2xf32>,
      %c0_10 = arith.constant 0 : index
      %c0_11 = arith.constant 0 : index
      %c0_12 = arith.constant 0 : index
      %c0_13 = arith.constant 0 : index
      %14 = vector.load %arg4[%c0_10, %c0_11, %c0_12, %c0_13] : memref<1x4x16x16xf32, #tpu.memory_space<vmem>>, vector<1x4x16x14xf32>
      %15 = vector.shape_cast %14 : vector<1x4x16x14xf32> to vector<4x16x14xf32>
      %c0_14 = arith.constant 0 : index
      %c2_15 = arith.constant 2 : index
      %c2_16 = arith.constant 2 : index
      %16 = vector.load %arg6[%c0_14, %c2_15, %c2_16] : memref<4x28x16xf32, #tpu.memory_space<vmem>>, vector<4x16x14xf32>
      tpu.vector_store %arg6[%c0_14, %c2_15, %c2_16], %15 {strides = array<i32>} : memref<4x28x16xf32, #tpu.memory_space<vmem>>, vector<4x16x14xf32>,
      %cst_17 = arith.constant 0.000000e+00 : f32
      %17 = vector.broadcast %cst_17 : f32 to vector<16x16xf32>
      %cst_18 = arith.constant 0.000000e+00 : f32
      %18 = vector.broadcast %cst_18 : f32 to vector<16x16xf32>
      %cst_19 = arith.constant 0.000000e+00 : f32
      %19 = vector.broadcast %cst_19 : f32 to vector<16x16xf32>
      %c0_20 = arith.constant 0 : index
      %c0_21 = arith.constant 0 : index
      %c0_22 = arith.constant 0 : index
      %c0_23 = arith.constant 0 : index
      %20 = vector.load %arg3[%c0_20, %c0_21, %c0_22, %c0_23] : memref<1x4x16x16xf32, #tpu.memory_space<vmem>>, vector<1x4x16x16xf32>
      %21 = vector.shape_cast %20 : vector<1x4x16x16xf32> to vector<4x16x16xf32>
      %c0_24 = arith.constant 0 : index
      %c0_25 = arith.constant 0 : index
      %c0_26 = arith.constant 0 : index
      %22 = vector.load %arg6[%c0_24, %c0_25, %c0_26] : memref<4x28x16xf32, #tpu.memory_space<vmem>>, vector<4x16x16xf32>
      %23 = arith.mulf %21, %22 : vector<4x16x16xf32>
      %cst_27 = arith.constant dense<0.000000e+00> : vector<16x16xf32>
      %24 = vector.multi_reduction <add>, %23, %cst_27 [0] : vector<4x16x16xf32> to vector<16x16xf32>
      %25 = arith.addf %17, %24 : vector<16x16xf32>
      %c0_28 = arith.constant 0 : index
      %c1 = arith.constant 1 : index
      %c0_29 = arith.constant 0 : index
      %26 = vector.load %arg6[%c0_28, %c1, %c0_29] : memref<4x28x16xf32, #tpu.memory_space<vmem>>, vector<4x16x16xf32>
      %27 = arith.mulf %21, %26 : vector<4x16x16xf32>
      %cst_30 = arith.constant dense<0.000000e+00> : vector<16x16xf32>
      %28 = vector.multi_reduction <add>, %27, %cst_30 [0] : vector<4x16x16xf32> to vector<16x16xf32>
      %29 = arith.addf %18, %28 : vector<16x16xf32>
      %c0_31 = arith.constant 0 : index
      %c2_32 = arith.constant 2 : index
      %c0_33 = arith.constant 0 : index
      %30 = vector.load %arg6[%c0_31, %c2_32, %c0_33] : memref<4x28x16xf32, #tpu.memory_space<vmem>>, vector<4x16x16xf32>
      %31 = arith.mulf %21, %30 : vector<4x16x16xf32>
      %cst_34 = arith.constant dense<0.000000e+00> : vector<16x16xf32>
      %32 = vector.multi_reduction <add>, %31, %cst_34 [0] : vector<4x16x16xf32> to vector<16x16xf32>
      %33 = arith.addf %19, %32 : vector<16x16xf32>
      %cst_35 = arith.constant 0.000000e+00 : f32
      %34 = vector.broadcast %cst_35 : f32 to vector<16x16xf32>
      %35 = arith.cmpf oge, %25, %34 : vector<16x16xf32>
      %cst_36 = arith.constant 1.000000e-01 : f32
      %36 = vector.broadcast %cst_36 : f32 to vector<16x16xf32>
      %37 = arith.mulf %36, %25 : vector<16x16xf32>
      %38 = arith.select %35, %25, %37 : vector<16x16xi1>, vector<16x16xf32>
      %c0_37 = arith.constant 0 : index
      %c0_38 = arith.constant 0 : index
      %c0_39 = arith.constant 0 : index
      %c0_40 = arith.constant 0 : index
      %c0_41 = arith.constant 0 : index
      %39 = vector.load %arg5[%c0_37, %c0_38, %c0_39, %c0_40, %c0_41] : memref<1x5x5x16x16xf32, #tpu.memory_space<vmem>>, vector<1x1x1x16x16xf32>
      %40 = vector.shape_cast %39 : vector<1x1x1x16x16xf32> to vector<16x16xf32>
      %41 = vector.shape_cast %38 : vector<16x16xf32> to vector<1x1x1x16x16xf32>
      tpu.vector_store %arg5[%c0_37, %c0_38, %c0_39, %c0_40, %c0_41], %41 {strides = array<i32>} : memref<1x5x5x16x16xf32, #tpu.memory_space<vmem>>, vector<1x1x1x16x16xf32>,
      %cst_42 = arith.constant 0.000000e+00 : f32
      %42 = vector.broadcast %cst_42 : f32 to vector<16x16xf32>
      %43 = arith.cmpf oge, %29, %42 : vector<16x16xf32>
      %cst_43 = arith.constant 1.000000e-01 : f32
      %44 = vector.broadcast %cst_43 : f32 to vector<16x16xf32>
      %45 = arith.mulf %44, %29 : vector<16x16xf32>
      %46 = arith.select %43, %29, %45 : vector<16x16xi1>, vector<16x16xf32>
      %c0_44 = arith.constant 0 : index
      %c1_45 = arith.constant 1 : index
      %c0_46 = arith.constant 0 : index
      %c0_47 = arith.constant 0 : index
      %c0_48 = arith.constant 0 : index
      %47 = vector.load %arg5[%c0_44, %c1_45, %c0_46, %c0_47, %c0_48] : memref<1x5x5x16x16xf32, #tpu.memory_space<vmem>>, vector<1x1x1x16x16xf32>
      %48 = vector.shape_cast %47 : vector<1x1x1x16x16xf32> to vector<16x16xf32>
      %49 = vector.shape_cast %46 : vector<16x16xf32> to vector<1x1x1x16x16xf32>
      tpu.vector_store %arg5[%c0_44, %c1_45, %c0_46, %c0_47, %c0_48], %49 {strides = array<i32>} : memref<1x5x5x16x16xf32, #tpu.memory_space<vmem>>, vector<1x1x1x16x16xf32>,
      %cst_49 = arith.constant 0.000000e+00 : f32
      %50 = vector.broadcast %cst_49 : f32 to vector<16x16xf32>
      %51 = arith.cmpf oge, %33, %50 : vector<16x16xf32>
      %cst_50 = arith.constant 1.000000e-01 : f32
      %52 = vector.broadcast %cst_50 : f32 to vector<16x16xf32>
      %53 = arith.mulf %52, %33 : vector<16x16xf32>
      %54 = arith.select %51, %33, %53 : vector<16x16xi1>, vector<16x16xf32>
      %c0_51 = arith.constant 0 : index
      %c2_52 = arith.constant 2 : index
      %c0_53 = arith.constant 0 : index
      %c0_54 = arith.constant 0 : index
      %c0_55 = arith.constant 0 : index
      %55 = vector.load %arg5[%c0_51, %c2_52, %c0_53, %c0_54, %c0_55] : memref<1x5x5x16x16xf32, #tpu.memory_space<vmem>>, vector<1x1x1x16x16xf32>
      %56 = vector.shape_cast %55 : vector<1x1x1x16x16xf32> to vector<16x16xf32>
      %57 = vector.shape_cast %54 : vector<16x16xf32> to vector<1x1x1x16x16xf32>
      tpu.vector_store %arg5[%c0_51, %c2_52, %c0_53, %c0_54, %c0_55], %57 {strides = array<i32>} : memref<1x5x5x16x16xf32, #tpu.memory_space<vmem>>, vector<1x1x1x16x16xf32>,
      %cst_56 = arith.constant 0.000000e+00 : f32
      %58 = vector.broadcast %cst_56 : f32 to vector<16x16xf32>
      %cst_57 = arith.constant 0.000000e+00 : f32
      %59 = vector.broadcast %cst_57 : f32 to vector<16x16xf32>
      %c0_58 = arith.constant 0 : index
      %c0_59 = arith.constant 0 : index
      %c0_60 = arith.constant 0 : index
      %c0_61 = arith.constant 0 : index
      %60 = vector.load %arg3[%c0_58, %c0_59, %c0_60, %c0_61] : memref<1x4x16x16xf32, #tpu.memory_space<vmem>>, vector<1x4x16x16xf32>
      %61 = vector.shape_cast %60 : vector<1x4x16x16xf32> to vector<4x16x16xf32>
      %c0_62 = arith.constant 0 : index
      %c3 = arith.constant 3 : index
      %c0_63 = arith.constant 0 : index
      %62 = vector.load %arg6[%c0_62, %c3, %c0_63] : memref<4x28x16xf32, #tpu.memory_space<vmem>>, vector<4x16x16xf32>
      %63 = arith.mulf %61, %62 : vector<4x16x16xf32>
      %cst_64 = arith.constant dense<0.000000e+00> : vector<16x16xf32>
      %64 = vector.multi_reduction <add>, %63, %cst_64 [0] : vector<4x16x16xf32> to vector<16x16xf32>
      %65 = arith.addf %58, %64 : vector<16x16xf32>
      %c0_65 = arith.constant 0 : index
      %c4 = arith.constant 4 : index
      %c0_66 = arith.constant 0 : index
      %66 = vector.load %arg6[%c0_65, %c4, %c0_66] : memref<4x28x16xf32, #tpu.memory_space<vmem>>, vector<4x16x16xf32>
      %67 = arith.mulf %61, %66 : vector<4x16x16xf32>
      %cst_67 = arith.constant dense<0.000000e+00> : vector<16x16xf32>
      %68 = vector.multi_reduction <add>, %67, %cst_67 [0] : vector<4x16x16xf32> to vector<16x16xf32>
      %69 = arith.addf %59, %68 : vector<16x16xf32>
      %cst_68 = arith.constant 0.000000e+00 : f32
      %70 = vector.broadcast %cst_68 : f32 to vector<16x16xf32>
      %71 = arith.cmpf oge, %65, %70 : vector<16x16xf32>
      %cst_69 = arith.constant 1.000000e-01 : f32
      %72 = vector.broadcast %cst_69 : f32 to vector<16x16xf32>
      %73 = arith.mulf %72, %65 : vector<16x16xf32>
      %74 = arith.select %71, %65, %73 : vector<16x16xi1>, vector<16x16xf32>
      %c0_70 = arith.constant 0 : index
      %c3_71 = arith.constant 3 : index
      %c0_72 = arith.constant 0 : index
      %c0_73 = arith.constant 0 : index
      %c0_74 = arith.constant 0 : index
      %75 = vector.load %arg5[%c0_70, %c3_71, %c0_72, %c0_73, %c0_74] : memref<1x5x5x16x16xf32, #tpu.memory_space<vmem>>, vector<1x1x1x16x16xf32>
      %76 = vector.shape_cast %75 : vector<1x1x1x16x16xf32> to vector<16x16xf32>
      %77 = vector.shape_cast %74 : vector<16x16xf32> to vector<1x1x1x16x16xf32>
      tpu.vector_store %arg5[%c0_70, %c3_71, %c0_72, %c0_73, %c0_74], %77 {strides = array<i32>} : memref<1x5x5x16x16xf32, #tpu.memory_space<vmem>>, vector<1x1x1x16x16xf32>,
      %cst_75 = arith.constant 0.000000e+00 : f32
      %78 = vector.broadcast %cst_75 : f32 to vector<16x16xf32>
      %79 = arith.cmpf oge, %69, %78 : vector<16x16xf32>
      %cst_76 = arith.constant 1.000000e-01 : f32
      %80 = vector.broadcast %cst_76 : f32 to vector<16x16xf32>
      %81 = arith.mulf %80, %69 : vector<16x16xf32>
      %82 = arith.select %79, %69, %81 : vector<16x16xi1>, vector<16x16xf32>
      %c0_77 = arith.constant 0 : index
      %c4_78 = arith.constant 4 : index
      %c0_79 = arith.constant 0 : index
      %c0_80 = arith.constant 0 : index
      %c0_81 = arith.constant 0 : index
      %83 = vector.load %arg5[%c0_77, %c4_78, %c0_79, %c0_80, %c0_81] : memref<1x5x5x16x16xf32, #tpu.memory_space<vmem>>, vector<1x1x1x16x16xf32>
      %84 = vector.shape_cast %83 : vector<1x1x1x16x16xf32> to vector<16x16xf32>
      %85 = vector.shape_cast %82 : vector<16x16xf32> to vector<1x1x1x16x16xf32>
      tpu.vector_store %arg5[%c0_77, %c4_78, %c0_79, %c0_80, %c0_81], %85 {strides = array<i32>} : memref<1x5x5x16x16xf32, #tpu.memory_space<vmem>>, vector<1x1x1x16x16xf32>,
      %cst_82 = arith.constant 0.000000e+00 : f32
      %86 = vector.broadcast %cst_82 : f32 to vector<4x16x1xf32>
      %c0_83 = arith.constant 0 : index
      %c2_84 = arith.constant 2 : index
      %c0_85 = arith.constant 0 : index
      %87 = vector.load %arg6[%c0_83, %c2_84, %c0_85] : memref<4x28x16xf32, #tpu.memory_space<vmem>>, vector<4x16x1xf32>
      tpu.vector_store %arg6[%c0_83, %c2_84, %c0_85], %86 {strides = array<i32>} : memref<4x28x16xf32, #tpu.memory_space<vmem>>, vector<4x16x1xf32>,
      %c0_86 = arith.constant 0 : index
      %c0_87 = arith.constant 0 : index
      %c0_88 = arith.constant 0 : index
      %c0_89 = arith.constant 0 : index
      %88 = vector.load %arg4[%c0_86, %c0_87, %c0_88, %c0_89] : memref<1x4x16x16xf32, #tpu.memory_space<vmem>>, vector<1x4x16x15xf32>
      %89 = vector.shape_cast %88 : vector<1x4x16x15xf32> to vector<4x16x15xf32>
      %c0_90 = arith.constant 0 : index
      %c2_91 = arith.constant 2 : index
      %c1_92 = arith.constant 1 : index
      %90 = vector.load %arg6[%c0_90, %c2_91, %c1_92] : memref<4x28x16xf32, #tpu.memory_space<vmem>>, vector<4x16x15xf32>
      tpu.vector_store %arg6[%c0_90, %c2_91, %c1_92], %89 {strides = array<i32>} : memref<4x28x16xf32, #tpu.memory_space<vmem>>, vector<4x16x15xf32>,
      %cst_93 = arith.constant 0.000000e+00 : f32
      %91 = vector.broadcast %cst_93 : f32 to vector<16x16xf32>
      %cst_94 = arith.constant 0.000000e+00 : f32
      %92 = vector.broadcast %cst_94 : f32 to vector<16x16xf32>
      %cst_95 = arith.constant 0.000000e+00 : f32
      %93 = vector.broadcast %cst_95 : f32 to vector<16x16xf32>
      %c0_96 = arith.constant 0 : index
      %c0_97 = arith.constant 0 : index
      %c0_98 = arith.constant 0 : index
      %c0_99 = arith.constant 0 : index
      %94 = vector.load %arg3[%c0_96, %c0_97, %c0_98, %c0_99] : memref<1x4x16x16xf32, #tpu.memory_space<vmem>>, vector<1x4x16x16xf32>
      %95 = vector.shape_cast %94 : vector<1x4x16x16xf32> to vector<4x16x16xf32>
      %c0_100 = arith.constant 0 : index
      %c0_101 = arith.constant 0 : index
      %c0_102 = arith.constant 0 : index
      %96 = vector.load %arg6[%c0_100, %c0_101, %c0_102] : memref<4x28x16xf32, #tpu.memory_space<vmem>>, vector<4x16x16xf32>
      %97 = arith.mulf %95, %96 : vector<4x16x16xf32>
      %cst_103 = arith.constant dense<0.000000e+00> : vector<16x16xf32>
      %98 = vector.multi_reduction <add>, %97, %cst_103 [0] : vector<4x16x16xf32> to vector<16x16xf32>
      %99 = arith.addf %91, %98 : vector<16x16xf32>
      %c0_104 = arith.constant 0 : index
      %c1_105 = arith.constant 1 : index
      %c0_106 = arith.constant 0 : index
      %100 = vector.load %arg6[%c0_104, %c1_105, %c0_106] : memref<4x28x16xf32, #tpu.memory_space<vmem>>, vector<4x16x16xf32>
      %101 = arith.mulf %95, %100 : vector<4x16x16xf32>
      %cst_107 = arith.constant dense<0.000000e+00> : vector<16x16xf32>
      %102 = vector.multi_reduction <add>, %101, %cst_107 [0] : vector<4x16x16xf32> to vector<16x16xf32>
      %103 = arith.addf %92, %102 : vector<16x16xf32>
      %c0_108 = arith.constant 0 : index
      %c2_109 = arith.constant 2 : index
      %c0_110 = arith.constant 0 : index
      %104 = vector.load %arg6[%c0_108, %c2_109, %c0_110] : memref<4x28x16xf32, #tpu.memory_space<vmem>>, vector<4x16x16xf32>
      %105 = arith.mulf %95, %104 : vector<4x16x16xf32>
      %cst_111 = arith.constant dense<0.000000e+00> : vector<16x16xf32>
      %106 = vector.multi_reduction <add>, %105, %cst_111 [0] : vector<4x16x16xf32> to vector<16x16xf32>
      %107 = arith.addf %93, %106 : vector<16x16xf32>
      %cst_112 = arith.constant 0.000000e+00 : f32
      %108 = vector.broadcast %cst_112 : f32 to vector<16x16xf32>
      %109 = arith.cmpf oge, %99, %108 : vector<16x16xf32>
      %cst_113 = arith.constant 1.000000e-01 : f32
      %110 = vector.broadcast %cst_113 : f32 to vector<16x16xf32>
      %111 = arith.mulf %110, %99 : vector<16x16xf32>
      %112 = arith.select %109, %99, %111 : vector<16x16xi1>, vector<16x16xf32>
      %c0_114 = arith.constant 0 : index
      %c0_115 = arith.constant 0 : index
      %c1_116 = arith.constant 1 : index
      %c0_117 = arith.constant 0 : index
      %c0_118 = arith.constant 0 : index
      %113 = vector.load %arg5[%c0_114, %c0_115, %c1_116, %c0_117, %c0_118] : memref<1x5x5x16x16xf32, #tpu.memory_space<vmem>>, vector<1x1x1x16x16xf32>
      %114 = vector.shape_cast %113 : vector<1x1x1x16x16xf32> to vector<16x16xf32>
      %115 = vector.shape_cast %112 : vector<16x16xf32> to vector<1x1x1x16x16xf32>
      tpu.vector_store %arg5[%c0_114, %c0_115, %c1_116, %c0_117, %c0_118], %115 {strides = array<i32>} : memref<1x5x5x16x16xf32, #tpu.memory_space<vmem>>, vector<1x1x1x16x16xf32>,
      %cst_119 = arith.constant 0.000000e+00 : f32
      %116 = vector.broadcast %cst_119 : f32 to vector<16x16xf32>
      %117 = arith.cmpf oge, %103, %116 : vector<16x16xf32>
      %cst_120 = arith.constant 1.000000e-01 : f32
      %118 = vector.broadcast %cst_120 : f32 to vector<16x16xf32>
      %119 = arith.mulf %118, %103 : vector<16x16xf32>
      %120 = arith.select %117, %103, %119 : vector<16x16xi1>, vector<16x16xf32>
      %c0_121 = arith.constant 0 : index
      %c1_122 = arith.constant 1 : index
      %c1_123 = arith.constant 1 : index
      %c0_124 = arith.constant 0 : index
      %c0_125 = arith.constant 0 : index
      %121 = vector.load %arg5[%c0_121, %c1_122, %c1_123, %c0_124, %c0_125] : memref<1x5x5x16x16xf32, #tpu.memory_space<vmem>>, vector<1x1x1x16x16xf32>
      %122 = vector.shape_cast %121 : vector<1x1x1x16x16xf32> to vector<16x16xf32>
      %123 = vector.shape_cast %120 : vector<16x16xf32> to vector<1x1x1x16x16xf32>
      tpu.vector_store %arg5[%c0_121, %c1_122, %c1_123, %c0_124, %c0_125], %123 {strides = array<i32>} : memref<1x5x5x16x16xf32, #tpu.memory_space<vmem>>, vector<1x1x1x16x16xf32>,
      %cst_126 = arith.constant 0.000000e+00 : f32
      %124 = vector.broadcast %cst_126 : f32 to vector<16x16xf32>
      %125 = arith.cmpf oge, %107, %124 : vector<16x16xf32>
      %cst_127 = arith.constant 1.000000e-01 : f32
      %126 = vector.broadcast %cst_127 : f32 to vector<16x16xf32>
      %127 = arith.mulf %126, %107 : vector<16x16xf32>
      %128 = arith.select %125, %107, %127 : vector<16x16xi1>, vector<16x16xf32>
      %c0_128 = arith.constant 0 : index
      %c2_129 = arith.constant 2 : index
      %c1_130 = arith.constant 1 : index
      %c0_131 = arith.constant 0 : index
      %c0_132 = arith.constant 0 : index
      %129 = vector.load %arg5[%c0_128, %c2_129, %c1_130, %c0_131, %c0_132] : memref<1x5x5x16x16xf32, #tpu.memory_space<vmem>>, vector<1x1x1x16x16xf32>
      %130 = vector.shape_cast %129 : vector<1x1x1x16x16xf32> to vector<16x16xf32>
      %131 = vector.shape_cast %128 : vector<16x16xf32> to vector<1x1x1x16x16xf32>
      tpu.vector_store %arg5[%c0_128, %c2_129, %c1_130, %c0_131, %c0_132], %131 {strides = array<i32>} : memref<1x5x5x16x16xf32, #tpu.memory_space<vmem>>, vector<1x1x1x16x16xf32>,
      %cst_133 = arith.constant 0.000000e+00 : f32
      %132 = vector.broadcast %cst_133 : f32 to vector<16x16xf32>
      %cst_134 = arith.constant 0.000000e+00 : f32
      %133 = vector.broadcast %cst_134 : f32 to vector<16x16xf32>
      %c0_135 = arith.constant 0 : index
      %c0_136 = arith.constant 0 : index
      %c0_137 = arith.constant 0 : index
      %c0_138 = arith.constant 0 : index
      %134 = vector.load %arg3[%c0_135, %c0_136, %c0_137, %c0_138] : memref<1x4x16x16xf32, #tpu.memory_space<vmem>>, vector<1x4x16x16xf32>
      %135 = vector.shape_cast %134 : vector<1x4x16x16xf32> to vector<4x16x16xf32>
      %c0_139 = arith.constant 0 : index
      %c3_140 = arith.constant 3 : index
      %c0_141 = arith.constant 0 : index
      %136 = vector.load %arg6[%c0_139, %c3_140, %c0_141] : memref<4x28x16xf32, #tpu.memory_space<vmem>>, vector<4x16x16xf32>
      %137 = arith.mulf %135, %136 : vector<4x16x16xf32>
      %cst_142 = arith.constant dense<0.000000e+00> : vector<16x16xf32>
      %138 = vector.multi_reduction <add>, %137, %cst_142 [0] : vector<4x16x16xf32> to vector<16x16xf32>
      %139 = arith.addf %132, %138 : vector<16x16xf32>
      %c0_143 = arith.constant 0 : index
      %c4_144 = arith.constant 4 : index
      %c0_145 = arith.constant 0 : index
      %140 = vector.load %arg6[%c0_143, %c4_144, %c0_145] : memref<4x28x16xf32, #tpu.memory_space<vmem>>, vector<4x16x16xf32>
      %141 = arith.mulf %135, %140 : vector<4x16x16xf32>
      %cst_146 = arith.constant dense<0.000000e+00> : vector<16x16xf32>
      %142 = vector.multi_reduction <add>, %141, %cst_146 [0] : vector<4x16x16xf32> to vector<16x16xf32>
      %143 = arith.addf %133, %142 : vector<16x16xf32>
      %cst_147 = arith.constant 0.000000e+00 : f32
      %144 = vector.broadcast %cst_147 : f32 to vector<16x16xf32>
      %145 = arith.cmpf oge, %139, %144 : vector<16x16xf32>
      %cst_148 = arith.constant 1.000000e-01 : f32
      %146 = vector.broadcast %cst_148 : f32 to vector<16x16xf32>
      %147 = arith.mulf %146, %139 : vector<16x16xf32>
      %148 = arith.select %145, %139, %147 : vector<16x16xi1>, vector<16x16xf32>
      %c0_149 = arith.constant 0 : index
      %c3_150 = arith.constant 3 : index
      %c1_151 = arith.constant 1 : index
      %c0_152 = arith.constant 0 : index
      %c0_153 = arith.constant 0 : index
      %149 = vector.load %arg5[%c0_149, %c3_150, %c1_151, %c0_152, %c0_153] : memref<1x5x5x16x16xf32, #tpu.memory_space<vmem>>, vector<1x1x1x16x16xf32>
      %150 = vector.shape_cast %149 : vector<1x1x1x16x16xf32> to vector<16x16xf32>
      %151 = vector.shape_cast %148 : vector<16x16xf32> to vector<1x1x1x16x16xf32>
      tpu.vector_store %arg5[%c0_149, %c3_150, %c1_151, %c0_152, %c0_153], %151 {strides = array<i32>} : memref<1x5x5x16x16xf32, #tpu.memory_space<vmem>>, vector<1x1x1x16x16xf32>,
      %cst_154 = arith.constant 0.000000e+00 : f32
      %152 = vector.broadcast %cst_154 : f32 to vector<16x16xf32>
      %153 = arith.cmpf oge, %143, %152 : vector<16x16xf32>
      %cst_155 = arith.constant 1.000000e-01 : f32
      %154 = vector.broadcast %cst_155 : f32 to vector<16x16xf32>
      %155 = arith.mulf %154, %143 : vector<16x16xf32>
      %156 = arith.select %153, %143, %155 : vector<16x16xi1>, vector<16x16xf32>
      %c0_156 = arith.constant 0 : index
      %c4_157 = arith.constant 4 : index
      %c1_158 = arith.constant 1 : index
      %c0_159 = arith.constant 0 : index
      %c0_160 = arith.constant 0 : index
      %157 = vector.load %arg5[%c0_156, %c4_157, %c1_158, %c0_159, %c0_160] : memref<1x5x5x16x16xf32, #tpu.memory_space<vmem>>, vector<1x1x1x16x16xf32>
      %158 = vector.shape_cast %157 : vector<1x1x1x16x16xf32> to vector<16x16xf32>
      %159 = vector.shape_cast %156 : vector<16x16xf32> to vector<1x1x1x16x16xf32>
      tpu.vector_store %arg5[%c0_156, %c4_157, %c1_158, %c0_159, %c0_160], %159 {strides = array<i32>} : memref<1x5x5x16x16xf32, #tpu.memory_space<vmem>>, vector<1x1x1x16x16xf32>,
      %c0_161 = arith.constant 0 : index
      %c0_162 = arith.constant 0 : index
      %c0_163 = arith.constant 0 : index
      %c0_164 = arith.constant 0 : index
      %160 = vector.load %arg4[%c0_161, %c0_162, %c0_163, %c0_164] : memref<1x4x16x16xf32, #tpu.memory_space<vmem>>, vector<1x4x16x16xf32>
      %161 = vector.shape_cast %160 : vector<1x4x16x16xf32> to vector<4x16x16xf32>
      %c0_165 = arith.constant 0 : index
      %c2_166 = arith.constant 2 : index
      %c0_167 = arith.constant 0 : index
      %162 = vector.load %arg6[%c0_165, %c2_166, %c0_167] : memref<4x28x16xf32, #tpu.memory_space<vmem>>, vector<4x16x16xf32>
      tpu.vector_store %arg6[%c0_165, %c2_166, %c0_167], %161 {strides = array<i32>} : memref<4x28x16xf32, #tpu.memory_space<vmem>>, vector<4x16x16xf32>,
      %cst_168 = arith.constant 0.000000e+00 : f32
      %163 = vector.broadcast %cst_168 : f32 to vector<16x16xf32>
      %cst_169 = arith.constant 0.000000e+00 : f32
      %164 = vector.broadcast %cst_169 : f32 to vector<16x16xf32>
      %cst_170 = arith.constant 0.000000e+00 : f32
      %165 = vector.broadcast %cst_170 : f32 to vector<16x16xf32>
      %c0_171 = arith.constant 0 : index
      %c0_172 = arith.constant 0 : index
      %c0_173 = arith.constant 0 : index
      %c0_174 = arith.constant 0 : index
      %166 = vector.load %arg3[%c0_171, %c0_172, %c0_173, %c0_174] : memref<1x4x16x16xf32, #tpu.memory_space<vmem>>, vector<1x4x16x16xf32>
      %167 = vector.shape_cast %166 : vector<1x4x16x16xf32> to vector<4x16x16xf32>
      %c0_175 = arith.constant 0 : index
      %c0_176 = arith.constant 0 : index
      %c0_177 = arith.constant 0 : index
      %168 = vector.load %arg6[%c0_175, %c0_176, %c0_177] : memref<4x28x16xf32, #tpu.memory_space<vmem>>, vector<4x16x16xf32>
      %169 = arith.mulf %167, %168 : vector<4x16x16xf32>
      %cst_178 = arith.constant dense<0.000000e+00> : vector<16x16xf32>
      %170 = vector.multi_reduction <add>, %169, %cst_178 [0] : vector<4x16x16xf32> to vector<16x16xf32>
      %171 = arith.addf %163, %170 : vector<16x16xf32>
      %c0_179 = arith.constant 0 : index
      %c1_180 = arith.constant 1 : index
      %c0_181 = arith.constant 0 : index
      %172 = vector.load %arg6[%c0_179, %c1_180, %c0_181] : memref<4x28x16xf32, #tpu.memory_space<vmem>>, vector<4x16x16xf32>
      %173 = arith.mulf %167, %172 : vector<4x16x16xf32>
      %cst_182 = arith.constant dense<0.000000e+00> : vector<16x16xf32>
      %174 = vector.multi_reduction <add>, %173, %cst_182 [0] : vector<4x16x16xf32> to vector<16x16xf32>
      %175 = arith.addf %164, %174 : vector<16x16xf32>
      %c0_183 = arith.constant 0 : index
      %c2_184 = arith.constant 2 : index
      %c0_185 = arith.constant 0 : index
      %176 = vector.load %arg6[%c0_183, %c2_184, %c0_185] : memref<4x28x16xf32, #tpu.memory_space<vmem>>, vector<4x16x16xf32>
      %177 = arith.mulf %167, %176 : vector<4x16x16xf32>
      %cst_186 = arith.constant dense<0.000000e+00> : vector<16x16xf32>
      %178 = vector.multi_reduction <add>, %177, %cst_186 [0] : vector<4x16x16xf32> to vector<16x16xf32>
      %179 = arith.addf %165, %178 : vector<16x16xf32>
      %cst_187 = arith.constant 0.000000e+00 : f32
      %180 = vector.broadcast %cst_187 : f32 to vector<16x16xf32>
      %181 = arith.cmpf oge, %171, %180 : vector<16x16xf32>
      %cst_188 = arith.constant 1.000000e-01 : f32
      %182 = vector.broadcast %cst_188 : f32 to vector<16x16xf32>
      %183 = arith.mulf %182, %171 : vector<16x16xf32>
      %184 = arith.select %181, %171, %183 : vector<16x16xi1>, vector<16x16xf32>
      %c0_189 = arith.constant 0 : index
      %c0_190 = arith.constant 0 : index
      %c2_191 = arith.constant 2 : index
      %c0_192 = arith.constant 0 : index
      %c0_193 = arith.constant 0 : index
      %185 = vector.load %arg5[%c0_189, %c0_190, %c2_191, %c0_192, %c0_193] : memref<1x5x5x16x16xf32, #tpu.memory_space<vmem>>, vector<1x1x1x16x16xf32>
      %186 = vector.shape_cast %185 : vector<1x1x1x16x16xf32> to vector<16x16xf32>
      %187 = vector.shape_cast %184 : vector<16x16xf32> to vector<1x1x1x16x16xf32>
      tpu.vector_store %arg5[%c0_189, %c0_190, %c2_191, %c0_192, %c0_193], %187 {strides = array<i32>} : memref<1x5x5x16x16xf32, #tpu.memory_space<vmem>>, vector<1x1x1x16x16xf32>,
      %cst_194 = arith.constant 0.000000e+00 : f32
      %188 = vector.broadcast %cst_194 : f32 to vector<16x16xf32>
      %189 = arith.cmpf oge, %175, %188 : vector<16x16xf32>
      %cst_195 = arith.constant 1.000000e-01 : f32
      %190 = vector.broadcast %cst_195 : f32 to vector<16x16xf32>
      %191 = arith.mulf %190, %175 : vector<16x16xf32>
      %192 = arith.select %189, %175, %191 : vector<16x16xi1>, vector<16x16xf32>
      %c0_196 = arith.constant 0 : index
      %c1_197 = arith.constant 1 : index
      %c2_198 = arith.constant 2 : index
      %c0_199 = arith.constant 0 : index
      %c0_200 = arith.constant 0 : index
      %193 = vector.load %arg5[%c0_196, %c1_197, %c2_198, %c0_199, %c0_200] : memref<1x5x5x16x16xf32, #tpu.memory_space<vmem>>, vector<1x1x1x16x16xf32>
      %194 = vector.shape_cast %193 : vector<1x1x1x16x16xf32> to vector<16x16xf32>
      %195 = vector.shape_cast %192 : vector<16x16xf32> to vector<1x1x1x16x16xf32>
      tpu.vector_store %arg5[%c0_196, %c1_197, %c2_198, %c0_199, %c0_200], %195 {strides = array<i32>} : memref<1x5x5x16x16xf32, #tpu.memory_space<vmem>>, vector<1x1x1x16x16xf32>,
      %cst_201 = arith.constant 0.000000e+00 : f32
      %196 = vector.broadcast %cst_201 : f32 to vector<16x16xf32>
      %197 = arith.cmpf oge, %179, %196 : vector<16x16xf32>
      %cst_202 = arith.constant 1.000000e-01 : f32
      %198 = vector.broadcast %cst_202 : f32 to vector<16x16xf32>
      %199 = arith.mulf %198, %179 : vector<16x16xf32>
      %200 = arith.select %197, %179, %199 : vector<16x16xi1>, vector<16x16xf32>
      %c0_203 = arith.constant 0 : index
      %c2_204 = arith.constant 2 : index
      %c2_205 = arith.constant 2 : index
      %c0_206 = arith.constant 0 : index
      %c0_207 = arith.constant 0 : index
      %201 = vector.load %arg5[%c0_203, %c2_204, %c2_205, %c0_206, %c0_207] : memref<1x5x5x16x16xf32, #tpu.memory_space<vmem>>, vector<1x1x1x16x16xf32>
      %202 = vector.shape_cast %201 : vector<1x1x1x16x16xf32> to vector<16x16xf32>
      %203 = vector.shape_cast %200 : vector<16x16xf32> to vector<1x1x1x16x16xf32>
      tpu.vector_store %arg5[%c0_203, %c2_204, %c2_205, %c0_206, %c0_207], %203 {strides = array<i32>} : memref<1x5x5x16x16xf32, #tpu.memory_space<vmem>>, vector<1x1x1x16x16xf32>,
      %cst_208 = arith.constant 0.000000e+00 : f32
      %204 = vector.broadcast %cst_208 : f32 to vector<16x16xf32>
      %cst_209 = arith.constant 0.000000e+00 : f32
      %205 = vector.broadcast %cst_209 : f32 to vector<16x16xf32>
      %c0_210 = arith.constant 0 : index
      %c0_211 = arith.constant 0 : index
      %c0_212 = arith.constant 0 : index
      %c0_213 = arith.constant 0 : index
      %206 = vector.load %arg3[%c0_210, %c0_211, %c0_212, %c0_213] : memref<1x4x16x16xf32, #tpu.memory_space<vmem>>, vector<1x4x16x16xf32>
      %207 = vector.shape_cast %206 : vector<1x4x16x16xf32> to vector<4x16x16xf32>
      %c0_214 = arith.constant 0 : index
      %c3_215 = arith.constant 3 : index
      %c0_216 = arith.constant 0 : index
      %208 = vector.load %arg6[%c0_214, %c3_215, %c0_216] : memref<4x28x16xf32, #tpu.memory_space<vmem>>, vector<4x16x16xf32>
      %209 = arith.mulf %207, %208 : vector<4x16x16xf32>
      %cst_217 = arith.constant dense<0.000000e+00> : vector<16x16xf32>
      %210 = vector.multi_reduction <add>, %209, %cst_217 [0] : vector<4x16x16xf32> to vector<16x16xf32>
      %211 = arith.addf %204, %210 : vector<16x16xf32>
      %c0_218 = arith.constant 0 : index
      %c4_219 = arith.constant 4 : index
      %c0_220 = arith.constant 0 : index
      %212 = vector.load %arg6[%c0_218, %c4_219, %c0_220] : memref<4x28x16xf32, #tpu.memory_space<vmem>>, vector<4x16x16xf32>
      %213 = arith.mulf %207, %212 : vector<4x16x16xf32>
      %cst_221 = arith.constant dense<0.000000e+00> : vector<16x16xf32>
      %214 = vector.multi_reduction <add>, %213, %cst_221 [0] : vector<4x16x16xf32> to vector<16x16xf32>
      %215 = arith.addf %205, %214 : vector<16x16xf32>
      %cst_222 = arith.constant 0.000000e+00 : f32
      %216 = vector.broadcast %cst_222 : f32 to vector<16x16xf32>
      %217 = arith.cmpf oge, %211, %216 : vector<16x16xf32>
      %cst_223 = arith.constant 1.000000e-01 : f32
      %218 = vector.broadcast %cst_223 : f32 to vector<16x16xf32>
      %219 = arith.mulf %218, %211 : vector<16x16xf32>
      %220 = arith.select %217, %211, %219 : vector<16x16xi1>, vector<16x16xf32>
      %c0_224 = arith.constant 0 : index
      %c3_225 = arith.constant 3 : index
      %c2_226 = arith.constant 2 : index
      %c0_227 = arith.constant 0 : index
      %c0_228 = arith.constant 0 : index
      %221 = vector.load %arg5[%c0_224, %c3_225, %c2_226, %c0_227, %c0_228] : memref<1x5x5x16x16xf32, #tpu.memory_space<vmem>>, vector<1x1x1x16x16xf32>
      %222 = vector.shape_cast %221 : vector<1x1x1x16x16xf32> to vector<16x16xf32>
      %223 = vector.shape_cast %220 : vector<16x16xf32> to vector<1x1x1x16x16xf32>
      tpu.vector_store %arg5[%c0_224, %c3_225, %c2_226, %c0_227, %c0_228], %223 {strides = array<i32>} : memref<1x5x5x16x16xf32, #tpu.memory_space<vmem>>, vector<1x1x1x16x16xf32>,
      %cst_229 = arith.constant 0.000000e+00 : f32
      %224 = vector.broadcast %cst_229 : f32 to vector<16x16xf32>
      %225 = arith.cmpf oge, %215, %224 : vector<16x16xf32>
      %cst_230 = arith.constant 1.000000e-01 : f32
      %226 = vector.broadcast %cst_230 : f32 to vector<16x16xf32>
      %227 = arith.mulf %226, %215 : vector<16x16xf32>
      %228 = arith.select %225, %215, %227 : vector<16x16xi1>, vector<16x16xf32>
      %c0_231 = arith.constant 0 : index
      %c4_232 = arith.constant 4 : index
      %c2_233 = arith.constant 2 : index
      %c0_234 = arith.constant 0 : index
      %c0_235 = arith.constant 0 : index
      %229 = vector.load %arg5[%c0_231, %c4_232, %c2_233, %c0_234, %c0_235] : memref<1x5x5x16x16xf32, #tpu.memory_space<vmem>>, vector<1x1x1x16x16xf32>
      %230 = vector.shape_cast %229 : vector<1x1x1x16x16xf32> to vector<16x16xf32>
      %231 = vector.shape_cast %228 : vector<16x16xf32> to vector<1x1x1x16x16xf32>
      tpu.vector_store %arg5[%c0_231, %c4_232, %c2_233, %c0_234, %c0_235], %231 {strides = array<i32>} : memref<1x5x5x16x16xf32, #tpu.memory_space<vmem>>, vector<1x1x1x16x16xf32>,
      %cst_236 = arith.constant 0.000000e+00 : f32
      %232 = vector.broadcast %cst_236 : f32 to vector<4x16x1xf32>
      %c0_237 = arith.constant 0 : index
      %c2_238 = arith.constant 2 : index
      %c15 = arith.constant 15 : index
      %233 = vector.load %arg6[%c0_237, %c2_238, %c15] : memref<4x28x16xf32, #tpu.memory_space<vmem>>, vector<4x16x1xf32>
      tpu.vector_store %arg6[%c0_237, %c2_238, %c15], %232 {strides = array<i32>} : memref<4x28x16xf32, #tpu.memory_space<vmem>>, vector<4x16x1xf32>,
      %c0_239 = arith.constant 0 : index
      %c0_240 = arith.constant 0 : index
      %c0_241 = arith.constant 0 : index
      %c1_242 = arith.constant 1 : index
      %234 = vector.load %arg4[%c0_239, %c0_240, %c0_241, %c1_242] : memref<1x4x16x16xf32, #tpu.memory_space<vmem>>, vector<1x4x16x15xf32>
      %235 = vector.shape_cast %234 : vector<1x4x16x15xf32> to vector<4x16x15xf32>
      %c0_243 = arith.constant 0 : index
      %c2_244 = arith.constant 2 : index
      %c0_245 = arith.constant 0 : index
      %236 = vector.load %arg6[%c0_243, %c2_244, %c0_245] : memref<4x28x16xf32, #tpu.memory_space<vmem>>, vector<4x16x15xf32>
      tpu.vector_store %arg6[%c0_243, %c2_244, %c0_245], %235 {strides = array<i32>} : memref<4x28x16xf32, #tpu.memory_space<vmem>>, vector<4x16x15xf32>,
      %cst_246 = arith.constant 0.000000e+00 : f32
      %237 = vector.broadcast %cst_246 : f32 to vector<16x16xf32>
      %cst_247 = arith.constant 0.000000e+00 : f32
      %238 = vector.broadcast %cst_247 : f32 to vector<16x16xf32>
      %cst_248 = arith.constant 0.000000e+00 : f32
      %239 = vector.broadcast %cst_248 : f32 to vector<16x16xf32>
      %c0_249 = arith.constant 0 : index
      %c0_250 = arith.constant 0 : index
      %c0_251 = arith.constant 0 : index
      %c0_252 = arith.constant 0 : index
      %240 = vector.load %arg3[%c0_249, %c0_250, %c0_251, %c0_252] : memref<1x4x16x16xf32, #tpu.memory_space<vmem>>, vector<1x4x16x16xf32>
      %241 = vector.shape_cast %240 : vector<1x4x16x16xf32> to vector<4x16x16xf32>
      %c0_253 = arith.constant 0 : index
      %c0_254 = arith.constant 0 : index
      %c0_255 = arith.constant 0 : index
      %242 = vector.load %arg6[%c0_253, %c0_254, %c0_255] : memref<4x28x16xf32, #tpu.memory_space<vmem>>, vector<4x16x16xf32>
      %243 = arith.mulf %241, %242 : vector<4x16x16xf32>
      %cst_256 = arith.constant dense<0.000000e+00> : vector<16x16xf32>
      %244 = vector.multi_reduction <add>, %243, %cst_256 [0] : vector<4x16x16xf32> to vector<16x16xf32>
      %245 = arith.addf %237, %244 : vector<16x16xf32>
      %c0_257 = arith.constant 0 : index
      %c1_258 = arith.constant 1 : index
      %c0_259 = arith.constant 0 : index
      %246 = vector.load %arg6[%c0_257, %c1_258, %c0_259] : memref<4x28x16xf32, #tpu.memory_space<vmem>>, vector<4x16x16xf32>
      %247 = arith.mulf %241, %246 : vector<4x16x16xf32>
      %cst_260 = arith.constant dense<0.000000e+00> : vector<16x16xf32>
      %248 = vector.multi_reduction <add>, %247, %cst_260 [0] : vector<4x16x16xf32> to vector<16x16xf32>
      %249 = arith.addf %238, %248 : vector<16x16xf32>
      %c0_261 = arith.constant 0 : index
      %c2_262 = arith.constant 2 : index
      %c0_263 = arith.constant 0 : index
      %250 = vector.load %arg6[%c0_261, %c2_262, %c0_263] : memref<4x28x16xf32, #tpu.memory_space<vmem>>, vector<4x16x16xf32>
      %251 = arith.mulf %241, %250 : vector<4x16x16xf32>
      %cst_264 = arith.constant dense<0.000000e+00> : vector<16x16xf32>
      %252 = vector.multi_reduction <add>, %251, %cst_264 [0] : vector<4x16x16xf32> to vector<16x16xf32>
      %253 = arith.addf %239, %252 : vector<16x16xf32>
      %cst_265 = arith.constant 0.000000e+00 : f32
      %254 = vector.broadcast %cst_265 : f32 to vector<16x16xf32>
      %255 = arith.cmpf oge, %245, %254 : vector<16x16xf32>
      %cst_266 = arith.constant 1.000000e-01 : f32
      %256 = vector.broadcast %cst_266 : f32 to vector<16x16xf32>
      %257 = arith.mulf %256, %245 : vector<16x16xf32>
      %258 = arith.select %255, %245, %257 : vector<16x16xi1>, vector<16x16xf32>
      %c0_267 = arith.constant 0 : index
      %c0_268 = arith.constant 0 : index
      %c3_269 = arith.constant 3 : index
      %c0_270 = arith.constant 0 : index
      %c0_271 = arith.constant 0 : index
      %259 = vector.load %arg5[%c0_267, %c0_268, %c3_269, %c0_270, %c0_271] : memref<1x5x5x16x16xf32, #tpu.memory_space<vmem>>, vector<1x1x1x16x16xf32>
      %260 = vector.shape_cast %259 : vector<1x1x1x16x16xf32> to vector<16x16xf32>
      %261 = vector.shape_cast %258 : vector<16x16xf32> to vector<1x1x1x16x16xf32>
      tpu.vector_store %arg5[%c0_267, %c0_268, %c3_269, %c0_270, %c0_271], %261 {strides = array<i32>} : memref<1x5x5x16x16xf32, #tpu.memory_space<vmem>>, vector<1x1x1x16x16xf32>,
      %cst_272 = arith.constant 0.000000e+00 : f32
      %262 = vector.broadcast %cst_272 : f32 to vector<16x16xf32>
      %263 = arith.cmpf oge, %249, %262 : vector<16x16xf32>
      %cst_273 = arith.constant 1.000000e-01 : f32
      %264 = vector.broadcast %cst_273 : f32 to vector<16x16xf32>
      %265 = arith.mulf %264, %249 : vector<16x16xf32>
      %266 = arith.select %263, %249, %265 : vector<16x16xi1>, vector<16x16xf32>
      %c0_274 = arith.constant 0 : index
      %c1_275 = arith.constant 1 : index
      %c3_276 = arith.constant 3 : index
      %c0_277 = arith.constant 0 : index
      %c0_278 = arith.constant 0 : index
      %267 = vector.load %arg5[%c0_274, %c1_275, %c3_276, %c0_277, %c0_278] : memref<1x5x5x16x16xf32, #tpu.memory_space<vmem>>, vector<1x1x1x16x16xf32>
      %268 = vector.shape_cast %267 : vector<1x1x1x16x16xf32> to vector<16x16xf32>
      %269 = vector.shape_cast %266 : vector<16x16xf32> to vector<1x1x1x16x16xf32>
      tpu.vector_store %arg5[%c0_274, %c1_275, %c3_276, %c0_277, %c0_278], %269 {strides = array<i32>} : memref<1x5x5x16x16xf32, #tpu.memory_space<vmem>>, vector<1x1x1x16x16xf32>,
      %cst_279 = arith.constant 0.000000e+00 : f32
      %270 = vector.broadcast %cst_279 : f32 to vector<16x16xf32>
      %271 = arith.cmpf oge, %253, %270 : vector<16x16xf32>
      %cst_280 = arith.constant 1.000000e-01 : f32
      %272 = vector.broadcast %cst_280 : f32 to vector<16x16xf32>
      %273 = arith.mulf %272, %253 : vector<16x16xf32>
      %274 = arith.select %271, %253, %273 : vector<16x16xi1>, vector<16x16xf32>
      %c0_281 = arith.constant 0 : index
      %c2_282 = arith.constant 2 : index
      %c3_283 = arith.constant 3 : index
      %c0_284 = arith.constant 0 : index
      %c0_285 = arith.constant 0 : index
      %275 = vector.load %arg5[%c0_281, %c2_282, %c3_283, %c0_284, %c0_285] : memref<1x5x5x16x16xf32, #tpu.memory_space<vmem>>, vector<1x1x1x16x16xf32>
      %276 = vector.shape_cast %275 : vector<1x1x1x16x16xf32> to vector<16x16xf32>
      %277 = vector.shape_cast %274 : vector<16x16xf32> to vector<1x1x1x16x16xf32>
      tpu.vector_store %arg5[%c0_281, %c2_282, %c3_283, %c0_284, %c0_285], %277 {strides = array<i32>} : memref<1x5x5x16x16xf32, #tpu.memory_space<vmem>>, vector<1x1x1x16x16xf32>,
      %cst_286 = arith.constant 0.000000e+00 : f32
      %278 = vector.broadcast %cst_286 : f32 to vector<16x16xf32>
      %cst_287 = arith.constant 0.000000e+00 : f32
      %279 = vector.broadcast %cst_287 : f32 to vector<16x16xf32>
      %c0_288 = arith.constant 0 : index
      %c0_289 = arith.constant 0 : index
      %c0_290 = arith.constant 0 : index
      %c0_291 = arith.constant 0 : index
      %280 = vector.load %arg3[%c0_288, %c0_289, %c0_290, %c0_291] : memref<1x4x16x16xf32, #tpu.memory_space<vmem>>, vector<1x4x16x16xf32>
      %281 = vector.shape_cast %280 : vector<1x4x16x16xf32> to vector<4x16x16xf32>
      %c0_292 = arith.constant 0 : index
      %c3_293 = arith.constant 3 : index
      %c0_294 = arith.constant 0 : index
      %282 = vector.load %arg6[%c0_292, %c3_293, %c0_294] : memref<4x28x16xf32, #tpu.memory_space<vmem>>, vector<4x16x16xf32>
      %283 = arith.mulf %281, %282 : vector<4x16x16xf32>
      %cst_295 = arith.constant dense<0.000000e+00> : vector<16x16xf32>
      %284 = vector.multi_reduction <add>, %283, %cst_295 [0] : vector<4x16x16xf32> to vector<16x16xf32>
      %285 = arith.addf %278, %284 : vector<16x16xf32>
      %c0_296 = arith.constant 0 : index
      %c4_297 = arith.constant 4 : index
      %c0_298 = arith.constant 0 : index
      %286 = vector.load %arg6[%c0_296, %c4_297, %c0_298] : memref<4x28x16xf32, #tpu.memory_space<vmem>>, vector<4x16x16xf32>
      %287 = arith.mulf %281, %286 : vector<4x16x16xf32>
      %cst_299 = arith.constant dense<0.000000e+00> : vector<16x16xf32>
      %288 = vector.multi_reduction <add>, %287, %cst_299 [0] : vector<4x16x16xf32> to vector<16x16xf32>
      %289 = arith.addf %279, %288 : vector<16x16xf32>
      %cst_300 = arith.constant 0.000000e+00 : f32
      %290 = vector.broadcast %cst_300 : f32 to vector<16x16xf32>
      %291 = arith.cmpf oge, %285, %290 : vector<16x16xf32>
      %cst_301 = arith.constant 1.000000e-01 : f32
      %292 = vector.broadcast %cst_301 : f32 to vector<16x16xf32>
      %293 = arith.mulf %292, %285 : vector<16x16xf32>
      %294 = arith.select %291, %285, %293 : vector<16x16xi1>, vector<16x16xf32>
      %c0_302 = arith.constant 0 : index
      %c3_303 = arith.constant 3 : index
      %c3_304 = arith.constant 3 : index
      %c0_305 = arith.constant 0 : index
      %c0_306 = arith.constant 0 : index
      %295 = vector.load %arg5[%c0_302, %c3_303, %c3_304, %c0_305, %c0_306] : memref<1x5x5x16x16xf32, #tpu.memory_space<vmem>>, vector<1x1x1x16x16xf32>
      %296 = vector.shape_cast %295 : vector<1x1x1x16x16xf32> to vector<16x16xf32>
      %297 = vector.shape_cast %294 : vector<16x16xf32> to vector<1x1x1x16x16xf32>
      tpu.vector_store %arg5[%c0_302, %c3_303, %c3_304, %c0_305, %c0_306], %297 {strides = array<i32>} : memref<1x5x5x16x16xf32, #tpu.memory_space<vmem>>, vector<1x1x1x16x16xf32>,
      %cst_307 = arith.constant 0.000000e+00 : f32
      %298 = vector.broadcast %cst_307 : f32 to vector<16x16xf32>
      %299 = arith.cmpf oge, %289, %298 : vector<16x16xf32>
      %cst_308 = arith.constant 1.000000e-01 : f32
      %300 = vector.broadcast %cst_308 : f32 to vector<16x16xf32>
      %301 = arith.mulf %300, %289 : vector<16x16xf32>
      %302 = arith.select %299, %289, %301 : vector<16x16xi1>, vector<16x16xf32>
      %c0_309 = arith.constant 0 : index
      %c4_310 = arith.constant 4 : index
      %c3_311 = arith.constant 3 : index
      %c0_312 = arith.constant 0 : index
      %c0_313 = arith.constant 0 : index
      %303 = vector.load %arg5[%c0_309, %c4_310, %c3_311, %c0_312, %c0_313] : memref<1x5x5x16x16xf32, #tpu.memory_space<vmem>>, vector<1x1x1x16x16xf32>
      %304 = vector.shape_cast %303 : vector<1x1x1x16x16xf32> to vector<16x16xf32>
      %305 = vector.shape_cast %302 : vector<16x16xf32> to vector<1x1x1x16x16xf32>
      tpu.vector_store %arg5[%c0_309, %c4_310, %c3_311, %c0_312, %c0_313], %305 {strides = array<i32>} : memref<1x5x5x16x16xf32, #tpu.memory_space<vmem>>, vector<1x1x1x16x16xf32>,
      %cst_314 = arith.constant 0.000000e+00 : f32
      %306 = vector.broadcast %cst_314 : f32 to vector<4x16x2xf32>
      %c0_315 = arith.constant 0 : index
      %c2_316 = arith.constant 2 : index
      %c14 = arith.constant 14 : index
      %307 = vector.load %arg6[%c0_315, %c2_316, %c14] : memref<4x28x16xf32, #tpu.memory_space<vmem>>, vector<4x16x2xf32>
      tpu.vector_store %arg6[%c0_315, %c2_316, %c14], %306 {strides = array<i32>} : memref<4x28x16xf32, #tpu.memory_space<vmem>>, vector<4x16x2xf32>,
      %c0_317 = arith.constant 0 : index
      %c0_318 = arith.constant 0 : index
      %c0_319 = arith.constant 0 : index
      %c2_320 = arith.constant 2 : index
      %308 = vector.load %arg4[%c0_317, %c0_318, %c0_319, %c2_320] : memref<1x4x16x16xf32, #tpu.memory_space<vmem>>, vector<1x4x16x14xf32>
      %309 = vector.shape_cast %308 : vector<1x4x16x14xf32> to vector<4x16x14xf32>
      %c0_321 = arith.constant 0 : index
      %c2_322 = arith.constant 2 : index
      %c0_323 = arith.constant 0 : index
      %310 = vector.load %arg6[%c0_321, %c2_322, %c0_323] : memref<4x28x16xf32, #tpu.memory_space<vmem>>, vector<4x16x14xf32>
      tpu.vector_store %arg6[%c0_321, %c2_322, %c0_323], %309 {strides = array<i32>} : memref<4x28x16xf32, #tpu.memory_space<vmem>>, vector<4x16x14xf32>,
      %cst_324 = arith.constant 0.000000e+00 : f32
      %311 = vector.broadcast %cst_324 : f32 to vector<16x16xf32>
      %cst_325 = arith.constant 0.000000e+00 : f32
      %312 = vector.broadcast %cst_325 : f32 to vector<16x16xf32>
      %cst_326 = arith.constant 0.000000e+00 : f32
      %313 = vector.broadcast %cst_326 : f32 to vector<16x16xf32>
      %c0_327 = arith.constant 0 : index
      %c0_328 = arith.constant 0 : index
      %c0_329 = arith.constant 0 : index
      %c0_330 = arith.constant 0 : index
      %314 = vector.load %arg3[%c0_327, %c0_328, %c0_329, %c0_330] : memref<1x4x16x16xf32, #tpu.memory_space<vmem>>, vector<1x4x16x16xf32>
      %315 = vector.shape_cast %314 : vector<1x4x16x16xf32> to vector<4x16x16xf32>
      %c0_331 = arith.constant 0 : index
      %c0_332 = arith.constant 0 : index
      %c0_333 = arith.constant 0 : index
      %316 = vector.load %arg6[%c0_331, %c0_332, %c0_333] : memref<4x28x16xf32, #tpu.memory_space<vmem>>, vector<4x16x16xf32>
      %317 = arith.mulf %315, %316 : vector<4x16x16xf32>
      %cst_334 = arith.constant dense<0.000000e+00> : vector<16x16xf32>
      %318 = vector.multi_reduction <add>, %317, %cst_334 [0] : vector<4x16x16xf32> to vector<16x16xf32>
      %319 = arith.addf %311, %318 : vector<16x16xf32>
      %c0_335 = arith.constant 0 : index
      %c1_336 = arith.constant 1 : index
      %c0_337 = arith.constant 0 : index
      %320 = vector.load %arg6[%c0_335, %c1_336, %c0_337] : memref<4x28x16xf32, #tpu.memory_space<vmem>>, vector<4x16x16xf32>
      %321 = arith.mulf %315, %320 : vector<4x16x16xf32>
      %cst_338 = arith.constant dense<0.000000e+00> : vector<16x16xf32>
      %322 = vector.multi_reduction <add>, %321, %cst_338 [0] : vector<4x16x16xf32> to vector<16x16xf32>
      %323 = arith.addf %312, %322 : vector<16x16xf32>
      %c0_339 = arith.constant 0 : index
      %c2_340 = arith.constant 2 : index
      %c0_341 = arith.constant 0 : index
      %324 = vector.load %arg6[%c0_339, %c2_340, %c0_341] : memref<4x28x16xf32, #tpu.memory_space<vmem>>, vector<4x16x16xf32>
      %325 = arith.mulf %315, %324 : vector<4x16x16xf32>
      %cst_342 = arith.constant dense<0.000000e+00> : vector<16x16xf32>
      %326 = vector.multi_reduction <add>, %325, %cst_342 [0] : vector<4x16x16xf32> to vector<16x16xf32>
      %327 = arith.addf %313, %326 : vector<16x16xf32>
      %cst_343 = arith.constant 0.000000e+00 : f32
      %328 = vector.broadcast %cst_343 : f32 to vector<16x16xf32>
      %329 = arith.cmpf oge, %319, %328 : vector<16x16xf32>
      %cst_344 = arith.constant 1.000000e-01 : f32
      %330 = vector.broadcast %cst_344 : f32 to vector<16x16xf32>
      %331 = arith.mulf %330, %319 : vector<16x16xf32>
      %332 = arith.select %329, %319, %331 : vector<16x16xi1>, vector<16x16xf32>
      %c0_345 = arith.constant 0 : index
      %c0_346 = arith.constant 0 : index
      %c4_347 = arith.constant 4 : index
      %c0_348 = arith.constant 0 : index
      %c0_349 = arith.constant 0 : index
      %333 = vector.load %arg5[%c0_345, %c0_346, %c4_347, %c0_348, %c0_349] : memref<1x5x5x16x16xf32, #tpu.memory_space<vmem>>, vector<1x1x1x16x16xf32>
      %334 = vector.shape_cast %333 : vector<1x1x1x16x16xf32> to vector<16x16xf32>
      %335 = vector.shape_cast %332 : vector<16x16xf32> to vector<1x1x1x16x16xf32>
      tpu.vector_store %arg5[%c0_345, %c0_346, %c4_347, %c0_348, %c0_349], %335 {strides = array<i32>} : memref<1x5x5x16x16xf32, #tpu.memory_space<vmem>>, vector<1x1x1x16x16xf32>,
      %cst_350 = arith.constant 0.000000e+00 : f32
      %336 = vector.broadcast %cst_350 : f32 to vector<16x16xf32>
      %337 = arith.cmpf oge, %323, %336 : vector<16x16xf32>
      %cst_351 = arith.constant 1.000000e-01 : f32
      %338 = vector.broadcast %cst_351 : f32 to vector<16x16xf32>
      %339 = arith.mulf %338, %323 : vector<16x16xf32>
      %340 = arith.select %337, %323, %339 : vector<16x16xi1>, vector<16x16xf32>
      %c0_352 = arith.constant 0 : index
      %c1_353 = arith.constant 1 : index
      %c4_354 = arith.constant 4 : index
      %c0_355 = arith.constant 0 : index
      %c0_356 = arith.constant 0 : index
      %341 = vector.load %arg5[%c0_352, %c1_353, %c4_354, %c0_355, %c0_356] : memref<1x5x5x16x16xf32, #tpu.memory_space<vmem>>, vector<1x1x1x16x16xf32>
      %342 = vector.shape_cast %341 : vector<1x1x1x16x16xf32> to vector<16x16xf32>
      %343 = vector.shape_cast %340 : vector<16x16xf32> to vector<1x1x1x16x16xf32>
      tpu.vector_store %arg5[%c0_352, %c1_353, %c4_354, %c0_355, %c0_356], %343 {strides = array<i32>} : memref<1x5x5x16x16xf32, #tpu.memory_space<vmem>>, vector<1x1x1x16x16xf32>,
      %cst_357 = arith.constant 0.000000e+00 : f32
      %344 = vector.broadcast %cst_357 : f32 to vector<16x16xf32>
      %345 = arith.cmpf oge, %327, %344 : vector<16x16xf32>
      %cst_358 = arith.constant 1.000000e-01 : f32
      %346 = vector.broadcast %cst_358 : f32 to vector<16x16xf32>
      %347 = arith.mulf %346, %327 : vector<16x16xf32>
      %348 = arith.select %345, %327, %347 : vector<16x16xi1>, vector<16x16xf32>
      %c0_359 = arith.constant 0 : index
      %c2_360 = arith.constant 2 : index
      %c4_361 = arith.constant 4 : index
      %c0_362 = arith.constant 0 : index
      %c0_363 = arith.constant 0 : index
      %349 = vector.load %arg5[%c0_359, %c2_360, %c4_361, %c0_362, %c0_363] : memref<1x5x5x16x16xf32, #tpu.memory_space<vmem>>, vector<1x1x1x16x16xf32>
      %350 = vector.shape_cast %349 : vector<1x1x1x16x16xf32> to vector<16x16xf32>
      %351 = vector.shape_cast %348 : vector<16x16xf32> to vector<1x1x1x16x16xf32>
      tpu.vector_store %arg5[%c0_359, %c2_360, %c4_361, %c0_362, %c0_363], %351 {strides = array<i32>} : memref<1x5x5x16x16xf32, #tpu.memory_space<vmem>>, vector<1x1x1x16x16xf32>,
      %cst_364 = arith.constant 0.000000e+00 : f32
      %352 = vector.broadcast %cst_364 : f32 to vector<16x16xf32>
      %cst_365 = arith.constant 0.000000e+00 : f32
      %353 = vector.broadcast %cst_365 : f32 to vector<16x16xf32>
      %c0_366 = arith.constant 0 : index
      %c0_367 = arith.constant 0 : index
      %c0_368 = arith.constant 0 : index
      %c0_369 = arith.constant 0 : index
      %354 = vector.load %arg3[%c0_366, %c0_367, %c0_368, %c0_369] : memref<1x4x16x16xf32, #tpu.memory_space<vmem>>, vector<1x4x16x16xf32>
      %355 = vector.shape_cast %354 : vector<1x4x16x16xf32> to vector<4x16x16xf32>
      %c0_370 = arith.constant 0 : index
      %c3_371 = arith.constant 3 : index
      %c0_372 = arith.constant 0 : index
      %356 = vector.load %arg6[%c0_370, %c3_371, %c0_372] : memref<4x28x16xf32, #tpu.memory_space<vmem>>, vector<4x16x16xf32>
      %357 = arith.mulf %355, %356 : vector<4x16x16xf32>
      %cst_373 = arith.constant dense<0.000000e+00> : vector<16x16xf32>
      %358 = vector.multi_reduction <add>, %357, %cst_373 [0] : vector<4x16x16xf32> to vector<16x16xf32>
      %359 = arith.addf %352, %358 : vector<16x16xf32>
      %c0_374 = arith.constant 0 : index
      %c4_375 = arith.constant 4 : index
      %c0_376 = arith.constant 0 : index
      %360 = vector.load %arg6[%c0_374, %c4_375, %c0_376] : memref<4x28x16xf32, #tpu.memory_space<vmem>>, vector<4x16x16xf32>
      %361 = arith.mulf %355, %360 : vector<4x16x16xf32>
      %cst_377 = arith.constant dense<0.000000e+00> : vector<16x16xf32>
      %362 = vector.multi_reduction <add>, %361, %cst_377 [0] : vector<4x16x16xf32> to vector<16x16xf32>
      %363 = arith.addf %353, %362 : vector<16x16xf32>
      %cst_378 = arith.constant 0.000000e+00 : f32
      %364 = vector.broadcast %cst_378 : f32 to vector<16x16xf32>
      %365 = arith.cmpf oge, %359, %364 : vector<16x16xf32>
      %cst_379 = arith.constant 1.000000e-01 : f32
      %366 = vector.broadcast %cst_379 : f32 to vector<16x16xf32>
      %367 = arith.mulf %366, %359 : vector<16x16xf32>
      %368 = arith.select %365, %359, %367 : vector<16x16xi1>, vector<16x16xf32>
      %c0_380 = arith.constant 0 : index
      %c3_381 = arith.constant 3 : index
      %c4_382 = arith.constant 4 : index
      %c0_383 = arith.constant 0 : index
      %c0_384 = arith.constant 0 : index
      %369 = vector.load %arg5[%c0_380, %c3_381, %c4_382, %c0_383, %c0_384] : memref<1x5x5x16x16xf32, #tpu.memory_space<vmem>>, vector<1x1x1x16x16xf32>
      %370 = vector.shape_cast %369 : vector<1x1x1x16x16xf32> to vector<16x16xf32>
      %371 = vector.shape_cast %368 : vector<16x16xf32> to vector<1x1x1x16x16xf32>
      tpu.vector_store %arg5[%c0_380, %c3_381, %c4_382, %c0_383, %c0_384], %371 {strides = array<i32>} : memref<1x5x5x16x16xf32, #tpu.memory_space<vmem>>, vector<1x1x1x16x16xf32>,
      %cst_385 = arith.constant 0.000000e+00 : f32
      %372 = vector.broadcast %cst_385 : f32 to vector<16x16xf32>
      %373 = arith.cmpf oge, %363, %372 : vector<16x16xf32>
      %cst_386 = arith.constant 1.000000e-01 : f32
      %374 = vector.broadcast %cst_386 : f32 to vector<16x16xf32>
      %375 = arith.mulf %374, %363 : vector<16x16xf32>
      %376 = arith.select %373, %363, %375 : vector<16x16xi1>, vector<16x16xf32>
      %c0_387 = arith.constant 0 : index
      %c4_388 = arith.constant 4 : index
      %c4_389 = arith.constant 4 : index
      %c0_390 = arith.constant 0 : index
      %c0_391 = arith.constant 0 : index
      %377 = vector.load %arg5[%c0_387, %c4_388, %c4_389, %c0_390, %c0_391] : memref<1x5x5x16x16xf32, #tpu.memory_space<vmem>>, vector<1x1x1x16x16xf32>
      %378 = vector.shape_cast %377 : vector<1x1x1x16x16xf32> to vector<16x16xf32>
      %379 = vector.shape_cast %376 : vector<16x16xf32> to vector<1x1x1x16x16xf32>
      tpu.vector_store %arg5[%c0_387, %c4_388, %c4_389, %c0_390, %c0_391], %379 {strides = array<i32>} : memref<1x5x5x16x16xf32, #tpu.memory_space<vmem>>, vector<1x1x1x16x16xf32>,
    } else {
    }
    %c1_i32 = arith.constant 1 : i32
    %3 = arith.cmpi eq, %arg2, %c1_i32 : i32
    %4 = arith.extui %3 : i1 to i32
    %c0_i32_1 = arith.constant 0 : i32
    %5 = arith.cmpi ne, %4, %c0_i32_1 : i32
    scf.if %5 {
      %cst = arith.constant 0.000000e+00 : f32
      %9 = vector.broadcast %cst : f32 to vector<4x4x16xf32>
      %c0 = arith.constant 0 : index
      %c0_3 = arith.constant 0 : index
      %c0_4 = arith.constant 0 : index
      %10 = vector.load %arg6[%c0, %c0_3, %c0_4] : memref<4x28x16xf32, #tpu.memory_space<vmem>>, vector<4x4x16xf32>
      tpu.vector_store %arg6[%c0, %c0_3, %c0_4], %9 {strides = array<i32>} : memref<4x28x16xf32, #tpu.memory_space<vmem>>, vector<4x4x16xf32>,
      %c0_5 = arith.constant 0 : index
      %c20 = arith.constant 20 : index
      %c0_6 = arith.constant 0 : index
      %11 = vector.load %arg6[%c0_5, %c20, %c0_6] : memref<4x28x16xf32, #tpu.memory_space<vmem>>, vector<4x4x16xf32>
      tpu.vector_store %arg6[%c0_5, %c20, %c0_6], %9 {strides = array<i32>} : memref<4x28x16xf32, #tpu.memory_space<vmem>>, vector<4x4x16xf32>,
      %cst_7 = arith.constant 0.000000e+00 : f32
      %12 = vector.broadcast %cst_7 : f32 to vector<4x16x4xf32>
      %c0_8 = arith.constant 0 : index
      %c4 = arith.constant 4 : index
      %c0_9 = arith.constant 0 : index
      %13 = vector.load %arg6[%c0_8, %c4, %c0_9] : memref<4x28x16xf32, #tpu.memory_space<vmem>>, vector<4x16x4xf32>
      tpu.vector_store %arg6[%c0_8, %c4, %c0_9], %12 {strides = array<i32>} : memref<4x28x16xf32, #tpu.memory_space<vmem>>, vector<4x16x4xf32>,
      %c0_10 = arith.constant 0 : index
      %c0_11 = arith.constant 0 : index
      %c0_12 = arith.constant 0 : index
      %c0_13 = arith.constant 0 : index
      %14 = vector.load %arg4[%c0_10, %c0_11, %c0_12, %c0_13] : memref<1x4x16x16xf32, #tpu.memory_space<vmem>>, vector<1x4x16x12xf32>
      %15 = vector.shape_cast %14 : vector<1x4x16x12xf32> to vector<4x16x12xf32>
      %c0_14 = arith.constant 0 : index
      %c4_15 = arith.constant 4 : index
      %c4_16 = arith.constant 4 : index
      %16 = vector.load %arg6[%c0_14, %c4_15, %c4_16] : memref<4x28x16xf32, #tpu.memory_space<vmem>>, vector<4x16x12xf32>
      tpu.vector_store %arg6[%c0_14, %c4_15, %c4_16], %15 {strides = array<i32>} : memref<4x28x16xf32, #tpu.memory_space<vmem>>, vector<4x16x12xf32>,
      %cst_17 = arith.constant 0.000000e+00 : f32
      %17 = vector.broadcast %cst_17 : f32 to vector<16x16xf32>
      %cst_18 = arith.constant 0.000000e+00 : f32
      %18 = vector.broadcast %cst_18 : f32 to vector<16x16xf32>
      %cst_19 = arith.constant 0.000000e+00 : f32
      %19 = vector.broadcast %cst_19 : f32 to vector<16x16xf32>
      %c0_20 = arith.constant 0 : index
      %c0_21 = arith.constant 0 : index
      %c0_22 = arith.constant 0 : index
      %c0_23 = arith.constant 0 : index
      %20 = vector.load %arg3[%c0_20, %c0_21, %c0_22, %c0_23] : memref<1x4x16x16xf32, #tpu.memory_space<vmem>>, vector<1x4x16x16xf32>
      %21 = vector.shape_cast %20 : vector<1x4x16x16xf32> to vector<4x16x16xf32>
      %c0_24 = arith.constant 0 : index
      %c0_25 = arith.constant 0 : index
      %c0_26 = arith.constant 0 : index
      %22 = vector.load %arg6[%c0_24, %c0_25, %c0_26] : memref<4x28x16xf32, #tpu.memory_space<vmem>>, vector<4x16x16xf32>
      %23 = arith.mulf %21, %22 : vector<4x16x16xf32>
      %cst_27 = arith.constant dense<0.000000e+00> : vector<16x16xf32>
      %24 = vector.multi_reduction <add>, %23, %cst_27 [0] : vector<4x16x16xf32> to vector<16x16xf32>
      %25 = arith.addf %17, %24 : vector<16x16xf32>
      %c0_28 = arith.constant 0 : index
      %c2 = arith.constant 2 : index
      %c0_29 = arith.constant 0 : index
      %26 = vector.load %arg6[%c0_28, %c2, %c0_29] : memref<4x28x16xf32, #tpu.memory_space<vmem>>, vector<4x16x16xf32>
      %27 = arith.mulf %21, %26 : vector<4x16x16xf32>
      %cst_30 = arith.constant dense<0.000000e+00> : vector<16x16xf32>
      %28 = vector.multi_reduction <add>, %27, %cst_30 [0] : vector<4x16x16xf32> to vector<16x16xf32>
      %29 = arith.addf %18, %28 : vector<16x16xf32>
      %c0_31 = arith.constant 0 : index
      %c4_32 = arith.constant 4 : index
      %c0_33 = arith.constant 0 : index
      %30 = vector.load %arg6[%c0_31, %c4_32, %c0_33] : memref<4x28x16xf32, #tpu.memory_space<vmem>>, vector<4x16x16xf32>
      %31 = arith.mulf %21, %30 : vector<4x16x16xf32>
      %cst_34 = arith.constant dense<0.000000e+00> : vector<16x16xf32>
      %32 = vector.multi_reduction <add>, %31, %cst_34 [0] : vector<4x16x16xf32> to vector<16x16xf32>
      %33 = arith.addf %19, %32 : vector<16x16xf32>
      %cst_35 = arith.constant 0.000000e+00 : f32
      %34 = vector.broadcast %cst_35 : f32 to vector<16x16xf32>
      %35 = arith.cmpf oge, %25, %34 : vector<16x16xf32>
      %cst_36 = arith.constant 1.000000e-01 : f32
      %36 = vector.broadcast %cst_36 : f32 to vector<16x16xf32>
      %37 = arith.mulf %36, %25 : vector<16x16xf32>
      %38 = arith.select %35, %25, %37 : vector<16x16xi1>, vector<16x16xf32>
      %c0_37 = arith.constant 0 : index
      %c0_38 = arith.constant 0 : index
      %c0_39 = arith.constant 0 : index
      %c0_40 = arith.constant 0 : index
      %c0_41 = arith.constant 0 : index
      %39 = vector.load %arg5[%c0_37, %c0_38, %c0_39, %c0_40, %c0_41] : memref<1x5x5x16x16xf32, #tpu.memory_space<vmem>>, vector<1x1x1x16x16xf32>
      %40 = vector.shape_cast %39 : vector<1x1x1x16x16xf32> to vector<16x16xf32>
      %41 = vector.shape_cast %38 : vector<16x16xf32> to vector<1x1x1x16x16xf32>
      tpu.vector_store %arg5[%c0_37, %c0_38, %c0_39, %c0_40, %c0_41], %41 {strides = array<i32>} : memref<1x5x5x16x16xf32, #tpu.memory_space<vmem>>, vector<1x1x1x16x16xf32>,
      %cst_42 = arith.constant 0.000000e+00 : f32
      %42 = vector.broadcast %cst_42 : f32 to vector<16x16xf32>
      %43 = arith.cmpf oge, %29, %42 : vector<16x16xf32>
      %cst_43 = arith.constant 1.000000e-01 : f32
      %44 = vector.broadcast %cst_43 : f32 to vector<16x16xf32>
      %45 = arith.mulf %44, %29 : vector<16x16xf32>
      %46 = arith.select %43, %29, %45 : vector<16x16xi1>, vector<16x16xf32>
      %c0_44 = arith.constant 0 : index
      %c1 = arith.constant 1 : index
      %c0_45 = arith.constant 0 : index
      %c0_46 = arith.constant 0 : index
      %c0_47 = arith.constant 0 : index
      %47 = vector.load %arg5[%c0_44, %c1, %c0_45, %c0_46, %c0_47] : memref<1x5x5x16x16xf32, #tpu.memory_space<vmem>>, vector<1x1x1x16x16xf32>
      %48 = vector.shape_cast %47 : vector<1x1x1x16x16xf32> to vector<16x16xf32>
      %49 = vector.shape_cast %46 : vector<16x16xf32> to vector<1x1x1x16x16xf32>
      tpu.vector_store %arg5[%c0_44, %c1, %c0_45, %c0_46, %c0_47], %49 {strides = array<i32>} : memref<1x5x5x16x16xf32, #tpu.memory_space<vmem>>, vector<1x1x1x16x16xf32>,
      %cst_48 = arith.constant 0.000000e+00 : f32
      %50 = vector.broadcast %cst_48 : f32 to vector<16x16xf32>
      %51 = arith.cmpf oge, %33, %50 : vector<16x16xf32>
      %cst_49 = arith.constant 1.000000e-01 : f32
      %52 = vector.broadcast %cst_49 : f32 to vector<16x16xf32>
      %53 = arith.mulf %52, %33 : vector<16x16xf32>
      %54 = arith.select %51, %33, %53 : vector<16x16xi1>, vector<16x16xf32>
      %c0_50 = arith.constant 0 : index
      %c2_51 = arith.constant 2 : index
      %c0_52 = arith.constant 0 : index
      %c0_53 = arith.constant 0 : index
      %c0_54 = arith.constant 0 : index
      %55 = vector.load %arg5[%c0_50, %c2_51, %c0_52, %c0_53, %c0_54] : memref<1x5x5x16x16xf32, #tpu.memory_space<vmem>>, vector<1x1x1x16x16xf32>
      %56 = vector.shape_cast %55 : vector<1x1x1x16x16xf32> to vector<16x16xf32>
      %57 = vector.shape_cast %54 : vector<16x16xf32> to vector<1x1x1x16x16xf32>
      tpu.vector_store %arg5[%c0_50, %c2_51, %c0_52, %c0_53, %c0_54], %57 {strides = array<i32>} : memref<1x5x5x16x16xf32, #tpu.memory_space<vmem>>, vector<1x1x1x16x16xf32>,
      %cst_55 = arith.constant 0.000000e+00 : f32
      %58 = vector.broadcast %cst_55 : f32 to vector<16x16xf32>
      %cst_56 = arith.constant 0.000000e+00 : f32
      %59 = vector.broadcast %cst_56 : f32 to vector<16x16xf32>
      %c0_57 = arith.constant 0 : index
      %c0_58 = arith.constant 0 : index
      %c0_59 = arith.constant 0 : index
      %c0_60 = arith.constant 0 : index
      %60 = vector.load %arg3[%c0_57, %c0_58, %c0_59, %c0_60] : memref<1x4x16x16xf32, #tpu.memory_space<vmem>>, vector<1x4x16x16xf32>
      %61 = vector.shape_cast %60 : vector<1x4x16x16xf32> to vector<4x16x16xf32>
      %c0_61 = arith.constant 0 : index
      %c6 = arith.constant 6 : index
      %c0_62 = arith.constant 0 : index
      %62 = vector.load %arg6[%c0_61, %c6, %c0_62] : memref<4x28x16xf32, #tpu.memory_space<vmem>>, vector<4x16x16xf32>
      %63 = arith.mulf %61, %62 : vector<4x16x16xf32>
      %cst_63 = arith.constant dense<0.000000e+00> : vector<16x16xf32>
      %64 = vector.multi_reduction <add>, %63, %cst_63 [0] : vector<4x16x16xf32> to vector<16x16xf32>
      %65 = arith.addf %58, %64 : vector<16x16xf32>
      %c0_64 = arith.constant 0 : index
      %c8 = arith.constant 8 : index
      %c0_65 = arith.constant 0 : index
      %66 = vector.load %arg6[%c0_64, %c8, %c0_65] : memref<4x28x16xf32, #tpu.memory_space<vmem>>, vector<4x16x16xf32>
      %67 = arith.mulf %61, %66 : vector<4x16x16xf32>
      %cst_66 = arith.constant dense<0.000000e+00> : vector<16x16xf32>
      %68 = vector.multi_reduction <add>, %67, %cst_66 [0] : vector<4x16x16xf32> to vector<16x16xf32>
      %69 = arith.addf %59, %68 : vector<16x16xf32>
      %cst_67 = arith.constant 0.000000e+00 : f32
      %70 = vector.broadcast %cst_67 : f32 to vector<16x16xf32>
      %71 = arith.cmpf oge, %65, %70 : vector<16x16xf32>
      %cst_68 = arith.constant 1.000000e-01 : f32
      %72 = vector.broadcast %cst_68 : f32 to vector<16x16xf32>
      %73 = arith.mulf %72, %65 : vector<16x16xf32>
      %74 = arith.select %71, %65, %73 : vector<16x16xi1>, vector<16x16xf32>
      %c0_69 = arith.constant 0 : index
      %c3 = arith.constant 3 : index
      %c0_70 = arith.constant 0 : index
      %c0_71 = arith.constant 0 : index
      %c0_72 = arith.constant 0 : index
      %75 = vector.load %arg5[%c0_69, %c3, %c0_70, %c0_71, %c0_72] : memref<1x5x5x16x16xf32, #tpu.memory_space<vmem>>, vector<1x1x1x16x16xf32>
      %76 = vector.shape_cast %75 : vector<1x1x1x16x16xf32> to vector<16x16xf32>
      %77 = vector.shape_cast %74 : vector<16x16xf32> to vector<1x1x1x16x16xf32>
      tpu.vector_store %arg5[%c0_69, %c3, %c0_70, %c0_71, %c0_72], %77 {strides = array<i32>} : memref<1x5x5x16x16xf32, #tpu.memory_space<vmem>>, vector<1x1x1x16x16xf32>,
      %cst_73 = arith.constant 0.000000e+00 : f32
      %78 = vector.broadcast %cst_73 : f32 to vector<16x16xf32>
      %79 = arith.cmpf oge, %69, %78 : vector<16x16xf32>
      %cst_74 = arith.constant 1.000000e-01 : f32
      %80 = vector.broadcast %cst_74 : f32 to vector<16x16xf32>
      %81 = arith.mulf %80, %69 : vector<16x16xf32>
      %82 = arith.select %79, %69, %81 : vector<16x16xi1>, vector<16x16xf32>
      %c0_75 = arith.constant 0 : index
      %c4_76 = arith.constant 4 : index
      %c0_77 = arith.constant 0 : index
      %c0_78 = arith.constant 0 : index
      %c0_79 = arith.constant 0 : index
      %83 = vector.load %arg5[%c0_75, %c4_76, %c0_77, %c0_78, %c0_79] : memref<1x5x5x16x16xf32, #tpu.memory_space<vmem>>, vector<1x1x1x16x16xf32>
      %84 = vector.shape_cast %83 : vector<1x1x1x16x16xf32> to vector<16x16xf32>
      %85 = vector.shape_cast %82 : vector<16x16xf32> to vector<1x1x1x16x16xf32>
      tpu.vector_store %arg5[%c0_75, %c4_76, %c0_77, %c0_78, %c0_79], %85 {strides = array<i32>} : memref<1x5x5x16x16xf32, #tpu.memory_space<vmem>>, vector<1x1x1x16x16xf32>,
      %cst_80 = arith.constant 0.000000e+00 : f32
      %86 = vector.broadcast %cst_80 : f32 to vector<4x16x2xf32>
      %c0_81 = arith.constant 0 : index
      %c4_82 = arith.constant 4 : index
      %c0_83 = arith.constant 0 : index
      %87 = vector.load %arg6[%c0_81, %c4_82, %c0_83] : memref<4x28x16xf32, #tpu.memory_space<vmem>>, vector<4x16x2xf32>
      tpu.vector_store %arg6[%c0_81, %c4_82, %c0_83], %86 {strides = array<i32>} : memref<4x28x16xf32, #tpu.memory_space<vmem>>, vector<4x16x2xf32>,
      %c0_84 = arith.constant 0 : index
      %c0_85 = arith.constant 0 : index
      %c0_86 = arith.constant 0 : index
      %c0_87 = arith.constant 0 : index
      %88 = vector.load %arg4[%c0_84, %c0_85, %c0_86, %c0_87] : memref<1x4x16x16xf32, #tpu.memory_space<vmem>>, vector<1x4x16x14xf32>
      %89 = vector.shape_cast %88 : vector<1x4x16x14xf32> to vector<4x16x14xf32>
      %c0_88 = arith.constant 0 : index
      %c4_89 = arith.constant 4 : index
      %c2_90 = arith.constant 2 : index
      %90 = vector.load %arg6[%c0_88, %c4_89, %c2_90] : memref<4x28x16xf32, #tpu.memory_space<vmem>>, vector<4x16x14xf32>
      tpu.vector_store %arg6[%c0_88, %c4_89, %c2_90], %89 {strides = array<i32>} : memref<4x28x16xf32, #tpu.memory_space<vmem>>, vector<4x16x14xf32>,
      %cst_91 = arith.constant 0.000000e+00 : f32
      %91 = vector.broadcast %cst_91 : f32 to vector<16x16xf32>
      %cst_92 = arith.constant 0.000000e+00 : f32
      %92 = vector.broadcast %cst_92 : f32 to vector<16x16xf32>
      %cst_93 = arith.constant 0.000000e+00 : f32
      %93 = vector.broadcast %cst_93 : f32 to vector<16x16xf32>
      %c0_94 = arith.constant 0 : index
      %c0_95 = arith.constant 0 : index
      %c0_96 = arith.constant 0 : index
      %c0_97 = arith.constant 0 : index
      %94 = vector.load %arg3[%c0_94, %c0_95, %c0_96, %c0_97] : memref<1x4x16x16xf32, #tpu.memory_space<vmem>>, vector<1x4x16x16xf32>
      %95 = vector.shape_cast %94 : vector<1x4x16x16xf32> to vector<4x16x16xf32>
      %c0_98 = arith.constant 0 : index
      %c0_99 = arith.constant 0 : index
      %c0_100 = arith.constant 0 : index
      %96 = vector.load %arg6[%c0_98, %c0_99, %c0_100] : memref<4x28x16xf32, #tpu.memory_space<vmem>>, vector<4x16x16xf32>
      %97 = arith.mulf %95, %96 : vector<4x16x16xf32>
      %cst_101 = arith.constant dense<0.000000e+00> : vector<16x16xf32>
      %98 = vector.multi_reduction <add>, %97, %cst_101 [0] : vector<4x16x16xf32> to vector<16x16xf32>
      %99 = arith.addf %91, %98 : vector<16x16xf32>
      %c0_102 = arith.constant 0 : index
      %c2_103 = arith.constant 2 : index
      %c0_104 = arith.constant 0 : index
      %100 = vector.load %arg6[%c0_102, %c2_103, %c0_104] : memref<4x28x16xf32, #tpu.memory_space<vmem>>, vector<4x16x16xf32>
      %101 = arith.mulf %95, %100 : vector<4x16x16xf32>
      %cst_105 = arith.constant dense<0.000000e+00> : vector<16x16xf32>
      %102 = vector.multi_reduction <add>, %101, %cst_105 [0] : vector<4x16x16xf32> to vector<16x16xf32>
      %103 = arith.addf %92, %102 : vector<16x16xf32>
      %c0_106 = arith.constant 0 : index
      %c4_107 = arith.constant 4 : index
      %c0_108 = arith.constant 0 : index
      %104 = vector.load %arg6[%c0_106, %c4_107, %c0_108] : memref<4x28x16xf32, #tpu.memory_space<vmem>>, vector<4x16x16xf32>
      %105 = arith.mulf %95, %104 : vector<4x16x16xf32>
      %cst_109 = arith.constant dense<0.000000e+00> : vector<16x16xf32>
      %106 = vector.multi_reduction <add>, %105, %cst_109 [0] : vector<4x16x16xf32> to vector<16x16xf32>
      %107 = arith.addf %93, %106 : vector<16x16xf32>
      %cst_110 = arith.constant 0.000000e+00 : f32
      %108 = vector.broadcast %cst_110 : f32 to vector<16x16xf32>
      %109 = arith.cmpf oge, %99, %108 : vector<16x16xf32>
      %cst_111 = arith.constant 1.000000e-01 : f32
      %110 = vector.broadcast %cst_111 : f32 to vector<16x16xf32>
      %111 = arith.mulf %110, %99 : vector<16x16xf32>
      %112 = arith.select %109, %99, %111 : vector<16x16xi1>, vector<16x16xf32>
      %c0_112 = arith.constant 0 : index
      %c0_113 = arith.constant 0 : index
      %c1_114 = arith.constant 1 : index
      %c0_115 = arith.constant 0 : index
      %c0_116 = arith.constant 0 : index
      %113 = vector.load %arg5[%c0_112, %c0_113, %c1_114, %c0_115, %c0_116] : memref<1x5x5x16x16xf32, #tpu.memory_space<vmem>>, vector<1x1x1x16x16xf32>
      %114 = vector.shape_cast %113 : vector<1x1x1x16x16xf32> to vector<16x16xf32>
      %115 = vector.shape_cast %112 : vector<16x16xf32> to vector<1x1x1x16x16xf32>
      tpu.vector_store %arg5[%c0_112, %c0_113, %c1_114, %c0_115, %c0_116], %115 {strides = array<i32>} : memref<1x5x5x16x16xf32, #tpu.memory_space<vmem>>, vector<1x1x1x16x16xf32>,
      %cst_117 = arith.constant 0.000000e+00 : f32
      %116 = vector.broadcast %cst_117 : f32 to vector<16x16xf32>
      %117 = arith.cmpf oge, %103, %116 : vector<16x16xf32>
      %cst_118 = arith.constant 1.000000e-01 : f32
      %118 = vector.broadcast %cst_118 : f32 to vector<16x16xf32>
      %119 = arith.mulf %118, %103 : vector<16x16xf32>
      %120 = arith.select %117, %103, %119 : vector<16x16xi1>, vector<16x16xf32>
      %c0_119 = arith.constant 0 : index
      %c1_120 = arith.constant 1 : index
      %c1_121 = arith.constant 1 : index
      %c0_122 = arith.constant 0 : index
      %c0_123 = arith.constant 0 : index
      %121 = vector.load %arg5[%c0_119, %c1_120, %c1_121, %c0_122, %c0_123] : memref<1x5x5x16x16xf32, #tpu.memory_space<vmem>>, vector<1x1x1x16x16xf32>
      %122 = vector.shape_cast %121 : vector<1x1x1x16x16xf32> to vector<16x16xf32>
      %123 = vector.shape_cast %120 : vector<16x16xf32> to vector<1x1x1x16x16xf32>
      tpu.vector_store %arg5[%c0_119, %c1_120, %c1_121, %c0_122, %c0_123], %123 {strides = array<i32>} : memref<1x5x5x16x16xf32, #tpu.memory_space<vmem>>, vector<1x1x1x16x16xf32>,
      %cst_124 = arith.constant 0.000000e+00 : f32
      %124 = vector.broadcast %cst_124 : f32 to vector<16x16xf32>
      %125 = arith.cmpf oge, %107, %124 : vector<16x16xf32>
      %cst_125 = arith.constant 1.000000e-01 : f32
      %126 = vector.broadcast %cst_125 : f32 to vector<16x16xf32>
      %127 = arith.mulf %126, %107 : vector<16x16xf32>
      %128 = arith.select %125, %107, %127 : vector<16x16xi1>, vector<16x16xf32>
      %c0_126 = arith.constant 0 : index
      %c2_127 = arith.constant 2 : index
      %c1_128 = arith.constant 1 : index
      %c0_129 = arith.constant 0 : index
      %c0_130 = arith.constant 0 : index
      %129 = vector.load %arg5[%c0_126, %c2_127, %c1_128, %c0_129, %c0_130] : memref<1x5x5x16x16xf32, #tpu.memory_space<vmem>>, vector<1x1x1x16x16xf32>
      %130 = vector.shape_cast %129 : vector<1x1x1x16x16xf32> to vector<16x16xf32>
      %131 = vector.shape_cast %128 : vector<16x16xf32> to vector<1x1x1x16x16xf32>
      tpu.vector_store %arg5[%c0_126, %c2_127, %c1_128, %c0_129, %c0_130], %131 {strides = array<i32>} : memref<1x5x5x16x16xf32, #tpu.memory_space<vmem>>, vector<1x1x1x16x16xf32>,
      %cst_131 = arith.constant 0.000000e+00 : f32
      %132 = vector.broadcast %cst_131 : f32 to vector<16x16xf32>
      %cst_132 = arith.constant 0.000000e+00 : f32
      %133 = vector.broadcast %cst_132 : f32 to vector<16x16xf32>
      %c0_133 = arith.constant 0 : index
      %c0_134 = arith.constant 0 : index
      %c0_135 = arith.constant 0 : index
      %c0_136 = arith.constant 0 : index
      %134 = vector.load %arg3[%c0_133, %c0_134, %c0_135, %c0_136] : memref<1x4x16x16xf32, #tpu.memory_space<vmem>>, vector<1x4x16x16xf32>
      %135 = vector.shape_cast %134 : vector<1x4x16x16xf32> to vector<4x16x16xf32>
      %c0_137 = arith.constant 0 : index
      %c6_138 = arith.constant 6 : index
      %c0_139 = arith.constant 0 : index
      %136 = vector.load %arg6[%c0_137, %c6_138, %c0_139] : memref<4x28x16xf32, #tpu.memory_space<vmem>>, vector<4x16x16xf32>
      %137 = arith.mulf %135, %136 : vector<4x16x16xf32>
      %cst_140 = arith.constant dense<0.000000e+00> : vector<16x16xf32>
      %138 = vector.multi_reduction <add>, %137, %cst_140 [0] : vector<4x16x16xf32> to vector<16x16xf32>
      %139 = arith.addf %132, %138 : vector<16x16xf32>
      %c0_141 = arith.constant 0 : index
      %c8_142 = arith.constant 8 : index
      %c0_143 = arith.constant 0 : index
      %140 = vector.load %arg6[%c0_141, %c8_142, %c0_143] : memref<4x28x16xf32, #tpu.memory_space<vmem>>, vector<4x16x16xf32>
      %141 = arith.mulf %135, %140 : vector<4x16x16xf32>
      %cst_144 = arith.constant dense<0.000000e+00> : vector<16x16xf32>
      %142 = vector.multi_reduction <add>, %141, %cst_144 [0] : vector<4x16x16xf32> to vector<16x16xf32>
      %143 = arith.addf %133, %142 : vector<16x16xf32>
      %cst_145 = arith.constant 0.000000e+00 : f32
      %144 = vector.broadcast %cst_145 : f32 to vector<16x16xf32>
      %145 = arith.cmpf oge, %139, %144 : vector<16x16xf32>
      %cst_146 = arith.constant 1.000000e-01 : f32
      %146 = vector.broadcast %cst_146 : f32 to vector<16x16xf32>
      %147 = arith.mulf %146, %139 : vector<16x16xf32>
      %148 = arith.select %145, %139, %147 : vector<16x16xi1>, vector<16x16xf32>
      %c0_147 = arith.constant 0 : index
      %c3_148 = arith.constant 3 : index
      %c1_149 = arith.constant 1 : index
      %c0_150 = arith.constant 0 : index
      %c0_151 = arith.constant 0 : index
      %149 = vector.load %arg5[%c0_147, %c3_148, %c1_149, %c0_150, %c0_151] : memref<1x5x5x16x16xf32, #tpu.memory_space<vmem>>, vector<1x1x1x16x16xf32>
      %150 = vector.shape_cast %149 : vector<1x1x1x16x16xf32> to vector<16x16xf32>
      %151 = vector.shape_cast %148 : vector<16x16xf32> to vector<1x1x1x16x16xf32>
      tpu.vector_store %arg5[%c0_147, %c3_148, %c1_149, %c0_150, %c0_151], %151 {strides = array<i32>} : memref<1x5x5x16x16xf32, #tpu.memory_space<vmem>>, vector<1x1x1x16x16xf32>,
      %cst_152 = arith.constant 0.000000e+00 : f32
      %152 = vector.broadcast %cst_152 : f32 to vector<16x16xf32>
      %153 = arith.cmpf oge, %143, %152 : vector<16x16xf32>
      %cst_153 = arith.constant 1.000000e-01 : f32
      %154 = vector.broadcast %cst_153 : f32 to vector<16x16xf32>
      %155 = arith.mulf %154, %143 : vector<16x16xf32>
      %156 = arith.select %153, %143, %155 : vector<16x16xi1>, vector<16x16xf32>
      %c0_154 = arith.constant 0 : index
      %c4_155 = arith.constant 4 : index
      %c1_156 = arith.constant 1 : index
      %c0_157 = arith.constant 0 : index
      %c0_158 = arith.constant 0 : index
      %157 = vector.load %arg5[%c0_154, %c4_155, %c1_156, %c0_157, %c0_158] : memref<1x5x5x16x16xf32, #tpu.memory_space<vmem>>, vector<1x1x1x16x16xf32>
      %158 = vector.shape_cast %157 : vector<1x1x1x16x16xf32> to vector<16x16xf32>
      %159 = vector.shape_cast %156 : vector<16x16xf32> to vector<1x1x1x16x16xf32>
      tpu.vector_store %arg5[%c0_154, %c4_155, %c1_156, %c0_157, %c0_158], %159 {strides = array<i32>} : memref<1x5x5x16x16xf32, #tpu.memory_space<vmem>>, vector<1x1x1x16x16xf32>,
      %c0_159 = arith.constant 0 : index
      %c0_160 = arith.constant 0 : index
      %c0_161 = arith.constant 0 : index
      %c0_162 = arith.constant 0 : index
      %160 = vector.load %arg4[%c0_159, %c0_160, %c0_161, %c0_162] : memref<1x4x16x16xf32, #tpu.memory_space<vmem>>, vector<1x4x16x16xf32>
      %161 = vector.shape_cast %160 : vector<1x4x16x16xf32> to vector<4x16x16xf32>
      %c0_163 = arith.constant 0 : index
      %c4_164 = arith.constant 4 : index
      %c0_165 = arith.constant 0 : index
      %162 = vector.load %arg6[%c0_163, %c4_164, %c0_165] : memref<4x28x16xf32, #tpu.memory_space<vmem>>, vector<4x16x16xf32>
      tpu.vector_store %arg6[%c0_163, %c4_164, %c0_165], %161 {strides = array<i32>} : memref<4x28x16xf32, #tpu.memory_space<vmem>>, vector<4x16x16xf32>,
      %cst_166 = arith.constant 0.000000e+00 : f32
      %163 = vector.broadcast %cst_166 : f32 to vector<16x16xf32>
      %cst_167 = arith.constant 0.000000e+00 : f32
      %164 = vector.broadcast %cst_167 : f32 to vector<16x16xf32>
      %cst_168 = arith.constant 0.000000e+00 : f32
      %165 = vector.broadcast %cst_168 : f32 to vector<16x16xf32>
      %c0_169 = arith.constant 0 : index
      %c0_170 = arith.constant 0 : index
      %c0_171 = arith.constant 0 : index
      %c0_172 = arith.constant 0 : index
      %166 = vector.load %arg3[%c0_169, %c0_170, %c0_171, %c0_172] : memref<1x4x16x16xf32, #tpu.memory_space<vmem>>, vector<1x4x16x16xf32>
      %167 = vector.shape_cast %166 : vector<1x4x16x16xf32> to vector<4x16x16xf32>
      %c0_173 = arith.constant 0 : index
      %c0_174 = arith.constant 0 : index
      %c0_175 = arith.constant 0 : index
      %168 = vector.load %arg6[%c0_173, %c0_174, %c0_175] : memref<4x28x16xf32, #tpu.memory_space<vmem>>, vector<4x16x16xf32>
      %169 = arith.mulf %167, %168 : vector<4x16x16xf32>
      %cst_176 = arith.constant dense<0.000000e+00> : vector<16x16xf32>
      %170 = vector.multi_reduction <add>, %169, %cst_176 [0] : vector<4x16x16xf32> to vector<16x16xf32>
      %171 = arith.addf %163, %170 : vector<16x16xf32>
      %c0_177 = arith.constant 0 : index
      %c2_178 = arith.constant 2 : index
      %c0_179 = arith.constant 0 : index
      %172 = vector.load %arg6[%c0_177, %c2_178, %c0_179] : memref<4x28x16xf32, #tpu.memory_space<vmem>>, vector<4x16x16xf32>
      %173 = arith.mulf %167, %172 : vector<4x16x16xf32>
      %cst_180 = arith.constant dense<0.000000e+00> : vector<16x16xf32>
      %174 = vector.multi_reduction <add>, %173, %cst_180 [0] : vector<4x16x16xf32> to vector<16x16xf32>
      %175 = arith.addf %164, %174 : vector<16x16xf32>
      %c0_181 = arith.constant 0 : index
      %c4_182 = arith.constant 4 : index
      %c0_183 = arith.constant 0 : index
      %176 = vector.load %arg6[%c0_181, %c4_182, %c0_183] : memref<4x28x16xf32, #tpu.memory_space<vmem>>, vector<4x16x16xf32>
      %177 = arith.mulf %167, %176 : vector<4x16x16xf32>
      %cst_184 = arith.constant dense<0.000000e+00> : vector<16x16xf32>
      %178 = vector.multi_reduction <add>, %177, %cst_184 [0] : vector<4x16x16xf32> to vector<16x16xf32>
      %179 = arith.addf %165, %178 : vector<16x16xf32>
      %cst_185 = arith.constant 0.000000e+00 : f32
      %180 = vector.broadcast %cst_185 : f32 to vector<16x16xf32>
      %181 = arith.cmpf oge, %171, %180 : vector<16x16xf32>
      %cst_186 = arith.constant 1.000000e-01 : f32
      %182 = vector.broadcast %cst_186 : f32 to vector<16x16xf32>
      %183 = arith.mulf %182, %171 : vector<16x16xf32>
      %184 = arith.select %181, %171, %183 : vector<16x16xi1>, vector<16x16xf32>
      %c0_187 = arith.constant 0 : index
      %c0_188 = arith.constant 0 : index
      %c2_189 = arith.constant 2 : index
      %c0_190 = arith.constant 0 : index
      %c0_191 = arith.constant 0 : index
      %185 = vector.load %arg5[%c0_187, %c0_188, %c2_189, %c0_190, %c0_191] : memref<1x5x5x16x16xf32, #tpu.memory_space<vmem>>, vector<1x1x1x16x16xf32>
      %186 = vector.shape_cast %185 : vector<1x1x1x16x16xf32> to vector<16x16xf32>
      %187 = vector.shape_cast %184 : vector<16x16xf32> to vector<1x1x1x16x16xf32>
      tpu.vector_store %arg5[%c0_187, %c0_188, %c2_189, %c0_190, %c0_191], %187 {strides = array<i32>} : memref<1x5x5x16x16xf32, #tpu.memory_space<vmem>>, vector<1x1x1x16x16xf32>,
      %cst_192 = arith.constant 0.000000e+00 : f32
      %188 = vector.broadcast %cst_192 : f32 to vector<16x16xf32>
      %189 = arith.cmpf oge, %175, %188 : vector<16x16xf32>
      %cst_193 = arith.constant 1.000000e-01 : f32
      %190 = vector.broadcast %cst_193 : f32 to vector<16x16xf32>
      %191 = arith.mulf %190, %175 : vector<16x16xf32>
      %192 = arith.select %189, %175, %191 : vector<16x16xi1>, vector<16x16xf32>
      %c0_194 = arith.constant 0 : index
      %c1_195 = arith.constant 1 : index
      %c2_196 = arith.constant 2 : index
      %c0_197 = arith.constant 0 : index
      %c0_198 = arith.constant 0 : index
      %193 = vector.load %arg5[%c0_194, %c1_195, %c2_196, %c0_197, %c0_198] : memref<1x5x5x16x16xf32, #tpu.memory_space<vmem>>, vector<1x1x1x16x16xf32>
      %194 = vector.shape_cast %193 : vector<1x1x1x16x16xf32> to vector<16x16xf32>
      %195 = vector.shape_cast %192 : vector<16x16xf32> to vector<1x1x1x16x16xf32>
      tpu.vector_store %arg5[%c0_194, %c1_195, %c2_196, %c0_197, %c0_198], %195 {strides = array<i32>} : memref<1x5x5x16x16xf32, #tpu.memory_space<vmem>>, vector<1x1x1x16x16xf32>,
      %cst_199 = arith.constant 0.000000e+00 : f32
      %196 = vector.broadcast %cst_199 : f32 to vector<16x16xf32>
      %197 = arith.cmpf oge, %179, %196 : vector<16x16xf32>
      %cst_200 = arith.constant 1.000000e-01 : f32
      %198 = vector.broadcast %cst_200 : f32 to vector<16x16xf32>
      %199 = arith.mulf %198, %179 : vector<16x16xf32>
      %200 = arith.select %197, %179, %199 : vector<16x16xi1>, vector<16x16xf32>
      %c0_201 = arith.constant 0 : index
      %c2_202 = arith.constant 2 : index
      %c2_203 = arith.constant 2 : index
      %c0_204 = arith.constant 0 : index
      %c0_205 = arith.constant 0 : index
      %201 = vector.load %arg5[%c0_201, %c2_202, %c2_203, %c0_204, %c0_205] : memref<1x5x5x16x16xf32, #tpu.memory_space<vmem>>, vector<1x1x1x16x16xf32>
      %202 = vector.shape_cast %201 : vector<1x1x1x16x16xf32> to vector<16x16xf32>
      %203 = vector.shape_cast %200 : vector<16x16xf32> to vector<1x1x1x16x16xf32>
      tpu.vector_store %arg5[%c0_201, %c2_202, %c2_203, %c0_204, %c0_205], %203 {strides = array<i32>} : memref<1x5x5x16x16xf32, #tpu.memory_space<vmem>>, vector<1x1x1x16x16xf32>,
      %cst_206 = arith.constant 0.000000e+00 : f32
      %204 = vector.broadcast %cst_206 : f32 to vector<16x16xf32>
      %cst_207 = arith.constant 0.000000e+00 : f32
      %205 = vector.broadcast %cst_207 : f32 to vector<16x16xf32>
      %c0_208 = arith.constant 0 : index
      %c0_209 = arith.constant 0 : index
      %c0_210 = arith.constant 0 : index
      %c0_211 = arith.constant 0 : index
      %206 = vector.load %arg3[%c0_208, %c0_209, %c0_210, %c0_211] : memref<1x4x16x16xf32, #tpu.memory_space<vmem>>, vector<1x4x16x16xf32>
      %207 = vector.shape_cast %206 : vector<1x4x16x16xf32> to vector<4x16x16xf32>
      %c0_212 = arith.constant 0 : index
      %c6_213 = arith.constant 6 : index
      %c0_214 = arith.constant 0 : index
      %208 = vector.load %arg6[%c0_212, %c6_213, %c0_214] : memref<4x28x16xf32, #tpu.memory_space<vmem>>, vector<4x16x16xf32>
      %209 = arith.mulf %207, %208 : vector<4x16x16xf32>
      %cst_215 = arith.constant dense<0.000000e+00> : vector<16x16xf32>
      %210 = vector.multi_reduction <add>, %209, %cst_215 [0] : vector<4x16x16xf32> to vector<16x16xf32>
      %211 = arith.addf %204, %210 : vector<16x16xf32>
      %c0_216 = arith.constant 0 : index
      %c8_217 = arith.constant 8 : index
      %c0_218 = arith.constant 0 : index
      %212 = vector.load %arg6[%c0_216, %c8_217, %c0_218] : memref<4x28x16xf32, #tpu.memory_space<vmem>>, vector<4x16x16xf32>
      %213 = arith.mulf %207, %212 : vector<4x16x16xf32>
      %cst_219 = arith.constant dense<0.000000e+00> : vector<16x16xf32>
      %214 = vector.multi_reduction <add>, %213, %cst_219 [0] : vector<4x16x16xf32> to vector<16x16xf32>
      %215 = arith.addf %205, %214 : vector<16x16xf32>
      %cst_220 = arith.constant 0.000000e+00 : f32
      %216 = vector.broadcast %cst_220 : f32 to vector<16x16xf32>
      %217 = arith.cmpf oge, %211, %216 : vector<16x16xf32>
      %cst_221 = arith.constant 1.000000e-01 : f32
      %218 = vector.broadcast %cst_221 : f32 to vector<16x16xf32>
      %219 = arith.mulf %218, %211 : vector<16x16xf32>
      %220 = arith.select %217, %211, %219 : vector<16x16xi1>, vector<16x16xf32>
      %c0_222 = arith.constant 0 : index
      %c3_223 = arith.constant 3 : index
      %c2_224 = arith.constant 2 : index
      %c0_225 = arith.constant 0 : index
      %c0_226 = arith.constant 0 : index
      %221 = vector.load %arg5[%c0_222, %c3_223, %c2_224, %c0_225, %c0_226] : memref<1x5x5x16x16xf32, #tpu.memory_space<vmem>>, vector<1x1x1x16x16xf32>
      %222 = vector.shape_cast %221 : vector<1x1x1x16x16xf32> to vector<16x16xf32>
      %223 = vector.shape_cast %220 : vector<16x16xf32> to vector<1x1x1x16x16xf32>
      tpu.vector_store %arg5[%c0_222, %c3_223, %c2_224, %c0_225, %c0_226], %223 {strides = array<i32>} : memref<1x5x5x16x16xf32, #tpu.memory_space<vmem>>, vector<1x1x1x16x16xf32>,
      %cst_227 = arith.constant 0.000000e+00 : f32
      %224 = vector.broadcast %cst_227 : f32 to vector<16x16xf32>
      %225 = arith.cmpf oge, %215, %224 : vector<16x16xf32>
      %cst_228 = arith.constant 1.000000e-01 : f32
      %226 = vector.broadcast %cst_228 : f32 to vector<16x16xf32>
      %227 = arith.mulf %226, %215 : vector<16x16xf32>
      %228 = arith.select %225, %215, %227 : vector<16x16xi1>, vector<16x16xf32>
      %c0_229 = arith.constant 0 : index
      %c4_230 = arith.constant 4 : index
      %c2_231 = arith.constant 2 : index
      %c0_232 = arith.constant 0 : index
      %c0_233 = arith.constant 0 : index
      %229 = vector.load %arg5[%c0_229, %c4_230, %c2_231, %c0_232, %c0_233] : memref<1x5x5x16x16xf32, #tpu.memory_space<vmem>>, vector<1x1x1x16x16xf32>
      %230 = vector.shape_cast %229 : vector<1x1x1x16x16xf32> to vector<16x16xf32>
      %231 = vector.shape_cast %228 : vector<16x16xf32> to vector<1x1x1x16x16xf32>
      tpu.vector_store %arg5[%c0_229, %c4_230, %c2_231, %c0_232, %c0_233], %231 {strides = array<i32>} : memref<1x5x5x16x16xf32, #tpu.memory_space<vmem>>, vector<1x1x1x16x16xf32>,
      %cst_234 = arith.constant 0.000000e+00 : f32
      %232 = vector.broadcast %cst_234 : f32 to vector<4x16x2xf32>
      %c0_235 = arith.constant 0 : index
      %c4_236 = arith.constant 4 : index
      %c14 = arith.constant 14 : index
      %233 = vector.load %arg6[%c0_235, %c4_236, %c14] : memref<4x28x16xf32, #tpu.memory_space<vmem>>, vector<4x16x2xf32>
      tpu.vector_store %arg6[%c0_235, %c4_236, %c14], %232 {strides = array<i32>} : memref<4x28x16xf32, #tpu.memory_space<vmem>>, vector<4x16x2xf32>,
      %c0_237 = arith.constant 0 : index
      %c0_238 = arith.constant 0 : index
      %c0_239 = arith.constant 0 : index
      %c2_240 = arith.constant 2 : index
      %234 = vector.load %arg4[%c0_237, %c0_238, %c0_239, %c2_240] : memref<1x4x16x16xf32, #tpu.memory_space<vmem>>, vector<1x4x16x14xf32>
      %235 = vector.shape_cast %234 : vector<1x4x16x14xf32> to vector<4x16x14xf32>
      %c0_241 = arith.constant 0 : index
      %c4_242 = arith.constant 4 : index
      %c0_243 = arith.constant 0 : index
      %236 = vector.load %arg6[%c0_241, %c4_242, %c0_243] : memref<4x28x16xf32, #tpu.memory_space<vmem>>, vector<4x16x14xf32>
      tpu.vector_store %arg6[%c0_241, %c4_242, %c0_243], %235 {strides = array<i32>} : memref<4x28x16xf32, #tpu.memory_space<vmem>>, vector<4x16x14xf32>,
      %cst_244 = arith.constant 0.000000e+00 : f32
      %237 = vector.broadcast %cst_244 : f32 to vector<16x16xf32>
      %cst_245 = arith.constant 0.000000e+00 : f32
      %238 = vector.broadcast %cst_245 : f32 to vector<16x16xf32>
      %cst_246 = arith.constant 0.000000e+00 : f32
      %239 = vector.broadcast %cst_246 : f32 to vector<16x16xf32>
      %c0_247 = arith.constant 0 : index
      %c0_248 = arith.constant 0 : index
      %c0_249 = arith.constant 0 : index
      %c0_250 = arith.constant 0 : index
      %240 = vector.load %arg3[%c0_247, %c0_248, %c0_249, %c0_250] : memref<1x4x16x16xf32, #tpu.memory_space<vmem>>, vector<1x4x16x16xf32>
      %241 = vector.shape_cast %240 : vector<1x4x16x16xf32> to vector<4x16x16xf32>
      %c0_251 = arith.constant 0 : index
      %c0_252 = arith.constant 0 : index
      %c0_253 = arith.constant 0 : index
      %242 = vector.load %arg6[%c0_251, %c0_252, %c0_253] : memref<4x28x16xf32, #tpu.memory_space<vmem>>, vector<4x16x16xf32>
      %243 = arith.mulf %241, %242 : vector<4x16x16xf32>
      %cst_254 = arith.constant dense<0.000000e+00> : vector<16x16xf32>
      %244 = vector.multi_reduction <add>, %243, %cst_254 [0] : vector<4x16x16xf32> to vector<16x16xf32>
      %245 = arith.addf %237, %244 : vector<16x16xf32>
      %c0_255 = arith.constant 0 : index
      %c2_256 = arith.constant 2 : index
      %c0_257 = arith.constant 0 : index
      %246 = vector.load %arg6[%c0_255, %c2_256, %c0_257] : memref<4x28x16xf32, #tpu.memory_space<vmem>>, vector<4x16x16xf32>
      %247 = arith.mulf %241, %246 : vector<4x16x16xf32>
      %cst_258 = arith.constant dense<0.000000e+00> : vector<16x16xf32>
      %248 = vector.multi_reduction <add>, %247, %cst_258 [0] : vector<4x16x16xf32> to vector<16x16xf32>
      %249 = arith.addf %238, %248 : vector<16x16xf32>
      %c0_259 = arith.constant 0 : index
      %c4_260 = arith.constant 4 : index
      %c0_261 = arith.constant 0 : index
      %250 = vector.load %arg6[%c0_259, %c4_260, %c0_261] : memref<4x28x16xf32, #tpu.memory_space<vmem>>, vector<4x16x16xf32>
      %251 = arith.mulf %241, %250 : vector<4x16x16xf32>
      %cst_262 = arith.constant dense<0.000000e+00> : vector<16x16xf32>
      %252 = vector.multi_reduction <add>, %251, %cst_262 [0] : vector<4x16x16xf32> to vector<16x16xf32>
      %253 = arith.addf %239, %252 : vector<16x16xf32>
      %cst_263 = arith.constant 0.000000e+00 : f32
      %254 = vector.broadcast %cst_263 : f32 to vector<16x16xf32>
      %255 = arith.cmpf oge, %245, %254 : vector<16x16xf32>
      %cst_264 = arith.constant 1.000000e-01 : f32
      %256 = vector.broadcast %cst_264 : f32 to vector<16x16xf32>
      %257 = arith.mulf %256, %245 : vector<16x16xf32>
      %258 = arith.select %255, %245, %257 : vector<16x16xi1>, vector<16x16xf32>
      %c0_265 = arith.constant 0 : index
      %c0_266 = arith.constant 0 : index
      %c3_267 = arith.constant 3 : index
      %c0_268 = arith.constant 0 : index
      %c0_269 = arith.constant 0 : index
      %259 = vector.load %arg5[%c0_265, %c0_266, %c3_267, %c0_268, %c0_269] : memref<1x5x5x16x16xf32, #tpu.memory_space<vmem>>, vector<1x1x1x16x16xf32>
      %260 = vector.shape_cast %259 : vector<1x1x1x16x16xf32> to vector<16x16xf32>
      %261 = vector.shape_cast %258 : vector<16x16xf32> to vector<1x1x1x16x16xf32>
      tpu.vector_store %arg5[%c0_265, %c0_266, %c3_267, %c0_268, %c0_269], %261 {strides = array<i32>} : memref<1x5x5x16x16xf32, #tpu.memory_space<vmem>>, vector<1x1x1x16x16xf32>,
      %cst_270 = arith.constant 0.000000e+00 : f32
      %262 = vector.broadcast %cst_270 : f32 to vector<16x16xf32>
      %263 = arith.cmpf oge, %249, %262 : vector<16x16xf32>
      %cst_271 = arith.constant 1.000000e-01 : f32
      %264 = vector.broadcast %cst_271 : f32 to vector<16x16xf32>
      %265 = arith.mulf %264, %249 : vector<16x16xf32>
      %266 = arith.select %263, %249, %265 : vector<16x16xi1>, vector<16x16xf32>
      %c0_272 = arith.constant 0 : index
      %c1_273 = arith.constant 1 : index
      %c3_274 = arith.constant 3 : index
      %c0_275 = arith.constant 0 : index
      %c0_276 = arith.constant 0 : index
      %267 = vector.load %arg5[%c0_272, %c1_273, %c3_274, %c0_275, %c0_276] : memref<1x5x5x16x16xf32, #tpu.memory_space<vmem>>, vector<1x1x1x16x16xf32>
      %268 = vector.shape_cast %267 : vector<1x1x1x16x16xf32> to vector<16x16xf32>
      %269 = vector.shape_cast %266 : vector<16x16xf32> to vector<1x1x1x16x16xf32>
      tpu.vector_store %arg5[%c0_272, %c1_273, %c3_274, %c0_275, %c0_276], %269 {strides = array<i32>} : memref<1x5x5x16x16xf32, #tpu.memory_space<vmem>>, vector<1x1x1x16x16xf32>,
      %cst_277 = arith.constant 0.000000e+00 : f32
      %270 = vector.broadcast %cst_277 : f32 to vector<16x16xf32>
      %271 = arith.cmpf oge, %253, %270 : vector<16x16xf32>
      %cst_278 = arith.constant 1.000000e-01 : f32
      %272 = vector.broadcast %cst_278 : f32 to vector<16x16xf32>
      %273 = arith.mulf %272, %253 : vector<16x16xf32>
      %274 = arith.select %271, %253, %273 : vector<16x16xi1>, vector<16x16xf32>
      %c0_279 = arith.constant 0 : index
      %c2_280 = arith.constant 2 : index
      %c3_281 = arith.constant 3 : index
      %c0_282 = arith.constant 0 : index
      %c0_283 = arith.constant 0 : index
      %275 = vector.load %arg5[%c0_279, %c2_280, %c3_281, %c0_282, %c0_283] : memref<1x5x5x16x16xf32, #tpu.memory_space<vmem>>, vector<1x1x1x16x16xf32>
      %276 = vector.shape_cast %275 : vector<1x1x1x16x16xf32> to vector<16x16xf32>
      %277 = vector.shape_cast %274 : vector<16x16xf32> to vector<1x1x1x16x16xf32>
      tpu.vector_store %arg5[%c0_279, %c2_280, %c3_281, %c0_282, %c0_283], %277 {strides = array<i32>} : memref<1x5x5x16x16xf32, #tpu.memory_space<vmem>>, vector<1x1x1x16x16xf32>,
      %cst_284 = arith.constant 0.000000e+00 : f32
      %278 = vector.broadcast %cst_284 : f32 to vector<16x16xf32>
      %cst_285 = arith.constant 0.000000e+00 : f32
      %279 = vector.broadcast %cst_285 : f32 to vector<16x16xf32>
      %c0_286 = arith.constant 0 : index
      %c0_287 = arith.constant 0 : index
      %c0_288 = arith.constant 0 : index
      %c0_289 = arith.constant 0 : index
      %280 = vector.load %arg3[%c0_286, %c0_287, %c0_288, %c0_289] : memref<1x4x16x16xf32, #tpu.memory_space<vmem>>, vector<1x4x16x16xf32>
      %281 = vector.shape_cast %280 : vector<1x4x16x16xf32> to vector<4x16x16xf32>
      %c0_290 = arith.constant 0 : index
      %c6_291 = arith.constant 6 : index
      %c0_292 = arith.constant 0 : index
      %282 = vector.load %arg6[%c0_290, %c6_291, %c0_292] : memref<4x28x16xf32, #tpu.memory_space<vmem>>, vector<4x16x16xf32>
      %283 = arith.mulf %281, %282 : vector<4x16x16xf32>
      %cst_293 = arith.constant dense<0.000000e+00> : vector<16x16xf32>
      %284 = vector.multi_reduction <add>, %283, %cst_293 [0] : vector<4x16x16xf32> to vector<16x16xf32>
      %285 = arith.addf %278, %284 : vector<16x16xf32>
      %c0_294 = arith.constant 0 : index
      %c8_295 = arith.constant 8 : index
      %c0_296 = arith.constant 0 : index
      %286 = vector.load %arg6[%c0_294, %c8_295, %c0_296] : memref<4x28x16xf32, #tpu.memory_space<vmem>>, vector<4x16x16xf32>
      %287 = arith.mulf %281, %286 : vector<4x16x16xf32>
      %cst_297 = arith.constant dense<0.000000e+00> : vector<16x16xf32>
      %288 = vector.multi_reduction <add>, %287, %cst_297 [0] : vector<4x16x16xf32> to vector<16x16xf32>
      %289 = arith.addf %279, %288 : vector<16x16xf32>
      %cst_298 = arith.constant 0.000000e+00 : f32
      %290 = vector.broadcast %cst_298 : f32 to vector<16x16xf32>
      %291 = arith.cmpf oge, %285, %290 : vector<16x16xf32>
      %cst_299 = arith.constant 1.000000e-01 : f32
      %292 = vector.broadcast %cst_299 : f32 to vector<16x16xf32>
      %293 = arith.mulf %292, %285 : vector<16x16xf32>
      %294 = arith.select %291, %285, %293 : vector<16x16xi1>, vector<16x16xf32>
      %c0_300 = arith.constant 0 : index
      %c3_301 = arith.constant 3 : index
      %c3_302 = arith.constant 3 : index
      %c0_303 = arith.constant 0 : index
      %c0_304 = arith.constant 0 : index
      %295 = vector.load %arg5[%c0_300, %c3_301, %c3_302, %c0_303, %c0_304] : memref<1x5x5x16x16xf32, #tpu.memory_space<vmem>>, vector<1x1x1x16x16xf32>
      %296 = vector.shape_cast %295 : vector<1x1x1x16x16xf32> to vector<16x16xf32>
      %297 = vector.shape_cast %294 : vector<16x16xf32> to vector<1x1x1x16x16xf32>
      tpu.vector_store %arg5[%c0_300, %c3_301, %c3_302, %c0_303, %c0_304], %297 {strides = array<i32>} : memref<1x5x5x16x16xf32, #tpu.memory_space<vmem>>, vector<1x1x1x16x16xf32>,
      %cst_305 = arith.constant 0.000000e+00 : f32
      %298 = vector.broadcast %cst_305 : f32 to vector<16x16xf32>
      %299 = arith.cmpf oge, %289, %298 : vector<16x16xf32>
      %cst_306 = arith.constant 1.000000e-01 : f32
      %300 = vector.broadcast %cst_306 : f32 to vector<16x16xf32>
      %301 = arith.mulf %300, %289 : vector<16x16xf32>
      %302 = arith.select %299, %289, %301 : vector<16x16xi1>, vector<16x16xf32>
      %c0_307 = arith.constant 0 : index
      %c4_308 = arith.constant 4 : index
      %c3_309 = arith.constant 3 : index
      %c0_310 = arith.constant 0 : index
      %c0_311 = arith.constant 0 : index
      %303 = vector.load %arg5[%c0_307, %c4_308, %c3_309, %c0_310, %c0_311] : memref<1x5x5x16x16xf32, #tpu.memory_space<vmem>>, vector<1x1x1x16x16xf32>
      %304 = vector.shape_cast %303 : vector<1x1x1x16x16xf32> to vector<16x16xf32>
      %305 = vector.shape_cast %302 : vector<16x16xf32> to vector<1x1x1x16x16xf32>
      tpu.vector_store %arg5[%c0_307, %c4_308, %c3_309, %c0_310, %c0_311], %305 {strides = array<i32>} : memref<1x5x5x16x16xf32, #tpu.memory_space<vmem>>, vector<1x1x1x16x16xf32>,
      %cst_312 = arith.constant 0.000000e+00 : f32
      %306 = vector.broadcast %cst_312 : f32 to vector<4x16x4xf32>
      %c0_313 = arith.constant 0 : index
      %c4_314 = arith.constant 4 : index
      %c12 = arith.constant 12 : index
      %307 = vector.load %arg6[%c0_313, %c4_314, %c12] : memref<4x28x16xf32, #tpu.memory_space<vmem>>, vector<4x16x4xf32>
      tpu.vector_store %arg6[%c0_313, %c4_314, %c12], %306 {strides = array<i32>} : memref<4x28x16xf32, #tpu.memory_space<vmem>>, vector<4x16x4xf32>,
      %c0_315 = arith.constant 0 : index
      %c0_316 = arith.constant 0 : index
      %c0_317 = arith.constant 0 : index
      %c4_318 = arith.constant 4 : index
      %308 = vector.load %arg4[%c0_315, %c0_316, %c0_317, %c4_318] : memref<1x4x16x16xf32, #tpu.memory_space<vmem>>, vector<1x4x16x12xf32>
      %309 = vector.shape_cast %308 : vector<1x4x16x12xf32> to vector<4x16x12xf32>
      %c0_319 = arith.constant 0 : index
      %c4_320 = arith.constant 4 : index
      %c0_321 = arith.constant 0 : index
      %310 = vector.load %arg6[%c0_319, %c4_320, %c0_321] : memref<4x28x16xf32, #tpu.memory_space<vmem>>, vector<4x16x12xf32>
      tpu.vector_store %arg6[%c0_319, %c4_320, %c0_321], %309 {strides = array<i32>} : memref<4x28x16xf32, #tpu.memory_space<vmem>>, vector<4x16x12xf32>,
      %cst_322 = arith.constant 0.000000e+00 : f32
      %311 = vector.broadcast %cst_322 : f32 to vector<16x16xf32>
      %cst_323 = arith.constant 0.000000e+00 : f32
      %312 = vector.broadcast %cst_323 : f32 to vector<16x16xf32>
      %cst_324 = arith.constant 0.000000e+00 : f32
      %313 = vector.broadcast %cst_324 : f32 to vector<16x16xf32>
      %c0_325 = arith.constant 0 : index
      %c0_326 = arith.constant 0 : index
      %c0_327 = arith.constant 0 : index
      %c0_328 = arith.constant 0 : index
      %314 = vector.load %arg3[%c0_325, %c0_326, %c0_327, %c0_328] : memref<1x4x16x16xf32, #tpu.memory_space<vmem>>, vector<1x4x16x16xf32>
      %315 = vector.shape_cast %314 : vector<1x4x16x16xf32> to vector<4x16x16xf32>
      %c0_329 = arith.constant 0 : index
      %c0_330 = arith.constant 0 : index
      %c0_331 = arith.constant 0 : index
      %316 = vector.load %arg6[%c0_329, %c0_330, %c0_331] : memref<4x28x16xf32, #tpu.memory_space<vmem>>, vector<4x16x16xf32>
      %317 = arith.mulf %315, %316 : vector<4x16x16xf32>
      %cst_332 = arith.constant dense<0.000000e+00> : vector<16x16xf32>
      %318 = vector.multi_reduction <add>, %317, %cst_332 [0] : vector<4x16x16xf32> to vector<16x16xf32>
      %319 = arith.addf %311, %318 : vector<16x16xf32>
      %c0_333 = arith.constant 0 : index
      %c2_334 = arith.constant 2 : index
      %c0_335 = arith.constant 0 : index
      %320 = vector.load %arg6[%c0_333, %c2_334, %c0_335] : memref<4x28x16xf32, #tpu.memory_space<vmem>>, vector<4x16x16xf32>
      %321 = arith.mulf %315, %320 : vector<4x16x16xf32>
      %cst_336 = arith.constant dense<0.000000e+00> : vector<16x16xf32>
      %322 = vector.multi_reduction <add>, %321, %cst_336 [0] : vector<4x16x16xf32> to vector<16x16xf32>
      %323 = arith.addf %312, %322 : vector<16x16xf32>
      %c0_337 = arith.constant 0 : index
      %c4_338 = arith.constant 4 : index
      %c0_339 = arith.constant 0 : index
      %324 = vector.load %arg6[%c0_337, %c4_338, %c0_339] : memref<4x28x16xf32, #tpu.memory_space<vmem>>, vector<4x16x16xf32>
      %325 = arith.mulf %315, %324 : vector<4x16x16xf32>
      %cst_340 = arith.constant dense<0.000000e+00> : vector<16x16xf32>
      %326 = vector.multi_reduction <add>, %325, %cst_340 [0] : vector<4x16x16xf32> to vector<16x16xf32>
      %327 = arith.addf %313, %326 : vector<16x16xf32>
      %cst_341 = arith.constant 0.000000e+00 : f32
      %328 = vector.broadcast %cst_341 : f32 to vector<16x16xf32>
      %329 = arith.cmpf oge, %319, %328 : vector<16x16xf32>
      %cst_342 = arith.constant 1.000000e-01 : f32
      %330 = vector.broadcast %cst_342 : f32 to vector<16x16xf32>
      %331 = arith.mulf %330, %319 : vector<16x16xf32>
      %332 = arith.select %329, %319, %331 : vector<16x16xi1>, vector<16x16xf32>
      %c0_343 = arith.constant 0 : index
      %c0_344 = arith.constant 0 : index
      %c4_345 = arith.constant 4 : index
      %c0_346 = arith.constant 0 : index
      %c0_347 = arith.constant 0 : index
      %333 = vector.load %arg5[%c0_343, %c0_344, %c4_345, %c0_346, %c0_347] : memref<1x5x5x16x16xf32, #tpu.memory_space<vmem>>, vector<1x1x1x16x16xf32>
      %334 = vector.shape_cast %333 : vector<1x1x1x16x16xf32> to vector<16x16xf32>
      %335 = vector.shape_cast %332 : vector<16x16xf32> to vector<1x1x1x16x16xf32>
      tpu.vector_store %arg5[%c0_343, %c0_344, %c4_345, %c0_346, %c0_347], %335 {strides = array<i32>} : memref<1x5x5x16x16xf32, #tpu.memory_space<vmem>>, vector<1x1x1x16x16xf32>,
      %cst_348 = arith.constant 0.000000e+00 : f32
      %336 = vector.broadcast %cst_348 : f32 to vector<16x16xf32>
      %337 = arith.cmpf oge, %323, %336 : vector<16x16xf32>
      %cst_349 = arith.constant 1.000000e-01 : f32
      %338 = vector.broadcast %cst_349 : f32 to vector<16x16xf32>
      %339 = arith.mulf %338, %323 : vector<16x16xf32>
      %340 = arith.select %337, %323, %339 : vector<16x16xi1>, vector<16x16xf32>
      %c0_350 = arith.constant 0 : index
      %c1_351 = arith.constant 1 : index
      %c4_352 = arith.constant 4 : index
      %c0_353 = arith.constant 0 : index
      %c0_354 = arith.constant 0 : index
      %341 = vector.load %arg5[%c0_350, %c1_351, %c4_352, %c0_353, %c0_354] : memref<1x5x5x16x16xf32, #tpu.memory_space<vmem>>, vector<1x1x1x16x16xf32>
      %342 = vector.shape_cast %341 : vector<1x1x1x16x16xf32> to vector<16x16xf32>
      %343 = vector.shape_cast %340 : vector<16x16xf32> to vector<1x1x1x16x16xf32>
      tpu.vector_store %arg5[%c0_350, %c1_351, %c4_352, %c0_353, %c0_354], %343 {strides = array<i32>} : memref<1x5x5x16x16xf32, #tpu.memory_space<vmem>>, vector<1x1x1x16x16xf32>,
      %cst_355 = arith.constant 0.000000e+00 : f32
      %344 = vector.broadcast %cst_355 : f32 to vector<16x16xf32>
      %345 = arith.cmpf oge, %327, %344 : vector<16x16xf32>
      %cst_356 = arith.constant 1.000000e-01 : f32
      %346 = vector.broadcast %cst_356 : f32 to vector<16x16xf32>
      %347 = arith.mulf %346, %327 : vector<16x16xf32>
      %348 = arith.select %345, %327, %347 : vector<16x16xi1>, vector<16x16xf32>
      %c0_357 = arith.constant 0 : index
      %c2_358 = arith.constant 2 : index
      %c4_359 = arith.constant 4 : index
      %c0_360 = arith.constant 0 : index
      %c0_361 = arith.constant 0 : index
      %349 = vector.load %arg5[%c0_357, %c2_358, %c4_359, %c0_360, %c0_361] : memref<1x5x5x16x16xf32, #tpu.memory_space<vmem>>, vector<1x1x1x16x16xf32>
      %350 = vector.shape_cast %349 : vector<1x1x1x16x16xf32> to vector<16x16xf32>
      %351 = vector.shape_cast %348 : vector<16x16xf32> to vector<1x1x1x16x16xf32>
      tpu.vector_store %arg5[%c0_357, %c2_358, %c4_359, %c0_360, %c0_361], %351 {strides = array<i32>} : memref<1x5x5x16x16xf32, #tpu.memory_space<vmem>>, vector<1x1x1x16x16xf32>,
      %cst_362 = arith.constant 0.000000e+00 : f32
      %352 = vector.broadcast %cst_362 : f32 to vector<16x16xf32>
      %cst_363 = arith.constant 0.000000e+00 : f32
      %353 = vector.broadcast %cst_363 : f32 to vector<16x16xf32>
      %c0_364 = arith.constant 0 : index
      %c0_365 = arith.constant 0 : index
      %c0_366 = arith.constant 0 : index
      %c0_367 = arith.constant 0 : index
      %354 = vector.load %arg3[%c0_364, %c0_365, %c0_366, %c0_367] : memref<1x4x16x16xf32, #tpu.memory_space<vmem>>, vector<1x4x16x16xf32>
      %355 = vector.shape_cast %354 : vector<1x4x16x16xf32> to vector<4x16x16xf32>
      %c0_368 = arith.constant 0 : index
      %c6_369 = arith.constant 6 : index
      %c0_370 = arith.constant 0 : index
      %356 = vector.load %arg6[%c0_368, %c6_369, %c0_370] : memref<4x28x16xf32, #tpu.memory_space<vmem>>, vector<4x16x16xf32>
      %357 = arith.mulf %355, %356 : vector<4x16x16xf32>
      %cst_371 = arith.constant dense<0.000000e+00> : vector<16x16xf32>
      %358 = vector.multi_reduction <add>, %357, %cst_371 [0] : vector<4x16x16xf32> to vector<16x16xf32>
      %359 = arith.addf %352, %358 : vector<16x16xf32>
      %c0_372 = arith.constant 0 : index
      %c8_373 = arith.constant 8 : index
      %c0_374 = arith.constant 0 : index
      %360 = vector.load %arg6[%c0_372, %c8_373, %c0_374] : memref<4x28x16xf32, #tpu.memory_space<vmem>>, vector<4x16x16xf32>
      %361 = arith.mulf %355, %360 : vector<4x16x16xf32>
      %cst_375 = arith.constant dense<0.000000e+00> : vector<16x16xf32>
      %362 = vector.multi_reduction <add>, %361, %cst_375 [0] : vector<4x16x16xf32> to vector<16x16xf32>
      %363 = arith.addf %353, %362 : vector<16x16xf32>
      %cst_376 = arith.constant 0.000000e+00 : f32
      %364 = vector.broadcast %cst_376 : f32 to vector<16x16xf32>
      %365 = arith.cmpf oge, %359, %364 : vector<16x16xf32>
      %cst_377 = arith.constant 1.000000e-01 : f32
      %366 = vector.broadcast %cst_377 : f32 to vector<16x16xf32>
      %367 = arith.mulf %366, %359 : vector<16x16xf32>
      %368 = arith.select %365, %359, %367 : vector<16x16xi1>, vector<16x16xf32>
      %c0_378 = arith.constant 0 : index
      %c3_379 = arith.constant 3 : index
      %c4_380 = arith.constant 4 : index
      %c0_381 = arith.constant 0 : index
      %c0_382 = arith.constant 0 : index
      %369 = vector.load %arg5[%c0_378, %c3_379, %c4_380, %c0_381, %c0_382] : memref<1x5x5x16x16xf32, #tpu.memory_space<vmem>>, vector<1x1x1x16x16xf32>
      %370 = vector.shape_cast %369 : vector<1x1x1x16x16xf32> to vector<16x16xf32>
      %371 = vector.shape_cast %368 : vector<16x16xf32> to vector<1x1x1x16x16xf32>
      tpu.vector_store %arg5[%c0_378, %c3_379, %c4_380, %c0_381, %c0_382], %371 {strides = array<i32>} : memref<1x5x5x16x16xf32, #tpu.memory_space<vmem>>, vector<1x1x1x16x16xf32>,
      %cst_383 = arith.constant 0.000000e+00 : f32
      %372 = vector.broadcast %cst_383 : f32 to vector<16x16xf32>
      %373 = arith.cmpf oge, %363, %372 : vector<16x16xf32>
      %cst_384 = arith.constant 1.000000e-01 : f32
      %374 = vector.broadcast %cst_384 : f32 to vector<16x16xf32>
      %375 = arith.mulf %374, %363 : vector<16x16xf32>
      %376 = arith.select %373, %363, %375 : vector<16x16xi1>, vector<16x16xf32>
      %c0_385 = arith.constant 0 : index
      %c4_386 = arith.constant 4 : index
      %c4_387 = arith.constant 4 : index
      %c0_388 = arith.constant 0 : index
      %c0_389 = arith.constant 0 : index
      %377 = vector.load %arg5[%c0_385, %c4_386, %c4_387, %c0_388, %c0_389] : memref<1x5x5x16x16xf32, #tpu.memory_space<vmem>>, vector<1x1x1x16x16xf32>
      %378 = vector.shape_cast %377 : vector<1x1x1x16x16xf32> to vector<16x16xf32>
      %379 = vector.shape_cast %376 : vector<16x16xf32> to vector<1x1x1x16x16xf32>
      tpu.vector_store %arg5[%c0_385, %c4_386, %c4_387, %c0_388, %c0_389], %379 {strides = array<i32>} : memref<1x5x5x16x16xf32, #tpu.memory_space<vmem>>, vector<1x1x1x16x16xf32>,
    } else {
    }
    %c2_i32 = arith.constant 2 : i32
    %6 = arith.cmpi eq, %arg2, %c2_i32 : i32
    %7 = arith.extui %6 : i1 to i32
    %c0_i32_2 = arith.constant 0 : i32
    %8 = arith.cmpi ne, %7, %c0_i32_2 : i32
    scf.if %8 {
      %cst = arith.constant 0.000000e+00 : f32
      %9 = vector.broadcast %cst : f32 to vector<4x6x16xf32>
      %c0 = arith.constant 0 : index
      %c0_3 = arith.constant 0 : index
      %c0_4 = arith.constant 0 : index
      %10 = vector.load %arg6[%c0, %c0_3, %c0_4] : memref<4x28x16xf32, #tpu.memory_space<vmem>>, vector<4x6x16xf32>
      tpu.vector_store %arg6[%c0, %c0_3, %c0_4], %9 {strides = array<i32>} : memref<4x28x16xf32, #tpu.memory_space<vmem>>, vector<4x6x16xf32>,
      %c0_5 = arith.constant 0 : index
      %c22 = arith.constant 22 : index
      %c0_6 = arith.constant 0 : index
      %11 = vector.load %arg6[%c0_5, %c22, %c0_6] : memref<4x28x16xf32, #tpu.memory_space<vmem>>, vector<4x6x16xf32>
      tpu.vector_store %arg6[%c0_5, %c22, %c0_6], %9 {strides = array<i32>} : memref<4x28x16xf32, #tpu.memory_space<vmem>>, vector<4x6x16xf32>,
      %cst_7 = arith.constant 0.000000e+00 : f32
      %12 = vector.broadcast %cst_7 : f32 to vector<4x16x6xf32>
      %c0_8 = arith.constant 0 : index
      %c6 = arith.constant 6 : index
      %c0_9 = arith.constant 0 : index
      %13 = vector.load %arg6[%c0_8, %c6, %c0_9] : memref<4x28x16xf32, #tpu.memory_space<vmem>>, vector<4x16x6xf32>
      tpu.vector_store %arg6[%c0_8, %c6, %c0_9], %12 {strides = array<i32>} : memref<4x28x16xf32, #tpu.memory_space<vmem>>, vector<4x16x6xf32>,
      %c0_10 = arith.constant 0 : index
      %c0_11 = arith.constant 0 : index
      %c0_12 = arith.constant 0 : index
      %c0_13 = arith.constant 0 : index
      %14 = vector.load %arg4[%c0_10, %c0_11, %c0_12, %c0_13] : memref<1x4x16x16xf32, #tpu.memory_space<vmem>>, vector<1x4x16x10xf32>
      %15 = vector.shape_cast %14 : vector<1x4x16x10xf32> to vector<4x16x10xf32>
      %c0_14 = arith.constant 0 : index
      %c6_15 = arith.constant 6 : index
      %c6_16 = arith.constant 6 : index
      %16 = vector.load %arg6[%c0_14, %c6_15, %c6_16] : memref<4x28x16xf32, #tpu.memory_space<vmem>>, vector<4x16x10xf32>
      tpu.vector_store %arg6[%c0_14, %c6_15, %c6_16], %15 {strides = array<i32>} : memref<4x28x16xf32, #tpu.memory_space<vmem>>, vector<4x16x10xf32>,
      %cst_17 = arith.constant 0.000000e+00 : f32
      %17 = vector.broadcast %cst_17 : f32 to vector<16x16xf32>
      %cst_18 = arith.constant 0.000000e+00 : f32
      %18 = vector.broadcast %cst_18 : f32 to vector<16x16xf32>
      %cst_19 = arith.constant 0.000000e+00 : f32
      %19 = vector.broadcast %cst_19 : f32 to vector<16x16xf32>
      %c0_20 = arith.constant 0 : index
      %c0_21 = arith.constant 0 : index
      %c0_22 = arith.constant 0 : index
      %c0_23 = arith.constant 0 : index
      %20 = vector.load %arg3[%c0_20, %c0_21, %c0_22, %c0_23] : memref<1x4x16x16xf32, #tpu.memory_space<vmem>>, vector<1x4x16x16xf32>
      %21 = vector.shape_cast %20 : vector<1x4x16x16xf32> to vector<4x16x16xf32>
      %c0_24 = arith.constant 0 : index
      %c0_25 = arith.constant 0 : index
      %c0_26 = arith.constant 0 : index
      %22 = vector.load %arg6[%c0_24, %c0_25, %c0_26] : memref<4x28x16xf32, #tpu.memory_space<vmem>>, vector<4x16x16xf32>
      %23 = arith.mulf %21, %22 : vector<4x16x16xf32>
      %cst_27 = arith.constant dense<0.000000e+00> : vector<16x16xf32>
      %24 = vector.multi_reduction <add>, %23, %cst_27 [0] : vector<4x16x16xf32> to vector<16x16xf32>
      %25 = arith.addf %17, %24 : vector<16x16xf32>
      %c0_28 = arith.constant 0 : index
      %c3 = arith.constant 3 : index
      %c0_29 = arith.constant 0 : index
      %26 = vector.load %arg6[%c0_28, %c3, %c0_29] : memref<4x28x16xf32, #tpu.memory_space<vmem>>, vector<4x16x16xf32>
      %27 = arith.mulf %21, %26 : vector<4x16x16xf32>
      %cst_30 = arith.constant dense<0.000000e+00> : vector<16x16xf32>
      %28 = vector.multi_reduction <add>, %27, %cst_30 [0] : vector<4x16x16xf32> to vector<16x16xf32>
      %29 = arith.addf %18, %28 : vector<16x16xf32>
      %c0_31 = arith.constant 0 : index
      %c6_32 = arith.constant 6 : index
      %c0_33 = arith.constant 0 : index
      %30 = vector.load %arg6[%c0_31, %c6_32, %c0_33] : memref<4x28x16xf32, #tpu.memory_space<vmem>>, vector<4x16x16xf32>
      %31 = arith.mulf %21, %30 : vector<4x16x16xf32>
      %cst_34 = arith.constant dense<0.000000e+00> : vector<16x16xf32>
      %32 = vector.multi_reduction <add>, %31, %cst_34 [0] : vector<4x16x16xf32> to vector<16x16xf32>
      %33 = arith.addf %19, %32 : vector<16x16xf32>
      %cst_35 = arith.constant 0.000000e+00 : f32
      %34 = vector.broadcast %cst_35 : f32 to vector<16x16xf32>
      %35 = arith.cmpf oge, %25, %34 : vector<16x16xf32>
      %cst_36 = arith.constant 1.000000e-01 : f32
      %36 = vector.broadcast %cst_36 : f32 to vector<16x16xf32>
      %37 = arith.mulf %36, %25 : vector<16x16xf32>
      %38 = arith.select %35, %25, %37 : vector<16x16xi1>, vector<16x16xf32>
      %c0_37 = arith.constant 0 : index
      %c0_38 = arith.constant 0 : index
      %c0_39 = arith.constant 0 : index
      %c0_40 = arith.constant 0 : index
      %c0_41 = arith.constant 0 : index
      %39 = vector.load %arg5[%c0_37, %c0_38, %c0_39, %c0_40, %c0_41] : memref<1x5x5x16x16xf32, #tpu.memory_space<vmem>>, vector<1x1x1x16x16xf32>
      %40 = vector.shape_cast %39 : vector<1x1x1x16x16xf32> to vector<16x16xf32>
      %41 = vector.shape_cast %38 : vector<16x16xf32> to vector<1x1x1x16x16xf32>
      tpu.vector_store %arg5[%c0_37, %c0_38, %c0_39, %c0_40, %c0_41], %41 {strides = array<i32>} : memref<1x5x5x16x16xf32, #tpu.memory_space<vmem>>, vector<1x1x1x16x16xf32>,
      %cst_42 = arith.constant 0.000000e+00 : f32
      %42 = vector.broadcast %cst_42 : f32 to vector<16x16xf32>
      %43 = arith.cmpf oge, %29, %42 : vector<16x16xf32>
      %cst_43 = arith.constant 1.000000e-01 : f32
      %44 = vector.broadcast %cst_43 : f32 to vector<16x16xf32>
      %45 = arith.mulf %44, %29 : vector<16x16xf32>
      %46 = arith.select %43, %29, %45 : vector<16x16xi1>, vector<16x16xf32>
      %c0_44 = arith.constant 0 : index
      %c1 = arith.constant 1 : index
      %c0_45 = arith.constant 0 : index
      %c0_46 = arith.constant 0 : index
      %c0_47 = arith.constant 0 : index
      %47 = vector.load %arg5[%c0_44, %c1, %c0_45, %c0_46, %c0_47] : memref<1x5x5x16x16xf32, #tpu.memory_space<vmem>>, vector<1x1x1x16x16xf32>
      %48 = vector.shape_cast %47 : vector<1x1x1x16x16xf32> to vector<16x16xf32>
      %49 = vector.shape_cast %46 : vector<16x16xf32> to vector<1x1x1x16x16xf32>
      tpu.vector_store %arg5[%c0_44, %c1, %c0_45, %c0_46, %c0_47], %49 {strides = array<i32>} : memref<1x5x5x16x16xf32, #tpu.memory_space<vmem>>, vector<1x1x1x16x16xf32>,
      %cst_48 = arith.constant 0.000000e+00 : f32
      %50 = vector.broadcast %cst_48 : f32 to vector<16x16xf32>
      %51 = arith.cmpf oge, %33, %50 : vector<16x16xf32>
      %cst_49 = arith.constant 1.000000e-01 : f32
      %52 = vector.broadcast %cst_49 : f32 to vector<16x16xf32>
      %53 = arith.mulf %52, %33 : vector<16x16xf32>
      %54 = arith.select %51, %33, %53 : vector<16x16xi1>, vector<16x16xf32>
      %c0_50 = arith.constant 0 : index
      %c2 = arith.constant 2 : index
      %c0_51 = arith.constant 0 : index
      %c0_52 = arith.constant 0 : index
      %c0_53 = arith.constant 0 : index
      %55 = vector.load %arg5[%c0_50, %c2, %c0_51, %c0_52, %c0_53] : memref<1x5x5x16x16xf32, #tpu.memory_space<vmem>>, vector<1x1x1x16x16xf32>
      %56 = vector.shape_cast %55 : vector<1x1x1x16x16xf32> to vector<16x16xf32>
      %57 = vector.shape_cast %54 : vector<16x16xf32> to vector<1x1x1x16x16xf32>
      tpu.vector_store %arg5[%c0_50, %c2, %c0_51, %c0_52, %c0_53], %57 {strides = array<i32>} : memref<1x5x5x16x16xf32, #tpu.memory_space<vmem>>, vector<1x1x1x16x16xf32>,
      %cst_54 = arith.constant 0.000000e+00 : f32
      %58 = vector.broadcast %cst_54 : f32 to vector<16x16xf32>
      %cst_55 = arith.constant 0.000000e+00 : f32
      %59 = vector.broadcast %cst_55 : f32 to vector<16x16xf32>
      %c0_56 = arith.constant 0 : index
      %c0_57 = arith.constant 0 : index
      %c0_58 = arith.constant 0 : index
      %c0_59 = arith.constant 0 : index
      %60 = vector.load %arg3[%c0_56, %c0_57, %c0_58, %c0_59] : memref<1x4x16x16xf32, #tpu.memory_space<vmem>>, vector<1x4x16x16xf32>
      %61 = vector.shape_cast %60 : vector<1x4x16x16xf32> to vector<4x16x16xf32>
      %c0_60 = arith.constant 0 : index
      %c9 = arith.constant 9 : index
      %c0_61 = arith.constant 0 : index
      %62 = vector.load %arg6[%c0_60, %c9, %c0_61] : memref<4x28x16xf32, #tpu.memory_space<vmem>>, vector<4x16x16xf32>
      %63 = arith.mulf %61, %62 : vector<4x16x16xf32>
      %cst_62 = arith.constant dense<0.000000e+00> : vector<16x16xf32>
      %64 = vector.multi_reduction <add>, %63, %cst_62 [0] : vector<4x16x16xf32> to vector<16x16xf32>
      %65 = arith.addf %58, %64 : vector<16x16xf32>
      %c0_63 = arith.constant 0 : index
      %c12 = arith.constant 12 : index
      %c0_64 = arith.constant 0 : index
      %66 = vector.load %arg6[%c0_63, %c12, %c0_64] : memref<4x28x16xf32, #tpu.memory_space<vmem>>, vector<4x16x16xf32>
      %67 = arith.mulf %61, %66 : vector<4x16x16xf32>
      %cst_65 = arith.constant dense<0.000000e+00> : vector<16x16xf32>
      %68 = vector.multi_reduction <add>, %67, %cst_65 [0] : vector<4x16x16xf32> to vector<16x16xf32>
      %69 = arith.addf %59, %68 : vector<16x16xf32>
      %cst_66 = arith.constant 0.000000e+00 : f32
      %70 = vector.broadcast %cst_66 : f32 to vector<16x16xf32>
      %71 = arith.cmpf oge, %65, %70 : vector<16x16xf32>
      %cst_67 = arith.constant 1.000000e-01 : f32
      %72 = vector.broadcast %cst_67 : f32 to vector<16x16xf32>
      %73 = arith.mulf %72, %65 : vector<16x16xf32>
      %74 = arith.select %71, %65, %73 : vector<16x16xi1>, vector<16x16xf32>
      %c0_68 = arith.constant 0 : index
      %c3_69 = arith.constant 3 : index
      %c0_70 = arith.constant 0 : index
      %c0_71 = arith.constant 0 : index
      %c0_72 = arith.constant 0 : index
      %75 = vector.load %arg5[%c0_68, %c3_69, %c0_70, %c0_71, %c0_72] : memref<1x5x5x16x16xf32, #tpu.memory_space<vmem>>, vector<1x1x1x16x16xf32>
      %76 = vector.shape_cast %75 : vector<1x1x1x16x16xf32> to vector<16x16xf32>
      %77 = vector.shape_cast %74 : vector<16x16xf32> to vector<1x1x1x16x16xf32>
      tpu.vector_store %arg5[%c0_68, %c3_69, %c0_70, %c0_71, %c0_72], %77 {strides = array<i32>} : memref<1x5x5x16x16xf32, #tpu.memory_space<vmem>>, vector<1x1x1x16x16xf32>,
      %cst_73 = arith.constant 0.000000e+00 : f32
      %78 = vector.broadcast %cst_73 : f32 to vector<16x16xf32>
      %79 = arith.cmpf oge, %69, %78 : vector<16x16xf32>
      %cst_74 = arith.constant 1.000000e-01 : f32
      %80 = vector.broadcast %cst_74 : f32 to vector<16x16xf32>
      %81 = arith.mulf %80, %69 : vector<16x16xf32>
      %82 = arith.select %79, %69, %81 : vector<16x16xi1>, vector<16x16xf32>
      %c0_75 = arith.constant 0 : index
      %c4 = arith.constant 4 : index
      %c0_76 = arith.constant 0 : index
      %c0_77 = arith.constant 0 : index
      %c0_78 = arith.constant 0 : index
      %83 = vector.load %arg5[%c0_75, %c4, %c0_76, %c0_77, %c0_78] : memref<1x5x5x16x16xf32, #tpu.memory_space<vmem>>, vector<1x1x1x16x16xf32>
      %84 = vector.shape_cast %83 : vector<1x1x1x16x16xf32> to vector<16x16xf32>
      %85 = vector.shape_cast %82 : vector<16x16xf32> to vector<1x1x1x16x16xf32>
      tpu.vector_store %arg5[%c0_75, %c4, %c0_76, %c0_77, %c0_78], %85 {strides = array<i32>} : memref<1x5x5x16x16xf32, #tpu.memory_space<vmem>>, vector<1x1x1x16x16xf32>,
      %cst_79 = arith.constant 0.000000e+00 : f32
      %86 = vector.broadcast %cst_79 : f32 to vector<4x16x3xf32>
      %c0_80 = arith.constant 0 : index
      %c6_81 = arith.constant 6 : index
      %c0_82 = arith.constant 0 : index
      %87 = vector.load %arg6[%c0_80, %c6_81, %c0_82] : memref<4x28x16xf32, #tpu.memory_space<vmem>>, vector<4x16x3xf32>
      tpu.vector_store %arg6[%c0_80, %c6_81, %c0_82], %86 {strides = array<i32>} : memref<4x28x16xf32, #tpu.memory_space<vmem>>, vector<4x16x3xf32>,
      %c0_83 = arith.constant 0 : index
      %c0_84 = arith.constant 0 : index
      %c0_85 = arith.constant 0 : index
      %c0_86 = arith.constant 0 : index
      %88 = vector.load %arg4[%c0_83, %c0_84, %c0_85, %c0_86] : memref<1x4x16x16xf32, #tpu.memory_space<vmem>>, vector<1x4x16x13xf32>
      %89 = vector.shape_cast %88 : vector<1x4x16x13xf32> to vector<4x16x13xf32>
      %c0_87 = arith.constant 0 : index
      %c6_88 = arith.constant 6 : index
      %c3_89 = arith.constant 3 : index
      %90 = vector.load %arg6[%c0_87, %c6_88, %c3_89] : memref<4x28x16xf32, #tpu.memory_space<vmem>>, vector<4x16x13xf32>
      tpu.vector_store %arg6[%c0_87, %c6_88, %c3_89], %89 {strides = array<i32>} : memref<4x28x16xf32, #tpu.memory_space<vmem>>, vector<4x16x13xf32>,
      %cst_90 = arith.constant 0.000000e+00 : f32
      %91 = vector.broadcast %cst_90 : f32 to vector<16x16xf32>
      %cst_91 = arith.constant 0.000000e+00 : f32
      %92 = vector.broadcast %cst_91 : f32 to vector<16x16xf32>
      %cst_92 = arith.constant 0.000000e+00 : f32
      %93 = vector.broadcast %cst_92 : f32 to vector<16x16xf32>
      %c0_93 = arith.constant 0 : index
      %c0_94 = arith.constant 0 : index
      %c0_95 = arith.constant 0 : index
      %c0_96 = arith.constant 0 : index
      %94 = vector.load %arg3[%c0_93, %c0_94, %c0_95, %c0_96] : memref<1x4x16x16xf32, #tpu.memory_space<vmem>>, vector<1x4x16x16xf32>
      %95 = vector.shape_cast %94 : vector<1x4x16x16xf32> to vector<4x16x16xf32>
      %c0_97 = arith.constant 0 : index
      %c0_98 = arith.constant 0 : index
      %c0_99 = arith.constant 0 : index
      %96 = vector.load %arg6[%c0_97, %c0_98, %c0_99] : memref<4x28x16xf32, #tpu.memory_space<vmem>>, vector<4x16x16xf32>
      %97 = arith.mulf %95, %96 : vector<4x16x16xf32>
      %cst_100 = arith.constant dense<0.000000e+00> : vector<16x16xf32>
      %98 = vector.multi_reduction <add>, %97, %cst_100 [0] : vector<4x16x16xf32> to vector<16x16xf32>
      %99 = arith.addf %91, %98 : vector<16x16xf32>
      %c0_101 = arith.constant 0 : index
      %c3_102 = arith.constant 3 : index
      %c0_103 = arith.constant 0 : index
      %100 = vector.load %arg6[%c0_101, %c3_102, %c0_103] : memref<4x28x16xf32, #tpu.memory_space<vmem>>, vector<4x16x16xf32>
      %101 = arith.mulf %95, %100 : vector<4x16x16xf32>
      %cst_104 = arith.constant dense<0.000000e+00> : vector<16x16xf32>
      %102 = vector.multi_reduction <add>, %101, %cst_104 [0] : vector<4x16x16xf32> to vector<16x16xf32>
      %103 = arith.addf %92, %102 : vector<16x16xf32>
      %c0_105 = arith.constant 0 : index
      %c6_106 = arith.constant 6 : index
      %c0_107 = arith.constant 0 : index
      %104 = vector.load %arg6[%c0_105, %c6_106, %c0_107] : memref<4x28x16xf32, #tpu.memory_space<vmem>>, vector<4x16x16xf32>
      %105 = arith.mulf %95, %104 : vector<4x16x16xf32>
      %cst_108 = arith.constant dense<0.000000e+00> : vector<16x16xf32>
      %106 = vector.multi_reduction <add>, %105, %cst_108 [0] : vector<4x16x16xf32> to vector<16x16xf32>
      %107 = arith.addf %93, %106 : vector<16x16xf32>
      %cst_109 = arith.constant 0.000000e+00 : f32
      %108 = vector.broadcast %cst_109 : f32 to vector<16x16xf32>
      %109 = arith.cmpf oge, %99, %108 : vector<16x16xf32>
      %cst_110 = arith.constant 1.000000e-01 : f32
      %110 = vector.broadcast %cst_110 : f32 to vector<16x16xf32>
      %111 = arith.mulf %110, %99 : vector<16x16xf32>
      %112 = arith.select %109, %99, %111 : vector<16x16xi1>, vector<16x16xf32>
      %c0_111 = arith.constant 0 : index
      %c0_112 = arith.constant 0 : index
      %c1_113 = arith.constant 1 : index
      %c0_114 = arith.constant 0 : index
      %c0_115 = arith.constant 0 : index
      %113 = vector.load %arg5[%c0_111, %c0_112, %c1_113, %c0_114, %c0_115] : memref<1x5x5x16x16xf32, #tpu.memory_space<vmem>>, vector<1x1x1x16x16xf32>
      %114 = vector.shape_cast %113 : vector<1x1x1x16x16xf32> to vector<16x16xf32>
      %115 = vector.shape_cast %112 : vector<16x16xf32> to vector<1x1x1x16x16xf32>
      tpu.vector_store %arg5[%c0_111, %c0_112, %c1_113, %c0_114, %c0_115], %115 {strides = array<i32>} : memref<1x5x5x16x16xf32, #tpu.memory_space<vmem>>, vector<1x1x1x16x16xf32>,
      %cst_116 = arith.constant 0.000000e+00 : f32
      %116 = vector.broadcast %cst_116 : f32 to vector<16x16xf32>
      %117 = arith.cmpf oge, %103, %116 : vector<16x16xf32>
      %cst_117 = arith.constant 1.000000e-01 : f32
      %118 = vector.broadcast %cst_117 : f32 to vector<16x16xf32>
      %119 = arith.mulf %118, %103 : vector<16x16xf32>
      %120 = arith.select %117, %103, %119 : vector<16x16xi1>, vector<16x16xf32>
      %c0_118 = arith.constant 0 : index
      %c1_119 = arith.constant 1 : index
      %c1_120 = arith.constant 1 : index
      %c0_121 = arith.constant 0 : index
      %c0_122 = arith.constant 0 : index
      %121 = vector.load %arg5[%c0_118, %c1_119, %c1_120, %c0_121, %c0_122] : memref<1x5x5x16x16xf32, #tpu.memory_space<vmem>>, vector<1x1x1x16x16xf32>
      %122 = vector.shape_cast %121 : vector<1x1x1x16x16xf32> to vector<16x16xf32>
      %123 = vector.shape_cast %120 : vector<16x16xf32> to vector<1x1x1x16x16xf32>
      tpu.vector_store %arg5[%c0_118, %c1_119, %c1_120, %c0_121, %c0_122], %123 {strides = array<i32>} : memref<1x5x5x16x16xf32, #tpu.memory_space<vmem>>, vector<1x1x1x16x16xf32>,
      %cst_123 = arith.constant 0.000000e+00 : f32
      %124 = vector.broadcast %cst_123 : f32 to vector<16x16xf32>
      %125 = arith.cmpf oge, %107, %124 : vector<16x16xf32>
      %cst_124 = arith.constant 1.000000e-01 : f32
      %126 = vector.broadcast %cst_124 : f32 to vector<16x16xf32>
      %127 = arith.mulf %126, %107 : vector<16x16xf32>
      %128 = arith.select %125, %107, %127 : vector<16x16xi1>, vector<16x16xf32>
      %c0_125 = arith.constant 0 : index
      %c2_126 = arith.constant 2 : index
      %c1_127 = arith.constant 1 : index
      %c0_128 = arith.constant 0 : index
      %c0_129 = arith.constant 0 : index
      %129 = vector.load %arg5[%c0_125, %c2_126, %c1_127, %c0_128, %c0_129] : memref<1x5x5x16x16xf32, #tpu.memory_space<vmem>>, vector<1x1x1x16x16xf32>
      %130 = vector.shape_cast %129 : vector<1x1x1x16x16xf32> to vector<16x16xf32>
      %131 = vector.shape_cast %128 : vector<16x16xf32> to vector<1x1x1x16x16xf32>
      tpu.vector_store %arg5[%c0_125, %c2_126, %c1_127, %c0_128, %c0_129], %131 {strides = array<i32>} : memref<1x5x5x16x16xf32, #tpu.memory_space<vmem>>, vector<1x1x1x16x16xf32>,
      %cst_130 = arith.constant 0.000000e+00 : f32
      %132 = vector.broadcast %cst_130 : f32 to vector<16x16xf32>
      %cst_131 = arith.constant 0.000000e+00 : f32
      %133 = vector.broadcast %cst_131 : f32 to vector<16x16xf32>
      %c0_132 = arith.constant 0 : index
      %c0_133 = arith.constant 0 : index
      %c0_134 = arith.constant 0 : index
      %c0_135 = arith.constant 0 : index
      %134 = vector.load %arg3[%c0_132, %c0_133, %c0_134, %c0_135] : memref<1x4x16x16xf32, #tpu.memory_space<vmem>>, vector<1x4x16x16xf32>
      %135 = vector.shape_cast %134 : vector<1x4x16x16xf32> to vector<4x16x16xf32>
      %c0_136 = arith.constant 0 : index
      %c9_137 = arith.constant 9 : index
      %c0_138 = arith.constant 0 : index
      %136 = vector.load %arg6[%c0_136, %c9_137, %c0_138] : memref<4x28x16xf32, #tpu.memory_space<vmem>>, vector<4x16x16xf32>
      %137 = arith.mulf %135, %136 : vector<4x16x16xf32>
      %cst_139 = arith.constant dense<0.000000e+00> : vector<16x16xf32>
      %138 = vector.multi_reduction <add>, %137, %cst_139 [0] : vector<4x16x16xf32> to vector<16x16xf32>
      %139 = arith.addf %132, %138 : vector<16x16xf32>
      %c0_140 = arith.constant 0 : index
      %c12_141 = arith.constant 12 : index
      %c0_142 = arith.constant 0 : index
      %140 = vector.load %arg6[%c0_140, %c12_141, %c0_142] : memref<4x28x16xf32, #tpu.memory_space<vmem>>, vector<4x16x16xf32>
      %141 = arith.mulf %135, %140 : vector<4x16x16xf32>
      %cst_143 = arith.constant dense<0.000000e+00> : vector<16x16xf32>
      %142 = vector.multi_reduction <add>, %141, %cst_143 [0] : vector<4x16x16xf32> to vector<16x16xf32>
      %143 = arith.addf %133, %142 : vector<16x16xf32>
      %cst_144 = arith.constant 0.000000e+00 : f32
      %144 = vector.broadcast %cst_144 : f32 to vector<16x16xf32>
      %145 = arith.cmpf oge, %139, %144 : vector<16x16xf32>
      %cst_145 = arith.constant 1.000000e-01 : f32
      %146 = vector.broadcast %cst_145 : f32 to vector<16x16xf32>
      %147 = arith.mulf %146, %139 : vector<16x16xf32>
      %148 = arith.select %145, %139, %147 : vector<16x16xi1>, vector<16x16xf32>
      %c0_146 = arith.constant 0 : index
      %c3_147 = arith.constant 3 : index
      %c1_148 = arith.constant 1 : index
      %c0_149 = arith.constant 0 : index
      %c0_150 = arith.constant 0 : index
      %149 = vector.load %arg5[%c0_146, %c3_147, %c1_148, %c0_149, %c0_150] : memref<1x5x5x16x16xf32, #tpu.memory_space<vmem>>, vector<1x1x1x16x16xf32>
      %150 = vector.shape_cast %149 : vector<1x1x1x16x16xf32> to vector<16x16xf32>
      %151 = vector.shape_cast %148 : vector<16x16xf32> to vector<1x1x1x16x16xf32>
      tpu.vector_store %arg5[%c0_146, %c3_147, %c1_148, %c0_149, %c0_150], %151 {strides = array<i32>} : memref<1x5x5x16x16xf32, #tpu.memory_space<vmem>>, vector<1x1x1x16x16xf32>,
      %cst_151 = arith.constant 0.000000e+00 : f32
      %152 = vector.broadcast %cst_151 : f32 to vector<16x16xf32>
      %153 = arith.cmpf oge, %143, %152 : vector<16x16xf32>
      %cst_152 = arith.constant 1.000000e-01 : f32
      %154 = vector.broadcast %cst_152 : f32 to vector<16x16xf32>
      %155 = arith.mulf %154, %143 : vector<16x16xf32>
      %156 = arith.select %153, %143, %155 : vector<16x16xi1>, vector<16x16xf32>
      %c0_153 = arith.constant 0 : index
      %c4_154 = arith.constant 4 : index
      %c1_155 = arith.constant 1 : index
      %c0_156 = arith.constant 0 : index
      %c0_157 = arith.constant 0 : index
      %157 = vector.load %arg5[%c0_153, %c4_154, %c1_155, %c0_156, %c0_157] : memref<1x5x5x16x16xf32, #tpu.memory_space<vmem>>, vector<1x1x1x16x16xf32>
      %158 = vector.shape_cast %157 : vector<1x1x1x16x16xf32> to vector<16x16xf32>
      %159 = vector.shape_cast %156 : vector<16x16xf32> to vector<1x1x1x16x16xf32>
      tpu.vector_store %arg5[%c0_153, %c4_154, %c1_155, %c0_156, %c0_157], %159 {strides = array<i32>} : memref<1x5x5x16x16xf32, #tpu.memory_space<vmem>>, vector<1x1x1x16x16xf32>,
      %c0_158 = arith.constant 0 : index
      %c0_159 = arith.constant 0 : index
      %c0_160 = arith.constant 0 : index
      %c0_161 = arith.constant 0 : index
      %160 = vector.load %arg4[%c0_158, %c0_159, %c0_160, %c0_161] : memref<1x4x16x16xf32, #tpu.memory_space<vmem>>, vector<1x4x16x16xf32>
      %161 = vector.shape_cast %160 : vector<1x4x16x16xf32> to vector<4x16x16xf32>
      %c0_162 = arith.constant 0 : index
      %c6_163 = arith.constant 6 : index
      %c0_164 = arith.constant 0 : index
      %162 = vector.load %arg6[%c0_162, %c6_163, %c0_164] : memref<4x28x16xf32, #tpu.memory_space<vmem>>, vector<4x16x16xf32>
      tpu.vector_store %arg6[%c0_162, %c6_163, %c0_164], %161 {strides = array<i32>} : memref<4x28x16xf32, #tpu.memory_space<vmem>>, vector<4x16x16xf32>,
      %cst_165 = arith.constant 0.000000e+00 : f32
      %163 = vector.broadcast %cst_165 : f32 to vector<16x16xf32>
      %cst_166 = arith.constant 0.000000e+00 : f32
      %164 = vector.broadcast %cst_166 : f32 to vector<16x16xf32>
      %cst_167 = arith.constant 0.000000e+00 : f32
      %165 = vector.broadcast %cst_167 : f32 to vector<16x16xf32>
      %c0_168 = arith.constant 0 : index
      %c0_169 = arith.constant 0 : index
      %c0_170 = arith.constant 0 : index
      %c0_171 = arith.constant 0 : index
      %166 = vector.load %arg3[%c0_168, %c0_169, %c0_170, %c0_171] : memref<1x4x16x16xf32, #tpu.memory_space<vmem>>, vector<1x4x16x16xf32>
      %167 = vector.shape_cast %166 : vector<1x4x16x16xf32> to vector<4x16x16xf32>
      %c0_172 = arith.constant 0 : index
      %c0_173 = arith.constant 0 : index
      %c0_174 = arith.constant 0 : index
      %168 = vector.load %arg6[%c0_172, %c0_173, %c0_174] : memref<4x28x16xf32, #tpu.memory_space<vmem>>, vector<4x16x16xf32>
      %169 = arith.mulf %167, %168 : vector<4x16x16xf32>
      %cst_175 = arith.constant dense<0.000000e+00> : vector<16x16xf32>
      %170 = vector.multi_reduction <add>, %169, %cst_175 [0] : vector<4x16x16xf32> to vector<16x16xf32>
      %171 = arith.addf %163, %170 : vector<16x16xf32>
      %c0_176 = arith.constant 0 : index
      %c3_177 = arith.constant 3 : index
      %c0_178 = arith.constant 0 : index
      %172 = vector.load %arg6[%c0_176, %c3_177, %c0_178] : memref<4x28x16xf32, #tpu.memory_space<vmem>>, vector<4x16x16xf32>
      %173 = arith.mulf %167, %172 : vector<4x16x16xf32>
      %cst_179 = arith.constant dense<0.000000e+00> : vector<16x16xf32>
      %174 = vector.multi_reduction <add>, %173, %cst_179 [0] : vector<4x16x16xf32> to vector<16x16xf32>
      %175 = arith.addf %164, %174 : vector<16x16xf32>
      %c0_180 = arith.constant 0 : index
      %c6_181 = arith.constant 6 : index
      %c0_182 = arith.constant 0 : index
      %176 = vector.load %arg6[%c0_180, %c6_181, %c0_182] : memref<4x28x16xf32, #tpu.memory_space<vmem>>, vector<4x16x16xf32>
      %177 = arith.mulf %167, %176 : vector<4x16x16xf32>
      %cst_183 = arith.constant dense<0.000000e+00> : vector<16x16xf32>
      %178 = vector.multi_reduction <add>, %177, %cst_183 [0] : vector<4x16x16xf32> to vector<16x16xf32>
      %179 = arith.addf %165, %178 : vector<16x16xf32>
      %cst_184 = arith.constant 0.000000e+00 : f32
      %180 = vector.broadcast %cst_184 : f32 to vector<16x16xf32>
      %181 = arith.cmpf oge, %171, %180 : vector<16x16xf32>
      %cst_185 = arith.constant 1.000000e-01 : f32
      %182 = vector.broadcast %cst_185 : f32 to vector<16x16xf32>
      %183 = arith.mulf %182, %171 : vector<16x16xf32>
      %184 = arith.select %181, %171, %183 : vector<16x16xi1>, vector<16x16xf32>
      %c0_186 = arith.constant 0 : index
      %c0_187 = arith.constant 0 : index
      %c2_188 = arith.constant 2 : index
      %c0_189 = arith.constant 0 : index
      %c0_190 = arith.constant 0 : index
      %185 = vector.load %arg5[%c0_186, %c0_187, %c2_188, %c0_189, %c0_190] : memref<1x5x5x16x16xf32, #tpu.memory_space<vmem>>, vector<1x1x1x16x16xf32>
      %186 = vector.shape_cast %185 : vector<1x1x1x16x16xf32> to vector<16x16xf32>
      %187 = vector.shape_cast %184 : vector<16x16xf32> to vector<1x1x1x16x16xf32>
      tpu.vector_store %arg5[%c0_186, %c0_187, %c2_188, %c0_189, %c0_190], %187 {strides = array<i32>} : memref<1x5x5x16x16xf32, #tpu.memory_space<vmem>>, vector<1x1x1x16x16xf32>,
      %cst_191 = arith.constant 0.000000e+00 : f32
      %188 = vector.broadcast %cst_191 : f32 to vector<16x16xf32>
      %189 = arith.cmpf oge, %175, %188 : vector<16x16xf32>
      %cst_192 = arith.constant 1.000000e-01 : f32
      %190 = vector.broadcast %cst_192 : f32 to vector<16x16xf32>
      %191 = arith.mulf %190, %175 : vector<16x16xf32>
      %192 = arith.select %189, %175, %191 : vector<16x16xi1>, vector<16x16xf32>
      %c0_193 = arith.constant 0 : index
      %c1_194 = arith.constant 1 : index
      %c2_195 = arith.constant 2 : index
      %c0_196 = arith.constant 0 : index
      %c0_197 = arith.constant 0 : index
      %193 = vector.load %arg5[%c0_193, %c1_194, %c2_195, %c0_196, %c0_197] : memref<1x5x5x16x16xf32, #tpu.memory_space<vmem>>, vector<1x1x1x16x16xf32>
      %194 = vector.shape_cast %193 : vector<1x1x1x16x16xf32> to vector<16x16xf32>
      %195 = vector.shape_cast %192 : vector<16x16xf32> to vector<1x1x1x16x16xf32>
      tpu.vector_store %arg5[%c0_193, %c1_194, %c2_195, %c0_196, %c0_197], %195 {strides = array<i32>} : memref<1x5x5x16x16xf32, #tpu.memory_space<vmem>>, vector<1x1x1x16x16xf32>,
      %cst_198 = arith.constant 0.000000e+00 : f32
      %196 = vector.broadcast %cst_198 : f32 to vector<16x16xf32>
      %197 = arith.cmpf oge, %179, %196 : vector<16x16xf32>
      %cst_199 = arith.constant 1.000000e-01 : f32
      %198 = vector.broadcast %cst_199 : f32 to vector<16x16xf32>
      %199 = arith.mulf %198, %179 : vector<16x16xf32>
      %200 = arith.select %197, %179, %199 : vector<16x16xi1>, vector<16x16xf32>
      %c0_200 = arith.constant 0 : index
      %c2_201 = arith.constant 2 : index
      %c2_202 = arith.constant 2 : index
      %c0_203 = arith.constant 0 : index
      %c0_204 = arith.constant 0 : index
      %201 = vector.load %arg5[%c0_200, %c2_201, %c2_202, %c0_203, %c0_204] : memref<1x5x5x16x16xf32, #tpu.memory_space<vmem>>, vector<1x1x1x16x16xf32>
      %202 = vector.shape_cast %201 : vector<1x1x1x16x16xf32> to vector<16x16xf32>
      %203 = vector.shape_cast %200 : vector<16x16xf32> to vector<1x1x1x16x16xf32>
      tpu.vector_store %arg5[%c0_200, %c2_201, %c2_202, %c0_203, %c0_204], %203 {strides = array<i32>} : memref<1x5x5x16x16xf32, #tpu.memory_space<vmem>>, vector<1x1x1x16x16xf32>,
      %cst_205 = arith.constant 0.000000e+00 : f32
      %204 = vector.broadcast %cst_205 : f32 to vector<16x16xf32>
      %cst_206 = arith.constant 0.000000e+00 : f32
      %205 = vector.broadcast %cst_206 : f32 to vector<16x16xf32>
      %c0_207 = arith.constant 0 : index
      %c0_208 = arith.constant 0 : index
      %c0_209 = arith.constant 0 : index
      %c0_210 = arith.constant 0 : index
      %206 = vector.load %arg3[%c0_207, %c0_208, %c0_209, %c0_210] : memref<1x4x16x16xf32, #tpu.memory_space<vmem>>, vector<1x4x16x16xf32>
      %207 = vector.shape_cast %206 : vector<1x4x16x16xf32> to vector<4x16x16xf32>
      %c0_211 = arith.constant 0 : index
      %c9_212 = arith.constant 9 : index
      %c0_213 = arith.constant 0 : index
      %208 = vector.load %arg6[%c0_211, %c9_212, %c0_213] : memref<4x28x16xf32, #tpu.memory_space<vmem>>, vector<4x16x16xf32>
      %209 = arith.mulf %207, %208 : vector<4x16x16xf32>
      %cst_214 = arith.constant dense<0.000000e+00> : vector<16x16xf32>
      %210 = vector.multi_reduction <add>, %209, %cst_214 [0] : vector<4x16x16xf32> to vector<16x16xf32>
      %211 = arith.addf %204, %210 : vector<16x16xf32>
      %c0_215 = arith.constant 0 : index
      %c12_216 = arith.constant 12 : index
      %c0_217 = arith.constant 0 : index
      %212 = vector.load %arg6[%c0_215, %c12_216, %c0_217] : memref<4x28x16xf32, #tpu.memory_space<vmem>>, vector<4x16x16xf32>
      %213 = arith.mulf %207, %212 : vector<4x16x16xf32>
      %cst_218 = arith.constant dense<0.000000e+00> : vector<16x16xf32>
      %214 = vector.multi_reduction <add>, %213, %cst_218 [0] : vector<4x16x16xf32> to vector<16x16xf32>
      %215 = arith.addf %205, %214 : vector<16x16xf32>
      %cst_219 = arith.constant 0.000000e+00 : f32
      %216 = vector.broadcast %cst_219 : f32 to vector<16x16xf32>
      %217 = arith.cmpf oge, %211, %216 : vector<16x16xf32>
      %cst_220 = arith.constant 1.000000e-01 : f32
      %218 = vector.broadcast %cst_220 : f32 to vector<16x16xf32>
      %219 = arith.mulf %218, %211 : vector<16x16xf32>
      %220 = arith.select %217, %211, %219 : vector<16x16xi1>, vector<16x16xf32>
      %c0_221 = arith.constant 0 : index
      %c3_222 = arith.constant 3 : index
      %c2_223 = arith.constant 2 : index
      %c0_224 = arith.constant 0 : index
      %c0_225 = arith.constant 0 : index
      %221 = vector.load %arg5[%c0_221, %c3_222, %c2_223, %c0_224, %c0_225] : memref<1x5x5x16x16xf32, #tpu.memory_space<vmem>>, vector<1x1x1x16x16xf32>
      %222 = vector.shape_cast %221 : vector<1x1x1x16x16xf32> to vector<16x16xf32>
      %223 = vector.shape_cast %220 : vector<16x16xf32> to vector<1x1x1x16x16xf32>
      tpu.vector_store %arg5[%c0_221, %c3_222, %c2_223, %c0_224, %c0_225], %223 {strides = array<i32>} : memref<1x5x5x16x16xf32, #tpu.memory_space<vmem>>, vector<1x1x1x16x16xf32>,
      %cst_226 = arith.constant 0.000000e+00 : f32
      %224 = vector.broadcast %cst_226 : f32 to vector<16x16xf32>
      %225 = arith.cmpf oge, %215, %224 : vector<16x16xf32>
      %cst_227 = arith.constant 1.000000e-01 : f32
      %226 = vector.broadcast %cst_227 : f32 to vector<16x16xf32>
      %227 = arith.mulf %226, %215 : vector<16x16xf32>
      %228 = arith.select %225, %215, %227 : vector<16x16xi1>, vector<16x16xf32>
      %c0_228 = arith.constant 0 : index
      %c4_229 = arith.constant 4 : index
      %c2_230 = arith.constant 2 : index
      %c0_231 = arith.constant 0 : index
      %c0_232 = arith.constant 0 : index
      %229 = vector.load %arg5[%c0_228, %c4_229, %c2_230, %c0_231, %c0_232] : memref<1x5x5x16x16xf32, #tpu.memory_space<vmem>>, vector<1x1x1x16x16xf32>
      %230 = vector.shape_cast %229 : vector<1x1x1x16x16xf32> to vector<16x16xf32>
      %231 = vector.shape_cast %228 : vector<16x16xf32> to vector<1x1x1x16x16xf32>
      tpu.vector_store %arg5[%c0_228, %c4_229, %c2_230, %c0_231, %c0_232], %231 {strides = array<i32>} : memref<1x5x5x16x16xf32, #tpu.memory_space<vmem>>, vector<1x1x1x16x16xf32>,
      %cst_233 = arith.constant 0.000000e+00 : f32
      %232 = vector.broadcast %cst_233 : f32 to vector<4x16x3xf32>
      %c0_234 = arith.constant 0 : index
      %c6_235 = arith.constant 6 : index
      %c13 = arith.constant 13 : index
      %233 = vector.load %arg6[%c0_234, %c6_235, %c13] : memref<4x28x16xf32, #tpu.memory_space<vmem>>, vector<4x16x3xf32>
      tpu.vector_store %arg6[%c0_234, %c6_235, %c13], %232 {strides = array<i32>} : memref<4x28x16xf32, #tpu.memory_space<vmem>>, vector<4x16x3xf32>,
      %c0_236 = arith.constant 0 : index
      %c0_237 = arith.constant 0 : index
      %c0_238 = arith.constant 0 : index
      %c3_239 = arith.constant 3 : index
      %234 = vector.load %arg4[%c0_236, %c0_237, %c0_238, %c3_239] : memref<1x4x16x16xf32, #tpu.memory_space<vmem>>, vector<1x4x16x13xf32>
      %235 = vector.shape_cast %234 : vector<1x4x16x13xf32> to vector<4x16x13xf32>
      %c0_240 = arith.constant 0 : index
      %c6_241 = arith.constant 6 : index
      %c0_242 = arith.constant 0 : index
      %236 = vector.load %arg6[%c0_240, %c6_241, %c0_242] : memref<4x28x16xf32, #tpu.memory_space<vmem>>, vector<4x16x13xf32>
      tpu.vector_store %arg6[%c0_240, %c6_241, %c0_242], %235 {strides = array<i32>} : memref<4x28x16xf32, #tpu.memory_space<vmem>>, vector<4x16x13xf32>,
      %cst_243 = arith.constant 0.000000e+00 : f32
      %237 = vector.broadcast %cst_243 : f32 to vector<16x16xf32>
      %cst_244 = arith.constant 0.000000e+00 : f32
      %238 = vector.broadcast %cst_244 : f32 to vector<16x16xf32>
      %cst_245 = arith.constant 0.000000e+00 : f32
      %239 = vector.broadcast %cst_245 : f32 to vector<16x16xf32>
      %c0_246 = arith.constant 0 : index
      %c0_247 = arith.constant 0 : index
      %c0_248 = arith.constant 0 : index
      %c0_249 = arith.constant 0 : index
      %240 = vector.load %arg3[%c0_246, %c0_247, %c0_248, %c0_249] : memref<1x4x16x16xf32, #tpu.memory_space<vmem>>, vector<1x4x16x16xf32>
      %241 = vector.shape_cast %240 : vector<1x4x16x16xf32> to vector<4x16x16xf32>
      %c0_250 = arith.constant 0 : index
      %c0_251 = arith.constant 0 : index
      %c0_252 = arith.constant 0 : index
      %242 = vector.load %arg6[%c0_250, %c0_251, %c0_252] : memref<4x28x16xf32, #tpu.memory_space<vmem>>, vector<4x16x16xf32>
      %243 = arith.mulf %241, %242 : vector<4x16x16xf32>
      %cst_253 = arith.constant dense<0.000000e+00> : vector<16x16xf32>
      %244 = vector.multi_reduction <add>, %243, %cst_253 [0] : vector<4x16x16xf32> to vector<16x16xf32>
      %245 = arith.addf %237, %244 : vector<16x16xf32>
      %c0_254 = arith.constant 0 : index
      %c3_255 = arith.constant 3 : index
      %c0_256 = arith.constant 0 : index
      %246 = vector.load %arg6[%c0_254, %c3_255, %c0_256] : memref<4x28x16xf32, #tpu.memory_space<vmem>>, vector<4x16x16xf32>
      %247 = arith.mulf %241, %246 : vector<4x16x16xf32>
      %cst_257 = arith.constant dense<0.000000e+00> : vector<16x16xf32>
      %248 = vector.multi_reduction <add>, %247, %cst_257 [0] : vector<4x16x16xf32> to vector<16x16xf32>
      %249 = arith.addf %238, %248 : vector<16x16xf32>
      %c0_258 = arith.constant 0 : index
      %c6_259 = arith.constant 6 : index
      %c0_260 = arith.constant 0 : index
      %250 = vector.load %arg6[%c0_258, %c6_259, %c0_260] : memref<4x28x16xf32, #tpu.memory_space<vmem>>, vector<4x16x16xf32>
      %251 = arith.mulf %241, %250 : vector<4x16x16xf32>
      %cst_261 = arith.constant dense<0.000000e+00> : vector<16x16xf32>
      %252 = vector.multi_reduction <add>, %251, %cst_261 [0] : vector<4x16x16xf32> to vector<16x16xf32>
      %253 = arith.addf %239, %252 : vector<16x16xf32>
      %cst_262 = arith.constant 0.000000e+00 : f32
      %254 = vector.broadcast %cst_262 : f32 to vector<16x16xf32>
      %255 = arith.cmpf oge, %245, %254 : vector<16x16xf32>
      %cst_263 = arith.constant 1.000000e-01 : f32
      %256 = vector.broadcast %cst_263 : f32 to vector<16x16xf32>
      %257 = arith.mulf %256, %245 : vector<16x16xf32>
      %258 = arith.select %255, %245, %257 : vector<16x16xi1>, vector<16x16xf32>
      %c0_264 = arith.constant 0 : index
      %c0_265 = arith.constant 0 : index
      %c3_266 = arith.constant 3 : index
      %c0_267 = arith.constant 0 : index
      %c0_268 = arith.constant 0 : index
      %259 = vector.load %arg5[%c0_264, %c0_265, %c3_266, %c0_267, %c0_268] : memref<1x5x5x16x16xf32, #tpu.memory_space<vmem>>, vector<1x1x1x16x16xf32>
      %260 = vector.shape_cast %259 : vector<1x1x1x16x16xf32> to vector<16x16xf32>
      %261 = vector.shape_cast %258 : vector<16x16xf32> to vector<1x1x1x16x16xf32>
      tpu.vector_store %arg5[%c0_264, %c0_265, %c3_266, %c0_267, %c0_268], %261 {strides = array<i32>} : memref<1x5x5x16x16xf32, #tpu.memory_space<vmem>>, vector<1x1x1x16x16xf32>,
      %cst_269 = arith.constant 0.000000e+00 : f32
      %262 = vector.broadcast %cst_269 : f32 to vector<16x16xf32>
      %263 = arith.cmpf oge, %249, %262 : vector<16x16xf32>
      %cst_270 = arith.constant 1.000000e-01 : f32
      %264 = vector.broadcast %cst_270 : f32 to vector<16x16xf32>
      %265 = arith.mulf %264, %249 : vector<16x16xf32>
      %266 = arith.select %263, %249, %265 : vector<16x16xi1>, vector<16x16xf32>
      %c0_271 = arith.constant 0 : index
      %c1_272 = arith.constant 1 : index
      %c3_273 = arith.constant 3 : index
      %c0_274 = arith.constant 0 : index
      %c0_275 = arith.constant 0 : index
      %267 = vector.load %arg5[%c0_271, %c1_272, %c3_273, %c0_274, %c0_275] : memref<1x5x5x16x16xf32, #tpu.memory_space<vmem>>, vector<1x1x1x16x16xf32>
      %268 = vector.shape_cast %267 : vector<1x1x1x16x16xf32> to vector<16x16xf32>
      %269 = vector.shape_cast %266 : vector<16x16xf32> to vector<1x1x1x16x16xf32>
      tpu.vector_store %arg5[%c0_271, %c1_272, %c3_273, %c0_274, %c0_275], %269 {strides = array<i32>} : memref<1x5x5x16x16xf32, #tpu.memory_space<vmem>>, vector<1x1x1x16x16xf32>,
      %cst_276 = arith.constant 0.000000e+00 : f32
      %270 = vector.broadcast %cst_276 : f32 to vector<16x16xf32>
      %271 = arith.cmpf oge, %253, %270 : vector<16x16xf32>
      %cst_277 = arith.constant 1.000000e-01 : f32
      %272 = vector.broadcast %cst_277 : f32 to vector<16x16xf32>
      %273 = arith.mulf %272, %253 : vector<16x16xf32>
      %274 = arith.select %271, %253, %273 : vector<16x16xi1>, vector<16x16xf32>
      %c0_278 = arith.constant 0 : index
      %c2_279 = arith.constant 2 : index
      %c3_280 = arith.constant 3 : index
      %c0_281 = arith.constant 0 : index
      %c0_282 = arith.constant 0 : index
      %275 = vector.load %arg5[%c0_278, %c2_279, %c3_280, %c0_281, %c0_282] : memref<1x5x5x16x16xf32, #tpu.memory_space<vmem>>, vector<1x1x1x16x16xf32>
      %276 = vector.shape_cast %275 : vector<1x1x1x16x16xf32> to vector<16x16xf32>
      %277 = vector.shape_cast %274 : vector<16x16xf32> to vector<1x1x1x16x16xf32>
      tpu.vector_store %arg5[%c0_278, %c2_279, %c3_280, %c0_281, %c0_282], %277 {strides = array<i32>} : memref<1x5x5x16x16xf32, #tpu.memory_space<vmem>>, vector<1x1x1x16x16xf32>,
      %cst_283 = arith.constant 0.000000e+00 : f32
      %278 = vector.broadcast %cst_283 : f32 to vector<16x16xf32>
      %cst_284 = arith.constant 0.000000e+00 : f32
      %279 = vector.broadcast %cst_284 : f32 to vector<16x16xf32>
      %c0_285 = arith.constant 0 : index
      %c0_286 = arith.constant 0 : index
      %c0_287 = arith.constant 0 : index
      %c0_288 = arith.constant 0 : index
      %280 = vector.load %arg3[%c0_285, %c0_286, %c0_287, %c0_288] : memref<1x4x16x16xf32, #tpu.memory_space<vmem>>, vector<1x4x16x16xf32>
      %281 = vector.shape_cast %280 : vector<1x4x16x16xf32> to vector<4x16x16xf32>
      %c0_289 = arith.constant 0 : index
      %c9_290 = arith.constant 9 : index
      %c0_291 = arith.constant 0 : index
      %282 = vector.load %arg6[%c0_289, %c9_290, %c0_291] : memref<4x28x16xf32, #tpu.memory_space<vmem>>, vector<4x16x16xf32>
      %283 = arith.mulf %281, %282 : vector<4x16x16xf32>
      %cst_292 = arith.constant dense<0.000000e+00> : vector<16x16xf32>
      %284 = vector.multi_reduction <add>, %283, %cst_292 [0] : vector<4x16x16xf32> to vector<16x16xf32>
      %285 = arith.addf %278, %284 : vector<16x16xf32>
      %c0_293 = arith.constant 0 : index
      %c12_294 = arith.constant 12 : index
      %c0_295 = arith.constant 0 : index
      %286 = vector.load %arg6[%c0_293, %c12_294, %c0_295] : memref<4x28x16xf32, #tpu.memory_space<vmem>>, vector<4x16x16xf32>
      %287 = arith.mulf %281, %286 : vector<4x16x16xf32>
      %cst_296 = arith.constant dense<0.000000e+00> : vector<16x16xf32>
      %288 = vector.multi_reduction <add>, %287, %cst_296 [0] : vector<4x16x16xf32> to vector<16x16xf32>
      %289 = arith.addf %279, %288 : vector<16x16xf32>
      %cst_297 = arith.constant 0.000000e+00 : f32
      %290 = vector.broadcast %cst_297 : f32 to vector<16x16xf32>
      %291 = arith.cmpf oge, %285, %290 : vector<16x16xf32>
      %cst_298 = arith.constant 1.000000e-01 : f32
      %292 = vector.broadcast %cst_298 : f32 to vector<16x16xf32>
      %293 = arith.mulf %292, %285 : vector<16x16xf32>
      %294 = arith.select %291, %285, %293 : vector<16x16xi1>, vector<16x16xf32>
      %c0_299 = arith.constant 0 : index
      %c3_300 = arith.constant 3 : index
      %c3_301 = arith.constant 3 : index
      %c0_302 = arith.constant 0 : index
      %c0_303 = arith.constant 0 : index
      %295 = vector.load %arg5[%c0_299, %c3_300, %c3_301, %c0_302, %c0_303] : memref<1x5x5x16x16xf32, #tpu.memory_space<vmem>>, vector<1x1x1x16x16xf32>
      %296 = vector.shape_cast %295 : vector<1x1x1x16x16xf32> to vector<16x16xf32>
      %297 = vector.shape_cast %294 : vector<16x16xf32> to vector<1x1x1x16x16xf32>
      tpu.vector_store %arg5[%c0_299, %c3_300, %c3_301, %c0_302, %c0_303], %297 {strides = array<i32>} : memref<1x5x5x16x16xf32, #tpu.memory_space<vmem>>, vector<1x1x1x16x16xf32>,
      %cst_304 = arith.constant 0.000000e+00 : f32
      %298 = vector.broadcast %cst_304 : f32 to vector<16x16xf32>
      %299 = arith.cmpf oge, %289, %298 : vector<16x16xf32>
      %cst_305 = arith.constant 1.000000e-01 : f32
      %300 = vector.broadcast %cst_305 : f32 to vector<16x16xf32>
      %301 = arith.mulf %300, %289 : vector<16x16xf32>
      %302 = arith.select %299, %289, %301 : vector<16x16xi1>, vector<16x16xf32>
      %c0_306 = arith.constant 0 : index
      %c4_307 = arith.constant 4 : index
      %c3_308 = arith.constant 3 : index
      %c0_309 = arith.constant 0 : index
      %c0_310 = arith.constant 0 : index
      %303 = vector.load %arg5[%c0_306, %c4_307, %c3_308, %c0_309, %c0_310] : memref<1x5x5x16x16xf32, #tpu.memory_space<vmem>>, vector<1x1x1x16x16xf32>
      %304 = vector.shape_cast %303 : vector<1x1x1x16x16xf32> to vector<16x16xf32>
      %305 = vector.shape_cast %302 : vector<16x16xf32> to vector<1x1x1x16x16xf32>
      tpu.vector_store %arg5[%c0_306, %c4_307, %c3_308, %c0_309, %c0_310], %305 {strides = array<i32>} : memref<1x5x5x16x16xf32, #tpu.memory_space<vmem>>, vector<1x1x1x16x16xf32>,
      %cst_311 = arith.constant 0.000000e+00 : f32
      %306 = vector.broadcast %cst_311 : f32 to vector<4x16x6xf32>
      %c0_312 = arith.constant 0 : index
      %c6_313 = arith.constant 6 : index
      %c10 = arith.constant 10 : index
      %307 = vector.load %arg6[%c0_312, %c6_313, %c10] : memref<4x28x16xf32, #tpu.memory_space<vmem>>, vector<4x16x6xf32>
      tpu.vector_store %arg6[%c0_312, %c6_313, %c10], %306 {strides = array<i32>} : memref<4x28x16xf32, #tpu.memory_space<vmem>>, vector<4x16x6xf32>,
      %c0_314 = arith.constant 0 : index
      %c0_315 = arith.constant 0 : index
      %c0_316 = arith.constant 0 : index
      %c6_317 = arith.constant 6 : index
      %308 = vector.load %arg4[%c0_314, %c0_315, %c0_316, %c6_317] : memref<1x4x16x16xf32, #tpu.memory_space<vmem>>, vector<1x4x16x10xf32>
      %309 = vector.shape_cast %308 : vector<1x4x16x10xf32> to vector<4x16x10xf32>
      %c0_318 = arith.constant 0 : index
      %c6_319 = arith.constant 6 : index
      %c0_320 = arith.constant 0 : index
      %310 = vector.load %arg6[%c0_318, %c6_319, %c0_320] : memref<4x28x16xf32, #tpu.memory_space<vmem>>, vector<4x16x10xf32>
      tpu.vector_store %arg6[%c0_318, %c6_319, %c0_320], %309 {strides = array<i32>} : memref<4x28x16xf32, #tpu.memory_space<vmem>>, vector<4x16x10xf32>,
      %cst_321 = arith.constant 0.000000e+00 : f32
      %311 = vector.broadcast %cst_321 : f32 to vector<16x16xf32>
      %cst_322 = arith.constant 0.000000e+00 : f32
      %312 = vector.broadcast %cst_322 : f32 to vector<16x16xf32>
      %cst_323 = arith.constant 0.000000e+00 : f32
      %313 = vector.broadcast %cst_323 : f32 to vector<16x16xf32>
      %c0_324 = arith.constant 0 : index
      %c0_325 = arith.constant 0 : index
      %c0_326 = arith.constant 0 : index
      %c0_327 = arith.constant 0 : index
      %314 = vector.load %arg3[%c0_324, %c0_325, %c0_326, %c0_327] : memref<1x4x16x16xf32, #tpu.memory_space<vmem>>, vector<1x4x16x16xf32>
      %315 = vector.shape_cast %314 : vector<1x4x16x16xf32> to vector<4x16x16xf32>
      %c0_328 = arith.constant 0 : index
      %c0_329 = arith.constant 0 : index
      %c0_330 = arith.constant 0 : index
      %316 = vector.load %arg6[%c0_328, %c0_329, %c0_330] : memref<4x28x16xf32, #tpu.memory_space<vmem>>, vector<4x16x16xf32>
      %317 = arith.mulf %315, %316 : vector<4x16x16xf32>
      %cst_331 = arith.constant dense<0.000000e+00> : vector<16x16xf32>
      %318 = vector.multi_reduction <add>, %317, %cst_331 [0] : vector<4x16x16xf32> to vector<16x16xf32>
      %319 = arith.addf %311, %318 : vector<16x16xf32>
      %c0_332 = arith.constant 0 : index
      %c3_333 = arith.constant 3 : index
      %c0_334 = arith.constant 0 : index
      %320 = vector.load %arg6[%c0_332, %c3_333, %c0_334] : memref<4x28x16xf32, #tpu.memory_space<vmem>>, vector<4x16x16xf32>
      %321 = arith.mulf %315, %320 : vector<4x16x16xf32>
      %cst_335 = arith.constant dense<0.000000e+00> : vector<16x16xf32>
      %322 = vector.multi_reduction <add>, %321, %cst_335 [0] : vector<4x16x16xf32> to vector<16x16xf32>
      %323 = arith.addf %312, %322 : vector<16x16xf32>
      %c0_336 = arith.constant 0 : index
      %c6_337 = arith.constant 6 : index
      %c0_338 = arith.constant 0 : index
      %324 = vector.load %arg6[%c0_336, %c6_337, %c0_338] : memref<4x28x16xf32, #tpu.memory_space<vmem>>, vector<4x16x16xf32>
      %325 = arith.mulf %315, %324 : vector<4x16x16xf32>
      %cst_339 = arith.constant dense<0.000000e+00> : vector<16x16xf32>
      %326 = vector.multi_reduction <add>, %325, %cst_339 [0] : vector<4x16x16xf32> to vector<16x16xf32>
      %327 = arith.addf %313, %326 : vector<16x16xf32>
      %cst_340 = arith.constant 0.000000e+00 : f32
      %328 = vector.broadcast %cst_340 : f32 to vector<16x16xf32>
      %329 = arith.cmpf oge, %319, %328 : vector<16x16xf32>
      %cst_341 = arith.constant 1.000000e-01 : f32
      %330 = vector.broadcast %cst_341 : f32 to vector<16x16xf32>
      %331 = arith.mulf %330, %319 : vector<16x16xf32>
      %332 = arith.select %329, %319, %331 : vector<16x16xi1>, vector<16x16xf32>
      %c0_342 = arith.constant 0 : index
      %c0_343 = arith.constant 0 : index
      %c4_344 = arith.constant 4 : index
      %c0_345 = arith.constant 0 : index
      %c0_346 = arith.constant 0 : index
      %333 = vector.load %arg5[%c0_342, %c0_343, %c4_344, %c0_345, %c0_346] : memref<1x5x5x16x16xf32, #tpu.memory_space<vmem>>, vector<1x1x1x16x16xf32>
      %334 = vector.shape_cast %333 : vector<1x1x1x16x16xf32> to vector<16x16xf32>
      %335 = vector.shape_cast %332 : vector<16x16xf32> to vector<1x1x1x16x16xf32>
      tpu.vector_store %arg5[%c0_342, %c0_343, %c4_344, %c0_345, %c0_346], %335 {strides = array<i32>} : memref<1x5x5x16x16xf32, #tpu.memory_space<vmem>>, vector<1x1x1x16x16xf32>,
      %cst_347 = arith.constant 0.000000e+00 : f32
      %336 = vector.broadcast %cst_347 : f32 to vector<16x16xf32>
      %337 = arith.cmpf oge, %323, %336 : vector<16x16xf32>
      %cst_348 = arith.constant 1.000000e-01 : f32
      %338 = vector.broadcast %cst_348 : f32 to vector<16x16xf32>
      %339 = arith.mulf %338, %323 : vector<16x16xf32>
      %340 = arith.select %337, %323, %339 : vector<16x16xi1>, vector<16x16xf32>
      %c0_349 = arith.constant 0 : index
      %c1_350 = arith.constant 1 : index
      %c4_351 = arith.constant 4 : index
      %c0_352 = arith.constant 0 : index
      %c0_353 = arith.constant 0 : index
      %341 = vector.load %arg5[%c0_349, %c1_350, %c4_351, %c0_352, %c0_353] : memref<1x5x5x16x16xf32, #tpu.memory_space<vmem>>, vector<1x1x1x16x16xf32>
      %342 = vector.shape_cast %341 : vector<1x1x1x16x16xf32> to vector<16x16xf32>
      %343 = vector.shape_cast %340 : vector<16x16xf32> to vector<1x1x1x16x16xf32>
      tpu.vector_store %arg5[%c0_349, %c1_350, %c4_351, %c0_352, %c0_353], %343 {strides = array<i32>} : memref<1x5x5x16x16xf32, #tpu.memory_space<vmem>>, vector<1x1x1x16x16xf32>,
      %cst_354 = arith.constant 0.000000e+00 : f32
      %344 = vector.broadcast %cst_354 : f32 to vector<16x16xf32>
      %345 = arith.cmpf oge, %327, %344 : vector<16x16xf32>
      %cst_355 = arith.constant 1.000000e-01 : f32
      %346 = vector.broadcast %cst_355 : f32 to vector<16x16xf32>
      %347 = arith.mulf %346, %327 : vector<16x16xf32>
      %348 = arith.select %345, %327, %347 : vector<16x16xi1>, vector<16x16xf32>
      %c0_356 = arith.constant 0 : index
      %c2_357 = arith.constant 2 : index
      %c4_358 = arith.constant 4 : index
      %c0_359 = arith.constant 0 : index
      %c0_360 = arith.constant 0 : index
      %349 = vector.load %arg5[%c0_356, %c2_357, %c4_358, %c0_359, %c0_360] : memref<1x5x5x16x16xf32, #tpu.memory_space<vmem>>, vector<1x1x1x16x16xf32>
      %350 = vector.shape_cast %349 : vector<1x1x1x16x16xf32> to vector<16x16xf32>
      %351 = vector.shape_cast %348 : vector<16x16xf32> to vector<1x1x1x16x16xf32>
      tpu.vector_store %arg5[%c0_356, %c2_357, %c4_358, %c0_359, %c0_360], %351 {strides = array<i32>} : memref<1x5x5x16x16xf32, #tpu.memory_space<vmem>>, vector<1x1x1x16x16xf32>,
      %cst_361 = arith.constant 0.000000e+00 : f32
      %352 = vector.broadcast %cst_361 : f32 to vector<16x16xf32>
      %cst_362 = arith.constant 0.000000e+00 : f32
      %353 = vector.broadcast %cst_362 : f32 to vector<16x16xf32>
      %c0_363 = arith.constant 0 : index
      %c0_364 = arith.constant 0 : index
      %c0_365 = arith.constant 0 : index
      %c0_366 = arith.constant 0 : index
      %354 = vector.load %arg3[%c0_363, %c0_364, %c0_365, %c0_366] : memref<1x4x16x16xf32, #tpu.memory_space<vmem>>, vector<1x4x16x16xf32>
      %355 = vector.shape_cast %354 : vector<1x4x16x16xf32> to vector<4x16x16xf32>
      %c0_367 = arith.constant 0 : index
      %c9_368 = arith.constant 9 : index
      %c0_369 = arith.constant 0 : index
      %356 = vector.load %arg6[%c0_367, %c9_368, %c0_369] : memref<4x28x16xf32, #tpu.memory_space<vmem>>, vector<4x16x16xf32>
      %357 = arith.mulf %355, %356 : vector<4x16x16xf32>
      %cst_370 = arith.constant dense<0.000000e+00> : vector<16x16xf32>
      %358 = vector.multi_reduction <add>, %357, %cst_370 [0] : vector<4x16x16xf32> to vector<16x16xf32>
      %359 = arith.addf %352, %358 : vector<16x16xf32>
      %c0_371 = arith.constant 0 : index
      %c12_372 = arith.constant 12 : index
      %c0_373 = arith.constant 0 : index
      %360 = vector.load %arg6[%c0_371, %c12_372, %c0_373] : memref<4x28x16xf32, #tpu.memory_space<vmem>>, vector<4x16x16xf32>
      %361 = arith.mulf %355, %360 : vector<4x16x16xf32>
      %cst_374 = arith.constant dense<0.000000e+00> : vector<16x16xf32>
      %362 = vector.multi_reduction <add>, %361, %cst_374 [0] : vector<4x16x16xf32> to vector<16x16xf32>
      %363 = arith.addf %353, %362 : vector<16x16xf32>
      %cst_375 = arith.constant 0.000000e+00 : f32
      %364 = vector.broadcast %cst_375 : f32 to vector<16x16xf32>
      %365 = arith.cmpf oge, %359, %364 : vector<16x16xf32>
      %cst_376 = arith.constant 1.000000e-01 : f32
      %366 = vector.broadcast %cst_376 : f32 to vector<16x16xf32>
      %367 = arith.mulf %366, %359 : vector<16x16xf32>
      %368 = arith.select %365, %359, %367 : vector<16x16xi1>, vector<16x16xf32>
      %c0_377 = arith.constant 0 : index
      %c3_378 = arith.constant 3 : index
      %c4_379 = arith.constant 4 : index
      %c0_380 = arith.constant 0 : index
      %c0_381 = arith.constant 0 : index
      %369 = vector.load %arg5[%c0_377, %c3_378, %c4_379, %c0_380, %c0_381] : memref<1x5x5x16x16xf32, #tpu.memory_space<vmem>>, vector<1x1x1x16x16xf32>
      %370 = vector.shape_cast %369 : vector<1x1x1x16x16xf32> to vector<16x16xf32>
      %371 = vector.shape_cast %368 : vector<16x16xf32> to vector<1x1x1x16x16xf32>
      tpu.vector_store %arg5[%c0_377, %c3_378, %c4_379, %c0_380, %c0_381], %371 {strides = array<i32>} : memref<1x5x5x16x16xf32, #tpu.memory_space<vmem>>, vector<1x1x1x16x16xf32>,
      %cst_382 = arith.constant 0.000000e+00 : f32
      %372 = vector.broadcast %cst_382 : f32 to vector<16x16xf32>
      %373 = arith.cmpf oge, %363, %372 : vector<16x16xf32>
      %cst_383 = arith.constant 1.000000e-01 : f32
      %374 = vector.broadcast %cst_383 : f32 to vector<16x16xf32>
      %375 = arith.mulf %374, %363 : vector<16x16xf32>
      %376 = arith.select %373, %363, %375 : vector<16x16xi1>, vector<16x16xf32>
      %c0_384 = arith.constant 0 : index
      %c4_385 = arith.constant 4 : index
      %c4_386 = arith.constant 4 : index
      %c0_387 = arith.constant 0 : index
      %c0_388 = arith.constant 0 : index
      %377 = vector.load %arg5[%c0_384, %c4_385, %c4_386, %c0_387, %c0_388] : memref<1x5x5x16x16xf32, #tpu.memory_space<vmem>>, vector<1x1x1x16x16xf32>
      %378 = vector.shape_cast %377 : vector<1x1x1x16x16xf32> to vector<16x16xf32>
      %379 = vector.shape_cast %376 : vector<16x16xf32> to vector<1x1x1x16x16xf32>
      tpu.vector_store %arg5[%c0_384, %c4_385, %c4_386, %c0_387, %c0_388], %379 {strides = array<i32>} : memref<1x5x5x16x16xf32, #tpu.memory_space<vmem>>, vector<1x1x1x16x16xf32>,
    } else {
    }
    return
  }
  func.func @transform_0(%arg0: i32, %arg1: i32, %arg2: i32) -> (i32, i32, i32, i32) {
    %c1_i32 = arith.constant 1 : i32
    %0 = arith.muli %arg0, %c1_i32 : i32
    %1 = arith.addi %0, %arg1 : i32
    %c0_i32 = arith.constant 0 : i32
    %c0_i32_0 = arith.constant 0 : i32
    %c0_i32_1 = arith.constant 0 : i32
    %c0_i32_2 = arith.constant 0 : i32
    return %1, %c0_i32, %c0_i32_0, %c0_i32_1 : i32, i32, i32, i32
  }
  func.func @transform_1(%arg0: i32, %arg1: i32, %arg2: i32) -> (i32, i32, i32, i32) {
    %c1_i32 = arith.constant 1 : i32
    %0 = arith.muli %arg0, %c1_i32 : i32
    %1 = arith.addi %0, %arg1 : i32
    %c0_i32 = arith.constant 0 : i32
    %c0_i32_0 = arith.constant 0 : i32
    %c0_i32_1 = arith.constant 0 : i32
    %c0_i32_2 = arith.constant 0 : i32
    return %1, %c0_i32, %c0_i32_0, %c0_i32_1 : i32, i32, i32, i32
  }
  func.func @transform_2(%arg0: i32, %arg1: i32, %arg2: i32) -> (i32, i32, i32, i32, i32) {
    %c3_i32 = arith.constant 3 : i32
    %0 = arith.muli %arg0, %c3_i32 : i32
    %1 = arith.addi %0, %arg2 : i32
    %c1_i32 = arith.constant 1 : i32
    %2 = arith.muli %1, %c1_i32 : i32
    %3 = arith.addi %2, %arg1 : i32
    %c0_i32 = arith.constant 0 : i32
    %c0_i32_0 = arith.constant 0 : i32
    %c0_i32_1 = arith.constant 0 : i32
    %c0_i32_2 = arith.constant 0 : i32
    %c0_i32_3 = arith.constant 0 : i32
    return %3, %c0_i32, %c0_i32_0, %c0_i32_1, %c0_i32_2 : i32, i32, i32, i32, i32
  }
}

</mosaic_0001>

<bundles_post_ra>
// kernel: tpu_custom_call.1
= control target key start
LH: loop header
LB: loop body
LE: loop exit
PB: predicated region body
PF: predicated region fallthrough
CT: control target
= control target key end

     0   :  { %s9193_s0 = inlined_call_operand.hbm [shape: f32[2,4,16,16], index: 0, kind: input, shape index: {}]   ;;  %s9194_s1 = inlined_call_operand.hbm [shape: f32[2,4,16,16], index: 1, kind: input, shape index: {}]   ;;  %s9195_s2 = inlined_call_operand.hbm [shape: f32[6,5,5,16,16], index: 2, kind: output, shape index: {}]  }
   0x1   :  { %9229 = sst [smem:[#allocation164_spill]] %s9193_s0 }
   0x2   :  { %7 = vsyncpa [#allocation4], 0 }
   0x3   :  { %9 = vsyncpa [#allocation4 + $0x1], 0 }
   0x4   :  { %10 = vsyncpa [#allocation7], 0 }
   0x5   :  { %12 = vsyncpa [#allocation7 + $0x1], 0 }
   0x6   :  { %13 = vsyncpa [#allocation5], 0 }
   0x7   :  { %15 = vsyncpa [#allocation5 + $0x1], 0  ;;  %s4986_s9 = smov 0   ;;  %s4988_s10 = smov 0  }
   0x8   :  { %s4990_s11 = smov 0   ;;  %s4992_s12 = smov 0  }
   0x9   :  { %s4994_s13 = smov 0   ;;  %s4996_s14 = smov 0  }
   0xa   :  { %s4998_s15 = smov 0   ;;  %s5000_s16 = smov 0  }
   0xb   :  { %s5002_s17 = smov 0   ;;  %s5004_s18 = smov 0  }
   0xc   :  { %s5006_s19 = smov 0  }
   0xd LB: > { %9230 = sst [smem:[#allocation12_spill]] %s4927_s14  ;;  %s4468_s20 = sadd.s32 4294967295, %s4947_s19   ;;  %s4947_s19 = sphi %s5006_s19, %s21_s19   ;;  %s4943_s18 = sphi %s5004_s18, %s9563_s18   ;;  %s4939_s17 = sphi %s5002_s17, %s9555_s17   ;;  %s4935_s16 = sphi %s5000_s16, %s9562_s16   ;;  %s4931_s15 = sphi %s4998_s15, %s9554_s15   ;;  %s4927_s14 = sphi %s4996_s14, %s9553_s14   ;;  %s4923_s13 = sphi %s4994_s13, %s9561_s13   ;;  %s4919_s12 = sphi %s4992_s12, %s9560_s12   ;;  %s4915_s11 = sphi %s4990_s11, %s9559_s11   ;;  %s4911_s10 = sphi %s4988_s10, %s9558_s10   ;;  %s4907_s9 = sphi %s4986_s9, %s9557_s9  }
   0xe   : > { %9231 = sst [smem:[#allocation13_spill]] %s4939_s17  ;;  %s4469_s21 = sadd.s32 4294967294, %s4947_s19  }
   0xf   : > { %s33_s22 = sadd.s32 1, %s4939_s17  ;;  %s40_s23 = sadd.s32 1, %s4943_s18 }
  0x10   : > { %p34_p0 = scmp.ge.s32.totalorder %s33_s22, 3  ;;  %s49_s24 = sadd.s32 1, %s4927_s14 }
  0x11   : > { %p56_p1 = scmp.ne.s32.totalorder %s4927_s14, %s4923_s13  ;;  %p57_p2 = scmp.eq.s32.totalorder %s4947_s19, 0 }
  0x12   : > { %s9565_s22 = smov (%p34_p0, %s33_s22), 0  ;;  %s9567_s23 = smov (!%p34_p0, %s40_s23), %s4943_s18 }
  0x13   : > { %9232 = sst [smem:[#allocation14_spill]] %s9565_s22  ;;  %p5050_p3 = por %p57_p2, %p56_p1 }
  0x14   : > { %p62_p4 = scmp.ne.s32.totalorder %s4923_s13, %s4919_s12  ;;  %p42_p5 = scmp.ge.s32.totalorder %s9567_s23, 2 }
  0x15   : > { %p63_p6 = scmp.eq.s32.totalorder %s4468_s20, 0  ;;  %s100_s26 = smul.u32 3, %s4943_s18 }
  0x16   : > { %s109_s27 = sadd.s32 1, %s4915_s11  ;;  %s9569_s23 = smov (%p42_p5, %s9567_s23), 0 }
  0x17   : > { %9234 = sst [smem:[#allocation15_spill]] %s9569_s23  ;;  %p5059_p7 = por %p63_p6, %p62_p4 }
  0x18   : > { %s101_s29 = sadd.s32 %s4939_s17, %s100_s26  ;;  %s46_s30 = ssub.s32 %s4943_s18, %s9569_s23 }
  0x19   : > { %s103_s3 = smul.u32 3, %s9569_s23  ;;  %p47_p8 = scmp.eq.s32.totalorder %s46_s30, 0 }
  0x1a   : > { %p119_p9 = scmp.ne.s32.totalorder %s4915_s11, %s4911_s10  ;;  %p120_p10 = scmp.eq.s32.totalorder %s4468_s20, 5 }
  0x1b   : > { %s104_s4 = sadd.s32 %s103_s3, %s9565_s22  ;;  %p125_p13 = scmp.ne.s32.totalorder %s4911_s10, %s4907_s9 }
  0x1c   : > { %s5071_s5 = scalar_select %p47_p8, %s4927_s14, %s49_s24  }
  0x1d   : > { %s106_s6 = ssub.s32 %s101_s29, %s104_s4  ;;  %p5073_p11 = por %p120_p10, %p119_p9 }
  0x1e   : > { %9236 = sst [smem:[#allocation16_spill]] %s5071_s5  ;;  %p107_p12 = scmp.eq.s32.totalorder %s106_s6, 0 }
  0x1f   : > { %p126_p0 = scmp.eq.s32.totalorder %s4469_s21, 5  ;;  %p4652_p2 = scmp.lt.s32.totalorder %s4947_s19, 6 }
  0x20   : > { %s5082_s8 = scalar_select %p107_p12, %s4915_s11, %s109_s27  }
  0x21   : > { %p5084_p1 = por %p126_p0, %p125_p13  ;;  %s5090_s20 = sand.u32 1, %s4927_s14  }
  0x22   : > { %s9197_s24 = sshll.u32 %s4943_s18, 10  ;;  %s4472_s26 = sshll.u32 %s5090_s20, 6 }
  0x23   : > { %s9239_s0 = sld [smem:[#allocation164_spill]]  ;;  %s150_s4 = scalar_lea.vmem [#allocation3], %s4472_s26 }
  0x24   : > { %s158_s21 = sshll.u32 %s150_s4, 4  ;;  %p5101_p4 = pnand %p4652_p2, %p5050_p3  ;;  %s159_s21 = int_to_ptr.vmem [resolvable:$true] %s158_s21 }
  0x25   : > { %s147_s6 = scalar_lea.sflag [#allocation4], %s5090_s20  ;;  %s4780_s23 = scalar_lea.vmem %s159_s21, 1024 }
  0x26   : > { %p4769_p5 = pneg %p5101_p4  ;;  %p4781_p6 = scmp.ne.s32.totalorder %s159_s21, %s4780_s23 }
  0x27   : > { %s4949_s29 = smov [#allocation3]  }
  0x28   : > { %p4783_p8 = pnand %p4781_p6, %p4769_p5  ;;  %s4785_s30 = sshll.u32 %s4949_s29, 4  ;;  %s4786_s30 = int_to_ptr.vmem [resolvable:$false] %s4785_s30 }
  0x29   : > { %s157_s3 = scalar_lea.hbm %s9239_s0, %s9197_s24  ;;  %s4787_s25 = scalar_lea.vmem %s4786_s30, 2048 }
  0x2a   : > { %p4784_p9 = pneg %p4783_p8  ;;  %p4788_p3 = scmp.lt.s32.totalorder %s159_s21, %s4786_s30 }
  0x2b   : > { %p4789_p10 = scmp.lt.s32.totalorder %s4787_s25, %s4780_s23 }
  0x2d   : > { %p4790_p12 = por %p4789_p10, %p4788_p3 }
  0x2f   : > { %p4791_p13 = pnand %p4790_p12, %p4784_p9 }
  0x31   : > { %4794 = shalt.err (!%p4791_p13)
}
  0x32   : > { %s4950_s4 = smov 128   ;;  %s4951_s24 = smov 8  }
  0x33   : > { %4644 = dma.hbm_to_vmem [thread:$0]  (!%p5101_p4), %s157_s3, 1024, %s159_s21, %s147_s6, %s4950_s4, %s4950_s4, %s4951_s24  }
  0x34   : > { %p4478_p0 = scmp.ge.s32.totalorder %s4947_s19, 1  ;;  %p188_p2 = scmp.lt.s32.totalorder %s4947_s19, 7 }
  0x35   : > { %s9242_s23 = sshll.u32 %s4943_s18, 10  ;;  %s172_s22 = scalar_lea.vmem [#allocation6], %s4472_s26 }
  0x36   : > { %p5115_p6 = pnand %p4478_p0, %p188_p2  ;;  %s179_s0 = scalar_lea.hbm %s9194_s1, %s9242_s23 }
  0x37   : > { %s180_s17 = sshll.u32 %s172_s22, 4  ;;  %s169_s5 = scalar_lea.sflag [#allocation7], %s5090_s20  ;;  %s181_s17 = int_to_ptr.vmem [resolvable:$true] %s180_s17 }
  0x38   : > { %s4808_s14 = scalar_lea.vmem %s181_s17, 1024  ;;  %s4952_s3 = smov [#allocation6]  }
  0x39   : > { %p4809_p8 = scmp.ne.s32.totalorder %s181_s17, %s4808_s14  ;;  %s4813_s21 = sshll.u32 %s4952_s3, 4  ;;  %s4814_s21 = int_to_ptr.vmem [resolvable:$false] %s4813_s21 }
  0x3a   : > { %s4815_s6 = scalar_lea.vmem %s4814_s21, 2048  ;;  %p4816_p10 = scmp.lt.s32.totalorder %s181_s17, %s4814_s21 }
  0x3b   : > { %p4811_p9 = pnand %p4809_p8, %p4769_p5  ;;  %p4817_p12 = scmp.lt.s32.totalorder %s4815_s6, %s4808_s14 }
  0x3d   : > { %p4812_p3 = pneg %p4811_p9  ;;  %p4818_p13 = por %p4817_p12, %p4816_p10 }
  0x3f   : > { %p4819_p0 = pnand %p4818_p13, %p4812_p3 }
  0x41   : > { %4822 = shalt.err (!%p4819_p0)
}
  0x42   : > { %4647 = dma.hbm_to_vmem [thread:$0]  (!%p5101_p4), %s179_s0, 1024, %s181_s17, %s169_s5, %s4950_s4, %s4950_s4, %s4951_s24  }
  0x43   : > { %192 = sbr.rel (%p5115_p6) target bundleno = 1109 (0x455), region = 28  ;;  %s194_s22 = sand.u32 (!%p5115_p6), 1, %s4923_s13  }
  0x44   : > { %s4479_s20 = sshll.u32 (!%p5115_p6), %s194_s22, 6  ;;  %s195_s26 = scalar_lea.sflag (!%p5115_p6), [#allocation4], %s194_s22 }
  0x45   : > { %s5133_s23 = scalar_lea.vmem (!%p5115_p6), [#allocation3], %s4479_s20 }
  0x48   : > { %4894 = dma.done.wait (%p5059_p7), %s195_s26, 1024  }
  0x49   : > { %4896 = vsyncadd (%p5059_p7), %s195_s26, 4294966272  ;;  %s204_s14 = scalar_lea.sflag [#allocation7], %s194_s22  ;;  %s5139_s30 = scalar_lea.vmem [#allocation6], %s4479_s20 }
  0x4a   : > { %4898 = dma.done.wait (%p5059_p7), %s204_s14, 1024  }
  0x4b   : > { %4900 = vsyncadd (%p5059_p7), %s204_s14, 4294966272  ;;  %s230_s0 = sand.u32 1, %s4911_s10   ;;  %p4481_p4 = scmp.ne.s32.totalorder %s4931_s15, 0 }
  0x4c   : > { %s4633_s17 = smul.u32 400, %s230_s0 }
  0x4d   : > { %241 = sbr.rel (%p4481_p4) target bundleno = 416 (0x1a0), region = 40 }
  0x4e   : > { %s5148_s5 = scalar_lea.vmem [#allocation8], %s4633_s17 }
  0x52   : > { %v5152_v0 = vld [vmem:[%s5139_s30 + $0x10] sm:$0xff]  ;;  %v5155_v1 = vld [vmem:[%s5139_s30] sm:$0xff]  ;;  %s4953_s28 = smov 2   ;;  %vm242_vm0 = vcmask 123904   ;;  %v5162_v2 = vld [vmem:[%s5139_s30 + $0x18] sm:$0xff]  ;;  %vm251_vm1 = vcmask 15360  }
  0x53   : > { %280 = vrot.lane.b32.xlu1 %v5152_v0, %s4953_s28  ;;  %276 = vrot.lane.b32.xlu0 %v5155_v1, %s4953_s28  ;;  %v5165_v3 = vld [vmem:[%s5139_s30 + $0x8] sm:$0xff]  ;;  %v9205_v4 = vmov 0.0   ;;  %v5199_v6 = vld [vmem:[%s5139_s30 + $0x20] sm:$0xff]  ;;  %s4955_s24 = smov 1   ;;  %s4956_s27 = smov 127   ;;  %vm300_vm2 = vcmask 130064  }
  0x54   : > { %244 = vst.msk [vmem:[#allocation2 + $0x20] sm:$0x3] %vm242_vm0, %v9205_v4  ;;  %243 = vst.msk [vmem:[#allocation2] sm:$0x3] %vm242_vm0, %v9205_v4  ;;  %v5196_v5 = vld [vmem:[%s5139_s30 + $0x28] sm:$0xff]  ;;  %v267_v7 = vld [vmem:[%s5139_s30 + $0x38] sm:$0xff] }
  0x55   : > { %254 = vst.msk [vmem:[#allocation2 + $0x22] sm:$0xff] %vm251_vm1, %v9205_v4  ;;  %252 = vst.msk [vmem:[#allocation2 + $0x2] sm:$0xff] %vm251_vm1, %v9205_v4  ;;  %v266_v8 = vld [vmem:[%s5139_s30 + $0x30] sm:$0xff]  ;;  %s4957_s4 = smov 126   ;;  %v5235_v14 = vld [vmem:[%s5133_s23] sm:$0xff]  ;;  %vm333_vm3 = vcmask 130048  }
  0x56   : > { %245 = vst.msk [vmem:[#allocation2 + $0x40] sm:$0x3] %vm242_vm0, %v9205_v4  ;;  %246 = vst.msk [vmem:[#allocation2 + $0x60] sm:$0x3] %vm242_vm0, %v9205_v4  ;;  %v5232_v13 = vld [vmem:[%s5133_s23 + $0x10] sm:$0xff]  ;;  %v5246_v29 = vld [vmem:[%s5133_s23 + $0x18] sm:$0xff] }
  0x57   : > { %247 = vst.msk [vmem:[#allocation2 + $0x12] sm:$0x3] %vm242_vm0, %v9205_v4  ;;  %248 = vst.msk [vmem:[#allocation2 + $0x32] sm:$0x3] %vm242_vm0, %v9205_v4  ;;  %282 = vrot.lane.b32.xlu1 %v5162_v2, %s4953_s28  ;;  %278 = vrot.lane.b32.xlu0 %v5165_v3, %s4953_s28  ;;  %vm530_vm4 = vcmask 7168   ;;  %v5252_v33 = vld [vmem:[%s5133_s23 + $0x8] sm:$0xff] }
  0x58   : > { %249 = vst.msk [vmem:[#allocation2 + $0x52] sm:$0x3] %vm242_vm0, %v9205_v4  ;;  %250 = vst.msk [vmem:[#allocation2 + $0x72] sm:$0x3] %vm242_vm0, %v9205_v4  ;;  %vm579_vm5 = vcmask 130056   ;;  %v5273_v56 = vld [vmem:[%s5133_s23 + $0x28] sm:$0xff] }
  0x59   : > { %253 = vst.msk [vmem:[#allocation2 + $0xa] sm:$0xff] %vm251_vm1, %v9205_v4  ;;  %255 = vst.msk [vmem:[#allocation2 + $0x2a] sm:$0xff] %vm251_vm1, %v9205_v4  ;;  %vm1046_vm6 = vcmask 130168   ;;  %vm1095_vm7 = vcmask 121856   ;;  %vm1325_vm0 = vcmask 130160  }
  0x5a   : > { %256 = vst.msk [vmem:[#allocation2 + $0x42] sm:$0xff] %vm251_vm1, %v9205_v4  ;;  %257 = vst.msk [vmem:[#allocation2 + $0x4a] sm:$0xff] %vm251_vm1, %v9205_v4 }
  0x5b   : > { %258 = vst.msk [vmem:[#allocation2 + $0x62] sm:$0xff] %vm251_vm1, %v9205_v4  ;;  %259 = vst.msk [vmem:[#allocation2 + $0x6a] sm:$0xff] %vm251_vm1, %v9205_v4  ;;  %286 = vrot.lane.b32.xlu1 %v5196_v5, %s4953_s28  ;;  %284 = vrot.lane.b32.xlu0 %v5199_v6, %s4953_s28 }
  0x5f   : > { %290 = vrot.lane.b32.xlu1 %v267_v7, %s4953_s28  ;;  %288 = vrot.lane.b32.xlu0 %v266_v8, %s4953_s28 }
  0x63   : > { %557 = vrot.lane.b32.xlu1 %v5165_v3, %s4955_s24  ;;  %555 = vrot.lane.b32.xlu0 %v5155_v1, %s4955_s24 }
  0x67   : > { %561 = vrot.lane.b32.xlu1 %v5162_v2, %s4955_s24  ;;  %559 = vrot.lane.b32.xlu0 %v5152_v0, %s4955_s24 }
  0x6b   : > { %565 = vrot.lane.b32.xlu1 %v5196_v5, %s4955_s24  ;;  %563 = vrot.lane.b32.xlu0 %v5199_v6, %s4955_s24 }
  0x6f   : > { %569 = vrot.lane.b32.xlu1 %v267_v7, %s4955_s24  ;;  %567 = vrot.lane.b32.xlu0 %v266_v8, %s4955_s24 }
  0x73   : > { %1073 = vrot.lane.b32.xlu1 %v5165_v3, %s4956_s27  ;;  %1071 = vrot.lane.b32.xlu0 %v5155_v1, %s4956_s27 }
  0x77   : > { %1077 = vrot.lane.b32.xlu1 %v5162_v2, %s4956_s27  ;;  %1075 = vrot.lane.b32.xlu0 %v5152_v0, %s4956_s27 }
  0x7b   : > { %1081 = vrot.lane.b32.xlu1 %v5196_v5, %s4956_s27  ;;  %1079 = vrot.lane.b32.xlu0 %v5199_v6, %s4956_s27 }
  0x7f   : > { %1085 = vrot.lane.b32.xlu1 %v267_v7, %s4956_s27  ;;  %1083 = vrot.lane.b32.xlu0 %v266_v8, %s4956_s27 }
  0x83   : > { %1352 = vrot.lane.b32.xlu1 %v5165_v3, %s4957_s4  ;;  %1350 = vrot.lane.b32.xlu0 %v5155_v1, %s4957_s4 }
  0x87   : > { %1356 = vrot.lane.b32.xlu1 %v5162_v2, %s4957_s4  ;;  %1354 = vrot.lane.b32.xlu0 %v5152_v0, %s4957_s4 }
  0x8b   : > { %1360 = vrot.lane.b32.xlu1 %v5196_v5, %s4957_s4  ;;  %1358 = vrot.lane.b32.xlu0 %v5199_v6, %s4957_s4 }
  0x8f   : > { %1364 = vrot.lane.b32.xlu1 %v267_v7, %s4957_s4  ;;  %1362 = vrot.lane.b32.xlu0 %v266_v8, %s4957_s4 }
  0xc5   : > { %v281_v9 = vpop.permute.xlu1 %280  ;;  %v277_v10 = vpop.permute.xlu0 %276 }
  0xc6   : > { %303 = vst.msk [vmem:[#allocation2 + $0x22] sm:$0xff] %vm300_vm2, %v281_v9  ;;  %301 = vst.msk [vmem:[#allocation2 + $0x2] sm:$0xff] %vm300_vm2, %v277_v10 }
  0xc9   : > { %v283_v11 = vpop.permute.xlu1 %282  ;;  %v279_v12 = vpop.permute.xlu0 %278 }
  0xca   : > { %304 = vst.msk [vmem:[#allocation2 + $0x2a] sm:$0xff] %vm300_vm2, %v283_v11  ;;  %302 = vst.msk [vmem:[#allocation2 + $0xa] sm:$0xff] %vm300_vm2, %v279_v12 }
  0xcd   : > { %v319_v15 = vld [vmem:[#allocation2 + $0x20] sm:$0xff]  ;;  %v287_v18 = vpop.permute.xlu1 %286  ;;  %v285_v19 = vpop.permute.xlu0 %284 }
  0xce   : > { %v352_v16 = vld [vmem:[#allocation2 + $0x21] sm:$0xff]  ;;  %v327_v20 = vmul.f32 %v319_v15, %v5232_v13  ;;  %306 = vst.msk [vmem:[#allocation2 + $0x4a] sm:$0xff] %vm300_vm2, %v287_v18  ;;  %305 = vst.msk [vmem:[#allocation2 + $0x42] sm:$0xff] %vm300_vm2, %v285_v19 }
  0xcf   : > { %v384_v17 = vld [vmem:[#allocation2 + $0x22] sm:$0xff]  ;;  %v360_v21 = vmul.f32 %v352_v16, %v5232_v13 }
  0xd0   : > { %v392_v22 = vmul.f32 %v384_v17, %v5232_v13  ;;  %v317_v23 = vld [vmem:[#allocation2] sm:$0xff]  ;;  %v335_v30 = vsel %vm333_vm3, %v327_v20, 0.0 }
  0xd1   : > { %v350_v24 = vld [vmem:[#allocation2 + $0x1] sm:$0xff]  ;;  %v325_v26 = vmul.f32 %v317_v23, %v5235_v14  ;;  %v367_v31 = vsel %vm333_vm3, %v360_v21, 0.0  ;;  %v353_v38 = vld [vmem:[#allocation2 + $0x29] sm:$0xff]  ;;  %v291_v40 = vpop.permute.xlu1 %290  ;;  %v289_v41 = vpop.permute.xlu0 %288 }
  0xd2   : > { %v382_v25 = vld [vmem:[#allocation2 + $0x2] sm:$0xff]  ;;  %v358_v27 = vmul.f32 %v350_v24, %v5235_v14  ;;  %v399_v32 = vsel %vm333_vm3, %v392_v22, 0.0  ;;  %v385_v39 = vld [vmem:[#allocation2 + $0x2a] sm:$0xff]  ;;  %308 = vst.msk [vmem:[#allocation2 + $0x6a] sm:$0xff] %vm300_vm2, %v291_v40  ;;  %307 = vst.msk [vmem:[#allocation2 + $0x62] sm:$0xff] %vm300_vm2, %v289_v41  ;;  %v361_v49 = vmul.f32 %v353_v38, %v5246_v29 }
  0xd3   : > { %v390_v28 = vmul.f32 %v382_v25, %v5235_v14  ;;  %v334_v34 = vsel %vm333_vm3, %v325_v26, 0.0  ;;  %v320_v37 = vld [vmem:[#allocation2 + $0x28] sm:$0xff]  ;;  %v393_v50 = vmul.f32 %v385_v39, %v5246_v29 }
  0xd4   : > { %v366_v35 = vsel %vm333_vm3, %v358_v27, 0.0  ;;  %v5257_v42 = vadd.f32 %v335_v30, %v334_v34  ;;  %v328_v45 = vmul.f32 %v320_v37, %v5246_v29  ;;  %v450_v46 = vld [vmem:[#allocation2 + $0x23] sm:$0xff]  ;;  %v451_v47 = vld [vmem:[#allocation2 + $0x2b] sm:$0xff]  ;;  %v374_v7 = vsel %vm333_vm3, %v361_v49, 0.0 }
  0xd5   : > { %v398_v36 = vsel %vm333_vm3, %v390_v28, 0.0  ;;  %v5259_v43 = vadd.f32 %v367_v31, %v366_v35  ;;  %v482_v48 = vld [vmem:[#allocation2 + $0x24] sm:$0xff]  ;;  %v458_v51 = vmul.f32 %v450_v46, %v5232_v13  ;;  %v459_v52 = vmul.f32 %v451_v47, %v5246_v29  ;;  %v483_v53 = vld [vmem:[#allocation2 + $0x2c] sm:$0xff]  ;;  %v558_v15 = vpop.permute.xlu1 %557  ;;  %v556_v16 = vpop.permute.xlu0 %555 }
  0xd6   : > { %v5261_v44 = vadd.f32 %v399_v32, %v398_v36  ;;  %533 = vst.msk [vmem:[#allocation2 + $0x22] sm:$0xff] %vm530_vm4, %v9205_v4  ;;  %v318_v54 = vld [vmem:[#allocation2 + $0x8] sm:$0xff]  ;;  %v342_v57 = vsel %vm333_vm3, %v328_v45, 0.0  ;;  %v490_v58 = vmul.f32 %v482_v48, %v5232_v13  ;;  %v491_v59 = vmul.f32 %v483_v53, %v5246_v29  ;;  %534 = vst.msk [vmem:[#allocation2 + $0x2a] sm:$0xff] %vm530_vm4, %v9205_v4  ;;  %v5299_v28 = vld [vmem:[%s5133_s23 + $0x20] sm:$0xff] }
  0xd7   : > { %v351_v55 = vld [vmem:[#allocation2 + $0x9] sm:$0xff]  ;;  %v326_v60 = vmul.f32 %v318_v54, %v5252_v33  ;;  %v406_v8 = vsel %vm333_vm3, %v393_v50, 0.0  ;;  %v465_v9 = vsel %vm333_vm3, %v458_v51, 0.0  ;;  %v472_v10 = vsel %vm333_vm3, %v459_v52, 0.0  ;;  %9243 = vst [vmem:[#allocation17_spill] sm:$0xff] %v5299_v28  ;;  %v321_v30 = vld [vmem:[#allocation2 + $0x40] sm:$0xff] }
  0xd8   : > { %v383_v61 = vld [vmem:[#allocation2 + $0xa] sm:$0xff]  ;;  %v497_v17 = vsel %vm333_vm3, %v490_v58, 0.0  ;;  %v504_v18 = vsel %vm333_vm3, %v491_v59, 0.0  ;;  %v359_v20 = vmul.f32 %v351_v55, %v5252_v33  ;;  %v354_v37 = vld [vmem:[#allocation2 + $0x41] sm:$0xff] }
  0xd9   : > { %v448_v62 = vld [vmem:[#allocation2 + $0x3] sm:$0xff]  ;;  %v449_v63 = vld [vmem:[#allocation2 + $0xb] sm:$0xff]  ;;  %v341_v19 = vsel %vm333_vm3, %v326_v60, 0.0  ;;  %v391_v23 = vmul.f32 %v383_v61, %v5252_v33  ;;  %v562_v49 = vpop.permute.xlu1 %561  ;;  %v560_v50 = vpop.permute.xlu0 %559 }
  0xda   : > { %v480_v11 = vld [vmem:[#allocation2 + $0x4] sm:$0xff]  ;;  %v481_v12 = vld [vmem:[#allocation2 + $0xc] sm:$0xff]  ;;  %v5293_v22 = vadd.f32 %v342_v57, %v341_v19  ;;  %v456_v24 = vmul.f32 %v448_v62, %v5235_v14  ;;  %v457_v25 = vmul.f32 %v449_v63, %v5252_v33  ;;  %v373_v31 = vsel %vm333_vm3, %v359_v20, 0.0  ;;  %583 = vst.msk [vmem:[#allocation2 + $0x2a] sm:$0xff] %vm579_vm5, %v562_v49  ;;  %582 = vst.msk [vmem:[#allocation2 + $0x22] sm:$0xff] %vm579_vm5, %v560_v50 }
  0xdb   : > { %532 = vst.msk [vmem:[#allocation2 + $0xa] sm:$0xff] %vm530_vm4, %v9205_v4  ;;  %531 = vst.msk [vmem:[#allocation2 + $0x2] sm:$0xff] %vm530_vm4, %v9205_v4  ;;  %v387_v21 = vld [vmem:[#allocation2 + $0x4a] sm:$0xff]  ;;  %v488_v32 = vmul.f32 %v480_v11, %v5235_v14  ;;  %v489_v34 = vmul.f32 %v481_v12, %v5252_v33  ;;  %v5307_v39 = vadd.f32 %v374_v7, %v373_v31  ;;  %v405_v40 = vsel %vm333_vm3, %v391_v23, 0.0  ;;  %v386_v46 = vld [vmem:[#allocation2 + $0x42] sm:$0xff] }
  0xdc   : > { %v453_v26 = vld [vmem:[#allocation2 + $0x4b] sm:$0xff]  ;;  %581 = vst.msk [vmem:[#allocation2 + $0xa] sm:$0xff] %vm579_vm5, %v558_v15  ;;  %580 = vst.msk [vmem:[#allocation2 + $0x2] sm:$0xff] %vm579_vm5, %v556_v16  ;;  %v395_v35 = vmul.f32 %v387_v21, %v5273_v56  ;;  %v464_v41 = vsel %vm333_vm3, %v456_v24, 0.0  ;;  %v471_v45 = vsel %vm333_vm3, %v457_v25, 0.0  ;;  %v5312_v47 = vld [vmem:[#allocation2 + $0x43] sm:$0xff]  ;;  %v407_v51 = vadd.f32 %v406_v8, %v405_v40 }
  0xdd   : > { %v485_v27 = vld [vmem:[#allocation2 + $0x4c] sm:$0xff]  ;;  %v5314_v48 = vld [vmem:[#allocation2 + $0x44] sm:$0xff]  ;;  %v5316_v52 = vadd.f32 %v465_v9, %v464_v41  ;;  %v473_v53 = vadd.f32 %v472_v10, %v471_v45  ;;  %v496_v54 = vsel %vm333_vm3, %v488_v32, 0.0  ;;  %v503_v61 = vsel %vm333_vm3, %v489_v34, 0.0  ;;  %v5351_v24 = vld [vmem:[%s5133_s23 + $0x38] sm:$0xff] }
  0xde   : > { %v322_v36 = vld [vmem:[#allocation2 + $0x48] sm:$0xff]  ;;  %v323_v59 = vld [vmem:[#allocation2 + $0x60] sm:$0xff]  ;;  %v5325_v60 = vadd.f32 %v497_v17, %v496_v54  ;;  %v408_v62 = vsel %vm333_vm3, %v395_v35, 0.0  ;;  %v461_v63 = vmul.f32 %v453_v26, %v5273_v56  ;;  %v505_v10 = vadd.f32 %v504_v18, %v503_v61  ;;  %9244 = vst [vmem:[#allocation18_spill] sm:$0xff] %v5351_v24  ;;  %v5354_v25 = vld [vmem:[%s5133_s23 + $0x30] sm:$0xff]  ;;  %v566_v26 = vpop.permute.xlu1 %565 }
  0xdf   : > { %v355_v38 = vld [vmem:[#allocation2 + $0x49] sm:$0xff]  ;;  %v5332_v8 = vld [vmem:[#allocation2 + $0x61] sm:$0xff]  ;;  %v5336_v11 = vadd.f32 %v408_v62, %v407_v51  ;;  %v493_v12 = vmul.f32 %v485_v27, %v5273_v56  ;;  %v329_v15 = vmul.f32 %v321_v30, %v5299_v28  ;;  %v330_v21 = vmul.f32 %v322_v36, %v5273_v56  ;;  %9245 = vst [vmem:[#allocation19_spill] sm:$0xff] %v5354_v25  ;;  %v564_v27 = vpop.permute.xlu0 %563 }
  0xe0   : > { %535 = vst.msk [vmem:[#allocation2 + $0x42] sm:$0xff] %vm530_vm4, %v9205_v4  ;;  %536 = vst.msk [vmem:[#allocation2 + $0x4a] sm:$0xff] %vm530_vm4, %v9205_v4  ;;  %v389_v55 = vld [vmem:[#allocation2 + $0x6a] sm:$0xff]  ;;  %v5340_v16 = vld [vmem:[#allocation2 + $0x62] sm:$0xff]  ;;  %v474_v20 = vsel %vm333_vm3, %v461_v63, 0.0  ;;  %v362_v23 = vmul.f32 %v354_v37, %v5299_v28  ;;  %v363_v18 = vmul.f32 %v355_v38, %v5273_v56  ;;  %v394_v34 = vmul.f32 %v386_v46, %v5299_v28 }
  0xe1   : > { %v455_v57 = vld [vmem:[#allocation2 + $0x6b] sm:$0xff]  ;;  %v5342_v17 = vld [vmem:[#allocation2 + $0x63] sm:$0xff]  ;;  %v475_v30 = vadd.f32 %v474_v20, %v473_v53  ;;  %v506_v31 = vsel %vm333_vm3, %v493_v12, 0.0  ;;  %v337_v32 = vsel %vm333_vm3, %v329_v15, 0.0  ;;  %585 = vst.msk [vmem:[#allocation2 + $0x4a] sm:$0xff] %vm579_vm5, %v566_v26  ;;  %584 = vst.msk [vmem:[#allocation2 + $0x42] sm:$0xff] %vm579_vm5, %v564_v27  ;;  %v331_v27 = vmul.f32 %v323_v59, %v5354_v25 }
  0xe2   : > { %v487_v58 = vld [vmem:[#allocation2 + $0x6c] sm:$0xff]  ;;  %v5344_v19 = vld [vmem:[#allocation2 + $0x64] sm:$0xff]  ;;  %v507_v38 = vadd.f32 %v506_v31, %v505_v10  ;;  %v338_v40 = vadd.f32 %v337_v32, %v5257_v42  ;;  %v344_v41 = vsel %vm333_vm3, %v330_v21, 0.0  ;;  %v369_v45 = vsel %vm333_vm3, %v362_v23, 0.0  ;;  %v570_v23 = vpop.permute.xlu1 %569 }
  0xe3   : > { %v5330_v7 = vld [vmem:[#allocation2 + $0x68] sm:$0xff]  ;;  %v5374_v49 = vld [vmem:[#allocation2] sm:$0xff]  ;;  %v345_v51 = vadd.f32 %v344_v41, %v5293_v22  ;;  %v370_v53 = vadd.f32 %v369_v45, %v5259_v43  ;;  %v376_v54 = vsel %vm333_vm3, %v363_v18, 0.0  ;;  %v401_v61 = vsel %vm333_vm3, %v394_v34, 0.0  ;;  %v568_v18 = vpop.permute.xlu0 %567 }
  0xe4   : > { %v5334_v9 = vld [vmem:[#allocation2 + $0x69] sm:$0xff]  ;;  %v5378_v50 = vld [vmem:[#allocation2 + $0x1] sm:$0xff]  ;;  %v5391_v10 = vadd.f32 %v376_v54, %v5307_v39  ;;  %v5394_v12 = vadd.f32 %v401_v61, %v5261_v44  ;;  %v460_v22 = vmul.f32 %v5312_v47, %v5299_v28  ;;  %v492_v43 = vmul.f32 %v5314_v48, %v5299_v28 }
  0xe5   : > { %537 = vst.msk [vmem:[#allocation2 + $0x62] sm:$0xff] %vm530_vm4, %v9205_v4  ;;  %538 = vst.msk [vmem:[#allocation2 + $0x6a] sm:$0xff] %vm530_vm4, %v9205_v4  ;;  %v5363_v35 = vld [vmem:[#allocation2 + $0xa] sm:$0xff]  ;;  %v5386_v42 = vld [vmem:[#allocation2 + $0x2] sm:$0xff]  ;;  %v397_v39 = vmul.f32 %v389_v55, %v5351_v24  ;;  %v463_v26 = vmul.f32 %v455_v57, %v5351_v24  ;;  %v495_v44 = vmul.f32 %v487_v58, %v5351_v24 }
  0xe6   : > { %v5365_v36 = vld [vmem:[#allocation2 + $0xb] sm:$0xff]  ;;  %v5388_v63 = vld [vmem:[#allocation2 + $0x3] sm:$0xff]  ;;  %587 = vst.msk [vmem:[#allocation2 + $0x6a] sm:$0xff] %vm579_vm5, %v570_v23  ;;  %586 = vst.msk [vmem:[#allocation2 + $0x62] sm:$0xff] %vm579_vm5, %v568_v18  ;;  %v467_v55 = vsel %vm333_vm3, %v460_v22, 0.0  ;;  %v499_v57 = vsel %vm333_vm3, %v492_v43, 0.0 }
  0xe7   : > { %v5367_v37 = vld [vmem:[#allocation2 + $0xc] sm:$0xff]  ;;  %v5400_v15 = vld [vmem:[#allocation2 + $0x4] sm:$0xff]  ;;  %v5435_v34 = vadd.f32 %v467_v55, %v5316_v52  ;;  %v5438_v41 = vadd.f32 %v499_v57, %v5325_v60  ;;  %v410_v45 = vsel %vm333_vm3, %v397_v39, 0.0  ;;  %v508_v43 = vsel %vm333_vm3, %v495_v44, 0.0 }
  0xe8   : > { %v5376_v46 = vld [vmem:[#allocation2 + $0x8] sm:$0xff]  ;;  %v5416_v48 = vld [vmem:[#allocation2 + $0x20] sm:$0xff]  ;;  %v411_v61 = vadd.f32 %v410_v45, %v5336_v11  ;;  %v339_v52 = vsel %vm333_vm3, %v331_v27, 0.0  ;;  %v509_v60 = vadd.f32 %v508_v43, %v507_v38  ;;  %v365_v39 = vmul.f32 %v5334_v9, %v5351_v24 }
  0xe9   : > { %v5384_v62 = vld [vmem:[#allocation2 + $0x9] sm:$0xff]  ;;  %v5428_v58 = vld [vmem:[#allocation2 + $0x21] sm:$0xff]  ;;  %v340_v23 = vadd.f32 %v339_v52, %v338_v40 }
  0xea   : > { %v5402_v20 = vld [vmem:[#allocation2 + $0x2a] sm:$0xff]  ;;  %817 = vst.msk [vmem:[#allocation2 + $0x2] sm:$0xff] %vm333_vm3, %v5155_v1  ;;  %818 = vst.msk [vmem:[#allocation2 + $0xa] sm:$0xff] %vm333_vm3, %v5165_v3  ;;  %v332_v1 = vmul.f32 %v5330_v7, %v5351_v24  ;;  %v364_v3 = vmul.f32 %v5332_v8, %v5354_v25  ;;  %v5432_v32 = vld [vmem:[#allocation2 + $0x22] sm:$0xff]  ;;  %v476_v7 = vsel %vm333_vm3, %v463_v26, 0.0  ;;  %vm432_vm8 = vcmp.ge.f32.partialorder %v411_v61, 0.0 }
  0xeb   : > { %v5404_v21 = vld [vmem:[#allocation2 + $0x2b] sm:$0xff]  ;;  %v5442_v54 = vld [vmem:[#allocation2 + $0x23] sm:$0xff]  ;;  %v477_v22 = vadd.f32 %v476_v7, %v475_v30  ;;  %v434_v11 = vmul.f32 0.1, %v411_v61  ;;  %vm522_vm10 = vcmp.ge.f32.partialorder %v509_v60, 0.0  ;;  %v378_v40 = vsel %vm333_vm3, %v365_v39, 0.0 }
  0xec   : > { %v5414_v47 = vld [vmem:[#allocation2 + $0x2c] sm:$0xff]  ;;  %v5444_v8 = vld [vmem:[#allocation2 + $0x24] sm:$0xff]  ;;  %v346_v18 = vsel %vm333_vm3, %v332_v1, 0.0  ;;  %v524_v26 = vmul.f32 0.1, %v509_v60  ;;  %vm414_vm11 = vcmp.ge.f32.partialorder %v340_v23, 0.0 }
  0xed   : > { %v5418_v31 = vld [vmem:[#allocation2 + $0x28] sm:$0xff]  ;;  %vm513_vm9 = vcmp.ge.f32.partialorder %v477_v22, 0.0  ;;  %v515_v30 = vmul.f32 0.1, %v477_v22  ;;  %v347_v44 = vadd.f32 %v346_v18, %v345_v51  ;;  %v436_v27 = vsel %vm432_vm8, %v411_v61, %v434_v11  ;;  %v1074_v61 = vpop.permute.xlu1 %1073 }
  0xee   : > { %v5430_v59 = vld [vmem:[#allocation2 + $0x29] sm:$0xff]  ;;  %4485 = vst.msk [vmem:[%s5148_s5 + $0xa8] sm:$0xff] %vm333_vm3, %v436_v27  ;;  %v526_v1 = vsel %vm522_vm10, %v509_v60, %v524_v26  ;;  %v379_v51 = vadd.f32 %v378_v40, %v5391_v10  ;;  %v416_v43 = vmul.f32 0.1, %v340_v23 }
  0xef   : > { %819 = vst.msk [vmem:[#allocation2 + $0x22] sm:$0xff] %vm333_vm3, %v5152_v0  ;;  %820 = vst.msk [vmem:[#allocation2 + $0x2a] sm:$0xff] %vm333_vm3, %v5162_v2  ;;  %v371_v0 = vsel %vm333_vm3, %v364_v3, 0.0  ;;  %v517_v2 = vsel %vm513_vm9, %v477_v22, %v515_v30  ;;  %v396_v3 = vmul.f32 %v5340_v16, %v5354_v25  ;;  %v1072_v22 = vpop.permute.xlu0 %1071  ;;  %vm415_vm12 = vcmp.ge.f32.partialorder %v347_v44, 0.0 }
  0xf0   : > { %v372_v38 = vadd.f32 %v371_v0, %v370_v53  ;;  %4487 = vst.msk [vmem:[%s5148_s5 + $0xf8] sm:$0xff] %vm333_vm3, %v517_v2  ;;  %4489 = vst.msk [vmem:[%s5148_s5 + $0x148] sm:$0xff] %vm333_vm3, %v526_v1  ;;  %v417_v52 = vmul.f32 0.1, %v347_v44  ;;  %vm423_vm14 = vcmp.ge.f32.partialorder %v379_v51, 0.0  ;;  %v418_v39 = vsel %vm414_vm11, %v340_v23, %v416_v43  ;;  %v5512_v43 = vld [vmem:[#allocation2 + $0x40] sm:$0xff] }
  0xf1   : > { %v5458_v55 = vld [vmem:[#allocation2] sm:$0xff]  ;;  %v5460_v9 = vld [vmem:[#allocation2 + $0x8] sm:$0xff]  ;;  %v403_v10 = vsel %vm333_vm3, %v396_v3, 0.0  ;;  %v425_v60 = vmul.f32 0.1, %v379_v51  ;;  %v462_v30 = vmul.f32 %v5342_v17, %v5354_v25  ;;  %420 = vst.msk [vmem:[%s5148_s5] sm:$0xff] %vm333_vm3, %v418_v39  ;;  %v669_v17 = vmul.f32 %v5363_v35, %v5252_v33 }
  0xf2   : > { %v5462_v57 = vld [vmem:[#allocation2 + $0x1] sm:$0xff]  ;;  %v5471_v53 = vld [vmem:[#allocation2 + $0x9] sm:$0xff]  ;;  %vm422_vm13 = vcmp.ge.f32.partialorder %v372_v38, 0.0  ;;  %v424_v16 = vmul.f32 0.1, %v372_v38  ;;  %v404_v18 = vadd.f32 %v403_v10, %v5394_v12  ;;  %v419_v11 = vsel %vm415_vm12, %v347_v44, %v417_v52  ;;  %9246 = vst [vmem:[#allocation20_spill] sm:$0xff] %v5512_v43 }
  0xf3   : > { %v5473_v45 = vld [vmem:[#allocation2 + $0x2] sm:$0xff]  ;;  %v5475_v7 = vld [vmem:[#allocation2 + $0xa] sm:$0xff]  ;;  %421 = vst.msk [vmem:[%s5148_s5 + $0x8] sm:$0xff] %vm333_vm3, %v419_v11  ;;  %v427_v40 = vsel %vm423_vm14, %v379_v51, %v425_v60  ;;  %v494_v12 = vmul.f32 %v5344_v19, %v5354_v25  ;;  %v469_v60 = vsel %vm333_vm3, %v462_v30, 0.0  ;;  %v736_v39 = vmul.f32 %v5365_v36, %v5252_v33 }
  0xf4   : > { %v5484_v26 = vld [vmem:[#allocation2 + $0x3] sm:$0xff]  ;;  %v5486_v0 = vld [vmem:[#allocation2 + $0xb] sm:$0xff]  ;;  %v426_v2 = vsel %vm422_vm13, %v372_v38, %v424_v16  ;;  %4483 = vst.msk [vmem:[%s5148_s5 + $0x58] sm:$0xff] %vm333_vm3, %v427_v40  ;;  %vm431_vm15 = vcmp.ge.f32.partialorder %v404_v18, 0.0  ;;  %v433_v16 = vmul.f32 0.1, %v404_v18  ;;  %v768_v36 = vmul.f32 %v5367_v37, %v5252_v33 }
  0xf5   : > { %v5488_v27 = vld [vmem:[#allocation2 + $0x4] sm:$0xff]  ;;  %v5498_v23 = vld [vmem:[#allocation2 + $0xc] sm:$0xff]  ;;  %4482 = vst.msk [vmem:[%s5148_s5 + $0x50] sm:$0xff] %vm333_vm3, %v426_v2  ;;  %v470_v2 = vadd.f32 %v469_v60, %v5435_v34  ;;  %v501_v40 = vsel %vm333_vm3, %v494_v12, 0.0  ;;  %v5539_v30 = vsel %vm333_vm3, %v669_v17, 0.0  ;;  %v5553_v17 = vsel %vm333_vm3, %v736_v39, 0.0 }
  0xf6   : > { %1047 = vst.msk [vmem:[#allocation2 + $0x2] sm:$0xff] %vm1046_vm6, %v9205_v4  ;;  %v5502_v44 = vld [vmem:[#allocation2 + $0x20] sm:$0xff]  ;;  %v5504_v1 = vld [vmem:[#allocation2 + $0x28] sm:$0xff]  ;;  %1048 = vst.msk [vmem:[#allocation2 + $0xa] sm:$0xff] %vm1046_vm6, %v9205_v4  ;;  %v435_v34 = vsel %vm431_vm15, %v404_v18, %v433_v16  ;;  %v502_v12 = vadd.f32 %v501_v40, %v5438_v41  ;;  %v604_v37 = vmul.f32 %v5374_v49, %v5235_v14  ;;  %v5566_v18 = vsel %vm333_vm3, %v768_v36, 0.0 }
  0xf7   : > { %v5506_v3 = vld [vmem:[#allocation2 + $0x4a] sm:$0xff]  ;;  %v5516_v35 = vld [vmem:[#allocation2 + $0x41] sm:$0xff]  ;;  %1096 = vst.msk [vmem:[#allocation2 + $0x2] sm:$0xff] %vm1095_vm7, %v1072_v22  ;;  %1097 = vst.msk [vmem:[#allocation2 + $0xa] sm:$0xff] %vm1095_vm7, %v1074_v61  ;;  %v1078_v22 = vpop.permute.xlu1 %1077  ;;  %vm512_vm1 = vcmp.ge.f32.partialorder %v470_v2, 0.0  ;;  %v605_v41 = vmul.f32 %v5376_v46, %v5252_v33  ;;  %v9251_v16 = vmov 0.0   ;;  %v636_v46 = vmul.f32 %v5378_v50, %v5235_v14 }
  0xf8   : > { %v5508_v38 = vld [vmem:[#allocation2 + $0x4b] sm:$0xff]  ;;  %9248 = vst [vmem:[#allocation22_spill] sm:$0xff] %v5516_v35  ;;  %v5520_v10 = vld [vmem:[#allocation2 + $0x42] sm:$0xff]  ;;  %4484 = vst.msk [vmem:[%s5148_s5 + $0xa0] sm:$0xff] %vm333_vm3, %v435_v34  ;;  %v514_v61 = vmul.f32 0.1, %v470_v2 }
  0xf9   : > { %v5510_v51 = vld [vmem:[#allocation2 + $0x4c] sm:$0xff]  ;;  %9250 = vst [vmem:[#allocation24_spill] sm:$0xff] %v5520_v10  ;;  %v5531_v11 = vld [vmem:[#allocation2 + $0x21] sm:$0xff]  ;;  %v816_v34 = vld [vmem:[%s5139_s30 + $0x38] sm:$0xff]  ;;  %vm521_vm2 = vcmp.ge.f32.partialorder %v502_v12, 0.0  ;;  %v5581_v36 = vsel %vm333_vm3, %v604_v37, 0.0 }
  0xfa   : > { %v5514_v19 = vld [vmem:[#allocation2 + $0x48] sm:$0xff]  ;;  %v815_v40 = vld [vmem:[%s5139_s30 + $0x30] sm:$0xff]  ;;  %v523_v43 = vmul.f32 0.1, %v502_v12  ;;  %v516_v37 = vsel %vm512_vm1, %v470_v2, %v514_v61  ;;  %v5597_v28 = vsel %vm333_vm3, %v605_v41, 0.0  ;;  %v5613_v2 = vsel %vm333_vm3, %v636_v46, 0.0 }
  0xfb   : > { %9247 = vst [vmem:[#allocation21_spill] sm:$0xff] %v5514_v19  ;;  %v5518_v52 = vld [vmem:[#allocation2 + $0x49] sm:$0xff]  ;;  %4486 = vst.msk [vmem:[%s5148_s5 + $0xf0] sm:$0xff] %vm333_vm3, %v516_v37 }
  0xfc   : > { %9249 = vst [vmem:[#allocation23_spill] sm:$0xff] %v5518_v52  ;;  %v5533_v25 = vld [vmem:[#allocation2 + $0x29] sm:$0xff]  ;;  %v1076_v52 = vpop.permute.xlu0 %1075 }
  0xfd   : > { %v5543_v24 = vld [vmem:[#allocation2 + $0x22] sm:$0xff]  ;;  %v5545_v4 = vld [vmem:[#allocation2 + $0x2a] sm:$0xff] }
  0xfe   : > { %v5547_v10 = vld [vmem:[#allocation2 + $0x23] sm:$0xff]  ;;  %v5557_v60 = vld [vmem:[#allocation2 + $0x2b] sm:$0xff] }
  0xff   : > { %v5559_v35 = vld [vmem:[#allocation2 + $0x24] sm:$0xff]  ;;  %v5561_v19 = vld [vmem:[#allocation2 + $0x2c] sm:$0xff] }
 0x100   : > { %1049 = vst.msk [vmem:[#allocation2 + $0x22] sm:$0xff] %vm1046_vm6, %v9251_v16  ;;  %1050 = vst.msk [vmem:[#allocation2 + $0x2a] sm:$0xff] %vm1046_vm6, %v9251_v16  ;;  %v5574_v49 = vld [vmem:[#allocation2 + $0x43] sm:$0xff]  ;;  %v5603_v50 = vld [vmem:[#allocation2 + $0x6c] sm:$0xff] }
 0x101   : > { %9252 = vst [vmem:[#allocation25_spill] sm:$0xff] %v5574_v49  ;;  %v5576_v39 = vld [vmem:[#allocation2 + $0x44] sm:$0xff]  ;;  %1099 = vst.msk [vmem:[#allocation2 + $0x2a] sm:$0xff] %vm1095_vm7, %v1078_v22  ;;  %v735_v22 = vmul.f32 %v5388_v63, %v5235_v14  ;;  %v841_v63 = vmul.f32 %v5458_v55, %v5235_v14 }
 0x102   : > { %9253 = vst [vmem:[#allocation26_spill] sm:$0xff] %v5576_v39  ;;  %821 = vst.msk [vmem:[#allocation2 + $0x42] sm:$0xff] %vm333_vm3, %v5199_v6  ;;  %v5589_v49 = vld [vmem:[#allocation2 + $0x6a] sm:$0xff]  ;;  %v637_v6 = vmul.f32 %v5384_v62, %v5252_v33  ;;  %v767_v62 = vmul.f32 %v5400_v15, %v5235_v14  ;;  %v5623_v41 = vld [vmem:[#allocation2 + $0x62] sm:$0xff]  ;;  %v842_v15 = vmul.f32 %v5460_v9, %v5252_v33 }
 0x103   : > { %822 = vst.msk [vmem:[#allocation2 + $0x4a] sm:$0xff] %vm333_vm3, %v5196_v5  ;;  %9254 = vst [vmem:[#allocation27_spill] sm:$0xff] %v5589_v49  ;;  %v5591_v39 = vld [vmem:[#allocation2 + $0x6b] sm:$0xff]  ;;  %v668_v5 = vmul.f32 %v5386_v42, %v5235_v14  ;;  %v5605_v49 = vld [vmem:[#allocation2 + $0x60] sm:$0xff] }
 0x104   : > { %9255 = vst [vmem:[#allocation28_spill] sm:$0xff] %v5591_v39  ;;  %1098 = vst.msk [vmem:[#allocation2 + $0x22] sm:$0xff] %vm1095_vm7, %v1076_v52  ;;  %v5607_v39 = vld [vmem:[#allocation2 + $0x68] sm:$0xff]  ;;  %v525_v52 = vsel %vm521_vm2, %v502_v12, %v523_v43  ;;  %v5628_v37 = vsel %vm333_vm3, %v637_v6, 0.0  ;;  %v873_v6 = vmul.f32 %v5462_v57, %v5235_v14  ;;  %v5665_v57 = vsel %vm333_vm3, %v842_v15, 0.0 }
 0x105   : > { %9256 = vst [vmem:[#allocation29_spill] sm:$0xff] %v5603_v50  ;;  %9257 = vst [vmem:[#allocation30_spill] sm:$0xff] %v5605_v49  ;;  %v5619_v42 = vld [vmem:[#allocation2 + $0x61] sm:$0xff]  ;;  %v5621_v61 = vld [vmem:[#allocation2 + $0x69] sm:$0xff]  ;;  %v5631_v43 = vsel %vm333_vm3, %v668_v5, 0.0  ;;  %v874_v5 = vmul.f32 %v5471_v53, %v5252_v33  ;;  %v905_v53 = vmul.f32 %v5473_v45, %v5235_v14  ;;  %v972_v15 = vmul.f32 %v5484_v26, %v5235_v14 }
 0x106   : > { %9258 = vst [vmem:[#allocation31_spill] sm:$0xff] %v5607_v39  ;;  %9259 = vst [vmem:[#allocation32_spill] sm:$0xff] %v5619_v42  ;;  %v5637_v12 = vld [vmem:[#allocation2 + $0x63] sm:$0xff]  ;;  %v5655_v9 = vld [vmem:[#allocation2 + $0xb] sm:$0xff]  ;;  %v973_v45 = vmul.f32 %v5486_v0, %v5252_v33  ;;  %v1005_v26 = vmul.f32 %v5498_v23, %v5252_v33  ;;  %v638_v50 = vmul.f32 %v5428_v58, %v5232_v13 }
 0x107   : > { %9260 = vst [vmem:[#allocation33_spill] sm:$0xff] %v5621_v61  ;;  %9261 = vst [vmem:[#allocation34_spill] sm:$0xff] %v5623_v41  ;;  %v5639_v46 = vld [vmem:[#allocation2 + $0x64] sm:$0xff]  ;;  %v5642_v41 = vsel %vm333_vm3, %v735_v22, 0.0 }
 0x108   : > { %4488 = vst.msk [vmem:[%s5148_s5 + $0x140] sm:$0xff] %vm333_vm3, %v525_v52  ;;  %9262 = vst [vmem:[#allocation35_spill] sm:$0xff] %v5637_v12  ;;  %v5645_v52 = vsel %vm333_vm3, %v767_v62, 0.0  ;;  %v5653_v55 = vld [vmem:[#allocation2 + $0xa] sm:$0xff]  ;;  %v5659_v22 = vld [vmem:[#allocation2] sm:$0xff]  ;;  %v5662_v62 = vsel %vm333_vm3, %v841_v63, 0.0 }
 0x109   : > { %9263 = vst [vmem:[#allocation36_spill] sm:$0xff] %v5639_v46  ;;  %823 = vst.msk [vmem:[#allocation2 + $0x62] sm:$0xff] %vm333_vm3, %v815_v40  ;;  %v5657_v46 = vld [vmem:[#allocation2 + $0xc] sm:$0xff]  ;;  %v906_v40 = vmul.f32 %v5475_v7, %v5252_v33  ;;  %v5681_v63 = vsel %vm333_vm3, %v874_v5, 0.0  ;;  %v5689_v7 = vld [vmem:[#allocation2 + $0x3] sm:$0xff]  ;;  %v1004_v5 = vmul.f32 %v5488_v27, %v5235_v14  ;;  %v5717_v14 = vsel %vm333_vm3, %v973_v45, 0.0 }
 0x10a   : > { %824 = vst.msk [vmem:[#allocation2 + $0x6a] sm:$0xff] %vm333_vm3, %v816_v34  ;;  %9264 = vst [vmem:[#allocation37_spill] sm:$0xff] %v5653_v55  ;;  %v5671_v34 = vld [vmem:[#allocation2 + $0x8] sm:$0xff]  ;;  %v5703_v0 = vld [vmem:[#allocation2 + $0x40] sm:$0xff]  ;;  %v671_v33 = vmul.f32 %v5402_v20, %v5246_v29  ;;  %v738_v27 = vmul.f32 %v5404_v21, %v5246_v29  ;;  %v770_v45 = vmul.f32 %v5414_v47, %v5246_v29 }
 0x10b   : > { %9265 = vst [vmem:[#allocation38_spill] sm:$0xff] %v5655_v9  ;;  %9266 = vst [vmem:[#allocation39_spill] sm:$0xff] %v5657_v46  ;;  %v5673_v55 = vld [vmem:[#allocation2 + $0x1] sm:$0xff]  ;;  %v5675_v9 = vld [vmem:[#allocation2 + $0x9] sm:$0xff]  ;;  %v5730_v61 = vsel %vm333_vm3, %v1004_v5, 0.0  ;;  %v606_v20 = vmul.f32 %v5416_v48, %v5232_v13 }
 0x10c   : > { %9267 = vst [vmem:[#allocation40_spill] sm:$0xff] %v5659_v22  ;;  %9268 = vst [vmem:[#allocation41_spill] sm:$0xff] %v5671_v34  ;;  %v5678_v22 = vsel %vm333_vm3, %v873_v6, 0.0  ;;  %v5687_v46 = vld [vmem:[#allocation2 + $0x2] sm:$0xff]  ;;  %v5697_v6 = vsel %vm333_vm3, %v906_v40, 0.0  ;;  %v5714_v40 = vsel %vm333_vm3, %v972_v15, 0.0 }
 0x10d   : > { %9269 = vst [vmem:[#allocation42_spill] sm:$0xff] %v5673_v55  ;;  %9270 = vst [vmem:[#allocation43_spill] sm:$0xff] %v5675_v9  ;;  %v5691_v34 = vld [vmem:[#allocation2 + $0x4] sm:$0xff]  ;;  %v1080_v55 = vpop.permute.xlu0 %1079  ;;  %v5694_v9 = vsel %vm333_vm3, %v905_v53, 0.0  ;;  %v1082_v53 = vpop.permute.xlu1 %1081  ;;  %v5733_v15 = vsel %vm333_vm3, %v1005_v26, 0.0  ;;  %v684_v49 = vsel %vm333_vm3, %v671_v33, 0.0  ;;  %v607_v26 = vmul.f32 %v5418_v31, %v5246_v29 }
 0x10e   : > { %9271 = vst [vmem:[#allocation44_spill] sm:$0xff] %v5687_v46  ;;  %9272 = vst [vmem:[#allocation45_spill] sm:$0xff] %v5689_v7  ;;  %v5705_v46 = vld [vmem:[#allocation2 + $0x48] sm:$0xff]  ;;  %v751_v5 = vsel %vm333_vm3, %v738_v27, 0.0  ;;  %v5756_v48 = vadd.f32 %v684_v49, %v5539_v30  ;;  %v783_v33 = vsel %vm333_vm3, %v770_v45, 0.0  ;;  %v613_v27 = vsel %vm333_vm3, %v606_v20, 0.0 }
 0x10f   : > { %9273 = vst [vmem:[#allocation46_spill] sm:$0xff] %v5691_v34  ;;  %v5707_v7 = vld [vmem:[#allocation2 + $0x41] sm:$0xff]  ;;  %1326 = vst.msk [vmem:[#allocation2 + $0x2] sm:$0xff] %vm1325_vm0, %v9251_v16  ;;  %v5723_v23 = vld [vmem:[#allocation2 + $0x49] sm:$0xff]  ;;  %v5773_v30 = vadd.f32 %v783_v33, %v5566_v18  ;;  %v620_v49 = vsel %vm333_vm3, %v607_v26, 0.0  ;;  %v639_v45 = vmul.f32 %v5430_v59, %v5246_v29  ;;  %v670_v26 = vmul.f32 %v5432_v32, %v5232_v13 }
 0x110   : > { %1327 = vst.msk [vmem:[#allocation2 + $0xa] sm:$0xff] %vm1325_vm0, %v9251_v16  ;;  %v5725_v34 = vld [vmem:[#allocation2 + $0x42] sm:$0xff]  ;;  %v5727_v12 = vld [vmem:[#allocation2 + $0x4a] sm:$0xff]  ;;  %v5789_v18 = vadd.f32 %v620_v49, %v5597_v28  ;;  %v737_v59 = vmul.f32 %v5442_v54, %v5232_v13  ;;  %v843_v32 = vmul.f32 %v5502_v44, %v5232_v13 }
 0x111   : > { %v5739_v42 = vld [vmem:[#allocation2 + $0x43] sm:$0xff]  ;;  %v5741_v21 = vld [vmem:[#allocation2 + $0x4b] sm:$0xff]  ;;  %v652_v28 = vsel %vm333_vm3, %v639_v45, 0.0 }
 0x112   : > { %v5743_v39 = vld [vmem:[#allocation2 + $0x44] sm:$0xff]  ;;  %v5751_v47 = vld [vmem:[#allocation2 + $0x4c] sm:$0xff]  ;;  %v5823_v45 = vadd.f32 %v652_v28, %v5628_v37  ;;  %v744_v44 = vsel %vm333_vm3, %v737_v59, 0.0 }
 0x113   : > { %9274 = vst [vmem:[#allocation47_spill] sm:$0xff] %v5743_v39  ;;  %9275 = vst [vmem:[#allocation48_spill] sm:$0xff] %v5751_v47  ;;  %v5759_v39 = vadd.f32 %v751_v5, %v5553_v17  ;;  %v5765_v31 = vld [vmem:[#allocation2 + $0x60] sm:$0xff]  ;;  %v5767_v58 = vld [vmem:[#allocation2 + $0x68] sm:$0xff]  ;;  %v5776_v17 = vadd.f32 %v613_v27, %v5581_v36  ;;  %v645_v36 = vsel %vm333_vm3, %v638_v50, 0.0  ;;  %v769_v50 = vmul.f32 %v5444_v8, %v5232_v13 }
 0x114   : > { %1051 = vst.msk [vmem:[#allocation2 + $0x42] sm:$0xff] %vm1046_vm6, %v9251_v16  ;;  %1052 = vst.msk [vmem:[#allocation2 + $0x4a] sm:$0xff] %vm1046_vm6, %v9251_v16  ;;  %v5769_v47 = vld [vmem:[#allocation2 + $0x61] sm:$0xff]  ;;  %v5781_v20 = vld [vmem:[#allocation2 + $0x69] sm:$0xff]  ;;  %v677_v8 = vsel %vm333_vm3, %v670_v26, 0.0  ;;  %v5842_v26 = vadd.f32 %v744_v44, %v5642_v41  ;;  %v975_v44 = vmul.f32 %v5557_v60, %v5246_v29 }
 0x115   : > { %9276 = vst [vmem:[#allocation49_spill] sm:$0xff] %v5767_v58  ;;  %1100 = vst.msk [vmem:[#allocation2 + $0x42] sm:$0xff] %vm1095_vm7, %v1080_v55  ;;  %v5783_v5 = vld [vmem:[#allocation2 + $0x62] sm:$0xff]  ;;  %v5785_v58 = vld [vmem:[#allocation2 + $0x6a] sm:$0xff]  ;;  %v1084_v55 = vpop.permute.xlu0 %1083  ;;  %v5839_v37 = vadd.f32 %v677_v8, %v5631_v43  ;;  %v776_v59 = vsel %vm333_vm3, %v769_v50, 0.0  ;;  %v875_v50 = vmul.f32 %v5531_v11, %v5232_v13  ;;  %v974_v8 = vmul.f32 %v5547_v10, %v5232_v13 }
 0x116   : > { %9277 = vst [vmem:[#allocation50_spill] sm:$0xff] %v5783_v5  ;;  %9278 = vst [vmem:[#allocation51_spill] sm:$0xff] %v5785_v58  ;;  %v5796_v33 = vld [vmem:[#allocation2 + $0x63] sm:$0xff]  ;;  %v5798_v27 = vld [vmem:[#allocation2 + $0x6b] sm:$0xff]  ;;  %v1086_v58 = vpop.permute.xlu1 %1085 }
 0x117   : > { %1101 = vst.msk [vmem:[#allocation2 + $0x4a] sm:$0xff] %vm1095_vm7, %v1082_v53  ;;  %9279 = vst [vmem:[#allocation52_spill] sm:$0xff] %v5798_v27  ;;  %v5800_v5 = vld [vmem:[#allocation2 + $0x64] sm:$0xff]  ;;  %v5803_v53 = vadd.f32 %v645_v36, %v5613_v2  ;;  %v5810_v49 = vld [vmem:[#allocation2 + $0x6c] sm:$0xff]  ;;  %v844_v36 = vmul.f32 %v5504_v1, %v5246_v29  ;;  %v850_v1 = vsel %vm333_vm3, %v843_v32, 0.0  ;;  %v882_v11 = vsel %vm333_vm3, %v875_v50, 0.0 }
 0x118   : > { %9280 = vst [vmem:[#allocation53_spill] sm:$0xff] %v5800_v5  ;;  %1053 = vst.msk [vmem:[#allocation2 + $0x62] sm:$0xff] %vm1046_vm6, %v9251_v16  ;;  %v5814_v54 = vld [vmem:[#allocation2 + $0x2a] sm:$0xff]  ;;  %v5820_v2 = vld [vmem:[#allocation2 + $0x20] sm:$0xff]  ;;  %v5857_v43 = vadd.f32 %v850_v1, %v5662_v62  ;;  %v907_v62 = vmul.f32 %v5543_v24, %v5232_v13 }
 0x119   : > { %9281 = vst [vmem:[#allocation54_spill] sm:$0xff] %v5814_v54  ;;  %v5816_v5 = vld [vmem:[#allocation2 + $0x2b] sm:$0xff]  ;;  %9284 = vst [vmem:[#allocation57_spill] sm:$0xff] %v5820_v2  ;;  %v5846_v28 = vld [vmem:[#allocation2 + $0x22] sm:$0xff]  ;;  %v857_v41 = vsel %vm333_vm3, %v844_v36, 0.0 }
 0x11a   : > { %9282 = vst [vmem:[#allocation55_spill] sm:$0xff] %v5816_v5  ;;  %v5818_v27 = vld [vmem:[#allocation2 + $0x2c] sm:$0xff]  ;;  %1054 = vst.msk [vmem:[#allocation2 + $0x6a] sm:$0xff] %vm1046_vm6, %v9251_v16  ;;  %v5833_v5 = vld [vmem:[#allocation2 + $0x21] sm:$0xff]  ;;  %v5867_v32 = vadd.f32 %v857_v41, %v5665_v57  ;;  %v1006_v57 = vmul.f32 %v5559_v35, %v5232_v13  ;;  %v914_v10 = vsel %vm333_vm3, %v907_v62, 0.0 }
 0x11b   : > { %9283 = vst [vmem:[#allocation56_spill] sm:$0xff] %v5818_v27  ;;  %v5831_v54 = vld [vmem:[#allocation2 + $0x28] sm:$0xff]  ;;  %1102 = vst.msk [vmem:[#allocation2 + $0x62] sm:$0xff] %vm1095_vm7, %v1084_v55  ;;  %v5854_v55 = vadd.f32 %v776_v59, %v5645_v52  ;;  %v876_v52 = vmul.f32 %v5533_v25, %v5246_v29 }
 0x11c   : > { %9285 = vst [vmem:[#allocation58_spill] sm:$0xff] %v5831_v54  ;;  %v5835_v27 = vld [vmem:[#allocation2 + $0x29] sm:$0xff]  ;;  %1103 = vst.msk [vmem:[#allocation2 + $0x6a] sm:$0xff] %vm1095_vm7, %v1086_v58  ;;  %v908_v58 = vmul.f32 %v5545_v4, %v5246_v29  ;;  %v5884_v25 = vld [vmem:[#allocation2 + $0x40] sm:$0xff]  ;;  %v5891_v4 = vadd.f32 %v882_v11, %v5678_v22 }
 0x11d   : > { %v5848_v2 = vld [vmem:[#allocation2 + $0x23] sm:$0xff]  ;;  %v889_v1 = vsel %vm333_vm3, %v876_v52, 0.0  ;;  %v981_v52 = vsel %vm333_vm3, %v974_v8, 0.0 }
 0x11e   : > { %v5850_v54 = vld [vmem:[#allocation2 + $0x24] sm:$0xff]  ;;  %v921_v60 = vsel %vm333_vm3, %v908_v58, 0.0  ;;  %v5898_v13 = vld [vmem:[#allocation2 + $0x4c] sm:$0xff]  ;;  %v5903_v50 = vadd.f32 %v889_v1, %v5681_v63  ;;  %v988_v63 = vsel %vm333_vm3, %v975_v44, 0.0  ;;  %v1013_v1 = vsel %vm333_vm3, %v1006_v57, 0.0 }
 0x11f   : > { %1328 = vst.msk [vmem:[#allocation2 + $0x22] sm:$0xff] %vm1325_vm0, %v9251_v16  ;;  %1329 = vst.msk [vmem:[#allocation2 + $0x2a] sm:$0xff] %vm1325_vm0, %v9251_v16  ;;  %v5882_v36 = vld [vmem:[#allocation2 + $0x4a] sm:$0xff]  ;;  %v5886_v59 = vld [vmem:[#allocation2 + $0x41] sm:$0xff]  ;;  %v5909_v22 = vadd.f32 %v921_v60, %v5697_v6  ;;  %v5930_v6 = vadd.f32 %v988_v63, %v5717_v14  ;;  %v5933_v8 = vadd.f32 %v1013_v1, %v5730_v61 }
 0x120   : > { %9286 = vst [vmem:[#allocation59_spill] sm:$0xff] %v5886_v59  ;;  %v5888_v24 = vld [vmem:[#allocation2 + $0x42] sm:$0xff]  ;;  %v5896_v41 = vld [vmem:[#allocation2 + $0x4b] sm:$0xff]  ;;  %v5919_v59 = vadd.f32 %v981_v52, %v5714_v40  ;;  %v673_v40 = vmul.f32 %v5506_v3, %v5273_v56  ;;  %v772_v61 = vmul.f32 %v5510_v51, %v5273_v56  ;;  %v9295_v52 = vld [vmem:[#allocation20_spill] sm:$0xff] }
 0x121   : > { %9287 = vst [vmem:[#allocation60_spill] sm:$0xff] %v5888_v24  ;;  %v5900_v35 = vld [vmem:[#allocation2 + $0x48] sm:$0xff]  ;;  %v5906_v24 = vadd.f32 %v914_v10, %v5694_v9  ;;  %v1007_v9 = vmul.f32 %v5561_v19, %v5246_v29  ;;  %v740_v29 = vmul.f32 %v5508_v38, %v5273_v56  ;;  %v9294_v60 = vld [vmem:[#allocation17_spill] sm:$0xff] }
 0x122   : > { %v5912_v62 = vld [vmem:[#allocation2 + $0x49] sm:$0xff]  ;;  %v5941_v44 = vld [vmem:[#allocation2 + $0x60] sm:$0xff]  ;;  %v608_v63 = vmul.f32 %v9295_v52, %v9294_v60 }
 0x123   : > { %v5914_v58 = vld [vmem:[#allocation2 + $0x43] sm:$0xff]  ;;  %9291 = vst [vmem:[#allocation64_spill] sm:$0xff] %v5941_v44  ;;  %v1020_v14 = vsel %vm333_vm3, %v1007_v9, 0.0  ;;  %v5954_v38 = vld [vmem:[#allocation2 + $0x6b] sm:$0xff]  ;;  %v686_v9 = vsel %vm333_vm3, %v673_v40, 0.0 }
 0x124   : > { %9288 = vst [vmem:[#allocation61_spill] sm:$0xff] %v5914_v58  ;;  %v5916_v11 = vld [vmem:[#allocation2 + $0x44] sm:$0xff] }
 0x125   : > { %9289 = vst [vmem:[#allocation62_spill] sm:$0xff] %v5916_v11  ;;  %1330 = vst.msk [vmem:[#allocation2 + $0x42] sm:$0xff] %vm1325_vm0, %v9251_v16  ;;  %v5939_v19 = vld [vmem:[#allocation2 + $0x6a] sm:$0xff]  ;;  %v5943_v57 = vld [vmem:[#allocation2 + $0x61] sm:$0xff] }
 0x126   : > { %1331 = vst.msk [vmem:[#allocation2 + $0x4a] sm:$0xff] %vm1325_vm0, %v9251_v16  ;;  %9290 = vst [vmem:[#allocation63_spill] sm:$0xff] %v5939_v19  ;;  %v5945_v10 = vld [vmem:[#allocation2 + $0x62] sm:$0xff]  ;;  %v5956_v19 = vld [vmem:[#allocation2 + $0x6c] sm:$0xff] }
 0x127   : > { %9292 = vst [vmem:[#allocation65_spill] sm:$0xff] %v5943_v57  ;;  %9293 = vst [vmem:[#allocation66_spill] sm:$0xff] %v5945_v10  ;;  %v9296_v3 = vld [vmem:[#allocation21_spill] sm:$0xff]  ;;  %v5958_v44 = vld [vmem:[#allocation2 + $0x68] sm:$0xff]  ;;  %v5961_v57 = vadd.f32 %v1020_v14, %v5733_v15  ;;  %v753_v10 = vsel %vm333_vm3, %v740_v29, 0.0  ;;  %v785_v15 = vsel %vm333_vm3, %v772_v61, 0.0 }
 0x128   : > { %v609_v1 = vmul.f32 %v9296_v3, %v5273_v56  ;;  %9297 = vst [vmem:[#allocation17_spill] sm:$0xff] %v5956_v19  ;;  %9298 = vst [vmem:[#allocation20_spill] sm:$0xff] %v5958_v44  ;;  %v9299_v51 = vld [vmem:[#allocation22_spill] sm:$0xff]  ;;  %v687_v19 = vadd.f32 %v686_v9, %v5756_v48  ;;  %v754_v44 = vadd.f32 %v753_v10, %v5759_v39  ;;  %v615_v14 = vsel %vm333_vm3, %v608_v63, 0.0  ;;  %v9301_v48 = vld [vmem:[#allocation23_spill] sm:$0xff] }
 0x129   : > { %v640_v11 = vmul.f32 %v9299_v51, %v9294_v60  ;;  %v5967_v52 = vld [vmem:[#allocation2 + $0x69] sm:$0xff]  ;;  %v786_v40 = vadd.f32 %v785_v15, %v5773_v30  ;;  %v616_v29 = vadd.f32 %v615_v14, %v5776_v17  ;;  %v641_v9 = vmul.f32 %v9301_v48, %v5273_v56  ;;  %v9302_v61 = vld [vmem:[#allocation24_spill] sm:$0xff] }
 0x12a   : > { %v5969_v58 = vld [vmem:[#allocation2 + $0x63] sm:$0xff]  ;;  %v622_v51 = vsel %vm333_vm3, %v609_v1, 0.0  ;;  %v672_v63 = vmul.f32 %v9302_v61, %v9294_v60 }
 0x12b   : > { %v5971_v3 = vld [vmem:[#allocation2 + $0x64] sm:$0xff]  ;;  %v5987_v39 = vadd.f32 %v622_v51, %v5789_v18  ;;  %v647_v10 = vsel %vm333_vm3, %v640_v11, 0.0  ;;  %v654_v17 = vsel %vm333_vm3, %v641_v9, 0.0  ;;  %v845_v18 = vmul.f32 %v5703_v0, %v9294_v60 }
 0x12c   : > { %9300 = vst [vmem:[#allocation21_spill] sm:$0xff] %v5971_v3  ;;  %1332 = vst.msk [vmem:[#allocation2 + $0x62] sm:$0xff] %vm1325_vm0, %v9251_v16  ;;  %v9303_v3 = vld [vmem:[#allocation25_spill] sm:$0xff]  ;;  %v5995_v30 = vadd.f32 %v647_v10, %v5803_v53  ;;  %v9304_v1 = vld [vmem:[#allocation26_spill] sm:$0xff]  ;;  %v6003_v14 = vadd.f32 %v654_v17, %v5823_v45  ;;  %v679_v11 = vsel %vm333_vm3, %v672_v63, 0.0  ;;  %v909_v63 = vmul.f32 %v5725_v34, %v9294_v60 }
 0x12d   : > { %1333 = vst.msk [vmem:[#allocation2 + $0x6a] sm:$0xff] %vm1325_vm0, %v9251_v16  ;;  %v739_v16 = vmul.f32 %v9303_v3, %v9294_v60  ;;  %v771_v15 = vmul.f32 %v9304_v1, %v9294_v60  ;;  %v846_v3 = vmul.f32 %v5705_v46, %v5273_v56  ;;  %v6010_v53 = vadd.f32 %v679_v11, %v5839_v37  ;;  %v9306_v11 = vld [vmem:[#allocation48_spill] sm:$0xff] }
 0x12e   : > { %v852_v0 = vsel %vm333_vm3, %v845_v18, 0.0  ;;  %v877_v46 = vmul.f32 %v5707_v7, %v9294_v60  ;;  %v977_v7 = vmul.f32 %v5741_v21, %v5273_v56  ;;  %v916_v34 = vsel %vm333_vm3, %v909_v63, 0.0 }
 0x12f   : > { %v746_v51 = vsel %vm333_vm3, %v739_v16, 0.0  ;;  %v778_v9 = vsel %vm333_vm3, %v771_v15, 0.0  ;;  %v6021_v10 = vadd.f32 %v852_v0, %v5857_v43  ;;  %v859_v61 = vsel %vm333_vm3, %v846_v3, 0.0 }
 0x130   : > { %v6013_v48 = vadd.f32 %v746_v51, %v5842_v26  ;;  %v6018_v45 = vadd.f32 %v778_v9, %v5854_v55  ;;  %v6027_v37 = vadd.f32 %v859_v61, %v5867_v32  ;;  %v878_v26 = vmul.f32 %v5723_v23, %v5273_v56  ;;  %v9305_v32 = vld [vmem:[#allocation47_spill] sm:$0xff]  ;;  %v9309_v61 = vld [vmem:[#allocation28_spill] sm:$0xff] }
 0x131   : > { %v910_v55 = vmul.f32 %v5727_v12, %v5273_v56  ;;  %v884_v43 = vsel %vm333_vm3, %v877_v46, 0.0  ;;  %v976_v16 = vmul.f32 %v5739_v42, %v9294_v60  ;;  %v1008_v17 = vmul.f32 %v9305_v32, %v9294_v60  ;;  %v9308_v9 = vld [vmem:[#allocation27_spill] sm:$0xff] }
 0x132   : > { %v6043_v1 = vadd.f32 %v884_v43, %v5891_v4  ;;  %v891_v23 = vsel %vm333_vm3, %v878_v26, 0.0  ;;  %v6052_v42 = vadd.f32 %v916_v34, %v5906_v24  ;;  %v990_v18 = vsel %vm333_vm3, %v977_v7, 0.0  ;;  %v9310_v26 = vld [vmem:[#allocation29_spill] sm:$0xff] }
 0x133   : > { %v923_v12 = vsel %vm333_vm3, %v910_v55, 0.0  ;;  %v6049_v15 = vadd.f32 %v891_v23, %v5903_v50  ;;  %v983_v60 = vsel %vm333_vm3, %v976_v16, 0.0  ;;  %v1009_v51 = vmul.f32 %v9306_v11, %v5273_v56  ;;  %v9311_v56 = vld [vmem:[#allocation19_spill] sm:$0xff]  ;;  %v9312_v55 = vld [vmem:[#allocation30_spill] sm:$0xff] }
 0x134   : > { %v6055_v21 = vadd.f32 %v923_v12, %v5909_v22  ;;  %v6059_v4 = vadd.f32 %v983_v60, %v5919_v59  ;;  %v1015_v3 = vsel %vm333_vm3, %v1008_v17, 0.0  ;;  %v6066_v50 = vadd.f32 %v990_v18, %v5930_v6  ;;  %v9307_v22 = vld [vmem:[#allocation18_spill] sm:$0xff]  ;;  %v9313_v6 = vld [vmem:[#allocation31_spill] sm:$0xff]  ;;  %v9314_v17 = vld [vmem:[#allocation32_spill] sm:$0xff] }
 0x135   : > { %v6069_v24 = vadd.f32 %v1015_v3, %v5933_v8  ;;  %v675_v0 = vmul.f32 %v9308_v9, %v9307_v22  ;;  %v742_v59 = vmul.f32 %v9309_v61, %v9307_v22  ;;  %v1022_v46 = vsel %vm333_vm3, %v1009_v51, 0.0  ;;  %v9315_v3 = vld [vmem:[#allocation33_spill] sm:$0xff] }
 0x136   : > { %v774_v63 = vmul.f32 %v9310_v26, %v9307_v22  ;;  %v610_v43 = vmul.f32 %v9312_v55, %v9311_v56  ;;  %v611_v16 = vmul.f32 %v9313_v6, %v9307_v22  ;;  %v6083_v8 = vadd.f32 %v1022_v46, %v5961_v57 }
 0x137   : > { %v688_v7 = vsel %vm333_vm3, %v675_v0, 0.0  ;;  %v755_v32 = vsel %vm333_vm3, %v742_v59, 0.0  ;;  %v642_v23 = vmul.f32 %v9314_v17, %v9311_v56  ;;  %v643_v9 = vmul.f32 %v9315_v3, %v9307_v22 }
 0x138   : > { %v689_v34 = vadd.f32 %v688_v7, %v687_v19  ;;  %v756_v12 = vadd.f32 %v755_v32, %v754_v44  ;;  %v787_v60 = vsel %vm333_vm3, %v774_v63, 0.0  ;;  %v617_v18 = vsel %vm333_vm3, %v610_v43, 0.0  ;;  %v9316_v43 = vld [vmem:[#allocation34_spill] sm:$0xff] }
 0x139   : > { %v788_v11 = vadd.f32 %v787_v60, %v786_v40  ;;  %v618_v51 = vadd.f32 %v617_v18, %v616_v29  ;;  %v624_v57 = vsel %vm333_vm3, %v611_v16, 0.0  ;;  %v649_v59 = vsel %vm333_vm3, %v642_v23, 0.0 }
 0x13a   : > { %vm711_vm4 = vcmp.ge.f32.partialorder %v689_v34, 0.0  ;;  %v713_v0 = vmul.f32 0.1, %v689_v34  ;;  %vm792_vm5 = vcmp.ge.f32.partialorder %v756_v12, 0.0  ;;  %v794_v61 = vmul.f32 0.1, %v756_v12 }
 0x13b   : > { %vm801_vm6 = vcmp.ge.f32.partialorder %v788_v11, 0.0  ;;  %v803_v19 = vmul.f32 0.1, %v788_v11  ;;  %v625_v44 = vadd.f32 %v624_v57, %v5987_v39  ;;  %v650_v29 = vadd.f32 %v649_v59, %v5995_v30 }
 0x13c   : > { %v715_v40 = vsel %vm711_vm4, %v689_v34, %v713_v0  ;;  %v796_v46 = vsel %vm792_vm5, %v756_v12, %v794_v61  ;;  %v656_v26 = vsel %vm333_vm3, %v643_v9, 0.0  ;;  %v674_v6 = vmul.f32 %v9316_v43, %v9311_v56  ;;  %v9317_v34 = vld [vmem:[#allocation35_spill] sm:$0xff]  ;;  %v9319_v9 = vld [vmem:[#allocation49_spill] sm:$0xff] }
 0x13d   : > { %4495 = vst.msk [vmem:[%s5148_s5 + $0xb8] sm:$0xff] %vm333_vm3, %v715_v40  ;;  %4497 = vst.msk [vmem:[%s5148_s5 + $0x108] sm:$0xff] %vm333_vm3, %v796_v46  ;;  %v805_v63 = vsel %vm801_vm6, %v788_v11, %v803_v19  ;;  %v657_v55 = vadd.f32 %v656_v26, %v6003_v14  ;;  %vm692_vm7 = vcmp.ge.f32.partialorder %v618_v51, 0.0  ;;  %vm693_vm8 = vcmp.ge.f32.partialorder %v625_v44, 0.0  ;;  %v9318_v11 = vld [vmem:[#allocation36_spill] sm:$0xff] }
 0x13e   : > { %4499 = vst.msk [vmem:[%s5148_s5 + $0x158] sm:$0xff] %vm333_vm3, %v805_v63  ;;  %v694_v39 = vmul.f32 0.1, %v618_v51  ;;  %v695_v30 = vmul.f32 0.1, %v625_v44  ;;  %vm701_vm9 = vcmp.ge.f32.partialorder %v650_v29, 0.0  ;;  %v741_v12 = vmul.f32 %v9317_v34, %v9311_v56 }
 0x13f   : > { %v681_v16 = vsel %vm333_vm3, %v674_v6, 0.0  ;;  %vm702_vm10 = vcmp.ge.f32.partialorder %v657_v55, 0.0  ;;  %v703_v7 = vmul.f32 0.1, %v650_v29  ;;  %v704_v32 = vmul.f32 0.1, %v657_v55 }
 0x140   : > { %v682_v14 = vadd.f32 %v681_v16, %v6010_v53  ;;  %v696_v17 = vsel %vm692_vm7, %v618_v51, %v694_v39  ;;  %v697_v23 = vsel %vm693_vm8, %v625_v44, %v695_v30  ;;  %v773_v57 = vmul.f32 %v9318_v11, %v9311_v56  ;;  %v9321_v30 = vld [vmem:[#allocation51_spill] sm:$0xff] }
 0x141   : > { %4490 = vst.msk [vmem:[%s5148_s5 + $0x10] sm:$0xff] %vm333_vm3, %v696_v17  ;;  %4491 = vst.msk [vmem:[%s5148_s5 + $0x18] sm:$0xff] %vm333_vm3, %v697_v23  ;;  %v705_v60 = vsel %vm701_vm9, %v650_v29, %v703_v7  ;;  %v706_v18 = vsel %vm702_vm10, %v657_v55, %v704_v32  ;;  %v847_v3 = vmul.f32 %v5765_v31, %v9311_v56  ;;  %v748_v51 = vsel %vm333_vm3, %v741_v12, 0.0  ;;  %v4761_v11 = vld [vmem:[%s5133_s23 + $0x30] sm:$0xff] }
 0x142   : > { %4492 = vst.msk [vmem:[%s5148_s5 + $0x60] sm:$0xff] %vm333_vm3, %v705_v60  ;;  %4493 = vst.msk [vmem:[%s5148_s5 + $0x68] sm:$0xff] %vm333_vm3, %v706_v18  ;;  %vm710_vm11 = vcmp.ge.f32.partialorder %v682_v14, 0.0  ;;  %v712_v53 = vmul.f32 0.1, %v682_v14  ;;  %v848_v0 = vmul.f32 %v9319_v9, %v9307_v22  ;;  %v749_v61 = vadd.f32 %v748_v51, %v6013_v48 }
 0x143   : > { %v780_v19 = vsel %vm333_vm3, %v773_v57, 0.0  ;;  %v854_v44 = vsel %vm333_vm3, %v847_v3, 0.0  ;;  %v879_v31 = vmul.f32 %v5769_v47, %v9311_v56  ;;  %v880_v63 = vmul.f32 %v5781_v20, %v9307_v22  ;;  %v4762_v3 = vld [vmem:[%s5133_s23 + $0x38] sm:$0xff] }
 0x144   : > { %v714_v59 = vsel %vm710_vm11, %v682_v14, %v712_v53  ;;  %v781_v40 = vadd.f32 %v780_v19, %v6018_v45  ;;  %v855_v46 = vadd.f32 %v854_v44, %v6021_v10  ;;  %v861_v29 = vsel %vm333_vm3, %v848_v0, 0.0  ;;  %v9320_v45 = vld [vmem:[#allocation50_spill] sm:$0xff]  ;;  %v9322_v53 = vld [vmem:[#allocation52_spill] sm:$0xff] }
 0x145   : > { %4494 = vst.msk [vmem:[%s5148_s5 + $0xb0] sm:$0xff] %vm333_vm3, %v714_v59  ;;  %vm791_vm12 = vcmp.ge.f32.partialorder %v749_v61, 0.0  ;;  %v793_v26 = vmul.f32 0.1, %v749_v61  ;;  %v862_v48 = vadd.f32 %v861_v29, %v6027_v37  ;;  %v886_v55 = vsel %vm333_vm3, %v879_v31, 0.0  ;;  %v9324_v59 = vld [vmem:[#allocation37_spill] sm:$0xff] }
 0x146   : > { %vm800_vm13 = vcmp.ge.f32.partialorder %v781_v40, 0.0  ;;  %v802_v47 = vmul.f32 0.1, %v781_v40  ;;  %v911_v43 = vmul.f32 %v9320_v45, %v9311_v56  ;;  %v887_v6 = vadd.f32 %v886_v55, %v6043_v1  ;;  %v9325_v55 = vld [vmem:[#allocation38_spill] sm:$0xff] }
 0x147   : > { %v795_v10 = vsel %vm791_vm12, %v749_v61, %v793_v26  ;;  %v893_v39 = vsel %vm333_vm3, %v880_v63, 0.0  ;;  %v912_v16 = vmul.f32 %v9321_v30, %v9307_v22  ;;  %vm929_vm14 = vcmp.ge.f32.partialorder %v855_v46, 0.0  ;;  %v9323_v61 = vld [vmem:[#allocation53_spill] sm:$0xff] }
 0x148   : > { %4496 = vst.msk [vmem:[%s5148_s5 + $0x100] sm:$0xff] %vm333_vm3, %v795_v10  ;;  %v804_v37 = vsel %vm800_vm13, %v781_v40, %v802_v47  ;;  %v894_v20 = vadd.f32 %v893_v39, %v6049_v15  ;;  %v918_v7 = vsel %vm333_vm3, %v911_v43, 0.0  ;;  %vm930_vm15 = vcmp.ge.f32.partialorder %v862_v48, 0.0  ;;  %v6191_v43 = vld [vmem:[%s5133_s23] sm:$0xff]  ;;  %v9326_v39 = vld [vmem:[#allocation39_spill] sm:$0xff] }
 0x149   : > { %4498 = vst.msk [vmem:[%s5148_s5 + $0x150] sm:$0xff] %vm333_vm3, %v804_v37  ;;  %v919_v56 = vadd.f32 %v918_v7, %v6052_v42  ;;  %v925_v1 = vsel %vm333_vm3, %v912_v16, 0.0  ;;  %v931_v32 = vmul.f32 0.1, %v855_v46  ;;  %v932_v14 = vmul.f32 0.1, %v862_v48 }
 0x14a   : > { %v926_v22 = vadd.f32 %v925_v1, %v6055_v21  ;;  %vm938_vm0 = vcmp.ge.f32.partialorder %v887_v6, 0.0  ;;  %vm939_vm1 = vcmp.ge.f32.partialorder %v894_v20, 0.0  ;;  %v940_v17 = vmul.f32 0.1, %v887_v6  ;;  %v6158_v21 = vld [vmem:[%s5133_s23 + $0x8] sm:$0xff]  ;;  %v9327_v16 = vld [vmem:[#allocation40_spill] sm:$0xff] }
 0x14b   : > { %v933_v15 = vsel %vm929_vm14, %v855_v46, %v931_v32  ;;  %v941_v23 = vmul.f32 0.1, %v894_v20  ;;  %vm947_vm2 = vcmp.ge.f32.partialorder %v919_v56, 0.0  ;;  %v934_v42 = vsel %vm930_vm15, %v862_v48, %v932_v14  ;;  %v9329_v32 = vld [vmem:[#allocation42_spill] sm:$0xff]  ;;  %v6206_v14 = vld [vmem:[%s5133_s23 + $0x18] sm:$0xff] }
 0x14c   : > { %4500 = vst.msk [vmem:[%s5148_s5 + $0x20] sm:$0xff] %vm333_vm3, %v933_v15  ;;  %vm948_vm4 = vcmp.ge.f32.partialorder %v926_v22, 0.0  ;;  %v949_v34 = vmul.f32 0.1, %v919_v56  ;;  %v950_v12 = vmul.f32 0.1, %v926_v22  ;;  %v942_v60 = vsel %vm938_vm0, %v887_v6, %v940_v17 }
 0x14d   : > { %4501 = vst.msk [vmem:[%s5148_s5 + $0x28] sm:$0xff] %vm333_vm3, %v934_v42  ;;  %v943_v18 = vsel %vm939_vm1, %v894_v20, %v941_v23  ;;  %v978_v57 = vmul.f32 %v4761_v11, %v5796_v33  ;;  %v979_v51 = vmul.f32 %v4762_v3, %v9322_v53  ;;  %4502 = vst.msk [vmem:[%s5148_s5 + $0x70] sm:$0xff] %vm333_vm3, %v942_v60  ;;  %v9330_v23 = vld [vmem:[#allocation43_spill] sm:$0xff]  ;;  %v9333_v53 = vld [vmem:[#allocation46_spill] sm:$0xff]  ;;  %vm1374_vm0 = vcmask 113664  }
 0x14e   : > { %4503 = vst.msk [vmem:[%s5148_s5 + $0x78] sm:$0xff] %vm333_vm3, %v943_v18  ;;  %v951_v9 = vsel %vm947_vm2, %v919_v56, %v949_v34  ;;  %v952_v0 = vsel %vm948_vm4, %v926_v22, %v950_v12  ;;  %v1010_v19 = vmul.f32 %v4761_v11, %v9323_v61  ;;  %v1011_v44 = vmul.f32 %v4762_v3, %v5810_v49  ;;  %v9328_v56 = vld [vmem:[#allocation41_spill] sm:$0xff]  ;;  %v9331_v34 = vld [vmem:[#allocation44_spill] sm:$0xff]  ;;  %v6219_v60 = vld [vmem:[%s5133_s23 + $0x10] sm:$0xff] }
 0x14f   : > { %4504 = vst.msk [vmem:[%s5148_s5 + $0xc0] sm:$0xff] %vm333_vm3, %v951_v9  ;;  %4505 = vst.msk [vmem:[%s5148_s5 + $0xc8] sm:$0xff] %vm333_vm3, %v952_v0  ;;  %v985_v33 = vsel %vm333_vm3, %v978_v57, 0.0  ;;  %v992_v31 = vsel %vm333_vm3, %v979_v51, 0.0  ;;  %v1185_v40 = vmul.f32 %v9324_v59, %v6158_v21  ;;  %v1252_v45 = vmul.f32 %v9325_v55, %v6158_v21  ;;  %v9332_v57 = vld [vmem:[#allocation45_spill] sm:$0xff]  ;;  %v9334_v61 = vld [vmem:[#allocation54_spill] sm:$0xff] }
 0x150   : > { %v986_v46 = vadd.f32 %v985_v33, %v6059_v4  ;;  %v993_v29 = vadd.f32 %v992_v31, %v6066_v50  ;;  %v1017_v26 = vsel %vm333_vm3, %v1010_v19, 0.0  ;;  %v1024_v48 = vsel %vm333_vm3, %v1011_v44, 0.0  ;;  %v9335_v44 = vld [vmem:[#allocation55_spill] sm:$0xff] }
 0x151   : > { %v1018_v49 = vadd.f32 %v1017_v26, %v6069_v24  ;;  %v1025_v63 = vadd.f32 %v1024_v48, %v6083_v8  ;;  %v1199_v47 = vsel %vm333_vm3, %v1185_v40, 0.0  ;;  %v1284_v30 = vmul.f32 %v9326_v39, %v6158_v21  ;;  %v9336_v40 = vld [vmem:[#allocation56_spill] sm:$0xff] }
 0x152   : > { %vm1028_vm5 = vcmp.ge.f32.partialorder %v986_v46, 0.0  ;;  %vm1029_vm6 = vcmp.ge.f32.partialorder %v993_v29, 0.0  ;;  %v1030_v4 = vmul.f32 0.1, %v986_v46  ;;  %v1031_v50 = vmul.f32 0.1, %v993_v29 }
 0x153   : > { %vm1037_vm7 = vcmp.ge.f32.partialorder %v1018_v49, 0.0  ;;  %vm1038_vm8 = vcmp.ge.f32.partialorder %v1025_v63, 0.0  ;;  %v1039_v24 = vmul.f32 0.1, %v1018_v49  ;;  %v1040_v8 = vmul.f32 0.1, %v1025_v63 }
 0x154   : > { %v1032_v10 = vsel %vm1028_vm5, %v986_v46, %v1030_v4  ;;  %v1033_v6 = vsel %vm1029_vm6, %v993_v29, %v1031_v50  ;;  %v1120_v37 = vmul.f32 %v9327_v16, %v6191_v43  ;;  %v1121_v1 = vmul.f32 %v9328_v56, %v6158_v21  ;;  %v9337_v29 = vld [vmem:[#allocation57_spill] sm:$0xff] }
 0x155   : > { %4506 = vst.msk [vmem:[%s5148_s5 + $0x110] sm:$0xff] %vm333_vm3, %v1032_v10  ;;  %4507 = vst.msk [vmem:[%s5148_s5 + $0x118] sm:$0xff] %vm333_vm3, %v1033_v6  ;;  %v1041_v20 = vsel %vm1037_vm7, %v1018_v49, %v1039_v24  ;;  %v1042_v7 = vsel %vm1038_vm8, %v1025_v63, %v1040_v8  ;;  %v1152_v22 = vmul.f32 %v9329_v32, %v6191_v43  ;;  %v1266_v15 = vsel %vm333_vm3, %v1252_v45, 0.0  ;;  %v9338_v63 = vld [vmem:[#allocation58_spill] sm:$0xff] }
 0x156   : > { %4508 = vst.msk [vmem:[%s5148_s5 + $0x160] sm:$0xff] %vm333_vm3, %v1041_v20  ;;  %4509 = vst.msk [vmem:[%s5148_s5 + $0x168] sm:$0xff] %vm333_vm3, %v1042_v7  ;;  %v1298_v17 = vsel %vm333_vm3, %v1284_v30, 0.0  ;;  %v1153_v42 = vmul.f32 %v9330_v23, %v6158_v21  ;;  %v1184_v12 = vmul.f32 %v9331_v34, %v6191_v43  ;;  %v1128_v18 = vsel %vm333_vm3, %v1120_v37, 0.0  ;;  %v6249_v10 = vld [vmem:[%s5133_s23 + $0x28] sm:$0xff]  ;;  %v6273_v23 = vpop.permute.xlu0 %1350 }
 0x157   : > { %v1135_v11 = vsel %vm333_vm3, %v1121_v1, 0.0  ;;  %v1251_v3 = vmul.f32 %v9332_v57, %v6191_v43  ;;  %v1283_v51 = vmul.f32 %v9333_v53, %v6191_v43  ;;  %v1160_v9 = vsel %vm333_vm3, %v1152_v22, 0.0  ;;  %1375 = vst.msk [vmem:[#allocation2 + $0x2] sm:$0xff] %vm1374_vm0, %v6273_v23 }
 0x158   : > { %v1167_v0 = vsel %vm333_vm3, %v1153_v42, 0.0  ;;  %v1187_v19 = vmul.f32 %v9334_v61, %v6206_v14  ;;  %v1254_v33 = vmul.f32 %v9335_v44, %v6206_v14  ;;  %v1192_v31 = vsel %vm333_vm3, %v1184_v12, 0.0  ;;  %v9341_v44 = vld [vmem:[#allocation61_spill] sm:$0xff] }
 0x159   : > { %v1259_v59 = vsel %vm333_vm3, %v1251_v3, 0.0  ;;  %v1286_v46 = vmul.f32 %v9336_v40, %v6206_v14  ;;  %v1122_v26 = vmul.f32 %v9337_v29, %v6219_v60  ;;  %v1123_v55 = vmul.f32 %v9338_v63, %v6206_v14  ;;  %v6299_v40 = vld [vmem:[%s5133_s23 + $0x38] sm:$0xff] }
 0x15a   : > { %v1200_v48 = vsel %vm333_vm3, %v1187_v19, 0.0  ;;  %v1267_v49 = vsel %vm333_vm3, %v1254_v33, 0.0  ;;  %v1154_v45 = vmul.f32 %v5833_v5, %v6219_v60  ;;  %v1291_v4 = vsel %vm333_vm3, %v1283_v51, 0.0  ;;  %v9339_v51 = vld [vmem:[#allocation59_spill] sm:$0xff]  ;;  %v9340_v19 = vld [vmem:[#allocation60_spill] sm:$0xff]  ;;  %v6307_v63 = vpop.permute.xlu0 %1354 }
 0x15b   : > { %v1201_v50 = vadd.f32 %v1200_v48, %v1199_v47  ;;  %v1299_v24 = vsel %vm333_vm3, %v1286_v46, 0.0  ;;  %v1129_v8 = vsel %vm333_vm3, %v1122_v26, 0.0  ;;  %v1268_v6 = vadd.f32 %v1267_v49, %v1266_v15  ;;  %v6303_v48 = vld [vmem:[%s5133_s23 + $0x30] sm:$0xff]  ;;  %1377 = vst.msk [vmem:[#allocation2 + $0x22] sm:$0xff] %vm1374_vm0, %v6307_v63 }
 0x15c   : > { %v1300_v39 = vadd.f32 %v1299_v24, %v1298_v17  ;;  %v1136_v30 = vsel %vm333_vm3, %v1123_v55, 0.0  ;;  %v1155_v16 = vmul.f32 %v5835_v27, %v6206_v14  ;;  %v1130_v37 = vadd.f32 %v1129_v8, %v1128_v18  ;;  %v6269_v17 = vld [vmem:[%s5133_s23 + $0x20] sm:$0xff] }
 0x15d   : > { %v1161_v5 = vsel %vm333_vm3, %v1154_v45, 0.0  ;;  %v1186_v47 = vmul.f32 %v5846_v28, %v6219_v60  ;;  %v1253_v20 = vmul.f32 %v5848_v2, %v6219_v60  ;;  %v1137_v7 = vadd.f32 %v1136_v30, %v1135_v11  ;;  %v6271_v2 = vpop.permute.xlu1 %1352 }
 0x15e   : > { %v1168_v56 = vsel %vm333_vm3, %v1155_v16, 0.0  ;;  %v1285_v1 = vmul.f32 %v5850_v54, %v6219_v60  ;;  %v1189_v32 = vmul.f32 %v5882_v36, %v6249_v10  ;;  %v1162_v22 = vadd.f32 %v1161_v5, %v1160_v9  ;;  %v9344_v5 = vld [vmem:[#allocation17_spill] sm:$0xff]  ;;  %1376 = vst.msk [vmem:[#allocation2 + $0xa] sm:$0xff] %vm1374_vm0, %v6271_v2 }
 0x15f   : > { %v1193_v27 = vsel %vm333_vm3, %v1186_v47, 0.0  ;;  %v1260_v15 = vsel %vm333_vm3, %v1253_v20, 0.0  ;;  %v1256_v28 = vmul.f32 %v5896_v41, %v6249_v10  ;;  %v1169_v42 = vadd.f32 %v1168_v56, %v1167_v0  ;;  %v9345_v20 = vld [vmem:[#allocation64_spill] sm:$0xff] }
 0x160   : > { %v1194_v34 = vadd.f32 %v1193_v27, %v1192_v31  ;;  %v1292_v54 = vsel %vm333_vm3, %v1285_v1, 0.0  ;;  %v1202_v36 = vsel %vm333_vm3, %v1189_v32, 0.0  ;;  %v1261_v12 = vadd.f32 %v1260_v15, %v1259_v59  ;;  %v9346_v56 = vld [vmem:[#allocation20_spill] sm:$0xff]  ;;  %v9347_v15 = vld [vmem:[#allocation65_spill] sm:$0xff] }
 0x161   : > { %v1203_v18 = vadd.f32 %v1202_v36, %v1201_v50  ;;  %v1269_v11 = vsel %vm333_vm3, %v1256_v28, 0.0  ;;  %v1288_v41 = vmul.f32 %v5898_v13, %v6249_v10  ;;  %v6280_v57 = vadd.f32 %v1292_v54, %v1291_v4  ;;  %v6305_v49 = vpop.permute.xlu1 %1356  ;;  %v9342_v50 = vld [vmem:[#allocation62_spill] sm:$0xff] }
 0x162   : > { %v1124_v3 = vmul.f32 %v5884_v25, %v6269_v17  ;;  %v1125_v53 = vmul.f32 %v5900_v35, %v6249_v10  ;;  %v1156_v9 = vmul.f32 %v9339_v51, %v6269_v17  ;;  %v1157_v61 = vmul.f32 %v5912_v62, %v6249_v10  ;;  %1378 = vst.msk [vmem:[#allocation2 + $0x2a] sm:$0xff] %vm1374_vm0, %v6305_v49 }
 0x163   : > { %v1301_v0 = vsel %vm333_vm3, %v1288_v41, 0.0  ;;  %v1188_v13 = vmul.f32 %v9340_v19, %v6269_v17  ;;  %v1255_v33 = vmul.f32 %v9341_v44, %v6269_v17  ;;  %v1270_v31 = vadd.f32 %v1269_v11, %v1268_v6 }
 0x164   : > { %v1131_v25 = vsel %vm333_vm3, %v1124_v3, 0.0  ;;  %v1138_v59 = vsel %vm333_vm3, %v1125_v53, 0.0  ;;  %v1163_v35 = vsel %vm333_vm3, %v1156_v9, 0.0  ;;  %v1302_v46 = vadd.f32 %v1301_v0, %v1300_v39  ;;  %v9343_v39 = vld [vmem:[#allocation63_spill] sm:$0xff]  ;;  %v1359_v53 = vpop.permute.xlu0 %1358 }
 0x165   : > { %v1132_v29 = vadd.f32 %v1131_v25, %v1130_v37  ;;  %v1139_v26 = vadd.f32 %v1138_v59, %v1137_v7  ;;  %v1170_v62 = vsel %vm333_vm3, %v1157_v61, 0.0  ;;  %v1164_v55 = vadd.f32 %v1163_v35, %v1162_v22  ;;  %v1361_v3 = vpop.permute.xlu1 %1360  ;;  %v9348_v25 = vld [vmem:[#allocation66_spill] sm:$0xff]  ;;  %1379 = vst.msk [vmem:[#allocation2 + $0x42] sm:$0xff] %vm1374_vm0, %v1359_v53 }
 0x166   : > { %v1195_v45 = vsel %vm333_vm3, %v1188_v13, 0.0  ;;  %v1262_v4 = vsel %vm333_vm3, %v1255_v33, 0.0  ;;  %v1287_v24 = vmul.f32 %v9342_v50, %v6269_v17  ;;  %v1171_v8 = vadd.f32 %v1170_v62, %v1169_v42  ;;  %1380 = vst.msk [vmem:[#allocation2 + $0x4a] sm:$0xff] %vm1374_vm0, %v1361_v3 }
 0x167   : > { %v1196_v6 = vadd.f32 %v1195_v45, %v1194_v34  ;;  %v1191_v30 = vmul.f32 %v9343_v39, %v6299_v40  ;;  %v1258_v16 = vmul.f32 %v5954_v38, %v6299_v40  ;;  %v6317_v37 = vadd.f32 %v1262_v4, %v1261_v12 }
 0x168   : > { %v1290_v47 = vmul.f32 %v9344_v5, %v6299_v40  ;;  %v1126_v7 = vmul.f32 %v9345_v20, %v6303_v48  ;;  %v1127_v1 = vmul.f32 %v9346_v56, %v6299_v40  ;;  %v1294_v32 = vsel %vm333_vm3, %v1287_v24, 0.0  ;;  %v1363_v45 = vpop.permute.xlu0 %1362 }
 0x169   : > { %v1204_v22 = vsel %vm333_vm3, %v1191_v30, 0.0  ;;  %v1271_v27 = vsel %vm333_vm3, %v1258_v16, 0.0  ;;  %v1158_v38 = vmul.f32 %v9347_v15, %v6303_v48  ;;  %v1159_v41 = vmul.f32 %v5967_v52, %v6299_v40  ;;  %v9349_v16 = vld [vmem:[#allocation21_spill] sm:$0xff]  ;;  %1381 = vst.msk [vmem:[#allocation2 + $0x62] sm:$0xff] %vm1374_vm0, %v1363_v45 }
 0x16a   : > { %v1205_v28 = vadd.f32 %v1204_v22, %v1203_v18  ;;  %v1272_v42 = vadd.f32 %v1271_v27, %v1270_v31  ;;  %v1303_v34 = vsel %vm333_vm3, %v1290_v47, 0.0  ;;  %v1133_v54 = vsel %vm333_vm3, %v1126_v7, 0.0  ;;  %v1555_v22 = vld [vmem:[#allocation2 + $0xc] sm:$0xff] }
 0x16b   : > { %v1304_v36 = vadd.f32 %v1303_v34, %v1302_v46  ;;  %v1134_v12 = vadd.f32 %v1133_v54, %v1132_v29  ;;  %v1140_v11 = vsel %vm333_vm3, %v1127_v1, 0.0  ;;  %v1165_v61 = vsel %vm333_vm3, %v1158_v38, 0.0  ;;  %v1456_v1 = vld [vmem:[#allocation2 + $0xa] sm:$0xff]  ;;  %v1391_v38 = vld [vmem:[#allocation2] sm:$0xff] }
 0x16c   : > { %vm1227_vm9 = vcmp.ge.f32.partialorder %v1205_v28, 0.0  ;;  %v1229_v51 = vmul.f32 0.1, %v1205_v28  ;;  %vm1308_vm10 = vcmp.ge.f32.partialorder %v1272_v42, 0.0  ;;  %v1310_v18 = vmul.f32 0.1, %v1272_v42 }
 0x16d   : > { %vm1317_vm11 = vcmp.ge.f32.partialorder %v1304_v36, 0.0  ;;  %v1319_v9 = vmul.f32 0.1, %v1304_v36  ;;  %v1141_v0 = vadd.f32 %v1140_v11, %v1139_v26  ;;  %v1166_v44 = vadd.f32 %v1165_v61, %v1164_v55  ;;  %v1365_v55 = vpop.permute.xlu1 %1364  ;;  %v1455_v11 = vld [vmem:[#allocation2 + $0x2] sm:$0xff] }
 0x16e   : > { %v1231_v19 = vsel %vm1227_vm9, %v1205_v28, %v1229_v51  ;;  %v1312_v13 = vsel %vm1308_vm10, %v1272_v42, %v1310_v18  ;;  %v1172_v33 = vsel %vm333_vm3, %v1159_v41, 0.0  ;;  %v1190_v59 = vmul.f32 %v9348_v25, %v6303_v48  ;;  %1382 = vst.msk [vmem:[#allocation2 + $0x6a] sm:$0xff] %vm1374_vm0, %v1365_v55  ;;  %v1392_v28 = vld [vmem:[#allocation2 + $0x8] sm:$0xff] }
 0x16f   : > { %4515 = vst.msk [vmem:[%s5148_s5 + $0xd8] sm:$0xff] %vm333_vm3, %v1231_v19  ;;  %4517 = vst.msk [vmem:[%s5148_s5 + $0x128] sm:$0xff] %vm333_vm3, %v1312_v13  ;;  %v1321_v52 = vsel %vm1317_vm11, %v1304_v36, %v1319_v9  ;;  %v1173_v31 = vadd.f32 %v1172_v33, %v1171_v8  ;;  %vm1208_vm12 = vcmp.ge.f32.partialorder %v1134_v12, 0.0  ;;  %vm1209_vm13 = vcmp.ge.f32.partialorder %v1141_v0, 0.0  ;;  %v1423_v42 = vld [vmem:[#allocation2 + $0x1] sm:$0xff]  ;;  %v1424_v36 = vld [vmem:[#allocation2 + $0x9] sm:$0xff] }
 0x170   : > { %4519 = vst.msk [vmem:[%s5148_s5 + $0x178] sm:$0xff] %vm333_vm3, %v1321_v52  ;;  %v1210_v35 = vmul.f32 0.1, %v1134_v12  ;;  %v1211_v46 = vmul.f32 0.1, %v1141_v0  ;;  %vm1217_vm14 = vcmp.ge.f32.partialorder %v1166_v44, 0.0  ;;  %v1257_v8 = vmul.f32 %v5969_v58, %v6303_v48 }
 0x171   : > { %v1197_v29 = vsel %vm333_vm3, %v1190_v59, 0.0  ;;  %vm1218_vm15 = vcmp.ge.f32.partialorder %v1173_v31, 0.0  ;;  %v1219_v26 = vmul.f32 0.1, %v1166_v44  ;;  %v1220_v62 = vmul.f32 0.1, %v1173_v31 }
 0x172   : > { %v1198_v4 = vadd.f32 %v1197_v29, %v1196_v6  ;;  %v1212_v50 = vsel %vm1208_vm12, %v1134_v12, %v1210_v35  ;;  %v1213_v24 = vsel %vm1209_vm13, %v1141_v0, %v1211_v46  ;;  %v1289_v5 = vmul.f32 %v9349_v16, %v6303_v48  ;;  %v1522_v41 = vld [vmem:[#allocation2 + $0x3] sm:$0xff]  ;;  %v1525_v9 = vld [vmem:[#allocation2 + $0x2b] sm:$0xff] }
 0x173   : > { %4510 = vst.msk [vmem:[%s5148_s5 + $0x30] sm:$0xff] %vm333_vm3, %v1212_v50  ;;  %4511 = vst.msk [vmem:[%s5148_s5 + $0x38] sm:$0xff] %vm333_vm3, %v1213_v24  ;;  %v1221_v39 = vsel %vm1217_vm14, %v1166_v44, %v1219_v26  ;;  %v1222_v30 = vsel %vm1218_vm15, %v1173_v31, %v1220_v62  ;;  %v1295_v47 = vadd.f32 %v1294_v32, %v6280_v57  ;;  %v1264_v58 = vsel %vm333_vm3, %v1257_v8, 0.0  ;;  %v1523_v32 = vld [vmem:[#allocation2 + $0xb] sm:$0xff]  ;;  %v1393_v33 = vld [vmem:[#allocation2 + $0x20] sm:$0xff] }
 0x174   : > { %4512 = vst.msk [vmem:[%s5148_s5 + $0x80] sm:$0xff] %vm333_vm3, %v1221_v39  ;;  %4513 = vst.msk [vmem:[%s5148_s5 + $0x88] sm:$0xff] %vm333_vm3, %v1222_v30  ;;  %vm1226_vm1 = vcmp.ge.f32.partialorder %v1198_v4, 0.0  ;;  %v1228_v6 = vmul.f32 0.1, %v1198_v4  ;;  %v1265_v57 = vadd.f32 %v1264_v58, %v6317_v37  ;;  %v1296_v20 = vsel %vm333_vm3, %v1289_v5, 0.0 }
 0x175   : > { %v1297_v56 = vadd.f32 %v1296_v20, %v1295_v47  ;;  %v1464_v37 = vmul.f32 %v1456_v1, %v6158_v21  ;;  %v1531_v27 = vmul.f32 %v1523_v32, %v6158_v21  ;;  %v1563_v15 = vmul.f32 %v1555_v22, %v6158_v21  ;;  %v1554_v51 = vld [vmem:[#allocation2 + $0x4] sm:$0xff]  ;;  %v1557_v44 = vld [vmem:[#allocation2 + $0x2c] sm:$0xff] }
 0x176   : > { %v1230_v7 = vsel %vm1226_vm1, %v1198_v4, %v1228_v6  ;;  %vm1307_vm2 = vcmp.ge.f32.partialorder %v1265_v57, 0.0  ;;  %v1309_v2 = vmul.f32 0.1, %v1265_v57  ;;  %v1399_v34 = vmul.f32 %v1391_v38, %v6191_v43  ;;  %v1458_v18 = vld [vmem:[#allocation2 + $0x2a] sm:$0xff]  ;;  %v1425_v62 = vld [vmem:[#allocation2 + $0x21] sm:$0xff] }
 0x177   : > { %4514 = vst.msk [vmem:[%s5148_s5 + $0xd0] sm:$0xff] %vm333_vm3, %v1230_v7  ;;  %vm1316_vm4 = vcmp.ge.f32.partialorder %v1297_v56, 0.0  ;;  %v1318_v23 = vmul.f32 0.1, %v1297_v56  ;;  %v1400_v54 = vmul.f32 %v1392_v28, %v6158_v21  ;;  %v1431_v12 = vmul.f32 %v1423_v42, %v6191_v43  ;;  %v1394_v52 = vld [vmem:[#allocation2 + $0x28] sm:$0xff] }
 0x178   : > { %v1311_v49 = vsel %vm1307_vm2, %v1265_v57, %v1309_v2  ;;  %v1478_v3 = vsel %vm333_vm3, %v1464_v37, 0.0  ;;  %v1432_v53 = vmul.f32 %v1424_v36, %v6158_v21  ;;  %v1545_v0 = vsel %vm333_vm3, %v1531_v27, 0.0  ;;  %v1426_v55 = vld [vmem:[#allocation2 + $0x29] sm:$0xff] }
 0x179   : > { %4516 = vst.msk [vmem:[%s5148_s5 + $0x120] sm:$0xff] %vm333_vm3, %v1311_v49  ;;  %v1320_v63 = vsel %vm1316_vm4, %v1297_v56, %v1318_v23  ;;  %v1577_v61 = vsel %vm333_vm3, %v1563_v15, 0.0  ;;  %v1407_v19 = vsel %vm333_vm3, %v1399_v34, 0.0  ;;  %v1463_v13 = vmul.f32 %v1455_v11, %v6191_v43  ;;  %v1457_v24 = vld [vmem:[#allocation2 + $0x22] sm:$0xff]  ;;  %v1460_v6 = vld [vmem:[#allocation2 + $0x4a] sm:$0xff] }
 0x17a   : > { %4518 = vst.msk [vmem:[%s5148_s5 + $0x170] sm:$0xff] %vm333_vm3, %v1320_v63  ;;  %v1414_v31 = vsel %vm333_vm3, %v1400_v54, 0.0  ;;  %v1530_v25 = vmul.f32 %v1522_v41, %v6191_v43  ;;  %v1562_v21 = vmul.f32 %v1554_v51, %v6191_v43  ;;  %v1466_v59 = vmul.f32 %v1458_v18, %v6206_v14  ;;  %v1524_v8 = vld [vmem:[#allocation2 + $0x23] sm:$0xff]  ;;  %v1527_v58 = vld [vmem:[#allocation2 + $0x4b] sm:$0xff] }
 0x17b   : > { %v1439_v35 = vsel %vm333_vm3, %v1431_v12, 0.0  ;;  %v1533_v46 = vmul.f32 %v1525_v9, %v6206_v14  ;;  %v1565_v29 = vmul.f32 %v1557_v44, %v6206_v14  ;;  %v1401_v26 = vmul.f32 %v1393_v33, %v6219_v60  ;;  %v1556_v39 = vld [vmem:[#allocation2 + $0x24] sm:$0xff]  ;;  %v1559_v2 = vld [vmem:[#allocation2 + $0x4c] sm:$0xff] }
 0x17c   : > { %v1446_v45 = vsel %vm333_vm3, %v1432_v53, 0.0  ;;  %v1471_v4 = vsel %vm333_vm3, %v1463_v13, 0.0  ;;  %v1479_v50 = vsel %vm333_vm3, %v1466_v59, 0.0  ;;  %v1402_v43 = vmul.f32 %v1394_v52, %v6206_v14  ;;  %v1395_v34 = vld [vmem:[#allocation2 + $0x40] sm:$0xff]  ;;  %v1396_v11 = vld [vmem:[#allocation2 + $0x48] sm:$0xff] }
 0x17d   : > { %v1538_v30 = vsel %vm333_vm3, %v1530_v25, 0.0  ;;  %v1570_v16 = vsel %vm333_vm3, %v1562_v21, 0.0  ;;  %v1546_v5 = vsel %vm333_vm3, %v1533_v46, 0.0  ;;  %v1578_v47 = vsel %vm333_vm3, %v1565_v29, 0.0  ;;  %v1428_v41 = vld [vmem:[#allocation2 + $0x49] sm:$0xff] }
 0x17e   : > { %v1480_v57 = vadd.f32 %v1479_v50, %v1478_v3  ;;  %v1547_v20 = vadd.f32 %v1546_v5, %v1545_v0  ;;  %v1579_v7 = vadd.f32 %v1578_v47, %v1577_v61  ;;  %v1408_v56 = vsel %vm333_vm3, %v1401_v26, 0.0  ;;  %v1459_v9 = vld [vmem:[#allocation2 + $0x42] sm:$0xff]  ;;  %v1462_v52 = vld [vmem:[#allocation2 + $0x6a] sm:$0xff] }
 0x17f   : > { %v1415_v23 = vsel %vm333_vm3, %v1402_v43, 0.0  ;;  %v1433_v49 = vmul.f32 %v1425_v62, %v6219_v60  ;;  %v1434_v63 = vmul.f32 %v1426_v55, %v6206_v14  ;;  %v1465_v1 = vmul.f32 %v1457_v24, %v6219_v60  ;;  %v1526_v0 = vld [vmem:[#allocation2 + $0x43] sm:$0xff]  ;;  %v1529_v50 = vld [vmem:[#allocation2 + $0x6b] sm:$0xff] }
 0x180   : > { %v1532_v32 = vmul.f32 %v1524_v8, %v6219_v60  ;;  %v1564_v22 = vmul.f32 %v1556_v39, %v6219_v60  ;;  %v1468_v37 = vmul.f32 %v1460_v6, %v6249_v10  ;;  %v1535_v27 = vmul.f32 %v1527_v58, %v6249_v10  ;;  %v1427_v60 = vld [vmem:[#allocation2 + $0x41] sm:$0xff]  ;;  %v1561_v39 = vld [vmem:[#allocation2 + $0x6c] sm:$0xff] }
 0x181   : > { %v1440_v15 = vsel %vm333_vm3, %v1433_v49, 0.0  ;;  %v1447_v38 = vsel %vm333_vm3, %v1434_v63, 0.0  ;;  %v1472_v28 = vsel %vm333_vm3, %v1465_v1, 0.0  ;;  %v1567_v42 = vmul.f32 %v1559_v2, %v6249_v10  ;;  %v1558_v61 = vld [vmem:[#allocation2 + $0x44] sm:$0xff] }
 0x182   : > { %v1409_v14 = vadd.f32 %v1408_v56, %v1407_v19  ;;  %v1416_v54 = vadd.f32 %v1415_v23, %v1414_v31  ;;  %v1441_v36 = vadd.f32 %v1440_v15, %v1439_v35  ;;  %v1539_v12 = vsel %vm333_vm3, %v1532_v32, 0.0  ;;  %v1429_v58 = vld [vmem:[#allocation2 + $0x61] sm:$0xff] }
 0x183   : > { %v1448_v3 = vadd.f32 %v1447_v38, %v1446_v45  ;;  %v1473_v53 = vadd.f32 %v1472_v28, %v1471_v4  ;;  %v1571_v51 = vsel %vm333_vm3, %v1564_v22, 0.0  ;;  %v1481_v18 = vsel %vm333_vm3, %v1468_v37, 0.0  ;;  %v1461_v56 = vld [vmem:[#allocation2 + $0x62] sm:$0xff] }
 0x184   : > { %v6416_v13 = vadd.f32 %v1539_v12, %v1538_v30  ;;  %v6418_v44 = vadd.f32 %v1571_v51, %v1570_v16  ;;  %v1482_v19 = vadd.f32 %v1481_v18, %v1480_v57  ;;  %v1548_v33 = vsel %vm333_vm3, %v1535_v27, 0.0  ;;  %v1397_v30 = vld [vmem:[#allocation2 + $0x60] sm:$0xff]  ;;  %v1398_v16 = vld [vmem:[#allocation2 + $0x68] sm:$0xff] }
 0x185   : > { %v1580_v31 = vsel %vm333_vm3, %v1567_v42, 0.0  ;;  %v1403_v25 = vmul.f32 %v1395_v34, %v6269_v17  ;;  %v1404_v21 = vmul.f32 %v1396_v11, %v6249_v10  ;;  %v1435_v59 = vmul.f32 %v1427_v60, %v6269_v17  ;;  %v1430_v57 = vld [vmem:[#allocation2 + $0x69] sm:$0xff] }
 0x186   : > { %v1436_v35 = vmul.f32 %v1428_v41, %v6249_v10  ;;  %v1467_v46 = vmul.f32 %v1459_v9, %v6269_v17  ;;  %v1534_v29 = vmul.f32 %v1526_v0, %v6269_v17  ;;  %v1566_v26 = vmul.f32 %v1558_v61, %v6269_v17 }
 0x187   : > { %v1410_v62 = vsel %vm333_vm3, %v1403_v25, 0.0  ;;  %v1417_v55 = vsel %vm333_vm3, %v1404_v21, 0.0  ;;  %v1442_v45 = vsel %vm333_vm3, %v1435_v59, 0.0  ;;  %v1470_v4 = vmul.f32 %v1462_v52, %v6299_v40  ;;  %v1560_v52 = vld [vmem:[#allocation2 + $0x64] sm:$0xff] }
 0x188   : > { %v1549_v43 = vadd.f32 %v1548_v33, %v1547_v20  ;;  %v1581_v24 = vadd.f32 %v1580_v31, %v1579_v7  ;;  %v1411_v8 = vadd.f32 %v1410_v62, %v1409_v14  ;;  %v1449_v10 = vsel %vm333_vm3, %v1436_v35, 0.0  ;;  %v1528_v33 = vld [vmem:[#allocation2 + $0x63] sm:$0xff] }
 0x189   : > { %v1418_v5 = vadd.f32 %v1417_v55, %v1416_v54  ;;  %v1443_v47 = vadd.f32 %v1442_v45, %v1441_v36  ;;  %v1450_v17 = vadd.f32 %v1449_v10, %v1448_v3  ;;  %v1474_v6 = vsel %vm333_vm3, %v1467_v46, 0.0 }
 0x18a   : > { %v1475_v2 = vadd.f32 %v1474_v6, %v1473_v53  ;;  %v1541_v23 = vsel %vm333_vm3, %v1534_v29, 0.0  ;;  %v1573_v20 = vsel %vm333_vm3, %v1566_v26, 0.0  ;;  %v1483_v7 = vsel %vm333_vm3, %v1470_v4, 0.0 }
 0x18b   : > { %v1484_v49 = vadd.f32 %v1483_v7, %v1482_v19  ;;  %v1537_v63 = vmul.f32 %v1529_v50, %v6299_v40  ;;  %v1569_v1 = vmul.f32 %v1561_v39, %v6299_v40  ;;  %v1405_v32 = vmul.f32 %v1397_v30, %v6303_v48 }
 0x18c   : > { %v1406_v22 = vmul.f32 %v1398_v16, %v6299_v40  ;;  %v1437_v37 = vmul.f32 %v1429_v58, %v6303_v48  ;;  %v1438_v27 = vmul.f32 %v1430_v57, %v6299_v40  ;;  %v1469_v15 = vmul.f32 %v1461_v56, %v6303_v48 }
 0x18d   : > { %vm1506_vm5 = vcmp.ge.f32.partialorder %v1484_v49, 0.0  ;;  %v1508_v38 = vmul.f32 0.1, %v1484_v49  ;;  %v1550_v28 = vsel %vm333_vm3, %v1537_v63, 0.0  ;;  %v1582_v42 = vsel %vm333_vm3, %v1569_v1, 0.0 }
 0x18e   : > { %v1551_v34 = vadd.f32 %v1550_v28, %v1549_v43  ;;  %v1583_v14 = vadd.f32 %v1582_v42, %v1581_v24  ;;  %v1412_v54 = vsel %vm333_vm3, %v1405_v32, 0.0  ;;  %v1419_v36 = vsel %vm333_vm3, %v1406_v22, 0.0 }
 0x18f   : > { %v1510_v12 = vsel %vm1506_vm5, %v1484_v49, %v1508_v38  ;;  %v1413_v11 = vadd.f32 %v1412_v54, %v1411_v8  ;;  %v1420_v60 = vadd.f32 %v1419_v36, %v1418_v5  ;;  %v1444_v41 = vsel %vm333_vm3, %v1437_v37, 0.0 }
 0x190   : > { %4525 = vst.msk [vmem:[%s5148_s5 + $0xe8] sm:$0xff] %vm333_vm3, %v1510_v12  ;;  %vm1587_vm6 = vcmp.ge.f32.partialorder %v1551_v34, 0.0  ;;  %v1589_v40 = vmul.f32 0.1, %v1551_v34  ;;  %vm1596_vm7 = vcmp.ge.f32.partialorder %v1583_v14, 0.0  ;;  %v1445_v53 = vadd.f32 %v1444_v41, %v1443_v47 }
 0x191   : > { %v1598_v3 = vmul.f32 0.1, %v1583_v14  ;;  %v1451_v51 = vsel %vm333_vm3, %v1438_v27, 0.0  ;;  %v1476_v18 = vsel %vm333_vm3, %v1469_v15, 0.0  ;;  %vm1487_vm8 = vcmp.ge.f32.partialorder %v1413_v11, 0.0 }
 0x192   : > { %v1591_v9 = vsel %vm1587_vm6, %v1551_v34, %v1589_v40  ;;  %v1452_v61 = vadd.f32 %v1451_v51, %v1450_v17  ;;  %v1477_v19 = vadd.f32 %v1476_v18, %v1475_v2  ;;  %vm1488_vm9 = vcmp.ge.f32.partialorder %v1420_v60, 0.0 }
 0x193   : > { %v1600_v0 = vsel %vm1596_vm7, %v1583_v14, %v1598_v3  ;;  %4527 = vst.msk [vmem:[%s5148_s5 + $0x138] sm:$0xff] %vm333_vm3, %v1591_v9  ;;  %v1489_v31 = vmul.f32 0.1, %v1413_v11  ;;  %v1490_v25 = vmul.f32 0.1, %v1420_v60  ;;  %vm1496_vm10 = vcmp.ge.f32.partialorder %v1445_v53, 0.0 }
 0x194   : > { %4529 = vst.msk [vmem:[%s5148_s5 + $0x188] sm:$0xff] %vm333_vm3, %v1600_v0  ;;  %vm1497_vm11 = vcmp.ge.f32.partialorder %v1452_v61, 0.0  ;;  %v1498_v21 = vmul.f32 0.1, %v1445_v53  ;;  %v1499_v59 = vmul.f32 0.1, %v1452_v61  ;;  %v1536_v26 = vmul.f32 %v1528_v33, %v6303_v48 }
 0x195   : > { %vm1505_vm12 = vcmp.ge.f32.partialorder %v1477_v19, 0.0  ;;  %v1491_v35 = vsel %vm1487_vm8, %v1413_v11, %v1489_v31  ;;  %v1492_v46 = vsel %vm1488_vm9, %v1420_v60, %v1490_v25  ;;  %v1507_v29 = vmul.f32 0.1, %v1477_v19 }
 0x196   : > { %v1542_v62 = vadd.f32 %v1541_v23, %v6416_v13  ;;  %4520 = vst.msk [vmem:[%s5148_s5 + $0x40] sm:$0xff] %vm333_vm3, %v1491_v35  ;;  %4521 = vst.msk [vmem:[%s5148_s5 + $0x48] sm:$0xff] %vm333_vm3, %v1492_v46  ;;  %v1500_v55 = vsel %vm1496_vm10, %v1445_v53, %v1498_v21  ;;  %v1501_v45 = vsel %vm1497_vm11, %v1452_v61, %v1499_v59  ;;  %v1543_v24 = vsel %vm333_vm3, %v1536_v26, 0.0 }
 0x197   : > { %v1568_v4 = vmul.f32 %v1560_v52, %v6303_v48  ;;  %v1574_v50 = vadd.f32 %v1573_v20, %v6418_v44  ;;  %4522 = vst.msk [vmem:[%s5148_s5 + $0x90] sm:$0xff] %vm333_vm3, %v1500_v55  ;;  %4523 = vst.msk [vmem:[%s5148_s5 + $0x98] sm:$0xff] %vm333_vm3, %v1501_v45  ;;  %v1509_v43 = vsel %vm1505_vm12, %v1477_v19, %v1507_v29 }
 0x198   : > { %4524 = vst.msk [vmem:[%s5148_s5 + $0xe0] sm:$0xff] %vm333_vm3, %v1509_v43  ;;  %v1544_v13 = vadd.f32 %v1543_v24, %v1542_v62 }
 0x199   : > { %v1575_v8 = vsel %vm333_vm3, %v1568_v4, 0.0 }
 0x19a   : > { %v1576_v10 = vadd.f32 %v1575_v8, %v1574_v50  ;;  %vm1586_vm13 = vcmp.ge.f32.partialorder %v1544_v13, 0.0  ;;  %v1588_v39 = vmul.f32 0.1, %v1544_v13 }
 0x19c   : > { %vm1595_vm14 = vcmp.ge.f32.partialorder %v1576_v10, 0.0  ;;  %v1597_v48 = vmul.f32 0.1, %v1576_v10  ;;  %v1590_v30 = vsel %vm1586_vm13, %v1544_v13, %v1588_v39 }
 0x19d   : > { %4526 = vst.msk [vmem:[%s5148_s5 + $0x130] sm:$0xff] %vm333_vm3, %v1590_v30 }
 0x19e   : > { %v1599_v44 = vsel %vm1595_vm14, %v1576_v10, %v1597_v48 }
 0x19f   : > { %4528 = vst.msk [vmem:[%s5148_s5 + $0x180] sm:$0xff] %vm333_vm3, %v1599_v44 }
 0x1a0 PF: > { %p4530_p7 = scmp.ne.s32.totalorder %s4931_s15, 1 }
 0x1a2   : > { %1607 = sbr.rel (%p4530_p7) target bundleno = 745 (0x2e9), region = 44 }
 0x1a7   : > { %v6481_v16 = vld [vmem:[%s5139_s30 + $0x10] sm:$0xff]  ;;  %v6484_v5 = vld [vmem:[%s5139_s30] sm:$0xff]  ;;  %s4958_s29 = smov 4   ;;  %vm1608_vm3 = vcmask 125952   ;;  %v6491_v47 = vld [vmem:[%s5139_s30 + $0x18] sm:$0xff]  ;;  %vm1617_vm15 = vcmask 31744  }
 0x1a8   : > { %1646 = vrot.lane.b32.xlu1 %v6481_v16, %s4958_s29  ;;  %1642 = vrot.lane.b32.xlu0 %v6484_v5, %s4958_s29  ;;  %v6494_v17 = vld [vmem:[%s5139_s30 + $0x8] sm:$0xff]  ;;  %v9209_v6 = vmov 0.0   ;;  %v6528_v57 = vld [vmem:[%s5139_s30 + $0x20] sm:$0xff]  ;;  %s4960_s25 = smov 2   ;;  %s4961_s3 = smov 126   ;;  %vm1666_vm0 = vcmask 130080  }
 0x1a9   : > { %1610 = vst.msk [vmem:[#allocation2 + $0x20] sm:$0xf] %vm1608_vm3, %v9209_v6  ;;  %1609 = vst.msk [vmem:[#allocation2] sm:$0xf] %vm1608_vm3, %v9209_v6  ;;  %v6525_v58 = vld [vmem:[%s5139_s30 + $0x28] sm:$0xff]  ;;  %v1633_v56 = vld [vmem:[%s5139_s30 + $0x38] sm:$0xff] }
 0x1aa   : > { %1620 = vst.msk [vmem:[#allocation2 + $0x24] sm:$0xff] %vm1617_vm15, %v9209_v6  ;;  %1618 = vst.msk [vmem:[#allocation2 + $0x4] sm:$0xff] %vm1617_vm15, %v9209_v6  ;;  %v1632_v2 = vld [vmem:[%s5139_s30 + $0x30] sm:$0xff]  ;;  %s4962_s21 = smov 124   ;;  %v6564_v1 = vld [vmem:[%s5133_s23] sm:$0xff]  ;;  %vm1699_vm1 = vcmask 130048  }
 0x1ab   : > { %1611 = vst.msk [vmem:[#allocation2 + $0x40] sm:$0xf] %vm1608_vm3, %v9209_v6  ;;  %1612 = vst.msk [vmem:[#allocation2 + $0x60] sm:$0xf] %vm1608_vm3, %v9209_v6  ;;  %v6561_v63 = vld [vmem:[%s5133_s23 + $0x10] sm:$0xff]  ;;  %v6575_v60 = vld [vmem:[%s5133_s23 + $0x18] sm:$0xff] }
 0x1ac   : > { %1613 = vst.msk [vmem:[#allocation2 + $0x14] sm:$0xf] %vm1608_vm3, %v9209_v6  ;;  %1614 = vst.msk [vmem:[#allocation2 + $0x34] sm:$0xf] %vm1608_vm3, %v9209_v6  ;;  %1648 = vrot.lane.b32.xlu1 %v6491_v47, %s4958_s29  ;;  %1644 = vrot.lane.b32.xlu0 %v6494_v17, %s4958_s29  ;;  %vm1896_vm2 = vcmask 15360   ;;  %v6581_v53 = vld [vmem:[%s5133_s23 + $0x8] sm:$0xff] }
 0x1ad   : > { %1615 = vst.msk [vmem:[#allocation2 + $0x54] sm:$0xf] %vm1608_vm3, %v9209_v6  ;;  %1616 = vst.msk [vmem:[#allocation2 + $0x74] sm:$0xf] %vm1608_vm3, %v9209_v6  ;;  %vm1945_vm4 = vcmask 130064   ;;  %vm2412_vm5 = vcmask 130160  }
 0x1ae   : > { %1619 = vst.msk [vmem:[#allocation2 + $0xc] sm:$0xff] %vm1617_vm15, %v9209_v6  ;;  %1621 = vst.msk [vmem:[#allocation2 + $0x2c] sm:$0xff] %vm1617_vm15, %v9209_v6  ;;  %vm2461_vm6 = vcmask 113664   ;;  %vm2691_vm14 = vcmask 130144  }
 0x1af   : > { %1622 = vst.msk [vmem:[#allocation2 + $0x44] sm:$0xff] %vm1617_vm15, %v9209_v6  ;;  %1623 = vst.msk [vmem:[#allocation2 + $0x4c] sm:$0xff] %vm1617_vm15, %v9209_v6 }
 0x1b0   : > { %1624 = vst.msk [vmem:[#allocation2 + $0x64] sm:$0xff] %vm1617_vm15, %v9209_v6  ;;  %1625 = vst.msk [vmem:[#allocation2 + $0x6c] sm:$0xff] %vm1617_vm15, %v9209_v6  ;;  %1652 = vrot.lane.b32.xlu1 %v6525_v58, %s4958_s29  ;;  %1650 = vrot.lane.b32.xlu0 %v6528_v57, %s4958_s29 }
 0x1b4   : > { %1656 = vrot.lane.b32.xlu1 %v1633_v56, %s4958_s29  ;;  %1654 = vrot.lane.b32.xlu0 %v1632_v2, %s4958_s29 }
 0x1b8   : > { %1923 = vrot.lane.b32.xlu1 %v6494_v17, %s4960_s25  ;;  %1921 = vrot.lane.b32.xlu0 %v6484_v5, %s4960_s25 }
 0x1bc   : > { %1927 = vrot.lane.b32.xlu1 %v6491_v47, %s4960_s25  ;;  %1925 = vrot.lane.b32.xlu0 %v6481_v16, %s4960_s25 }
 0x1c0   : > { %1931 = vrot.lane.b32.xlu1 %v6525_v58, %s4960_s25  ;;  %1929 = vrot.lane.b32.xlu0 %v6528_v57, %s4960_s25 }
 0x1c4   : > { %1935 = vrot.lane.b32.xlu1 %v1633_v56, %s4960_s25  ;;  %1933 = vrot.lane.b32.xlu0 %v1632_v2, %s4960_s25 }
 0x1c8   : > { %2439 = vrot.lane.b32.xlu1 %v6494_v17, %s4961_s3  ;;  %2437 = vrot.lane.b32.xlu0 %v6484_v5, %s4961_s3 }
 0x1cc   : > { %2443 = vrot.lane.b32.xlu1 %v6491_v47, %s4961_s3  ;;  %2441 = vrot.lane.b32.xlu0 %v6481_v16, %s4961_s3 }
 0x1d0   : > { %2447 = vrot.lane.b32.xlu1 %v6525_v58, %s4961_s3  ;;  %2445 = vrot.lane.b32.xlu0 %v6528_v57, %s4961_s3 }
 0x1d4   : > { %2451 = vrot.lane.b32.xlu1 %v1633_v56, %s4961_s3  ;;  %2449 = vrot.lane.b32.xlu0 %v1632_v2, %s4961_s3 }
 0x1d8   : > { %2718 = vrot.lane.b32.xlu1 %v6494_v17, %s4962_s21  ;;  %2716 = vrot.lane.b32.xlu0 %v6484_v5, %s4962_s21 }
 0x1dc   : > { %2722 = vrot.lane.b32.xlu1 %v6491_v47, %s4962_s21  ;;  %2720 = vrot.lane.b32.xlu0 %v6481_v16, %s4962_s21 }
 0x1e0   : > { %2726 = vrot.lane.b32.xlu1 %v6525_v58, %s4962_s21  ;;  %2724 = vrot.lane.b32.xlu0 %v6528_v57, %s4962_s21 }
 0x1e4   : > { %2730 = vrot.lane.b32.xlu1 %v1633_v56, %s4962_s21  ;;  %2728 = vrot.lane.b32.xlu0 %v1632_v2, %s4962_s21 }
 0x21a   : > { %v1647_v23 = vpop.permute.xlu1 %1646  ;;  %v1643_v20 = vpop.permute.xlu0 %1642 }
 0x21b   : > { %1669 = vst.msk [vmem:[#allocation2 + $0x24] sm:$0xff] %vm1666_vm0, %v1647_v23  ;;  %1667 = vst.msk [vmem:[#allocation2 + $0x4] sm:$0xff] %vm1666_vm0, %v1643_v20  ;;  %v6616_v20 = vld [vmem:[%s5133_s23 + $0x28] sm:$0xff] }
 0x21e   : > { %v1649_v7 = vpop.permute.xlu1 %1648  ;;  %v1645_v49 = vpop.permute.xlu0 %1644 }
 0x21f   : > { %1670 = vst.msk [vmem:[#allocation2 + $0x2c] sm:$0xff] %vm1666_vm0, %v1649_v7  ;;  %1668 = vst.msk [vmem:[#allocation2 + $0xc] sm:$0xff] %vm1666_vm0, %v1645_v49 }
 0x222   : > { %v1685_v32 = vld [vmem:[#allocation2 + $0x20] sm:$0xff]  ;;  %v1653_v27 = vpop.permute.xlu1 %1652  ;;  %v1651_v15 = vpop.permute.xlu0 %1650 }
 0x223   : > { %v1718_v22 = vld [vmem:[#allocation2 + $0x22] sm:$0xff]  ;;  %v1693_v38 = vmul.f32 %v1685_v32, %v6561_v63  ;;  %1672 = vst.msk [vmem:[#allocation2 + $0x4c] sm:$0xff] %vm1666_vm0, %v1653_v27  ;;  %1671 = vst.msk [vmem:[#allocation2 + $0x44] sm:$0xff] %vm1666_vm0, %v1651_v15 }
 0x224   : > { %v1750_v37 = vld [vmem:[#allocation2 + $0x24] sm:$0xff]  ;;  %v1726_v28 = vmul.f32 %v1718_v22, %v6561_v63 }
 0x225   : > { %v1758_v42 = vmul.f32 %v1750_v37, %v6561_v63  ;;  %v1683_v34 = vld [vmem:[#allocation2] sm:$0xff]  ;;  %v1701_v41 = vsel %vm1699_vm1, %v1693_v38, 0.0 }
 0x226   : > { %v1716_v14 = vld [vmem:[#allocation2 + $0x2] sm:$0xff]  ;;  %v1691_v36 = vmul.f32 %v1683_v34, %v6564_v1  ;;  %v1733_v40 = vsel %vm1699_vm1, %v1726_v28, 0.0  ;;  %v1719_v61 = vld [vmem:[#allocation2 + $0x2a] sm:$0xff]  ;;  %v1657_v33 = vpop.permute.xlu1 %1656  ;;  %v1655_v52 = vpop.permute.xlu0 %1654 }
 0x227   : > { %v1748_v54 = vld [vmem:[#allocation2 + $0x4] sm:$0xff]  ;;  %v1724_v12 = vmul.f32 %v1716_v14, %v6564_v1  ;;  %v1765_v3 = vsel %vm1699_vm1, %v1758_v42, 0.0  ;;  %v1751_v19 = vld [vmem:[#allocation2 + $0x2c] sm:$0xff]  ;;  %1674 = vst.msk [vmem:[#allocation2 + $0x6c] sm:$0xff] %vm1666_vm0, %v1657_v33  ;;  %1673 = vst.msk [vmem:[#allocation2 + $0x64] sm:$0xff] %vm1666_vm0, %v1655_v52  ;;  %v1727_v26 = vmul.f32 %v1719_v61, %v6575_v60 }
 0x228   : > { %v1756_v11 = vmul.f32 %v1748_v54, %v6564_v1  ;;  %v1700_v51 = vsel %vm1699_vm1, %v1691_v36, 0.0  ;;  %v1686_v0 = vld [vmem:[#allocation2 + $0x28] sm:$0xff]  ;;  %v1849_v29 = vld [vmem:[#allocation2 + $0x30] sm:$0xff]  ;;  %v1759_v62 = vmul.f32 %v1751_v19, %v6575_v60  ;;  %v6630_v36 = vld [vmem:[%s5133_s23 + $0x20] sm:$0xff] }
 0x229   : > { %v1732_v18 = vsel %vm1699_vm1, %v1724_v12, 0.0  ;;  %v6586_v31 = vadd.f32 %v1701_v41, %v1700_v51  ;;  %v1694_v59 = vmul.f32 %v1686_v0, %v6575_v60  ;;  %v1816_v35 = vld [vmem:[#allocation2 + $0x26] sm:$0xff]  ;;  %v1817_v46 = vld [vmem:[#allocation2 + $0x2e] sm:$0xff]  ;;  %v1856_v13 = vmul.f32 %v1686_v0, %v6561_v63 }
 0x22a   : > { %v1764_v9 = vsel %vm1699_vm1, %v1756_v11, 0.0  ;;  %v6588_v25 = vadd.f32 %v1733_v40, %v1732_v18  ;;  %v1824_v55 = vmul.f32 %v1816_v35, %v6561_v63  ;;  %v1825_v45 = vmul.f32 %v1817_v46, %v6575_v60  ;;  %1900 = vst.msk [vmem:[#allocation2 + $0x2c] sm:$0xff] %vm1896_vm2, %v9209_v6  ;;  %1899 = vst.msk [vmem:[#allocation2 + $0x24] sm:$0xff] %vm1896_vm2, %v9209_v6  ;;  %v1684_v4 = vld [vmem:[#allocation2 + $0x8] sm:$0xff]  ;;  %v1847_v30 = vld [vmem:[#allocation2 + $0x10] sm:$0xff]  ;;  %v1924_v49 = vpop.permute.xlu1 %1923  ;;  %v1922_v32 = vpop.permute.xlu0 %1921 }
 0x22b   : > { %v6590_v21 = vadd.f32 %v1765_v3, %v1764_v9  ;;  %v1717_v50 = vld [vmem:[#allocation2 + $0xa] sm:$0xff]  ;;  %v1708_v24 = vsel %vm1699_vm1, %v1694_v59, 0.0  ;;  %v1857_v8 = vmul.f32 %v1849_v29, %v6575_v60  ;;  %v1692_v10 = vmul.f32 %v1684_v4, %v6581_v53  ;;  %v1687_v12 = vld [vmem:[#allocation2 + $0x40] sm:$0xff] }
 0x22c   : > { %v1749_v43 = vld [vmem:[#allocation2 + $0xc] sm:$0xff]  ;;  %v1740_v44 = vsel %vm1699_vm1, %v1727_v26, 0.0  ;;  %v1772_v56 = vsel %vm1699_vm1, %v1759_v62, 0.0  ;;  %v1831_v2 = vsel %vm1699_vm1, %v1824_v55, 0.0  ;;  %v1838_v23 = vsel %vm1699_vm1, %v1825_v45, 0.0  ;;  %v1720_v41 = vld [vmem:[#allocation2 + $0x42] sm:$0xff] }
 0x22d   : > { %v1814_v39 = vld [vmem:[#allocation2 + $0x6] sm:$0xff]  ;;  %v1815_v48 = vld [vmem:[#allocation2 + $0xe] sm:$0xff]  ;;  %v1863_v22 = vsel %vm1699_vm1, %v1856_v13, 0.0  ;;  %v1870_v37 = vsel %vm1699_vm1, %v1857_v8, 0.0  ;;  %v1707_v27 = vsel %vm1699_vm1, %v1692_v10, 0.0  ;;  %v1725_v15 = vmul.f32 %v1717_v50, %v6581_v53 }
 0x22e   : > { %1898 = vst.msk [vmem:[#allocation2 + $0xc] sm:$0xff] %vm1896_vm2, %v9209_v6  ;;  %1897 = vst.msk [vmem:[#allocation2 + $0x4] sm:$0xff] %vm1896_vm2, %v9209_v6  ;;  %v1753_v7 = vld [vmem:[#allocation2 + $0x4c] sm:$0xff]  ;;  %v6624_v42 = vadd.f32 %v1708_v24, %v1707_v27  ;;  %v1757_v34 = vmul.f32 %v1749_v43, %v6581_v53  ;;  %v1822_v14 = vmul.f32 %v1814_v39, %v6564_v1  ;;  %v1752_v0 = vld [vmem:[#allocation2 + $0x44] sm:$0xff]  ;;  %v1928_v26 = vpop.permute.xlu1 %1927  ;;  %v1926_v62 = vpop.permute.xlu0 %1925 }
 0x22f   : > { %v1819_v38 = vld [vmem:[#allocation2 + $0x4e] sm:$0xff]  ;;  %1947 = vst.msk [vmem:[#allocation2 + $0xc] sm:$0xff] %vm1945_vm4, %v1924_v49  ;;  %1946 = vst.msk [vmem:[#allocation2 + $0x4] sm:$0xff] %vm1945_vm4, %v1922_v32  ;;  %v1823_v54 = vmul.f32 %v1815_v48, %v6581_v53  ;;  %v1739_v40 = vsel %vm1699_vm1, %v1725_v15, 0.0  ;;  %v1854_v3 = vmul.f32 %v1684_v4, %v6564_v1  ;;  %v1855_v51 = vmul.f32 %v1847_v30, %v6581_v53  ;;  %v6638_v61 = vld [vmem:[#allocation2 + $0x46] sm:$0xff] }
 0x230   : > { %v1851_v28 = vld [vmem:[#allocation2 + $0x50] sm:$0xff]  ;;  %v6632_v11 = vld [vmem:[#allocation2 + $0x48] sm:$0xff]  ;;  %v1761_v18 = vmul.f32 %v1753_v7, %v6616_v20  ;;  %v6640_v19 = vadd.f32 %v1740_v44, %v1739_v40  ;;  %v1771_v33 = vsel %vm1699_vm1, %v1757_v34, 0.0  ;;  %v1830_v52 = vsel %vm1699_vm1, %v1822_v14, 0.0  ;;  %v6658_v43 = vld [vmem:[#allocation2 + $0x60] sm:$0xff]  ;;  %1949 = vst.msk [vmem:[#allocation2 + $0x2c] sm:$0xff] %vm1945_vm4, %v1928_v26 }
 0x231   : > { %v1721_v9 = vld [vmem:[#allocation2 + $0x4a] sm:$0xff]  ;;  %v1837_v59 = vsel %vm1699_vm1, %v1823_v54, 0.0  ;;  %v1773_v55 = vadd.f32 %v1772_v56, %v1771_v33  ;;  %v6655_v45 = vadd.f32 %v1831_v2, %v1830_v52  ;;  %v1862_v50 = vsel %vm1699_vm1, %v1854_v3, 0.0  ;;  %v6662_v13 = vld [vmem:[#allocation2 + $0x62] sm:$0xff]  ;;  %1948 = vst.msk [vmem:[#allocation2 + $0x24] sm:$0xff] %vm1945_vm4, %v1926_v62  ;;  %v6691_v15 = vld [vmem:[%s5133_s23 + $0x38] sm:$0xff] }
 0x232   : > { %1901 = vst.msk [vmem:[#allocation2 + $0x44] sm:$0xff] %vm1896_vm2, %v9209_v6  ;;  %1902 = vst.msk [vmem:[#allocation2 + $0x4c] sm:$0xff] %vm1896_vm2, %v9209_v6  ;;  %v6649_v35 = vld [vmem:[#allocation2 + $0x6c] sm:$0xff]  ;;  %v1839_v4 = vadd.f32 %v1838_v23, %v1837_v59  ;;  %v6666_v8 = vadd.f32 %v1863_v22, %v1862_v50  ;;  %v1869_v10 = vsel %vm1699_vm1, %v1855_v51, 0.0  ;;  %v1774_v39 = vsel %vm1699_vm1, %v1761_v18, 0.0  ;;  %v6673_v44 = vld [vmem:[#allocation2 + $0x64] sm:$0xff]  ;;  %v1932_v54 = vpop.permute.xlu1 %1931 }
 0x233   : > { %v6651_v46 = vld [vmem:[#allocation2 + $0x6e] sm:$0xff]  ;;  %v1827_v48 = vmul.f32 %v1819_v38, %v6616_v20  ;;  %v6675_v56 = vld [vmem:[#allocation2 + $0x66] sm:$0xff]  ;;  %v1871_v2 = vadd.f32 %v1870_v37, %v1869_v10  ;;  %v6677_v23 = vadd.f32 %v1774_v39, %v1773_v55  ;;  %v1859_v7 = vmul.f32 %v1851_v28, %v6616_v20  ;;  %9350 = vst [vmem:[#allocation67_spill] sm:$0xff] %v6691_v15 }
 0x234   : > { %v6653_v29 = vld [vmem:[#allocation2 + $0x70] sm:$0xff]  ;;  %v6660_v24 = vld [vmem:[#allocation2 + $0x68] sm:$0xff]  ;;  %v1695_v49 = vmul.f32 %v1687_v12, %v6630_v36  ;;  %v1696_v22 = vmul.f32 %v6632_v11, %v6616_v20  ;;  %v1728_v27 = vmul.f32 %v1720_v41, %v6630_v36  ;;  %v1729_v37 = vmul.f32 %v1721_v9, %v6616_v20  ;;  %v1930_v12 = vpop.permute.xlu0 %1929  ;;  %1951 = vst.msk [vmem:[#allocation2 + $0x4c] sm:$0xff] %vm1945_vm4, %v1932_v54 }
 0x235   : > { %v6671_v30 = vld [vmem:[#allocation2 + $0x6a] sm:$0xff]  ;;  %v1840_v32 = vsel %vm1699_vm1, %v1827_v48, 0.0  ;;  %v1872_v3 = vsel %vm1699_vm1, %v1859_v7, 0.0  ;;  %v1760_v41 = vmul.f32 %v1752_v0, %v6630_v36  ;;  %1950 = vst.msk [vmem:[#allocation2 + $0x44] sm:$0xff] %vm1945_vm4, %v1930_v12 }
 0x236   : > { %1903 = vst.msk [vmem:[#allocation2 + $0x64] sm:$0xff] %vm1896_vm2, %v9209_v6  ;;  %1904 = vst.msk [vmem:[#allocation2 + $0x6c] sm:$0xff] %vm1896_vm2, %v9209_v6  ;;  %v6694_v38 = vld [vmem:[%s5133_s23 + $0x30] sm:$0xff]  ;;  %v1841_v40 = vadd.f32 %v1840_v32, %v1839_v4  ;;  %v1703_v51 = vsel %vm1699_vm1, %v1695_v49, 0.0  ;;  %v6705_v18 = vld [vmem:[#allocation2] sm:$0xff]  ;;  %v1873_v52 = vadd.f32 %v1872_v3, %v1871_v2  ;;  %v1710_v26 = vsel %vm1699_vm1, %v1696_v22, 0.0  ;;  %v1936_v32 = vpop.permute.xlu1 %1935 }
 0x237   : > { %9351 = vst [vmem:[#allocation68_spill] sm:$0xff] %v6694_v38  ;;  %v6696_v28 = vld [vmem:[#allocation2 + $0xc] sm:$0xff]  ;;  %v6709_v33 = vld [vmem:[#allocation2 + $0x2] sm:$0xff]  ;;  %v1704_v59 = vadd.f32 %v1703_v51, %v6586_v31  ;;  %v1735_v62 = vsel %vm1699_vm1, %v1728_v27, 0.0  ;;  %v1711_v50 = vadd.f32 %v1710_v26, %v6624_v42  ;;  %v1742_v39 = vsel %vm1699_vm1, %v1729_v37, 0.0  ;;  %1953 = vst.msk [vmem:[#allocation2 + $0x6c] sm:$0xff] %vm1945_vm4, %v1936_v32 }
 0x238   : > { %v6698_v34 = vld [vmem:[#allocation2 + $0xe] sm:$0xff]  ;;  %v6718_v0 = vld [vmem:[#allocation2 + $0x4] sm:$0xff]  ;;  %v1736_v10 = vadd.f32 %v1735_v62, %v6588_v25  ;;  %v1767_v48 = vsel %vm1699_vm1, %v1760_v41, 0.0  ;;  %v6731_v31 = vadd.f32 %v1742_v39, %v6640_v19  ;;  %v1826_v25 = vmul.f32 %v6638_v61, %v6630_v36 }
 0x239   : > { %v6700_v14 = vld [vmem:[#allocation2 + $0x10] sm:$0xff]  ;;  %v6707_v9 = vld [vmem:[#allocation2 + $0x8] sm:$0xff]  ;;  %v6734_v2 = vadd.f32 %v1767_v48, %v6590_v21  ;;  %v1858_v42 = vmul.f32 %v6632_v11, %v6630_v36  ;;  %v1763_v19 = vmul.f32 %v6649_v35, %v6691_v15  ;;  %v1829_v21 = vmul.f32 %v6651_v46, %v6691_v15  ;;  %v6754_v22 = vld [vmem:[#allocation2 + $0x20] sm:$0xff] }
 0x23a   : > { %v6716_v55 = vld [vmem:[#allocation2 + $0xa] sm:$0xff]  ;;  %v1861_v61 = vmul.f32 %v6653_v29, %v6691_v15  ;;  %v1697_v11 = vmul.f32 %v6658_v43, %v6694_v38  ;;  %v6758_v37 = vld [vmem:[#allocation2 + $0x22] sm:$0xff]  ;;  %v1833_v35 = vsel %vm1699_vm1, %v1826_v25, 0.0  ;;  %v1698_v29 = vmul.f32 %v6660_v24, %v6691_v15 }
 0x23b   : > { %v6720_v4 = vld [vmem:[#allocation2 + $0x6] sm:$0xff]  ;;  %v6742_v49 = vld [vmem:[#allocation2 + $0x2e] sm:$0xff]  ;;  %v1865_v46 = vsel %vm1699_vm1, %v1858_v42, 0.0  ;;  %v1730_v43 = vmul.f32 %v6662_v13, %v6694_v38  ;;  %v6775_v51 = vadd.f32 %v1833_v35, %v6655_v45  ;;  %v1776_v26 = vsel %vm1699_vm1, %v1763_v19, 0.0 }
 0x23c   : > { %2183 = vst.msk [vmem:[#allocation2 + $0x4] sm:$0xff] %vm1699_vm1, %v6484_v5  ;;  %2184 = vst.msk [vmem:[#allocation2 + $0xc] sm:$0xff] %vm1699_vm1, %v6494_v17  ;;  %v6740_v7 = vld [vmem:[#allocation2 + $0x2c] sm:$0xff]  ;;  %v1934_v17 = vpop.permute.xlu0 %1933  ;;  %v6770_v12 = vld [vmem:[#allocation2 + $0x24] sm:$0xff]  ;;  %v6778_v41 = vadd.f32 %v1865_v46, %v6666_v8  ;;  %v1842_v62 = vsel %vm1699_vm1, %v1829_v21, 0.0  ;;  %v1777_v13 = vadd.f32 %v1776_v26, %v6677_v23  ;;  %v1874_v48 = vsel %vm1699_vm1, %v1861_v61, 0.0 }
 0x23d   : > { %v6744_v5 = vld [vmem:[#allocation2 + $0x30] sm:$0xff]  ;;  %v6756_v27 = vld [vmem:[#allocation2 + $0x28] sm:$0xff]  ;;  %1952 = vst.msk [vmem:[#allocation2 + $0x64] sm:$0xff] %vm1945_vm4, %v1934_v17  ;;  %v1843_v39 = vadd.f32 %v1842_v62, %v1841_v40  ;;  %v1705_v45 = vsel %vm1699_vm1, %v1697_v11, 0.0  ;;  %v1875_v25 = vadd.f32 %v1874_v48, %v1873_v52  ;;  %v1712_v42 = vsel %vm1699_vm1, %v1698_v29, 0.0 }
 0x23e   : > { %v6768_v54 = vld [vmem:[#allocation2 + $0x2a] sm:$0xff]  ;;  %v1706_v8 = vadd.f32 %v1705_v45, %v1704_v59  ;;  %v1731_v32 = vmul.f32 %v6671_v30, %v6691_v15  ;;  %vm1798_vm7 = vcmp.ge.f32.partialorder %v1777_v13, 0.0  ;;  %v1800_v17 = vmul.f32 0.1, %v1777_v13 }
 0x23f   : > { %v6772_v3 = vld [vmem:[#allocation2 + $0x26] sm:$0xff]  ;;  %vm1879_vm8 = vcmp.ge.f32.partialorder %v1843_v39, 0.0  ;;  %vm1888_vm9 = vcmp.ge.f32.partialorder %v1875_v25, 0.0  ;;  %v1713_v23 = vadd.f32 %v1712_v42, %v1711_v50  ;;  %v1737_v40 = vsel %vm1699_vm1, %v1730_v43, 0.0  ;;  %v2440_v50 = vpop.permute.xlu1 %2439 }
 0x240   : > { %2185 = vst.msk [vmem:[#allocation2 + $0x24] sm:$0xff] %vm1699_vm1, %v6481_v16  ;;  %2186 = vst.msk [vmem:[#allocation2 + $0x2c] sm:$0xff] %vm1699_vm1, %v6491_v47  ;;  %v1881_v16 = vmul.f32 0.1, %v1843_v39  ;;  %v1890_v47 = vmul.f32 0.1, %v1875_v25  ;;  %v2438_v59 = vpop.permute.xlu0 %2437  ;;  %v1802_v21 = vsel %vm1798_vm7, %v1777_v13, %v1800_v17  ;;  %v1738_v30 = vadd.f32 %v1737_v40, %v1736_v10 }
 0x241   : > { %v1744_v11 = vsel %vm1699_vm1, %v1731_v32, 0.0  ;;  %4534 = vst.msk [vmem:[%s5148_s5 + $0xa8] sm:$0xff] %vm1699_vm1, %v1802_v21  ;;  %v1762_v10 = vmul.f32 %v6673_v44, %v6694_v38  ;;  %vm1780_vm10 = vcmp.ge.f32.partialorder %v1706_v8, 0.0  ;;  %vm1781_vm11 = vcmp.ge.f32.partialorder %v1713_v23, 0.0 }
 0x242   : > { %v1883_v61 = vsel %vm1879_vm8, %v1843_v39, %v1881_v16  ;;  %v1892_v43 = vsel %vm1888_vm9, %v1875_v25, %v1890_v47  ;;  %v1745_v26 = vadd.f32 %v1744_v11, %v6731_v31  ;;  %v1782_v48 = vmul.f32 0.1, %v1706_v8  ;;  %v6836_v11 = vld [vmem:[#allocation2 + $0x4e] sm:$0xff] }
 0x243   : > { %v6793_v19 = vld [vmem:[#allocation2] sm:$0xff]  ;;  %v6795_v52 = vld [vmem:[#allocation2 + $0x8] sm:$0xff]  ;;  %4536 = vst.msk [vmem:[%s5148_s5 + $0xf8] sm:$0xff] %vm1699_vm1, %v1883_v61  ;;  %4538 = vst.msk [vmem:[%s5148_s5 + $0x148] sm:$0xff] %vm1699_vm1, %v1892_v43  ;;  %v1783_v45 = vmul.f32 0.1, %v1713_v23  ;;  %v1828_v16 = vmul.f32 %v6675_v56, %v6694_v38 }
 0x244   : > { %v6798_v35 = vld [vmem:[#allocation2 + $0x2] sm:$0xff]  ;;  %v6800_v46 = vld [vmem:[#allocation2 + $0xa] sm:$0xff]  ;;  %vm1788_vm12 = vcmp.ge.f32.partialorder %v1738_v30, 0.0  ;;  %v1769_v31 = vsel %vm1699_vm1, %v1762_v10, 0.0  ;;  %vm1789_vm13 = vcmp.ge.f32.partialorder %v1745_v26, 0.0  ;;  %v1784_v32 = vsel %vm1780_vm10, %v1706_v8, %v1782_v48 }
 0x245   : > { %v6802_v29 = vld [vmem:[#allocation2 + $0x4] sm:$0xff]  ;;  %v6812_v62 = vld [vmem:[#allocation2 + $0xc] sm:$0xff]  ;;  %v1790_v44 = vmul.f32 0.1, %v1738_v30  ;;  %v1791_v25 = vmul.f32 0.1, %v1745_v26  ;;  %v1770_v42 = vadd.f32 %v1769_v31, %v6734_v2  ;;  %v1785_v17 = vsel %vm1781_vm11, %v1713_v23, %v1783_v45 }
 0x246   : > { %v6814_v13 = vld [vmem:[#allocation2 + $0x6] sm:$0xff]  ;;  %v6816_v39 = vld [vmem:[#allocation2 + $0xe] sm:$0xff]  ;;  %1786 = vst.msk [vmem:[%s5148_s5] sm:$0xff] %vm1699_vm1, %v1784_v32  ;;  %1787 = vst.msk [vmem:[%s5148_s5 + $0x8] sm:$0xff] %vm1699_vm1, %v1785_v17  ;;  %v1860_v10 = vmul.f32 %v6660_v24, %v6694_v38  ;;  %v2035_v48 = vmul.f32 %v6696_v28, %v6581_v53  ;;  %v2442_v17 = vpop.permute.xlu0 %2441  ;;  %v2102_v28 = vmul.f32 %v6698_v34, %v6581_v53  ;;  %v9355_v15 = vmov 0.0  }
 0x247   : > { %2413 = vst.msk [vmem:[#allocation2 + $0x4] sm:$0xff] %vm2412_vm5, %v9209_v6  ;;  %v6828_v47 = vld [vmem:[#allocation2 + $0x10] sm:$0xff]  ;;  %v6830_v40 = vld [vmem:[#allocation2 + $0x20] sm:$0xff]  ;;  %v6832_v21 = vld [vmem:[#allocation2 + $0x28] sm:$0xff]  ;;  %v1792_v56 = vsel %vm1788_vm12, %v1738_v30, %v1790_v44  ;;  %vm1797_vm3 = vcmp.ge.f32.partialorder %v1770_v42, 0.0  ;;  %v1835_v30 = vsel %vm1699_vm1, %v1828_v16, 0.0  ;;  %v2134_v16 = vmul.f32 %v6700_v14, %v6581_v53 }
 0x248   : > { %2462 = vst.msk [vmem:[#allocation2 + $0x4] sm:$0xff] %vm2461_vm6, %v2438_v59  ;;  %v6834_v61 = vld [vmem:[#allocation2 + $0x4c] sm:$0xff]  ;;  %v6840_v2 = vld [vmem:[#allocation2 + $0x40] sm:$0xff]  ;;  %v1793_v59 = vsel %vm1789_vm13, %v1745_v26, %v1791_v25  ;;  %v1799_v24 = vmul.f32 0.1, %v1770_v42  ;;  %v2444_v25 = vpop.permute.xlu1 %2443  ;;  %v1970_v14 = vmul.f32 %v6705_v18, %v6564_v1  ;;  %v1971_v18 = vmul.f32 %v6707_v9, %v6581_v53 }
 0x249   : > { %v6838_v43 = vld [vmem:[#allocation2 + $0x50] sm:$0xff]  ;;  %9352 = vst [vmem:[#allocation69_spill] sm:$0xff] %v6840_v2  ;;  %v6842_v8 = vld [vmem:[#allocation2 + $0x48] sm:$0xff]  ;;  %2414 = vst.msk [vmem:[#allocation2 + $0xc] sm:$0xff] %vm2412_vm5, %v9209_v6  ;;  %v1836_v6 = vadd.f32 %v1835_v30, %v6775_v51 }
 0x24a   : > { %9353 = vst [vmem:[#allocation70_spill] sm:$0xff] %v6842_v8  ;;  %v6844_v23 = vld [vmem:[#allocation2 + $0x42] sm:$0xff]  ;;  %v6860_v31 = vld [vmem:[#allocation2 + $0x2a] sm:$0xff]  ;;  %4531 = vst.msk [vmem:[%s5148_s5 + $0x50] sm:$0xff] %vm1699_vm1, %v1792_v56  ;;  %v1867_v56 = vsel %vm1699_vm1, %v1860_v10, 0.0  ;;  %v1801_v51 = vsel %vm1797_vm3, %v1770_v42, %v1799_v24  ;;  %v6912_v42 = vsel %vm1699_vm1, %v2134_v16, 0.0  ;;  %v2002_v16 = vmul.f32 %v6709_v33, %v6564_v1 }
 0x24b   : > { %9354 = vst [vmem:[#allocation71_spill] sm:$0xff] %v6844_v23  ;;  %v6858_v45 = vld [vmem:[#allocation2 + $0x22] sm:$0xff]  ;;  %4532 = vst.msk [vmem:[%s5148_s5 + $0x58] sm:$0xff] %vm1699_vm1, %v1793_v59  ;;  %v6871_v26 = vld [vmem:[#allocation2 + $0x2c] sm:$0xff]  ;;  %v6879_v59 = vsel %vm1699_vm1, %v2035_v48, 0.0  ;;  %v1868_v10 = vadd.f32 %v1867_v56, %v6778_v41  ;;  %v6894_v48 = vsel %vm1699_vm1, %v2102_v28, 0.0 }
 0x24c   : > { %v6862_v32 = vld [vmem:[#allocation2 + $0x24] sm:$0xff]  ;;  %2463 = vst.msk [vmem:[#allocation2 + $0xc] sm:$0xff] %vm2461_vm6, %v2440_v50  ;;  %v6883_v34 = vld [vmem:[#allocation2 + $0x2e] sm:$0xff]  ;;  %v2182_v2 = vld [vmem:[%s5139_s30 + $0x38] sm:$0xff]  ;;  %vm1878_vm15 = vcmp.ge.f32.partialorder %v1836_v6, 0.0  ;;  %v6926_v56 = vsel %vm1699_vm1, %v1970_v14, 0.0 }
 0x24d   : > { %v6873_v44 = vld [vmem:[#allocation2 + $0x26] sm:$0xff]  ;;  %v6885_v38 = vld [vmem:[#allocation2 + $0x30] sm:$0xff]  ;;  %4533 = vst.msk [vmem:[%s5148_s5 + $0xa0] sm:$0xff] %vm1699_vm1, %v1801_v51  ;;  %v1880_v41 = vmul.f32 0.1, %v1836_v6  ;;  %vm1887_vm0 = vcmp.ge.f32.partialorder %v1868_v10, 0.0 }
 0x24e   : > { %2415 = vst.msk [vmem:[#allocation2 + $0x24] sm:$0xff] %vm2412_vm5, %v9355_v15  ;;  %v6889_v50 = vld [vmem:[#allocation2 + $0x4a] sm:$0xff]  ;;  %2416 = vst.msk [vmem:[#allocation2 + $0x2c] sm:$0xff] %vm2412_vm5, %v9355_v15  ;;  %v1889_v28 = vmul.f32 0.1, %v1868_v10  ;;  %v6941_v14 = vld [vmem:[#allocation2 + $0x62] sm:$0xff] }
 0x24f   : > { %9356 = vst [vmem:[#allocation72_spill] sm:$0xff] %v6889_v50  ;;  %v6900_v30 = vld [vmem:[#allocation2 + $0x44] sm:$0xff]  ;;  %v6904_v8 = vld [vmem:[#allocation2 + $0x6c] sm:$0xff]  ;;  %2464 = vst.msk [vmem:[#allocation2 + $0x24] sm:$0xff] %vm2461_vm6, %v2442_v17 }
 0x250   : > { %v6902_v23 = vld [vmem:[#allocation2 + $0x46] sm:$0xff]  ;;  %9357 = vst [vmem:[#allocation73_spill] sm:$0xff] %v6904_v8  ;;  %v2181_v50 = vld [vmem:[%s5139_s30 + $0x30] sm:$0xff]  ;;  %2465 = vst.msk [vmem:[#allocation2 + $0x2c] sm:$0xff] %vm2461_vm6, %v2444_v25  ;;  %v2003_v25 = vmul.f32 %v6716_v55, %v6581_v53  ;;  %v2133_v55 = vmul.f32 %v6707_v9, %v6564_v1 }
 0x251   : > { %2187 = vst.msk [vmem:[#allocation2 + $0x44] sm:$0xff] %vm1699_vm1, %v6528_v57  ;;  %2188 = vst.msk [vmem:[#allocation2 + $0x4c] sm:$0xff] %vm1699_vm1, %v6525_v58  ;;  %v6920_v24 = vld [vmem:[#allocation2 + $0x6e] sm:$0xff]  ;;  %v6930_v57 = vld [vmem:[#allocation2 + $0x60] sm:$0xff]  ;;  %v1882_v58 = vsel %vm1878_vm15, %v1836_v6, %v1880_v41  ;;  %v6950_v6 = vsel %vm1699_vm1, %v2002_v16, 0.0  ;;  %v2101_v41 = vmul.f32 %v6720_v4, %v6564_v1 }
 0x252   : > { %9358 = vst [vmem:[#allocation74_spill] sm:$0xff] %v6920_v24  ;;  %v6922_v17 = vld [vmem:[#allocation2 + $0x70] sm:$0xff]  ;;  %9360 = vst [vmem:[#allocation76_spill] sm:$0xff] %v6930_v57  ;;  %v6932_v51 = vld [vmem:[#allocation2 + $0x68] sm:$0xff]  ;;  %v6935_v24 = vsel %vm1699_vm1, %v1971_v18, 0.0  ;;  %v1891_v57 = vsel %vm1887_vm0, %v1868_v10, %v1889_v28  ;;  %v2207_v10 = vmul.f32 %v6793_v19, %v6564_v1  ;;  %v2208_v28 = vmul.f32 %v6795_v52, %v6581_v53 }
 0x253   : > { %9359 = vst [vmem:[#allocation75_spill] sm:$0xff] %v6922_v17  ;;  %9361 = vst [vmem:[#allocation77_spill] sm:$0xff] %v6932_v51  ;;  %v2034_v17 = vmul.f32 %v6718_v0, %v6564_v1  ;;  %v6943_v8 = vld [vmem:[#allocation2 + $0x6a] sm:$0xff]  ;;  %v6961_v0 = vsel %vm1699_vm1, %v2003_v25, 0.0  ;;  %v6974_v4 = vld [vmem:[#allocation2] sm:$0xff]  ;;  %v2239_v19 = vmul.f32 %v6798_v35, %v6564_v1  ;;  %v2272_v35 = vmul.f32 %v6812_v62, %v6581_v53 }
 0x254   : > { %9362 = vst [vmem:[#allocation78_spill] sm:$0xff] %v6941_v14  ;;  %9363 = vst [vmem:[#allocation79_spill] sm:$0xff] %v6943_v8  ;;  %v6945_v33 = vld [vmem:[#allocation2 + $0x64] sm:$0xff]  ;;  %v6972_v9 = vld [vmem:[#allocation2 + $0xc] sm:$0xff]  ;;  %v2339_v62 = vmul.f32 %v6816_v39, %v6581_v53  ;;  %v2370_v39 = vmul.f32 %v6795_v52, %v6564_v1 }
 0x255   : > { %9364 = vst [vmem:[#allocation80_spill] sm:$0xff] %v6945_v33  ;;  %4535 = vst.msk [vmem:[%s5148_s5 + $0xf0] sm:$0xff] %vm1699_vm1, %v1882_v58  ;;  %v6956_v18 = vld [vmem:[#allocation2 + $0x66] sm:$0xff]  ;;  %v6964_v33 = vsel %vm1699_vm1, %v2034_v17, 0.0  ;;  %v6982_v17 = vsel %vm1699_vm1, %v2133_v55, 0.0  ;;  %v6988_v58 = vld [vmem:[#allocation2 + $0xe] sm:$0xff]  ;;  %v2271_v55 = vmul.f32 %v6802_v29, %v6564_v1  ;;  %v2338_v29 = vmul.f32 %v6814_v13, %v6564_v1 }
 0x256   : > { %9365 = vst [vmem:[#allocation81_spill] sm:$0xff] %v6956_v18  ;;  %4537 = vst.msk [vmem:[%s5148_s5 + $0x140] sm:$0xff] %vm1699_vm1, %v1891_v57  ;;  %v6976_v16 = vld [vmem:[#allocation2 + $0x2] sm:$0xff]  ;;  %v6979_v57 = vsel %vm1699_vm1, %v2101_v41, 0.0  ;;  %v6998_v41 = vsel %vm1699_vm1, %v2208_v28, 0.0  ;;  %v7034_v13 = vsel %vm1699_vm1, %v2272_v35, 0.0  ;;  %v2037_v35 = vmul.f32 %v6740_v7, %v6575_v60 }
 0x257   : > { %2189 = vst.msk [vmem:[#allocation2 + $0x64] sm:$0xff] %vm1699_vm1, %v2181_v50  ;;  %2190 = vst.msk [vmem:[#allocation2 + $0x6c] sm:$0xff] %vm1699_vm1, %v2182_v2  ;;  %v2240_v50 = vmul.f32 %v6800_v46, %v6581_v53  ;;  %v6990_v2 = vld [vmem:[#allocation2 + $0x10] sm:$0xff]  ;;  %v6992_v25 = vld [vmem:[#allocation2 + $0x8] sm:$0xff]  ;;  %v7047_v14 = vsel %vm1699_vm1, %v2338_v29, 0.0  ;;  %v2104_v1 = vmul.f32 %v6742_v49, %v6575_v60  ;;  %v7063_v51 = vsel %vm1699_vm1, %v2370_v39, 0.0 }
 0x258   : > { %9366 = vst [vmem:[#allocation82_spill] sm:$0xff] %v6972_v9  ;;  %9367 = vst [vmem:[#allocation83_spill] sm:$0xff] %v6974_v4  ;;  %v7004_v4 = vld [vmem:[#allocation2 + $0xa] sm:$0xff]  ;;  %v7020_v9 = vld [vmem:[#allocation2 + $0x40] sm:$0xff]  ;;  %v1972_v7 = vmul.f32 %v6754_v22, %v6561_v63  ;;  %v2050_v49 = vsel %vm1699_vm1, %v2037_v35, 0.0 }
 0x259   : > { %9368 = vst [vmem:[#allocation84_spill] sm:$0xff] %v6976_v16  ;;  %9369 = vst [vmem:[#allocation85_spill] sm:$0xff] %v6988_v58  ;;  %v6995_v16 = vsel %vm1699_vm1, %v2207_v10, 0.0  ;;  %v7006_v46 = vld [vmem:[#allocation2 + $0x4] sm:$0xff]  ;;  %v7011_v10 = vsel %vm1699_vm1, %v2239_v19, 0.0  ;;  %v7014_v28 = vsel %vm1699_vm1, %v2240_v50, 0.0  ;;  %v2371_v50 = vmul.f32 %v6828_v47, %v6581_v53 }
 0x25a   : > { %9370 = vst [vmem:[#allocation86_spill] sm:$0xff] %v6990_v2  ;;  %9371 = vst [vmem:[#allocation87_spill] sm:$0xff] %v6992_v25  ;;  %v7008_v58 = vld [vmem:[#allocation2 + $0x6] sm:$0xff]  ;;  %v2448_v2 = vpop.permute.xlu1 %2447  ;;  %v2446_v25 = vpop.permute.xlu0 %2445  ;;  %v7031_v19 = vsel %vm1699_vm1, %v2271_v55, 0.0  ;;  %v7050_v55 = vsel %vm1699_vm1, %v2339_v62, 0.0  ;;  %v7058_v53 = vld [vmem:[#allocation2 + $0x4e] sm:$0xff]  ;;  %v2136_v62 = vmul.f32 %v6744_v5, %v6575_v60  ;;  %v7091_v35 = vadd.f32 %v2050_v49, %v6879_v59 }
 0x25b   : > { %9372 = vst [vmem:[#allocation88_spill] sm:$0xff] %v7004_v4  ;;  %9373 = vst [vmem:[#allocation89_spill] sm:$0xff] %v7006_v46  ;;  %v7022_v4 = vld [vmem:[#allocation2 + $0x48] sm:$0xff]  ;;  %v7060_v47 = vld [vmem:[#allocation2 + $0x50] sm:$0xff]  ;;  %v7066_v29 = vsel %vm1699_vm1, %v2371_v50, 0.0  ;;  %v2117_v39 = vsel %vm1699_vm1, %v2104_v1, 0.0  ;;  %v1973_v50 = vmul.f32 %v6756_v27, %v6575_v60 }
 0x25c   : > { %9374 = vst [vmem:[#allocation90_spill] sm:$0xff] %v7008_v58  ;;  %v7024_v46 = vld [vmem:[#allocation2 + $0x42] sm:$0xff]  ;;  %2692 = vst.msk [vmem:[#allocation2 + $0x4] sm:$0xff] %vm2691_vm14, %v9355_v15  ;;  %v7040_v58 = vld [vmem:[#allocation2 + $0x4a] sm:$0xff]  ;;  %v7094_v1 = vadd.f32 %v2117_v39, %v6894_v48 }
 0x25d   : > { %2693 = vst.msk [vmem:[#allocation2 + $0xc] sm:$0xff] %vm2691_vm14, %v9355_v15  ;;  %v7042_v18 = vld [vmem:[#allocation2 + $0x44] sm:$0xff]  ;;  %v7044_v8 = vld [vmem:[#allocation2 + $0x4c] sm:$0xff]  ;;  %9377 = vst [vmem:[#allocation93_spill] sm:$0xff] %v7058_v53  ;;  %v1986_v48 = vsel %vm1699_vm1, %v1973_v50, 0.0  ;;  %v2103_v50 = vmul.f32 %v6772_v3, %v6561_v63  ;;  %v2135_v3 = vmul.f32 %v6756_v27, %v6561_v63 }
 0x25e   : > { %9375 = vst [vmem:[#allocation91_spill] sm:$0xff] %v7044_v8  ;;  %v7056_v52 = vld [vmem:[#allocation2 + $0x46] sm:$0xff]  ;;  %9378 = vst [vmem:[#allocation94_spill] sm:$0xff] %v7060_v47  ;;  %v2004_v47 = vmul.f32 %v6758_v37, %v6561_v63  ;;  %v1979_v37 = vsel %vm1699_vm1, %v1972_v7, 0.0  ;;  %v7115_v49 = vld [vmem:[#allocation2 + $0x6e] sm:$0xff] }
 0x25f   : > { %9376 = vst [vmem:[#allocation92_spill] sm:$0xff] %v7056_v52  ;;  %2417 = vst.msk [vmem:[#allocation2 + $0x44] sm:$0xff] %vm2412_vm5, %v9355_v15  ;;  %v7082_v5 = vld [vmem:[#allocation2 + $0x60] sm:$0xff]  ;;  %v7084_v53 = vld [vmem:[#allocation2 + $0x68] sm:$0xff]  ;;  %v2149_v52 = vsel %vm1699_vm1, %v2136_v62, 0.0  ;;  %v7108_v59 = vadd.f32 %v1979_v37, %v6926_v56  ;;  %v2005_v62 = vmul.f32 %v6768_v54, %v6575_v60  ;;  %v7126_v56 = vadd.f32 %v1986_v48, %v6935_v24 }
 0x260   : > { %2418 = vst.msk [vmem:[#allocation2 + $0x4c] sm:$0xff] %vm2412_vm5, %v9355_v15  ;;  %9379 = vst [vmem:[#allocation95_spill] sm:$0xff] %v7082_v5  ;;  %v7086_v22 = vld [vmem:[#allocation2 + $0x62] sm:$0xff]  ;;  %v7098_v8 = vld [vmem:[#allocation2 + $0x6a] sm:$0xff]  ;;  %v2036_v54 = vmul.f32 %v6770_v12, %v6561_v63  ;;  %v2209_v48 = vmul.f32 %v6830_v40, %v6561_v63  ;;  %v2110_v27 = vsel %vm1699_vm1, %v2103_v50, 0.0  ;;  %v2210_v40 = vmul.f32 %v6832_v21, %v6575_v60 }
 0x261   : > { %9380 = vst [vmem:[#allocation96_spill] sm:$0xff] %v7084_v53  ;;  %9381 = vst [vmem:[#allocation97_spill] sm:$0xff] %v7086_v22  ;;  %v7100_v5 = vld [vmem:[#allocation2 + $0x64] sm:$0xff]  ;;  %v7102_v53 = vld [vmem:[#allocation2 + $0x6c] sm:$0xff]  ;;  %v2452_v22 = vpop.permute.xlu1 %2451  ;;  %v2018_v12 = vsel %vm1699_vm1, %v2005_v62, 0.0 }
 0x262   : > { %2467 = vst.msk [vmem:[#allocation2 + $0x4c] sm:$0xff] %vm2461_vm6, %v2448_v2  ;;  %2466 = vst.msk [vmem:[#allocation2 + $0x44] sm:$0xff] %vm2461_vm6, %v2446_v25  ;;  %v2450_v2 = vpop.permute.xlu0 %2449  ;;  %v7105_v25 = vadd.f32 %v2149_v52, %v6912_v42  ;;  %v7113_v7 = vld [vmem:[#allocation2 + $0x66] sm:$0xff]  ;;  %v7117_v39 = vld [vmem:[#allocation2 + $0x70] sm:$0xff]  ;;  %v2011_v52 = vsel %vm1699_vm1, %v2004_v47, 0.0  ;;  %v2043_v62 = vsel %vm1699_vm1, %v2036_v54, 0.0 }
 0x263   : > { %9382 = vst [vmem:[#allocation98_spill] sm:$0xff] %v7100_v5  ;;  %9383 = vst [vmem:[#allocation99_spill] sm:$0xff] %v7102_v53  ;;  %v7119_v53 = vld [vmem:[#allocation2 + $0x2c] sm:$0xff]  ;;  %v7121_v5 = vld [vmem:[#allocation2 + $0x20] sm:$0xff]  ;;  %v7144_v47 = vadd.f32 %v2011_v52, %v6950_v6  ;;  %v7160_v6 = vadd.f32 %v2018_v12, %v6961_v0  ;;  %v2142_v0 = vsel %vm1699_vm1, %v2135_v3, 0.0  ;;  %v2216_v52 = vsel %vm1699_vm1, %v2209_v48, 0.0 }
 0x264   : > { %9384 = vst [vmem:[#allocation100_spill] sm:$0xff] %v7119_v53  ;;  %9385 = vst [vmem:[#allocation101_spill] sm:$0xff] %v7121_v5  ;;  %v7123_v42 = vld [vmem:[#allocation2 + $0x22] sm:$0xff]  ;;  %v7137_v37 = vld [vmem:[#allocation2 + $0x2e] sm:$0xff]  ;;  %v7179_v54 = vadd.f32 %v2142_v0, %v6982_v17  ;;  %v7182_v50 = vadd.f32 %v2216_v52, %v6995_v16  ;;  %v2223_v12 = vsel %vm1699_vm1, %v2210_v40, 0.0  ;;  %v2242_v17 = vmul.f32 %v6860_v31, %v6575_v60 }
 0x265   : > { %9386 = vst [vmem:[#allocation102_spill] sm:$0xff] %v7123_v42  ;;  %2419 = vst.msk [vmem:[#allocation2 + $0x64] sm:$0xff] %vm2412_vm5, %v9355_v15  ;;  %v7139_v42 = vld [vmem:[#allocation2 + $0x30] sm:$0xff]  ;;  %v7141_v24 = vld [vmem:[#allocation2 + $0x28] sm:$0xff]  ;;  %v7194_v3 = vadd.f32 %v2223_v12, %v6998_v41  ;;  %v2273_v16 = vmul.f32 %v6862_v32, %v6561_v63  ;;  %v2274_v48 = vmul.f32 %v6871_v26, %v6575_v60 }
 0x266   : > { %2420 = vst.msk [vmem:[#allocation2 + $0x6c] sm:$0xff] %vm2412_vm5, %v9355_v15  ;;  %9387 = vst [vmem:[#allocation103_spill] sm:$0xff] %v7137_v37  ;;  %v7151_v5 = vld [vmem:[#allocation2 + $0x2a] sm:$0xff]  ;;  %v2340_v41 = vmul.f32 %v6873_v44, %v6561_v63  ;;  %v2341_v31 = vmul.f32 %v6883_v34, %v6575_v60  ;;  %v2372_v32 = vmul.f32 %v6832_v21, %v6561_v63 }
 0x267   : > { %v7153_v53 = vld [vmem:[#allocation2 + $0x24] sm:$0xff]  ;;  %2469 = vst.msk [vmem:[#allocation2 + $0x6c] sm:$0xff] %vm2461_vm6, %v2452_v22  ;;  %2468 = vst.msk [vmem:[#allocation2 + $0x64] sm:$0xff] %vm2461_vm6, %v2450_v2  ;;  %v7171_v22 = vadd.f32 %v2043_v62, %v6964_v33  ;;  %v7174_v2 = vadd.f32 %v2110_v27, %v6979_v57  ;;  %v2287_v44 = vsel %vm1699_vm1, %v2274_v48, 0.0 }
 0x268   : > { %v7155_v37 = vld [vmem:[#allocation2 + $0x26] sm:$0xff]  ;;  %v7238_v34 = vadd.f32 %v2287_v44, %v7034_v13 }
 0x269   : > { %9388 = vst [vmem:[#allocation104_spill] sm:$0xff] %v7155_v37  ;;  %2694 = vst.msk [vmem:[#allocation2 + $0x24] sm:$0xff] %vm2691_vm14, %v9355_v15  ;;  %v2241_v37 = vmul.f32 %v6858_v45, %v6561_v63  ;;  %v7187_v33 = vld [vmem:[#allocation2 + $0x4c] sm:$0xff]  ;;  %v7202_v27 = vld [vmem:[#allocation2 + $0x40] sm:$0xff] }
 0x26a   : > { %2695 = vst.msk [vmem:[#allocation2 + $0x2c] sm:$0xff] %vm2691_vm14, %v9355_v15  ;;  %v7189_v62 = vld [vmem:[#allocation2 + $0x4e] sm:$0xff]  ;;  %v7206_v40 = vld [vmem:[#allocation2 + $0x42] sm:$0xff] }
 0x26b   : > { %v7191_v57 = vld [vmem:[#allocation2 + $0x50] sm:$0xff]  ;;  %v7204_v45 = vld [vmem:[#allocation2 + $0x48] sm:$0xff]  ;;  %9390 = vst [vmem:[#allocation106_spill] sm:$0xff] %v7206_v40  ;;  %v2248_v0 = vsel %vm1699_vm1, %v2241_v37, 0.0  ;;  %v2255_v37 = vsel %vm1699_vm1, %v2242_v17, 0.0  ;;  %v2280_v40 = vsel %vm1699_vm1, %v2273_v16, 0.0 }
 0x26c   : > { %9389 = vst [vmem:[#allocation105_spill] sm:$0xff] %v7204_v45  ;;  %v7215_v52 = vld [vmem:[#allocation2 + $0x4a] sm:$0xff]  ;;  %v7222_v45 = vadd.f32 %v2248_v0, %v7011_v10  ;;  %v7232_v63 = vadd.f32 %v2255_v37, %v7014_v28  ;;  %v7235_v21 = vadd.f32 %v2280_v40, %v7031_v19  ;;  %v2347_v10 = vsel %vm1699_vm1, %v2340_v41, 0.0 }
 0x26d   : > { %v7217_v26 = vld [vmem:[#allocation2 + $0x44] sm:$0xff]  ;;  %v7248_v0 = vadd.f32 %v2347_v10, %v7047_v14  ;;  %v2354_v28 = vsel %vm1699_vm1, %v2341_v31, 0.0  ;;  %v2373_v19 = vmul.f32 %v6885_v38, %v6575_v60  ;;  %v2379_v40 = vsel %vm1699_vm1, %v2372_v32, 0.0 }
 0x26e   : > { %v7219_v12 = vld [vmem:[#allocation2 + $0x46] sm:$0xff]  ;;  %v7243_v16 = vld [vmem:[#allocation2 + $0x6e] sm:$0xff]  ;;  %v7261_v44 = vadd.f32 %v2354_v28, %v7050_v55  ;;  %v2039_v14 = vmul.f32 %v6834_v61, %v6616_v20  ;;  %v2106_v60 = vmul.f32 %v6836_v11, %v6616_v20  ;;  %v2138_v55 = vmul.f32 %v6838_v43, %v6616_v20 }
 0x26f   : > { %2696 = vst.msk [vmem:[#allocation2 + $0x44] sm:$0xff] %vm2691_vm14, %v9355_v15  ;;  %2697 = vst.msk [vmem:[#allocation2 + $0x4c] sm:$0xff] %vm2691_vm14, %v9355_v15  ;;  %v7241_v17 = vld [vmem:[#allocation2 + $0x6c] sm:$0xff]  ;;  %v7254_v13 = vld [vmem:[#allocation2 + $0x60] sm:$0xff]  ;;  %v2386_v10 = vsel %vm1699_vm1, %v2373_v19, 0.0 }
 0x270   : > { %v7245_v48 = vld [vmem:[#allocation2 + $0x70] sm:$0xff]  ;;  %9392 = vst [vmem:[#allocation108_spill] sm:$0xff] %v7254_v13  ;;  %v7256_v37 = vld [vmem:[#allocation2 + $0x68] sm:$0xff]  ;;  %v2387_v11 = vadd.f32 %v2386_v10, %v7066_v29  ;;  %v2119_v19 = vsel %vm1699_vm1, %v2106_v60, 0.0  ;;  %v9400_v43 = vld [vmem:[#allocation71_spill] sm:$0xff] }
 0x271   : > { %9391 = vst [vmem:[#allocation107_spill] sm:$0xff] %v7245_v48  ;;  %9393 = vst [vmem:[#allocation109_spill] sm:$0xff] %v7256_v37  ;;  %v7258_v41 = vld [vmem:[#allocation2 + $0x62] sm:$0xff]  ;;  %v7264_v48 = vadd.f32 %v2379_v40, %v7063_v51  ;;  %v7270_v38 = vld [vmem:[#allocation2 + $0x6a] sm:$0xff] }
 0x272   : > { %9394 = vst [vmem:[#allocation110_spill] sm:$0xff] %v7258_v41  ;;  %9395 = vst [vmem:[#allocation111_spill] sm:$0xff] %v7270_v38  ;;  %v7272_v31 = vld [vmem:[#allocation2 + $0x64] sm:$0xff]  ;;  %v9398_v51 = vld [vmem:[#allocation69_spill] sm:$0xff]  ;;  %v2120_v38 = vadd.f32 %v2119_v19, %v7094_v1  ;;  %v2151_v41 = vsel %vm1699_vm1, %v2138_v55, 0.0  ;;  %v2038_v1 = vmul.f32 %v6900_v30, %v6630_v36  ;;  %v2243_v19 = vmul.f32 %v7024_v46, %v6630_v36 }
 0x273   : > { %9396 = vst [vmem:[#allocation112_spill] sm:$0xff] %v7272_v31  ;;  %v7274_v32 = vld [vmem:[#allocation2 + $0x66] sm:$0xff]  ;;  %v1974_v28 = vmul.f32 %v9398_v51, %v6630_v36  ;;  %v9399_v40 = vld [vmem:[#allocation70_spill] sm:$0xff]  ;;  %v2006_v31 = vmul.f32 %v9400_v43, %v6630_v36  ;;  %v2152_v13 = vadd.f32 %v2151_v41, %v7105_v25  ;;  %v2275_v43 = vmul.f32 %v7042_v18, %v6630_v36 }
 0x274   : > { %9397 = vst [vmem:[#allocation113_spill] sm:$0xff] %v7274_v32  ;;  %v1975_v61 = vmul.f32 %v9399_v40, %v6616_v20  ;;  %2698 = vst.msk [vmem:[#allocation2 + $0x64] sm:$0xff] %vm2691_vm14, %v9355_v15  ;;  %v2052_v32 = vsel %vm1699_vm1, %v2039_v14, 0.0  ;;  %v9401_v14 = vld [vmem:[#allocation72_spill] sm:$0xff] }
 0x275   : > { %2699 = vst.msk [vmem:[#allocation2 + $0x6c] sm:$0xff] %vm2691_vm14, %v9355_v15  ;;  %v2053_v51 = vadd.f32 %v2052_v32, %v7091_v35  ;;  %v1981_v37 = vsel %vm1699_vm1, %v1974_v28, 0.0  ;;  %v2007_v60 = vmul.f32 %v9401_v14, %v6616_v20  ;;  %v2013_v35 = vsel %vm1699_vm1, %v2006_v31, 0.0  ;;  %v9403_v14 = vld [vmem:[#allocation92_spill] sm:$0xff] }
 0x276   : > { %v1982_v15 = vadd.f32 %v1981_v37, %v7108_v59  ;;  %v1988_v29 = vsel %vm1699_vm1, %v1975_v61, 0.0  ;;  %v2105_v32 = vmul.f32 %v6902_v23, %v6630_v36  ;;  %v7310_v25 = vadd.f32 %v2013_v35, %v7144_v47  ;;  %v9404_v35 = vld [vmem:[#allocation93_spill] sm:$0xff] }
 0x277   : > { %v7302_v10 = vadd.f32 %v1988_v29, %v7126_v56  ;;  %v2020_v59 = vsel %vm1699_vm1, %v2007_v60, 0.0  ;;  %v2137_v37 = vmul.f32 %v9399_v40, %v6630_v36  ;;  %v2211_v56 = vmul.f32 %v7020_v9, %v6630_v36 }
 0x278   : > { %v7318_v41 = vadd.f32 %v2020_v59, %v7160_v6  ;;  %v2045_v31 = vsel %vm1699_vm1, %v2038_v1, 0.0  ;;  %v2112_v30 = vsel %vm1699_vm1, %v2105_v32, 0.0  ;;  %v2212_v23 = vmul.f32 %v7022_v4, %v6616_v20 }
 0x279   : > { %v7325_v47 = vadd.f32 %v2045_v31, %v7171_v22  ;;  %v7328_v55 = vadd.f32 %v2112_v30, %v7174_v2  ;;  %v2144_v28 = vsel %vm1699_vm1, %v2137_v37, 0.0  ;;  %v2218_v9 = vsel %vm1699_vm1, %v2211_v56, 0.0  ;;  %v9405_v31 = vld [vmem:[#allocation94_spill] sm:$0xff] }
 0x27a   : > { %v7333_v6 = vadd.f32 %v2144_v28, %v7179_v54  ;;  %v7336_v40 = vadd.f32 %v2218_v9, %v7182_v50  ;;  %v2225_v61 = vsel %vm1699_vm1, %v2212_v23, 0.0  ;;  %v2244_v2 = vmul.f32 %v7040_v58, %v6616_v20  ;;  %v9402_v54 = vld [vmem:[#allocation91_spill] sm:$0xff]  ;;  %v9407_v28 = vld [vmem:[#allocation73_spill] sm:$0xff] }
 0x27b   : > { %v7342_v22 = vadd.f32 %v2225_v61, %v7194_v3  ;;  %v2276_v29 = vmul.f32 %v9402_v54, %v6616_v20  ;;  %v2250_v50 = vsel %vm1699_vm1, %v2243_v19, 0.0  ;;  %v2342_v60 = vmul.f32 %v9403_v14, %v6630_v36  ;;  %v9408_v61 = vld [vmem:[#allocation74_spill] sm:$0xff]  ;;  %v9411_v54 = vld [vmem:[#allocation76_spill] sm:$0xff] }
 0x27c   : > { %v2343_v46 = vmul.f32 %v9404_v35, %v6616_v20  ;;  %v2374_v3 = vmul.f32 %v7022_v4, %v6630_v36  ;;  %v7358_v1 = vadd.f32 %v2250_v50, %v7222_v45  ;;  %v2257_v58 = vsel %vm1699_vm1, %v2244_v2, 0.0  ;;  %v9409_v2 = vld [vmem:[#allocation75_spill] sm:$0xff]  ;;  %v9413_v35 = vld [vmem:[#allocation78_spill] sm:$0xff] }
 0x27d   : > { %v2282_v18 = vsel %vm1699_vm1, %v2275_v43, 0.0  ;;  %v2289_v32 = vsel %vm1699_vm1, %v2276_v29, 0.0  ;;  %v7364_v59 = vadd.f32 %v2257_v58, %v7232_v63  ;;  %v2349_v36 = vsel %vm1699_vm1, %v2342_v60, 0.0 }
 0x27e   : > { %v7367_v37 = vadd.f32 %v2282_v18, %v7235_v21  ;;  %v7370_v56 = vadd.f32 %v2289_v32, %v7238_v34  ;;  %v7374_v4 = vadd.f32 %v2349_v36, %v7248_v0  ;;  %v2356_v45 = vsel %vm1699_vm1, %v2343_v46, 0.0  ;;  %v9406_v34 = vld [vmem:[#allocation67_spill] sm:$0xff] }
 0x27f   : > { %v2375_v30 = vmul.f32 %v9405_v31, %v6616_v20  ;;  %v2381_v23 = vsel %vm1699_vm1, %v2374_v3, 0.0  ;;  %v7381_v63 = vadd.f32 %v2356_v45, %v7261_v44  ;;  %v2041_v9 = vmul.f32 %v9407_v28, %v9406_v34  ;;  %v9410_v20 = vld [vmem:[#allocation68_spill] sm:$0xff]  ;;  %v9412_v44 = vld [vmem:[#allocation77_spill] sm:$0xff]  ;;  %v9414_v31 = vld [vmem:[#allocation79_spill] sm:$0xff] }
 0x280   : > { %v7384_v21 = vadd.f32 %v2381_v23, %v7264_v48  ;;  %v2108_v0 = vmul.f32 %v9408_v61, %v9406_v34  ;;  %v2140_v43 = vmul.f32 %v9409_v2, %v9406_v34  ;;  %v1976_v29 = vmul.f32 %v9411_v54, %v9410_v20 }
 0x281   : > { %v2388_v19 = vsel %vm1699_vm1, %v2375_v30, 0.0  ;;  %v1977_v50 = vmul.f32 %v9412_v44, %v9406_v34  ;;  %v2054_v48 = vsel %vm1699_vm1, %v2041_v9, 0.0  ;;  %v2008_v46 = vmul.f32 %v9413_v35, %v9410_v20 }
 0x282   : > { %v7397_v14 = vadd.f32 %v2388_v19, %v2387_v11  ;;  %v2121_v60 = vsel %vm1699_vm1, %v2108_v0, 0.0  ;;  %v2055_v3 = vadd.f32 %v2054_v48, %v2053_v51  ;;  %v2153_v18 = vsel %vm1699_vm1, %v2140_v43, 0.0  ;;  %v9415_v43 = vld [vmem:[#allocation80_spill] sm:$0xff] }
 0x283   : > { %v2122_v58 = vadd.f32 %v2121_v60, %v2120_v38  ;;  %v1983_v32 = vsel %vm1699_vm1, %v1976_v29, 0.0  ;;  %v2154_v36 = vadd.f32 %v2153_v18, %v2152_v13  ;;  %v1990_v11 = vsel %vm1699_vm1, %v1977_v50, 0.0 }
 0x284   : > { %v1984_v45 = vadd.f32 %v1983_v32, %v1982_v15  ;;  %v2009_v30 = vmul.f32 %v9414_v31, %v9406_v34  ;;  %vm2077_vm2 = vcmp.ge.f32.partialorder %v2055_v3, 0.0  ;;  %v2079_v23 = vmul.f32 0.1, %v2055_v3  ;;  %v9418_v31 = vld [vmem:[#allocation96_spill] sm:$0xff] }
 0x285   : > { %vm2158_vm4 = vcmp.ge.f32.partialorder %v2122_v58, 0.0  ;;  %v2160_v28 = vmul.f32 0.1, %v2122_v58  ;;  %vm2167_vm5 = vcmp.ge.f32.partialorder %v2154_v36, 0.0  ;;  %v2169_v38 = vmul.f32 0.1, %v2154_v36 }
 0x286   : > { %v1991_v51 = vadd.f32 %v1990_v11, %v7302_v10  ;;  %v2015_v9 = vsel %vm1699_vm1, %v2008_v46, 0.0  ;;  %v2081_v13 = vsel %vm2077_vm2, %v2055_v3, %v2079_v23  ;;  %v2022_v0 = vsel %vm1699_vm1, %v2009_v30, 0.0  ;;  %v9416_v46 = vld [vmem:[#allocation81_spill] sm:$0xff] }
 0x287   : > { %v2162_v61 = vsel %vm2158_vm4, %v2122_v58, %v2160_v28  ;;  %v2016_v15 = vadd.f32 %v2015_v9, %v7310_v25  ;;  %4544 = vst.msk [vmem:[%s5148_s5 + $0xb8] sm:$0xff] %vm1699_vm1, %v2081_v13  ;;  %v2171_v19 = vsel %vm2167_vm5, %v2154_v36, %v2169_v38  ;;  %v2023_v2 = vadd.f32 %v2022_v0, %v7318_v41  ;;  %v9417_v36 = vld [vmem:[#allocation95_spill] sm:$0xff]  ;;  %v9419_v38 = vld [vmem:[#allocation97_spill] sm:$0xff] }
 0x288   : > { %4546 = vst.msk [vmem:[%s5148_s5 + $0x108] sm:$0xff] %vm1699_vm1, %v2162_v61  ;;  %v2040_v54 = vmul.f32 %v9415_v43, %v9410_v20  ;;  %vm2058_vm6 = vcmp.ge.f32.partialorder %v1984_v45, 0.0  ;;  %4548 = vst.msk [vmem:[%s5148_s5 + $0x158] sm:$0xff] %vm1699_vm1, %v2171_v19  ;;  %vm2059_vm7 = vcmp.ge.f32.partialorder %v1991_v51, 0.0  ;;  %v2060_v10 = vmul.f32 0.1, %v1984_v45 }
 0x289   : > { %v2061_v25 = vmul.f32 0.1, %v1991_v51  ;;  %vm2067_vm8 = vcmp.ge.f32.partialorder %v2016_v15, 0.0  ;;  %vm2068_vm9 = vcmp.ge.f32.partialorder %v2023_v2, 0.0  ;;  %v2069_v50 = vmul.f32 0.1, %v2016_v15 }
 0x28a   : > { %v2047_v29 = vsel %vm1699_vm1, %v2040_v54, 0.0  ;;  %v2070_v48 = vmul.f32 0.1, %v2023_v2  ;;  %v2062_v60 = vsel %vm2058_vm6, %v1984_v45, %v2060_v10  ;;  %v2107_v3 = vmul.f32 %v9416_v46, %v9410_v20 }
 0x28b   : > { %v2048_v41 = vadd.f32 %v2047_v29, %v7325_v47  ;;  %v2063_v35 = vsel %vm2059_vm7, %v1991_v51, %v2061_v25  ;;  %4539 = vst.msk [vmem:[%s5148_s5 + $0x10] sm:$0xff] %vm1699_vm1, %v2062_v60  ;;  %v2071_v58 = vsel %vm2067_vm8, %v2016_v15, %v2069_v50  ;;  %v2139_v32 = vmul.f32 %v9412_v44, %v9410_v20  ;;  %v9421_v29 = vld [vmem:[#allocation99_spill] sm:$0xff] }
 0x28c   : > { %4540 = vst.msk [vmem:[%s5148_s5 + $0x18] sm:$0xff] %vm1699_vm1, %v2063_v35  ;;  %v2072_v18 = vsel %vm2068_vm9, %v2023_v2, %v2070_v48  ;;  %v2213_v11 = vmul.f32 %v9417_v36, %v9410_v20  ;;  %4541 = vst.msk [vmem:[%s5148_s5 + $0x60] sm:$0xff] %vm1699_vm1, %v2071_v58  ;;  %v2114_v45 = vsel %vm1699_vm1, %v2107_v3, 0.0  ;;  %v2214_v30 = vmul.f32 %v9418_v31, %v9406_v34  ;;  %v4763_v36 = vld [vmem:[%s5133_s23 + $0x30] sm:$0xff] }
 0x28d   : > { %4542 = vst.msk [vmem:[%s5148_s5 + $0x68] sm:$0xff] %vm1699_vm1, %v2072_v18  ;;  %vm2076_vm10 = vcmp.ge.f32.partialorder %v2048_v41, 0.0  ;;  %v2078_v47 = vmul.f32 0.1, %v2048_v41  ;;  %v2115_v23 = vadd.f32 %v2114_v45, %v7328_v55  ;;  %v2146_v28 = vsel %vm1699_vm1, %v2139_v32, 0.0 }
 0x28e   : > { %v2220_v44 = vsel %vm1699_vm1, %v2213_v11, 0.0  ;;  %v2245_v51 = vmul.f32 %v9419_v38, %v9410_v20  ;;  %v2147_v13 = vadd.f32 %v2146_v28, %v7333_v6  ;;  %v2227_v15 = vsel %vm1699_vm1, %v2214_v30, 0.0  ;;  %v9420_v6 = vld [vmem:[#allocation98_spill] sm:$0xff] }
 0x28f   : > { %v2080_v9 = vsel %vm2076_vm10, %v2048_v41, %v2078_v47  ;;  %v2221_v61 = vadd.f32 %v2220_v44, %v7336_v40  ;;  %vm2157_vm11 = vcmp.ge.f32.partialorder %v2115_v23, 0.0  ;;  %v2159_v0 = vmul.f32 0.1, %v2115_v23  ;;  %v4764_v47 = vld [vmem:[%s5133_s23 + $0x38] sm:$0xff] }
 0x290   : > { %4543 = vst.msk [vmem:[%s5148_s5 + $0xb0] sm:$0xff] %vm1699_vm1, %v2080_v9  ;;  %v2228_v55 = vadd.f32 %v2227_v15, %v7342_v22  ;;  %v2246_v19 = vmul.f32 %v7098_v8, %v9406_v34  ;;  %vm2166_vm12 = vcmp.ge.f32.partialorder %v2147_v13, 0.0  ;;  %v2168_v2 = vmul.f32 0.1, %v2147_v13  ;;  %v9422_v38 = vld [vmem:[#allocation82_spill] sm:$0xff] }
 0x291   : > { %v2252_v43 = vsel %vm1699_vm1, %v2245_v51, 0.0  ;;  %v2277_v54 = vmul.f32 %v9420_v6, %v9410_v20  ;;  %v2161_v40 = vsel %vm2157_vm11, %v2115_v23, %v2159_v0  ;;  %v2278_v50 = vmul.f32 %v9421_v29, %v9406_v34 }
 0x292   : > { %v2253_v10 = vadd.f32 %v2252_v43, %v7358_v1  ;;  %v2259_v25 = vsel %vm1699_vm1, %v2246_v19, 0.0  ;;  %4545 = vst.msk [vmem:[%s5148_s5 + $0x100] sm:$0xff] %vm1699_vm1, %v2161_v40  ;;  %v2170_v22 = vsel %vm2166_vm12, %v2147_v13, %v2168_v2  ;;  %vm2295_vm13 = vcmp.ge.f32.partialorder %v2221_v61, 0.0  ;;  %v7505_v2 = vld [vmem:[%s5133_s23] sm:$0xff] }
 0x293   : > { %v2260_v8 = vadd.f32 %v2259_v25, %v7364_v59  ;;  %v2284_v48 = vsel %vm1699_vm1, %v2277_v54, 0.0  ;;  %4547 = vst.msk [vmem:[%s5148_s5 + $0x150] sm:$0xff] %vm1699_vm1, %v2170_v22  ;;  %v2291_v1 = vsel %vm1699_vm1, %v2278_v50, 0.0  ;;  %vm2296_vm14 = vcmp.ge.f32.partialorder %v2228_v55, 0.0  ;;  %v9424_v54 = vld [vmem:[#allocation86_spill] sm:$0xff]  ;;  %v9426_v22 = vld [vmem:[#allocation87_spill] sm:$0xff] }
 0x294   : > { %v2285_v20 = vadd.f32 %v2284_v48, %v7367_v37  ;;  %v2297_v41 = vmul.f32 0.1, %v2221_v61  ;;  %v2292_v34 = vadd.f32 %v2291_v1, %v7370_v56  ;;  %v2298_v60 = vmul.f32 0.1, %v2228_v55  ;;  %v7472_v56 = vld [vmem:[%s5133_s23 + $0x8] sm:$0xff]  ;;  %v7520_v1 = vld [vmem:[%s5133_s23 + $0x18] sm:$0xff] }
 0x295   : > { %vm2304_vm3 = vcmp.ge.f32.partialorder %v2253_v10, 0.0  ;;  %vm2305_vm15 = vcmp.ge.f32.partialorder %v2260_v8, 0.0  ;;  %v2306_v35 = vmul.f32 0.1, %v2253_v10  ;;  %v2307_v46 = vmul.f32 0.1, %v2260_v8 }
 0x296   : > { %v2299_v59 = vsel %vm2295_vm13, %v2221_v61, %v2297_v41  ;;  %vm2313_vm0 = vcmp.ge.f32.partialorder %v2285_v20, 0.0  ;;  %v2300_v37 = vsel %vm2296_vm14, %v2228_v55, %v2298_v60  ;;  %vm2314_vm2 = vcmp.ge.f32.partialorder %v2292_v34, 0.0  ;;  %v9423_v55 = vld [vmem:[#allocation85_spill] sm:$0xff]  ;;  %v9427_v48 = vld [vmem:[#allocation84_spill] sm:$0xff] }
 0x297   : > { %4549 = vst.msk [vmem:[%s5148_s5 + $0x20] sm:$0xff] %vm1699_vm1, %v2299_v59  ;;  %v2315_v3 = vmul.f32 0.1, %v2285_v20  ;;  %v2316_v58 = vmul.f32 0.1, %v2292_v34  ;;  %4550 = vst.msk [vmem:[%s5148_s5 + $0x28] sm:$0xff] %vm1699_vm1, %v2300_v37  ;;  %v2308_v18 = vsel %vm2304_vm3, %v2253_v10, %v2306_v35  ;;  %v2309_v32 = vsel %vm2305_vm15, %v2260_v8, %v2307_v46 }
 0x298   : > { %v2344_v11 = vmul.f32 %v4763_v36, %v7113_v7  ;;  %v2345_v45 = vmul.f32 %v4764_v47, %v7115_v49  ;;  %4551 = vst.msk [vmem:[%s5148_s5 + $0x70] sm:$0xff] %vm1699_vm1, %v2308_v18  ;;  %4552 = vst.msk [vmem:[%s5148_s5 + $0x78] sm:$0xff] %vm1699_vm1, %v2309_v32  ;;  %v2376_v28 = vmul.f32 %v4763_v36, %v9418_v31  ;;  %v9425_v10 = vld [vmem:[#allocation83_spill] sm:$0xff]  ;;  %v9428_v60 = vld [vmem:[#allocation88_spill] sm:$0xff]  ;;  %vm2740_vm3 = vcmask 97280  }
 0x299   : > { %v2317_v30 = vsel %vm2313_vm0, %v2285_v20, %v2315_v3  ;;  %v2318_v23 = vsel %vm2314_vm2, %v2292_v34, %v2316_v58  ;;  %v2377_v44 = vmul.f32 %v4764_v47, %v7117_v39  ;;  %v2551_v51 = vmul.f32 %v9422_v38, %v7472_v56  ;;  %v9429_v35 = vld [vmem:[#allocation89_spill] sm:$0xff]  ;;  %v9430_v18 = vld [vmem:[#allocation90_spill] sm:$0xff] }
 0x29a   : > { %4553 = vst.msk [vmem:[%s5148_s5 + $0xc0] sm:$0xff] %vm1699_vm1, %v2317_v30  ;;  %4554 = vst.msk [vmem:[%s5148_s5 + $0xc8] sm:$0xff] %vm1699_vm1, %v2318_v23  ;;  %v2351_v7 = vsel %vm1699_vm1, %v2344_v11, 0.0  ;;  %v2358_v49 = vsel %vm1699_vm1, %v2345_v45, 0.0  ;;  %v2383_v61 = vsel %vm1699_vm1, %v2376_v28, 0.0  ;;  %v2618_v19 = vmul.f32 %v9423_v55, %v7472_v56  ;;  %v7533_v37 = vld [vmem:[%s5133_s23 + $0x10] sm:$0xff] }
 0x29b   : > { %v2352_v9 = vadd.f32 %v2351_v7, %v7374_v4  ;;  %v2359_v13 = vadd.f32 %v2358_v49, %v7381_v63  ;;  %v2390_v31 = vsel %vm1699_vm1, %v2377_v44, 0.0  ;;  %v2384_v39 = vadd.f32 %v2383_v61, %v7384_v21  ;;  %v9431_v45 = vld [vmem:[#allocation100_spill] sm:$0xff]  ;;  %v9432_v23 = vld [vmem:[#allocation103_spill] sm:$0xff]  ;;  %v9433_v38 = vld [vmem:[#allocation101_spill] sm:$0xff] }
 0x29c   : > { %v2391_v15 = vadd.f32 %v2390_v31, %v7397_v14  ;;  %v2565_v0 = vsel %vm1699_vm1, %v2551_v51, 0.0  ;;  %v2650_v40 = vmul.f32 %v9424_v54, %v7472_v56  ;;  %v2486_v25 = vmul.f32 %v9425_v10, %v7505_v2  ;;  %v9434_v31 = vld [vmem:[#allocation102_spill] sm:$0xff] }
 0x29d   : > { %vm2394_vm4 = vcmp.ge.f32.partialorder %v2352_v9, 0.0  ;;  %vm2395_vm5 = vcmp.ge.f32.partialorder %v2359_v13, 0.0  ;;  %v2396_v4 = vmul.f32 0.1, %v2352_v9  ;;  %v2397_v63 = vmul.f32 0.1, %v2359_v13 }
 0x29e   : > { %vm2403_vm6 = vcmp.ge.f32.partialorder %v2384_v39, 0.0  ;;  %vm2404_vm7 = vcmp.ge.f32.partialorder %v2391_v15, 0.0  ;;  %v2405_v21 = vmul.f32 0.1, %v2384_v39  ;;  %v2406_v14 = vmul.f32 0.1, %v2391_v15 }
 0x29f   : > { %v2398_v43 = vsel %vm2394_vm4, %v2352_v9, %v2396_v4  ;;  %v2399_v6 = vsel %vm2395_vm5, %v2359_v13, %v2397_v63  ;;  %v2487_v8 = vmul.f32 %v9426_v22, %v7472_v56  ;;  %v2518_v20 = vmul.f32 %v9427_v48, %v7505_v2  ;;  %v7563_v4 = vld [vmem:[%s5133_s23 + $0x28] sm:$0xff] }
 0x2a0   : > { %4555 = vst.msk [vmem:[%s5148_s5 + $0x110] sm:$0xff] %vm1699_vm1, %v2398_v43  ;;  %4556 = vst.msk [vmem:[%s5148_s5 + $0x118] sm:$0xff] %vm1699_vm1, %v2399_v6  ;;  %v2407_v29 = vsel %vm2403_vm6, %v2384_v39, %v2405_v21  ;;  %v2408_v50 = vsel %vm2404_vm7, %v2391_v15, %v2406_v14  ;;  %v2632_v41 = vsel %vm1699_vm1, %v2618_v19, 0.0  ;;  %v2664_v34 = vsel %vm1699_vm1, %v2650_v40, 0.0  ;;  %v9435_v40 = vld [vmem:[#allocation104_spill] sm:$0xff] }
 0x2a1   : > { %4557 = vst.msk [vmem:[%s5148_s5 + $0x160] sm:$0xff] %vm1699_vm1, %v2407_v29  ;;  %4558 = vst.msk [vmem:[%s5148_s5 + $0x168] sm:$0xff] %vm1699_vm1, %v2408_v50  ;;  %v2519_v59 = vmul.f32 %v9428_v60, %v7472_v56  ;;  %v2550_v46 = vmul.f32 %v9429_v35, %v7505_v2  ;;  %v2494_v3 = vsel %vm1699_vm1, %v2486_v25, 0.0  ;;  %v2501_v58 = vsel %vm1699_vm1, %v2487_v8, 0.0 }
 0x2a2   : > { %v2617_v32 = vmul.f32 %v9430_v18, %v7505_v2  ;;  %v2649_v36 = vmul.f32 %v9426_v22, %v7505_v2  ;;  %v2526_v11 = vsel %vm1699_vm1, %v2518_v20, 0.0  ;;  %v2553_v30 = vmul.f32 %v9431_v45, %v7520_v1  ;;  %v7583_v20 = vld [vmem:[%s5133_s23 + $0x20] sm:$0xff] }
 0x2a3   : > { %v2533_v47 = vsel %vm1699_vm1, %v2519_v59, 0.0  ;;  %v2620_v28 = vmul.f32 %v9432_v23, %v7520_v1  ;;  %v2558_v44 = vsel %vm1699_vm1, %v2550_v46, 0.0  ;;  %v2652_v49 = vmul.f32 %v7139_v42, %v7520_v1 }
 0x2a4   : > { %v2625_v7 = vsel %vm1699_vm1, %v2617_v32, 0.0  ;;  %v2488_v51 = vmul.f32 %v9433_v38, %v7533_v37  ;;  %v2566_v9 = vsel %vm1699_vm1, %v2553_v30, 0.0  ;;  %v2489_v61 = vmul.f32 %v7141_v24, %v7520_v1  ;;  %v9436_v32 = vld [vmem:[#allocation105_spill] sm:$0xff] }
 0x2a5   : > { %v2633_v13 = vsel %vm1699_vm1, %v2620_v28, 0.0  ;;  %v2520_v39 = vmul.f32 %v9434_v31, %v7533_v37  ;;  %v2657_v15 = vsel %vm1699_vm1, %v2649_v36, 0.0  ;;  %v2567_v55 = vadd.f32 %v2566_v9, %v2565_v0 }
 0x2a6   : > { %v2665_v19 = vsel %vm1699_vm1, %v2652_v49, 0.0  ;;  %v2495_v42 = vsel %vm1699_vm1, %v2488_v51, 0.0  ;;  %v2634_v63 = vadd.f32 %v2633_v13, %v2632_v41  ;;  %v2502_v14 = vsel %vm1699_vm1, %v2489_v61, 0.0  ;;  %v7585_v41 = vpop.permute.xlu1 %2718  ;;  %v7613_v49 = vld [vmem:[%s5133_s23 + $0x38] sm:$0xff]  ;;  %v7617_v13 = vld [vmem:[%s5133_s23 + $0x30] sm:$0xff] }
 0x2a7   : > { %v2666_v21 = vadd.f32 %v2665_v19, %v2664_v34  ;;  %v2521_v43 = vmul.f32 %v7151_v5, %v7520_v1  ;;  %v2496_v6 = vadd.f32 %v2495_v42, %v2494_v3  ;;  %v2527_v54 = vsel %vm1699_vm1, %v2520_v39, 0.0  ;;  %v7587_v34 = vpop.permute.xlu0 %2716  ;;  %2742 = vst.msk [vmem:[#allocation2 + $0xc] sm:$0xff] %vm2740_vm3, %v7585_v41 }
 0x2a8   : > { %v2552_v0 = vmul.f32 %v7153_v53, %v7533_v37  ;;  %v2619_v10 = vmul.f32 %v9435_v40, %v7533_v37  ;;  %v2503_v25 = vadd.f32 %v2502_v14, %v2501_v58  ;;  %v2651_v50 = vmul.f32 %v7141_v24, %v7533_v37  ;;  %v9438_v14 = vld [vmem:[#allocation107_spill] sm:$0xff]  ;;  %2741 = vst.msk [vmem:[#allocation2 + $0x4] sm:$0xff] %vm2740_vm3, %v7587_v34 }
 0x2a9   : > { %v2534_v29 = vsel %vm1699_vm1, %v2521_v43, 0.0  ;;  %v2555_v22 = vmul.f32 %v7187_v33, %v7563_v4  ;;  %v2528_v8 = vadd.f32 %v2527_v54, %v2526_v11  ;;  %v2622_v53 = vmul.f32 %v7189_v62, %v7563_v4  ;;  %v9437_v11 = vld [vmem:[#allocation106_spill] sm:$0xff] }
 0x2aa   : > { %v2559_v5 = vsel %vm1699_vm1, %v2552_v0, 0.0  ;;  %v2626_v48 = vsel %vm1699_vm1, %v2619_v10, 0.0  ;;  %v2535_v60 = vadd.f32 %v2534_v29, %v2533_v47  ;;  %v2658_v24 = vsel %vm1699_vm1, %v2651_v50, 0.0  ;;  %v9440_v0 = vld [vmem:[#allocation109_spill] sm:$0xff]  ;;  %v9441_v29 = vld [vmem:[#allocation110_spill] sm:$0xff] }
 0x2ab   : > { %v2560_v59 = vadd.f32 %v2559_v5, %v2558_v44  ;;  %v2568_v33 = vsel %vm1699_vm1, %v2555_v22, 0.0  ;;  %v2627_v35 = vadd.f32 %v2626_v48, %v2625_v7  ;;  %v2635_v3 = vsel %vm1699_vm1, %v2622_v53, 0.0  ;;  %v7621_v61 = vpop.permute.xlu0 %2720 }
 0x2ac   : > { %v2569_v46 = vadd.f32 %v2568_v33, %v2567_v55  ;;  %v2654_v62 = vmul.f32 %v7191_v57, %v7563_v4  ;;  %v7594_v58 = vadd.f32 %v2658_v24, %v2657_v15  ;;  %v2490_v18 = vmul.f32 %v7202_v27, %v7583_v20  ;;  %2743 = vst.msk [vmem:[#allocation2 + $0x24] sm:$0xff] %vm2740_vm3, %v7621_v61 }
 0x2ad   : > { %v2491_v36 = vmul.f32 %v9436_v32, %v7563_v4  ;;  %v2522_v47 = vmul.f32 %v9437_v11, %v7583_v20  ;;  %v2523_v30 = vmul.f32 %v7215_v52, %v7563_v4  ;;  %v2554_v57 = vmul.f32 %v7217_v26, %v7583_v20  ;;  %v7619_v26 = vpop.permute.xlu1 %2722 }
 0x2ae   : > { %v2667_v45 = vsel %vm1699_vm1, %v2654_v62, 0.0  ;;  %v2621_v23 = vmul.f32 %v7219_v12, %v7583_v20  ;;  %v2636_v28 = vadd.f32 %v2635_v3, %v2634_v63  ;;  %v2497_v27 = vsel %vm1699_vm1, %v2490_v18, 0.0  ;;  %2744 = vst.msk [vmem:[#allocation2 + $0x2c] sm:$0xff] %vm2740_vm3, %v7619_v26 }
 0x2af   : > { %v2504_v44 = vsel %vm1699_vm1, %v2491_v36, 0.0  ;;  %v2529_v7 = vsel %vm1699_vm1, %v2522_v47, 0.0  ;;  %v2668_v38 = vadd.f32 %v2667_v45, %v2666_v21  ;;  %v2498_v51 = vadd.f32 %v2497_v27, %v2496_v6  ;;  %v9439_v6 = vld [vmem:[#allocation108_spill] sm:$0xff] }
 0x2b0   : > { %v2505_v9 = vadd.f32 %v2504_v44, %v2503_v25  ;;  %v2536_v52 = vsel %vm1699_vm1, %v2523_v30, 0.0  ;;  %v2530_v12 = vadd.f32 %v2529_v7, %v2528_v8  ;;  %v2561_v31 = vsel %vm1699_vm1, %v2554_v57, 0.0 }
 0x2b1   : > { %v2628_v39 = vsel %vm1699_vm1, %v2621_v23, 0.0  ;;  %v2653_v15 = vmul.f32 %v9436_v32, %v7583_v20  ;;  %v2537_v55 = vadd.f32 %v2536_v52, %v2535_v60  ;;  %v2562_v19 = vadd.f32 %v2561_v31, %v2560_v59  ;;  %v9442_v59 = vld [vmem:[#allocation111_spill] sm:$0xff]  ;;  %v2727_v33 = vpop.permute.xlu1 %2726  ;;  %v9443_v23 = vld [vmem:[#allocation112_spill] sm:$0xff] }
 0x2b2   : > { %v2557_v42 = vmul.f32 %v7241_v17, %v7613_v49  ;;  %v2624_v63 = vmul.f32 %v7243_v16, %v7613_v49  ;;  %v7631_v21 = vadd.f32 %v2628_v39, %v2627_v35  ;;  %v2656_v43 = vmul.f32 %v9438_v14, %v7613_v49  ;;  %v2725_v35 = vpop.permute.xlu0 %2724  ;;  %2746 = vst.msk [vmem:[#allocation2 + $0x4c] sm:$0xff] %vm2740_vm3, %v2727_v33 }
 0x2b3   : > { %v2492_v54 = vmul.f32 %v9439_v6, %v7617_v13  ;;  %v2493_v40 = vmul.f32 %v9440_v0, %v7613_v49  ;;  %v2660_v10 = vsel %vm1699_vm1, %v2653_v15, 0.0  ;;  %v2524_v16 = vmul.f32 %v9441_v29, %v7617_v13  ;;  %v9444_v15 = vld [vmem:[#allocation113_spill] sm:$0xff]  ;;  %2745 = vst.msk [vmem:[#allocation2 + $0x44] sm:$0xff] %vm2740_vm3, %v2725_v35 }
 0x2b4   : > { %v2570_v25 = vsel %vm1699_vm1, %v2557_v42, 0.0  ;;  %v2637_v17 = vsel %vm1699_vm1, %v2624_v63, 0.0  ;;  %v2669_v8 = vsel %vm1699_vm1, %v2656_v43, 0.0  ;;  %v2525_v24 = vmul.f32 %v9442_v59, %v7613_v49  ;;  %v2821_v59 = vld [vmem:[#allocation2 + $0x4] sm:$0xff] }
 0x2b5   : > { %v2571_v50 = vadd.f32 %v2570_v25, %v2569_v46  ;;  %v2638_v22 = vadd.f32 %v2637_v17, %v2636_v28  ;;  %v2499_v5 = vsel %vm1699_vm1, %v2492_v54, 0.0  ;;  %v2670_v48 = vadd.f32 %v2669_v8, %v2668_v38  ;;  %v2889_v25 = vld [vmem:[#allocation2 + $0xe] sm:$0xff]  ;;  %v2789_v8 = vld [vmem:[#allocation2 + $0x2] sm:$0xff] }
 0x2b6   : > { %v2500_v53 = vadd.f32 %v2499_v5, %v2498_v51  ;;  %v2506_v60 = vsel %vm1699_vm1, %v2493_v40, 0.0  ;;  %v2531_v32 = vsel %vm1699_vm1, %v2524_v16, 0.0  ;;  %v2538_v45 = vsel %vm1699_vm1, %v2525_v24, 0.0  ;;  %v2729_v52 = vpop.permute.xlu0 %2728  ;;  %v2921_v17 = vld [vmem:[#allocation2 + $0x10] sm:$0xff]  ;;  %v2888_v24 = vld [vmem:[#allocation2 + $0x6] sm:$0xff] }
 0x2b7   : > { %vm2593_vm8 = vcmp.ge.f32.partialorder %v2571_v50, 0.0  ;;  %v2595_v3 = vmul.f32 0.1, %v2571_v50  ;;  %vm2674_vm9 = vcmp.ge.f32.partialorder %v2638_v22, 0.0  ;;  %v2676_v46 = vmul.f32 0.1, %v2638_v22 }
 0x2b8   : > { %vm2683_vm10 = vcmp.ge.f32.partialorder %v2670_v48, 0.0  ;;  %v2685_v62 = vmul.f32 0.1, %v2670_v48  ;;  %v2507_v18 = vadd.f32 %v2506_v60, %v2505_v9  ;;  %v2532_v47 = vadd.f32 %v2531_v32, %v2530_v12  ;;  %v2731_v9 = vpop.permute.xlu1 %2730  ;;  %2747 = vst.msk [vmem:[#allocation2 + $0x64] sm:$0xff] %vm2740_vm3, %v2729_v52  ;;  %v2923_v32 = vld [vmem:[#allocation2 + $0x30] sm:$0xff] }
 0x2b9   : > { %v2597_v36 = vsel %vm2593_vm8, %v2571_v50, %v2595_v3  ;;  %v2678_v11 = vsel %vm2674_vm9, %v2638_v22, %v2676_v46  ;;  %v2539_v57 = vadd.f32 %v2538_v45, %v2537_v55  ;;  %v2556_v28 = vmul.f32 %v9443_v23, %v7617_v13  ;;  %2748 = vst.msk [vmem:[#allocation2 + $0x6c] sm:$0xff] %vm2740_vm3, %v2731_v9  ;;  %v2757_v50 = vld [vmem:[#allocation2] sm:$0xff]  ;;  %v2758_v22 = vld [vmem:[#allocation2 + $0x8] sm:$0xff] }
 0x2ba   : > { %4564 = vst.msk [vmem:[%s5148_s5 + $0xd8] sm:$0xff] %vm1699_vm1, %v2597_v36  ;;  %4566 = vst.msk [vmem:[%s5148_s5 + $0x128] sm:$0xff] %vm1699_vm1, %v2678_v11  ;;  %v2687_v30 = vsel %vm2683_vm10, %v2670_v48, %v2685_v62  ;;  %vm2574_vm11 = vcmp.ge.f32.partialorder %v2500_v53, 0.0  ;;  %vm2575_vm12 = vcmp.ge.f32.partialorder %v2507_v18, 0.0  ;;  %v2576_v27 = vmul.f32 0.1, %v2500_v53 }
 0x2bb   : > { %4568 = vst.msk [vmem:[%s5148_s5 + $0x178] sm:$0xff] %vm1699_vm1, %v2687_v30  ;;  %v2577_v44 = vmul.f32 0.1, %v2507_v18  ;;  %vm2583_vm13 = vcmp.ge.f32.partialorder %v2532_v47, 0.0  ;;  %v2563_v7 = vsel %vm1699_vm1, %v2556_v28, 0.0  ;;  %vm2584_vm14 = vcmp.ge.f32.partialorder %v2539_v57, 0.0 }
 0x2bc   : > { %v2585_v38 = vmul.f32 0.1, %v2532_v47  ;;  %v2586_v51 = vmul.f32 0.1, %v2539_v57  ;;  %v2564_v12 = vadd.f32 %v2563_v7, %v2562_v19  ;;  %v2578_v31 = vsel %vm2574_vm11, %v2500_v53, %v2576_v27  ;;  %v2790_v53 = vld [vmem:[#allocation2 + $0xa] sm:$0xff]  ;;  %v2759_v30 = vld [vmem:[#allocation2 + $0x20] sm:$0xff] }
 0x2bd   : > { %v2579_v39 = vsel %vm2575_vm12, %v2507_v18, %v2577_v44  ;;  %v2623_v55 = vmul.f32 %v9444_v15, %v7617_v13  ;;  %4559 = vst.msk [vmem:[%s5148_s5 + $0x30] sm:$0xff] %vm1699_vm1, %v2578_v31  ;;  %v2655_v14 = vmul.f32 %v9440_v0, %v7617_v13  ;;  %v2661_v43 = vadd.f32 %v2660_v10, %v7594_v58  ;;  %v2822_v10 = vld [vmem:[#allocation2 + $0xc] sm:$0xff]  ;;  %v2791_v23 = vld [vmem:[#allocation2 + $0x22] sm:$0xff] }
 0x2be   : > { %4560 = vst.msk [vmem:[%s5148_s5 + $0x38] sm:$0xff] %vm1699_vm1, %v2579_v39  ;;  %v2587_v42 = vsel %vm2583_vm13, %v2532_v47, %v2585_v38  ;;  %v2588_v63 = vsel %vm2584_vm14, %v2539_v57, %v2586_v51  ;;  %vm2592_vm15 = vcmp.ge.f32.partialorder %v2564_v12, 0.0  ;;  %v2594_v19 = vmul.f32 0.1, %v2564_v12  ;;  %v2824_v62 = vld [vmem:[#allocation2 + $0x2c] sm:$0xff] }
 0x2bf   : > { %4561 = vst.msk [vmem:[%s5148_s5 + $0x80] sm:$0xff] %vm1699_vm1, %v2587_v42  ;;  %4562 = vst.msk [vmem:[%s5148_s5 + $0x88] sm:$0xff] %vm1699_vm1, %v2588_v63  ;;  %v2630_v6 = vsel %vm1699_vm1, %v2623_v55, 0.0  ;;  %v2662_v54 = vsel %vm1699_vm1, %v2655_v14, 0.0  ;;  %v2897_v29 = vmul.f32 %v2889_v25, %v7472_v56  ;;  %v2929_v16 = vmul.f32 %v2921_v17, %v7472_v56  ;;  %v2891_v18 = vld [vmem:[#allocation2 + $0x2e] sm:$0xff] }
 0x2c0   : > { %v2631_v58 = vadd.f32 %v2630_v6, %v7631_v21  ;;  %v2596_v0 = vsel %vm2592_vm15, %v2564_v12, %v2594_v19  ;;  %v2663_v40 = vadd.f32 %v2662_v54, %v2661_v43  ;;  %v2830_v21 = vmul.f32 %v2822_v10, %v7472_v56  ;;  %v2760_v57 = vld [vmem:[#allocation2 + $0x28] sm:$0xff] }
 0x2c1   : > { %4563 = vst.msk [vmem:[%s5148_s5 + $0xd0] sm:$0xff] %vm1699_vm1, %v2596_v0  ;;  %v2765_v5 = vmul.f32 %v2757_v50, %v7505_v2  ;;  %v2766_v48 = vmul.f32 %v2758_v22, %v7472_v56  ;;  %v2797_v60 = vmul.f32 %v2789_v8, %v7505_v2  ;;  %v2928_v33 = vmul.f32 %v2758_v22, %v7505_v2  ;;  %v2792_v39 = vld [vmem:[#allocation2 + $0x2a] sm:$0xff] }
 0x2c2   : > { %vm2673_vm0 = vcmp.ge.f32.partialorder %v2631_v58, 0.0  ;;  %v2675_v41 = vmul.f32 0.1, %v2631_v58  ;;  %vm2682_vm2 = vcmp.ge.f32.partialorder %v2663_v40, 0.0  ;;  %v2684_v34 = vmul.f32 0.1, %v2663_v40 }
 0x2c3   : > { %v2844_v35 = vsel %vm1699_vm1, %v2830_v21, 0.0  ;;  %v2911_v3 = vsel %vm1699_vm1, %v2897_v29, 0.0  ;;  %v2798_v46 = vmul.f32 %v2790_v53, %v7472_v56  ;;  %v2943_v36 = vsel %vm1699_vm1, %v2929_v16, 0.0  ;;  %v2890_v43 = vld [vmem:[#allocation2 + $0x26] sm:$0xff] }
 0x2c4   : > { %v2677_v26 = vsel %vm2673_vm0, %v2631_v58, %v2675_v41  ;;  %v2686_v61 = vsel %vm2682_vm2, %v2663_v40, %v2684_v34  ;;  %v2773_v11 = vsel %vm1699_vm1, %v2765_v5, 0.0  ;;  %v2780_v47 = vsel %vm1699_vm1, %v2766_v48, 0.0  ;;  %v2826_v19 = vld [vmem:[#allocation2 + $0x4c] sm:$0xff] }
 0x2c5   : > { %4565 = vst.msk [vmem:[%s5148_s5 + $0x120] sm:$0xff] %vm1699_vm1, %v2677_v26  ;;  %4567 = vst.msk [vmem:[%s5148_s5 + $0x170] sm:$0xff] %vm1699_vm1, %v2686_v61  ;;  %v2829_v45 = vmul.f32 %v2821_v59, %v7505_v2  ;;  %v2805_v28 = vsel %vm1699_vm1, %v2797_v60, 0.0  ;;  %v2812_v27 = vsel %vm1699_vm1, %v2798_v46, 0.0  ;;  %v2896_v56 = vmul.f32 %v2888_v24, %v7505_v2  ;;  %v2823_v2 = vld [vmem:[#allocation2 + $0x24] sm:$0xff]  ;;  %v2893_v40 = vld [vmem:[#allocation2 + $0x4e] sm:$0xff] }
 0x2c6   : > { %v2832_v44 = vmul.f32 %v2824_v62, %v7520_v1  ;;  %v2936_v7 = vsel %vm1699_vm1, %v2928_v33, 0.0  ;;  %v2899_v38 = vmul.f32 %v2891_v18, %v7520_v1  ;;  %v2931_v51 = vmul.f32 %v2923_v32, %v7520_v1  ;;  %v2925_v41 = vld [vmem:[#allocation2 + $0x50] sm:$0xff]  ;;  %v2762_v59 = vld [vmem:[#allocation2 + $0x48] sm:$0xff] }
 0x2c7   : > { %v2767_v9 = vmul.f32 %v2759_v30, %v7533_v37  ;;  %v2837_v52 = vsel %vm1699_vm1, %v2829_v45, 0.0  ;;  %v2768_v31 = vmul.f32 %v2760_v57, %v7520_v1  ;;  %v2799_v15 = vmul.f32 %v2791_v23, %v7533_v37  ;;  %v2793_v24 = vld [vmem:[#allocation2 + $0x42] sm:$0xff] }
 0x2c8   : > { %v2845_v12 = vsel %vm1699_vm1, %v2832_v44, 0.0  ;;  %v2904_v55 = vsel %vm1699_vm1, %v2896_v56, 0.0  ;;  %v2912_v42 = vsel %vm1699_vm1, %v2899_v38, 0.0  ;;  %v2944_v63 = vsel %vm1699_vm1, %v2931_v51, 0.0  ;;  %v2825_v62 = vld [vmem:[#allocation2 + $0x44] sm:$0xff] }
 0x2c9   : > { %v2774_v14 = vsel %vm1699_vm1, %v2767_v9, 0.0  ;;  %v2846_v6 = vadd.f32 %v2845_v12, %v2844_v35  ;;  %v2913_v58 = vadd.f32 %v2912_v42, %v2911_v3  ;;  %v2945_v54 = vadd.f32 %v2944_v63, %v2943_v36  ;;  %v2892_v18 = vld [vmem:[#allocation2 + $0x46] sm:$0xff]  ;;  %v2895_v12 = vld [vmem:[#allocation2 + $0x6e] sm:$0xff] }
 0x2ca   : > { %v2781_v0 = vsel %vm1699_vm1, %v2768_v31, 0.0  ;;  %v2775_v34 = vadd.f32 %v2774_v14, %v2773_v11  ;;  %v2800_v26 = vmul.f32 %v2792_v39, %v7520_v1  ;;  %v2806_v61 = vsel %vm1699_vm1, %v2799_v15, 0.0  ;;  %v2761_v1 = vld [vmem:[#allocation2 + $0x40] sm:$0xff]  ;;  %v2927_v31 = vld [vmem:[#allocation2 + $0x70] sm:$0xff]  ;;  %v2764_v42 = vld [vmem:[#allocation2 + $0x68] sm:$0xff] }
 0x2cb   : > { %v2831_v10 = vmul.f32 %v2823_v2, %v7533_v37  ;;  %v2782_v25 = vadd.f32 %v2781_v0, %v2780_v47  ;;  %v2898_v17 = vmul.f32 %v2890_v43, %v7533_v37  ;;  %v2930_v21 = vmul.f32 %v2760_v57, %v7533_v37  ;;  %v2794_v37 = vld [vmem:[#allocation2 + $0x4a] sm:$0xff]  ;;  %v2795_v63 = vld [vmem:[#allocation2 + $0x62] sm:$0xff] }
 0x2cc   : > { %v2834_v29 = vmul.f32 %v2826_v19, %v7563_v4  ;;  %v2813_v16 = vsel %vm1699_vm1, %v2800_v26, 0.0  ;;  %v2901_v22 = vmul.f32 %v2893_v40, %v7563_v4  ;;  %v2933_v8 = vmul.f32 %v2925_v41, %v7563_v4 }
 0x2cd   : > { %v2838_v50 = vsel %vm1699_vm1, %v2831_v10, 0.0  ;;  %v2807_v5 = vadd.f32 %v2806_v61, %v2805_v28  ;;  %v2814_v48 = vadd.f32 %v2813_v16, %v2812_v27  ;;  %v2905_v53 = vsel %vm1699_vm1, %v2898_v17, 0.0 }
 0x2ce   : > { %v2937_v60 = vsel %vm1699_vm1, %v2930_v21, 0.0  ;;  %v2839_v33 = vadd.f32 %v2838_v50, %v2837_v52  ;;  %v2906_v35 = vadd.f32 %v2905_v53, %v2904_v55  ;;  %v2847_v3 = vsel %vm1699_vm1, %v2834_v29, 0.0  ;;  %v2763_v55 = vld [vmem:[#allocation2 + $0x60] sm:$0xff] }
 0x2cf   : > { %v2914_v46 = vsel %vm1699_vm1, %v2901_v22, 0.0  ;;  %v7731_v32 = vadd.f32 %v2937_v60, %v2936_v7  ;;  %v2848_v36 = vadd.f32 %v2847_v3, %v2846_v6  ;;  %v2946_v11 = vsel %vm1699_vm1, %v2933_v8, 0.0  ;;  %v2828_v7 = vld [vmem:[#allocation2 + $0x6c] sm:$0xff]  ;;  %v2827_v8 = vld [vmem:[#allocation2 + $0x64] sm:$0xff] }
 0x2d0   : > { %v2769_v47 = vmul.f32 %v2761_v1, %v7583_v20  ;;  %v2915_v45 = vadd.f32 %v2914_v46, %v2913_v58  ;;  %v2770_v30 = vmul.f32 %v2762_v59, %v7563_v4  ;;  %v2801_v57 = vmul.f32 %v2793_v24, %v7583_v20  ;;  %v2796_v6 = vld [vmem:[#allocation2 + $0x6a] sm:$0xff] }
 0x2d1   : > { %v2802_v23 = vmul.f32 %v2794_v37, %v7563_v4  ;;  %v2833_v27 = vmul.f32 %v2825_v62, %v7583_v20  ;;  %v2900_v56 = vmul.f32 %v2892_v18, %v7583_v20  ;;  %v2932_v44 = vmul.f32 %v2762_v59, %v7583_v20  ;;  %v2894_v62 = vld [vmem:[#allocation2 + $0x66] sm:$0xff] }
 0x2d2   : > { %v2776_v28 = vsel %vm1699_vm1, %v2769_v47, 0.0  ;;  %v2947_v38 = vadd.f32 %v2946_v11, %v2945_v54  ;;  %v2783_v51 = vsel %vm1699_vm1, %v2770_v30, 0.0  ;;  %v2808_v9 = vsel %vm1699_vm1, %v2801_v57, 0.0 }
 0x2d3   : > { %v2815_v52 = vsel %vm1699_vm1, %v2802_v23, 0.0  ;;  %v2777_v39 = vadd.f32 %v2776_v28, %v2775_v34  ;;  %v2784_v4 = vadd.f32 %v2783_v51, %v2782_v25  ;;  %v2809_v15 = vadd.f32 %v2808_v9, %v2807_v5 }
 0x2d4   : > { %v2840_v2 = vsel %vm1699_vm1, %v2833_v27, 0.0  ;;  %v2816_v14 = vadd.f32 %v2815_v52, %v2814_v48  ;;  %v2907_v43 = vsel %vm1699_vm1, %v2900_v56, 0.0  ;;  %v2836_v19 = vmul.f32 %v2828_v7, %v7613_v49 }
 0x2d5   : > { %v2841_v20 = vadd.f32 %v2840_v2, %v2839_v33  ;;  %v7748_v58 = vadd.f32 %v2907_v43, %v2906_v35  ;;  %v2939_v54 = vsel %vm1699_vm1, %v2932_v44, 0.0  ;;  %v2903_v0 = vmul.f32 %v2895_v12, %v7613_v49 }
 0x2d6   : > { %v2935_v40 = vmul.f32 %v2927_v31, %v7613_v49  ;;  %v2849_v41 = vsel %vm1699_vm1, %v2836_v19, 0.0  ;;  %v2771_v34 = vmul.f32 %v2763_v55, %v7617_v13  ;;  %v2772_v26 = vmul.f32 %v2764_v42, %v7613_v49 }
 0x2d7   : > { %v2803_v61 = vmul.f32 %v2795_v63, %v7617_v13  ;;  %v2850_v10 = vadd.f32 %v2849_v41, %v2848_v36  ;;  %v2916_v25 = vsel %vm1699_vm1, %v2903_v0, 0.0  ;;  %v2804_v21 = vmul.f32 %v2796_v6, %v7613_v49 }
 0x2d8   : > { %v2948_v17 = vsel %vm1699_vm1, %v2935_v40, 0.0  ;;  %v2917_v29 = vadd.f32 %v2916_v25, %v2915_v45  ;;  %v2778_v50 = vsel %vm1699_vm1, %v2771_v34, 0.0  ;;  %v2785_v22 = vsel %vm1699_vm1, %v2772_v26, 0.0 }
 0x2d9   : > { %v2949_v16 = vadd.f32 %v2948_v17, %v2947_v38  ;;  %vm2872_vm4 = vcmp.ge.f32.partialorder %v2850_v10, 0.0  ;;  %v2874_v1 = vmul.f32 0.1, %v2850_v10  ;;  %v2779_v5 = vadd.f32 %v2778_v50, %v2777_v39 }
 0x2da   : > { %v2786_v48 = vadd.f32 %v2785_v22, %v2784_v4  ;;  %vm2953_vm5 = vcmp.ge.f32.partialorder %v2917_v29, 0.0  ;;  %v2955_v53 = vmul.f32 0.1, %v2917_v29  ;;  %v2810_v49 = vsel %vm1699_vm1, %v2803_v61, 0.0 }
 0x2db   : > { %vm2962_vm6 = vcmp.ge.f32.partialorder %v2949_v16, 0.0  ;;  %v2964_v60 = vmul.f32 0.1, %v2949_v16  ;;  %v2876_v59 = vsel %vm2872_vm4, %v2850_v10, %v2874_v1  ;;  %v2817_v24 = vsel %vm1699_vm1, %v2804_v21, 0.0 }
 0x2dc   : > { %v2835_v37 = vmul.f32 %v2827_v8, %v7617_v13  ;;  %4574 = vst.msk [vmem:[%s5148_s5 + $0xe8] sm:$0xff] %vm1699_vm1, %v2876_v59  ;;  %v2957_v33 = vsel %vm2953_vm5, %v2917_v29, %v2955_v53  ;;  %v2811_v3 = vadd.f32 %v2810_v49, %v2809_v15  ;;  %v2818_v46 = vadd.f32 %v2817_v24, %v2816_v14 }
 0x2dd   : > { %v2966_v35 = vsel %vm2962_vm6, %v2949_v16, %v2964_v60  ;;  %4576 = vst.msk [vmem:[%s5148_s5 + $0x138] sm:$0xff] %vm1699_vm1, %v2957_v33  ;;  %vm2853_vm7 = vcmp.ge.f32.partialorder %v2779_v5, 0.0  ;;  %vm2854_vm8 = vcmp.ge.f32.partialorder %v2786_v48, 0.0  ;;  %v2855_v36 = vmul.f32 0.1, %v2779_v5 }
 0x2de   : > { %4578 = vst.msk [vmem:[%s5148_s5 + $0x188] sm:$0xff] %vm1699_vm1, %v2966_v35  ;;  %v2842_v18 = vsel %vm1699_vm1, %v2835_v37, 0.0  ;;  %v2856_v47 = vmul.f32 0.1, %v2786_v48  ;;  %vm2862_vm9 = vcmp.ge.f32.partialorder %v2811_v3, 0.0  ;;  %vm2863_vm10 = vcmp.ge.f32.partialorder %v2818_v46, 0.0 }
 0x2df   : > { %v2843_v11 = vadd.f32 %v2842_v18, %v2841_v20  ;;  %v2857_v45 = vsel %vm2853_vm7, %v2779_v5, %v2855_v36  ;;  %v2864_v30 = vmul.f32 0.1, %v2811_v3  ;;  %v2865_v57 = vmul.f32 0.1, %v2818_v46 }
 0x2e0   : > { %v2902_v23 = vmul.f32 %v2894_v62, %v7617_v13  ;;  %v2858_v28 = vsel %vm2854_vm8, %v2786_v48, %v2856_v47  ;;  %4569 = vst.msk [vmem:[%s5148_s5 + $0x40] sm:$0xff] %vm1699_vm1, %v2857_v45  ;;  %v2934_v56 = vmul.f32 %v2764_v42, %v7617_v13  ;;  %v2940_v44 = vadd.f32 %v2939_v54, %v7731_v32 }
 0x2e1   : > { %vm2871_vm11 = vcmp.ge.f32.partialorder %v2843_v11, 0.0  ;;  %v2873_v27 = vmul.f32 0.1, %v2843_v11  ;;  %4570 = vst.msk [vmem:[%s5148_s5 + $0x48] sm:$0xff] %vm1699_vm1, %v2858_v28  ;;  %v2866_v7 = vsel %vm2862_vm9, %v2811_v3, %v2864_v30  ;;  %v2867_v38 = vsel %vm2863_vm10, %v2818_v46, %v2865_v57 }
 0x2e2   : > { %v2909_v51 = vsel %vm1699_vm1, %v2902_v23, 0.0  ;;  %4571 = vst.msk [vmem:[%s5148_s5 + $0x90] sm:$0xff] %vm1699_vm1, %v2866_v7  ;;  %4572 = vst.msk [vmem:[%s5148_s5 + $0x98] sm:$0xff] %vm1699_vm1, %v2867_v38  ;;  %v2941_v12 = vsel %vm1699_vm1, %v2934_v56, 0.0 }
 0x2e3   : > { %v2875_v9 = vsel %vm2871_vm11, %v2843_v11, %v2873_v27  ;;  %v2910_v52 = vadd.f32 %v2909_v51, %v7748_v58  ;;  %v2942_v13 = vadd.f32 %v2941_v12, %v2940_v44 }
 0x2e4   : > { %4573 = vst.msk [vmem:[%s5148_s5 + $0xe0] sm:$0xff] %vm1699_vm1, %v2875_v9 }
 0x2e5   : > { %vm2952_vm12 = vcmp.ge.f32.partialorder %v2910_v52, 0.0  ;;  %v2954_v32 = vmul.f32 0.1, %v2910_v52  ;;  %vm2961_vm13 = vcmp.ge.f32.partialorder %v2942_v13, 0.0  ;;  %v2963_v31 = vmul.f32 0.1, %v2942_v13 }
 0x2e7   : > { %v2956_v39 = vsel %vm2952_vm12, %v2910_v52, %v2954_v32  ;;  %v2965_v4 = vsel %vm2961_vm13, %v2942_v13, %v2963_v31 }
 0x2e8   : > { %4575 = vst.msk [vmem:[%s5148_s5 + $0x130] sm:$0xff] %vm1699_vm1, %v2956_v39  ;;  %4577 = vst.msk [vmem:[%s5148_s5 + $0x180] sm:$0xff] %vm1699_vm1, %v2965_v4 }
 0x2e9 PF: > { %p4579_p5 = scmp.ne.s32.totalorder %s4931_s15, 2 }
 0x2eb   : > { %2973 = sbr.rel (%p4579_p5) target bundleno = 1083 (0x43b), region = 48 }
 0x2f0   : > { %v7794_v15 = vld [vmem:[%s5139_s30 + $0x10] sm:$0xff]  ;;  %v7797_v2 = vld [vmem:[%s5139_s30] sm:$0xff]  ;;  %s4963_s6 = smov 6   ;;  %vm2974_vm1 = vcmask 128000   ;;  %v7804_v55 = vld [vmem:[%s5139_s30 + $0x18] sm:$0xff]  ;;  %vm2983_vm14 = vcmask 48128  }
 0x2f1   : > { %3012 = vrot.lane.b32.xlu1 %v7794_v15, %s4963_s6  ;;  %3008 = vrot.lane.b32.xlu0 %v7797_v2, %s4963_s6  ;;  %v7807_v42 = vld [vmem:[%s5139_s30 + $0x8] sm:$0xff]  ;;  %v9225_v63 = vmov 0.0   ;;  %v7841_v20 = vld [vmem:[%s5139_s30 + $0x20] sm:$0xff]  ;;  %s4965_s22 = smov 3   ;;  %s4966_s20 = smov 125   ;;  %vm3032_vm3 = vcmask 130096  }
 0x2f2   : > { %2976 = vst.msk [vmem:[#allocation2 + $0x20] sm:$0x3f] %vm2974_vm1, %v9225_v63  ;;  %2975 = vst.msk [vmem:[#allocation2] sm:$0x3f] %vm2974_vm1, %v9225_v63  ;;  %v7838_v14 = vld [vmem:[%s5139_s30 + $0x28] sm:$0xff]  ;;  %v2999_v43 = vld [vmem:[%s5139_s30 + $0x38] sm:$0xff] }
 0x2f3   : > { %2986 = vst.msk [vmem:[#allocation2 + $0x26] sm:$0xff] %vm2983_vm14, %v9225_v63  ;;  %2984 = vst.msk [vmem:[#allocation2 + $0x6] sm:$0xff] %vm2983_vm14, %v9225_v63  ;;  %v2998_v19 = vld [vmem:[%s5139_s30 + $0x30] sm:$0xff]  ;;  %s4967_s26 = smov 122   ;;  %v7877_v41 = vld [vmem:[%s5133_s23] sm:$0xff]  ;;  %vm3065_vm15 = vcmask 130048  }
 0x2f4   : > { %2977 = vst.msk [vmem:[#allocation2 + $0x40] sm:$0x3f] %vm2974_vm1, %v9225_v63  ;;  %2978 = vst.msk [vmem:[#allocation2 + $0x60] sm:$0x3f] %vm2974_vm1, %v9225_v63  ;;  %v7874_v40 = vld [vmem:[%s5133_s23 + $0x10] sm:$0xff]  ;;  %v7888_v48 = vld [vmem:[%s5133_s23 + $0x18] sm:$0xff] }
 0x2f5   : > { %2979 = vst.msk [vmem:[#allocation2 + $0x16] sm:$0x3f] %vm2974_vm1, %v9225_v63  ;;  %2980 = vst.msk [vmem:[#allocation2 + $0x36] sm:$0x3f] %vm2974_vm1, %v9225_v63  ;;  %3014 = vrot.lane.b32.xlu1 %v7804_v55, %s4963_s6  ;;  %3010 = vrot.lane.b32.xlu0 %v7807_v42, %s4963_s6  ;;  %vm3262_vm0 = vcmask 23552   ;;  %v7894_v49 = vld [vmem:[%s5133_s23 + $0x8] sm:$0xff] }
 0x2f6   : > { %2981 = vst.msk [vmem:[#allocation2 + $0x56] sm:$0x3f] %vm2974_vm1, %v9225_v63  ;;  %2982 = vst.msk [vmem:[#allocation2 + $0x76] sm:$0x3f] %vm2974_vm1, %v9225_v63  ;;  %vm3311_vm2 = vcmask 130072   ;;  %v7915_v9 = vld [vmem:[%s5133_s23 + $0x28] sm:$0xff] }
 0x2f7   : > { %2985 = vst.msk [vmem:[#allocation2 + $0xe] sm:$0xff] %vm2983_vm14, %v9225_v63  ;;  %2987 = vst.msk [vmem:[#allocation2 + $0x2e] sm:$0xff] %vm2983_vm14, %v9225_v63  ;;  %vm3778_vm4 = vcmask 130152   ;;  %vm3827_vm5 = vcmask 105472   ;;  %vm4057_vm1 = vcmask 130128  }
 0x2f8   : > { %2988 = vst.msk [vmem:[#allocation2 + $0x46] sm:$0xff] %vm2983_vm14, %v9225_v63  ;;  %2989 = vst.msk [vmem:[#allocation2 + $0x4e] sm:$0xff] %vm2983_vm14, %v9225_v63 }
 0x2f9   : > { %2990 = vst.msk [vmem:[#allocation2 + $0x66] sm:$0xff] %vm2983_vm14, %v9225_v63  ;;  %2991 = vst.msk [vmem:[#allocation2 + $0x6e] sm:$0xff] %vm2983_vm14, %v9225_v63  ;;  %3018 = vrot.lane.b32.xlu1 %v7838_v14, %s4963_s6  ;;  %3016 = vrot.lane.b32.xlu0 %v7841_v20, %s4963_s6 }
 0x2fd   : > { %3022 = vrot.lane.b32.xlu1 %v2999_v43, %s4963_s6  ;;  %3020 = vrot.lane.b32.xlu0 %v2998_v19, %s4963_s6 }
 0x301   : > { %3289 = vrot.lane.b32.xlu1 %v7807_v42, %s4965_s22  ;;  %3287 = vrot.lane.b32.xlu0 %v7797_v2, %s4965_s22 }
 0x305   : > { %3293 = vrot.lane.b32.xlu1 %v7804_v55, %s4965_s22  ;;  %3291 = vrot.lane.b32.xlu0 %v7794_v15, %s4965_s22 }
 0x309   : > { %3297 = vrot.lane.b32.xlu1 %v7838_v14, %s4965_s22  ;;  %3295 = vrot.lane.b32.xlu0 %v7841_v20, %s4965_s22 }
 0x30d   : > { %3301 = vrot.lane.b32.xlu1 %v2999_v43, %s4965_s22  ;;  %3299 = vrot.lane.b32.xlu0 %v2998_v19, %s4965_s22 }
 0x311   : > { %3805 = vrot.lane.b32.xlu1 %v7807_v42, %s4966_s20  ;;  %3803 = vrot.lane.b32.xlu0 %v7797_v2, %s4966_s20 }
 0x315   : > { %3809 = vrot.lane.b32.xlu1 %v7804_v55, %s4966_s20  ;;  %3807 = vrot.lane.b32.xlu0 %v7794_v15, %s4966_s20 }
 0x319   : > { %3813 = vrot.lane.b32.xlu1 %v7838_v14, %s4966_s20  ;;  %3811 = vrot.lane.b32.xlu0 %v7841_v20, %s4966_s20 }
 0x31d   : > { %3817 = vrot.lane.b32.xlu1 %v2999_v43, %s4966_s20  ;;  %3815 = vrot.lane.b32.xlu0 %v2998_v19, %s4966_s20 }
 0x321   : > { %4084 = vrot.lane.b32.xlu1 %v7807_v42, %s4967_s26  ;;  %4082 = vrot.lane.b32.xlu0 %v7797_v2, %s4967_s26 }
 0x325   : > { %4088 = vrot.lane.b32.xlu1 %v7804_v55, %s4967_s26  ;;  %4086 = vrot.lane.b32.xlu0 %v7794_v15, %s4967_s26 }
 0x329   : > { %4092 = vrot.lane.b32.xlu1 %v7838_v14, %s4967_s26  ;;  %4090 = vrot.lane.b32.xlu0 %v7841_v20, %s4967_s26 }
 0x32d   : > { %4096 = vrot.lane.b32.xlu1 %v2999_v43, %s4967_s26  ;;  %4094 = vrot.lane.b32.xlu0 %v2998_v19, %s4967_s26 }
 0x363   : > { %v3013_v6 = vpop.permute.xlu1 %3012  ;;  %v3009_v58 = vpop.permute.xlu0 %3008 }
 0x364   : > { %3035 = vst.msk [vmem:[#allocation2 + $0x26] sm:$0xff] %vm3032_vm3, %v3013_v6  ;;  %3033 = vst.msk [vmem:[#allocation2 + $0x6] sm:$0xff] %vm3032_vm3, %v3009_v58 }
 0x367   : > { %v3015_v54 = vpop.permute.xlu1 %3014  ;;  %v3011_v0 = vpop.permute.xlu0 %3010 }
 0x368   : > { %3036 = vst.msk [vmem:[#allocation2 + $0x2e] sm:$0xff] %vm3032_vm3, %v3015_v54  ;;  %3034 = vst.msk [vmem:[#allocation2 + $0xe] sm:$0xff] %vm3032_vm3, %v3011_v0 }
 0x36b   : > { %v3051_v34 = vld [vmem:[#allocation2 + $0x20] sm:$0xff]  ;;  %v3019_v10 = vpop.permute.xlu1 %3018  ;;  %v3017_v25 = vpop.permute.xlu0 %3016 }
 0x36c   : > { %v3084_v26 = vld [vmem:[#allocation2 + $0x23] sm:$0xff]  ;;  %v3059_v17 = vmul.f32 %v3051_v34, %v7874_v40  ;;  %3038 = vst.msk [vmem:[#allocation2 + $0x4e] sm:$0xff] %vm3032_vm3, %v3019_v10  ;;  %3037 = vst.msk [vmem:[#allocation2 + $0x46] sm:$0xff] %vm3032_vm3, %v3017_v25 }
 0x36d   : > { %v3116_v61 = vld [vmem:[#allocation2 + $0x26] sm:$0xff]  ;;  %v3092_v21 = vmul.f32 %v3084_v26, %v7874_v40 }
 0x36e   : > { %v3124_v29 = vmul.f32 %v3116_v61, %v7874_v40  ;;  %v3049_v16 = vld [vmem:[#allocation2] sm:$0xff]  ;;  %v3067_v53 = vsel %vm3065_vm15, %v3059_v17, 0.0 }
 0x36f   : > { %v3082_v50 = vld [vmem:[#allocation2 + $0x3] sm:$0xff]  ;;  %v3057_v8 = vmul.f32 %v3049_v16, %v7877_v41  ;;  %v3099_v60 = vsel %vm3065_vm15, %v3092_v21, 0.0  ;;  %v3085_v3 = vld [vmem:[#allocation2 + $0x2b] sm:$0xff]  ;;  %v3023_v62 = vpop.permute.xlu1 %3022  ;;  %v3021_v18 = vpop.permute.xlu0 %3020  ;;  %v3215_v7 = vld [vmem:[#allocation2 + $0x34] sm:$0xff] }
 0x370   : > { %v3114_v22 = vld [vmem:[#allocation2 + $0x6] sm:$0xff]  ;;  %v3090_v1 = vmul.f32 %v3082_v50, %v7877_v41  ;;  %v3131_v59 = vsel %vm3065_vm15, %v3124_v29, 0.0  ;;  %v3117_v46 = vld [vmem:[#allocation2 + $0x2e] sm:$0xff]  ;;  %3040 = vst.msk [vmem:[#allocation2 + $0x6e] sm:$0xff] %vm3032_vm3, %v3023_v62  ;;  %3039 = vst.msk [vmem:[#allocation2 + $0x66] sm:$0xff] %vm3032_vm3, %v3021_v18  ;;  %v3093_v28 = vmul.f32 %v3085_v3, %v7888_v48  ;;  %v3223_v13 = vmul.f32 %v3215_v7, %v7888_v48 }
 0x371   : > { %v3122_v5 = vmul.f32 %v3114_v22, %v7877_v41  ;;  %v3066_v24 = vsel %vm3065_vm15, %v3057_v8, 0.0  ;;  %v3052_v35 = vld [vmem:[#allocation2 + $0x28] sm:$0xff]  ;;  %v3183_v57 = vld [vmem:[#allocation2 + $0x31] sm:$0xff]  ;;  %v3125_v27 = vmul.f32 %v3117_v46, %v7888_v48 }
 0x372   : > { %v3098_v37 = vsel %vm3065_vm15, %v3090_v1, 0.0  ;;  %v7899_v36 = vadd.f32 %v3067_v53, %v3066_v24  ;;  %v3060_v45 = vmul.f32 %v3052_v35, %v7888_v48  ;;  %v3182_v30 = vld [vmem:[#allocation2 + $0x29] sm:$0xff]  ;;  %v3191_v44 = vmul.f32 %v3183_v57, %v7888_v48  ;;  %v3181_v4 = vld [vmem:[#allocation2 + $0x11] sm:$0xff] }
 0x373   : > { %v3130_v33 = vsel %vm3065_vm15, %v3122_v5, 0.0  ;;  %v7901_v11 = vadd.f32 %v3099_v60, %v3098_v37  ;;  %v3214_v23 = vld [vmem:[#allocation2 + $0x2c] sm:$0xff]  ;;  %v3190_v56 = vmul.f32 %v3182_v30, %v7874_v40  ;;  %v3106_v43 = vsel %vm3065_vm15, %v3093_v28, 0.0  ;;  %v3213_v0 = vld [vmem:[#allocation2 + $0x14] sm:$0xff]  ;;  %v3290_v34 = vpop.permute.xlu1 %3289  ;;  %v3288_v26 = vpop.permute.xlu0 %3287  ;;  %v7941_v5 = vld [vmem:[%s5133_s23 + $0x20] sm:$0xff] }
 0x374   : > { %v7903_v47 = vadd.f32 %v3131_v59, %v3130_v33  ;;  %3265 = vst.msk [vmem:[#allocation2 + $0x26] sm:$0xff] %vm3262_vm0, %v9225_v63  ;;  %v3050_v38 = vld [vmem:[#allocation2 + $0x8] sm:$0xff]  ;;  %v3074_v52 = vsel %vm3065_vm15, %v3060_v45, 0.0  ;;  %v3222_v12 = vmul.f32 %v3214_v23, %v7874_v40  ;;  %3266 = vst.msk [vmem:[#allocation2 + $0x2e] sm:$0xff] %vm3262_vm0, %v9225_v63  ;;  %v3138_v19 = vsel %vm3065_vm15, %v3125_v27, 0.0  ;;  %v3185_v8 = vld [vmem:[#allocation2 + $0x51] sm:$0xff] }
 0x375   : > { %v3083_v51 = vld [vmem:[#allocation2 + $0xb] sm:$0xff]  ;;  %v3058_v32 = vmul.f32 %v3050_v38, %v7894_v49  ;;  %v3197_v6 = vsel %vm3065_vm15, %v3190_v56, 0.0  ;;  %v3204_v58 = vsel %vm3065_vm15, %v3191_v44, 0.0  ;;  %v3236_v10 = vsel %vm3065_vm15, %v3223_v13, 0.0  ;;  %v3217_v1 = vld [vmem:[#allocation2 + $0x54] sm:$0xff]  ;;  %9445 = vst [vmem:[#allocation114_spill] sm:$0xff] %v7941_v5 }
 0x376   : > { %v3115_v31 = vld [vmem:[#allocation2 + $0xe] sm:$0xff]  ;;  %v3229_v61 = vsel %vm3065_vm15, %v3222_v12, 0.0  ;;  %v3091_v17 = vmul.f32 %v3083_v51, %v7894_v49  ;;  %v3189_v22 = vmul.f32 %v3181_v4, %v7894_v49  ;;  %v3053_v53 = vld [vmem:[#allocation2 + $0x40] sm:$0xff]  ;;  %v3221_v24 = vmul.f32 %v3213_v0, %v7894_v49 }
 0x377   : > { %v3180_v39 = vld [vmem:[#allocation2 + $0x9] sm:$0xff]  ;;  %v3073_v25 = vsel %vm3065_vm15, %v3058_v32, 0.0  ;;  %v3123_v16 = vmul.f32 %v3115_v31, %v7894_v49  ;;  %v3294_v28 = vpop.permute.xlu1 %3293  ;;  %v3292_v27 = vpop.permute.xlu0 %3291  ;;  %v3219_v12 = vld [vmem:[#allocation2 + $0x74] sm:$0xff]  ;;  %v3055_v13 = vld [vmem:[#allocation2 + $0x60] sm:$0xff]  ;;  %v3193_v4 = vmul.f32 %v3185_v8, %v7915_v9  ;;  %v3225_v0 = vmul.f32 %v3217_v1, %v7915_v9 }
 0x378   : > { %v3212_v54 = vld [vmem:[#allocation2 + $0xc] sm:$0xff]  ;;  %v7935_v29 = vadd.f32 %v3074_v52, %v3073_v25  ;;  %v3188_v50 = vmul.f32 %v3180_v39, %v7877_v41  ;;  %v3105_v60 = vsel %vm3065_vm15, %v3091_v17, 0.0  ;;  %v3086_v35 = vld [vmem:[#allocation2 + $0x43] sm:$0xff]  ;;  %v3203_v45 = vsel %vm3065_vm15, %v3189_v22, 0.0  ;;  %3315 = vst.msk [vmem:[#allocation2 + $0x2e] sm:$0xff] %vm3311_vm2, %v3294_v28  ;;  %3314 = vst.msk [vmem:[#allocation2 + $0x26] sm:$0xff] %vm3311_vm2, %v3292_v27 }
 0x379   : > { %3264 = vst.msk [vmem:[#allocation2 + $0xe] sm:$0xff] %vm3262_vm0, %v9225_v63  ;;  %3263 = vst.msk [vmem:[#allocation2 + $0x6] sm:$0xff] %vm3262_vm0, %v9225_v63  ;;  %v3119_v21 = vld [vmem:[#allocation2 + $0x4e] sm:$0xff]  ;;  %v3220_v59 = vmul.f32 %v3212_v54, %v7877_v41  ;;  %v7949_v46 = vadd.f32 %v3106_v43, %v3105_v60  ;;  %v3137_v62 = vsel %vm3065_vm15, %v3123_v16, 0.0  ;;  %v3118_v30 = vld [vmem:[#allocation2 + $0x46] sm:$0xff]  ;;  %v3205_v7 = vadd.f32 %v3204_v58, %v3203_v45 }
 0x37a   : > { %3313 = vst.msk [vmem:[#allocation2 + $0xe] sm:$0xff] %vm3311_vm2, %v3290_v34  ;;  %3312 = vst.msk [vmem:[#allocation2 + $0x6] sm:$0xff] %vm3311_vm2, %v3288_v26  ;;  %v3127_v37 = vmul.f32 %v3119_v21, %v7915_v9  ;;  %v3054_v33 = vld [vmem:[#allocation2 + $0x48] sm:$0xff]  ;;  %v3196_v18 = vsel %vm3065_vm15, %v3188_v50, 0.0  ;;  %v3139_v56 = vadd.f32 %v3138_v19, %v3137_v62  ;;  %v3187_v52 = vld [vmem:[#allocation2 + $0x71] sm:$0xff]  ;;  %v3235_v31 = vsel %vm3065_vm15, %v3221_v24, 0.0 }
 0x37b   : > { %v3087_v3 = vld [vmem:[#allocation2 + $0x4b] sm:$0xff]  ;;  %v7958_v44 = vadd.f32 %v3197_v6, %v3196_v18  ;;  %v3228_v38 = vsel %vm3065_vm15, %v3220_v59, 0.0  ;;  %v7974_v19 = vld [vmem:[#allocation2 + $0x63] sm:$0xff]  ;;  %v3237_v58 = vadd.f32 %v3236_v10, %v3235_v31  ;;  %v3061_v34 = vmul.f32 %v3053_v53, %v7941_v5  ;;  %v7993_v50 = vld [vmem:[%s5133_s23 + $0x38] sm:$0xff]  ;;  %v3298_v8 = vpop.permute.xlu1 %3297  ;;  %v3296_v1 = vpop.permute.xlu0 %3295 }
 0x37c   : > { %v7954_v57 = vld [vmem:[#allocation2 + $0x49] sm:$0xff]  ;;  %v7967_v32 = vadd.f32 %v3229_v61, %v3228_v38  ;;  %v3140_v39 = vsel %vm3065_vm15, %v3127_v37, 0.0  ;;  %v3206_v17 = vsel %vm3065_vm15, %v3193_v4, 0.0  ;;  %v3062_v21 = vmul.f32 %v3054_v33, %v7915_v9  ;;  %9446 = vst [vmem:[#allocation115_spill] sm:$0xff] %v7993_v50 }
 0x37d   : > { %v7956_v23 = vld [vmem:[#allocation2 + $0x4c] sm:$0xff]  ;;  %v7978_v54 = vadd.f32 %v3140_v39, %v3139_v56  ;;  %v3094_v16 = vmul.f32 %v3086_v35, %v7941_v5  ;;  %v3095_v10 = vmul.f32 %v3087_v3, %v7915_v9  ;;  %v3207_v53 = vadd.f32 %v3206_v17, %v3205_v7 }
 0x37e   : > { %3267 = vst.msk [vmem:[#allocation2 + $0x46] sm:$0xff] %vm3262_vm0, %v9225_v63  ;;  %3268 = vst.msk [vmem:[#allocation2 + $0x4e] sm:$0xff] %vm3262_vm0, %v9225_v63  ;;  %v3121_v51 = vld [vmem:[#allocation2 + $0x6e] sm:$0xff]  ;;  %v7982_v26 = vld [vmem:[#allocation2 + $0x66] sm:$0xff]  ;;  %v3238_v60 = vsel %vm3065_vm15, %v3225_v0, 0.0  ;;  %v3069_v59 = vsel %vm3065_vm15, %v3061_v34, 0.0  ;;  %v3126_v24 = vmul.f32 %v3118_v30, %v7941_v5 }
 0x37f   : > { %v7972_v43 = vld [vmem:[#allocation2 + $0x68] sm:$0xff]  ;;  %v7996_v22 = vld [vmem:[%s5133_s23 + $0x30] sm:$0xff]  ;;  %3317 = vst.msk [vmem:[#allocation2 + $0x4e] sm:$0xff] %vm3311_vm2, %v3298_v8  ;;  %3316 = vst.msk [vmem:[#allocation2 + $0x46] sm:$0xff] %vm3311_vm2, %v3296_v1  ;;  %v3239_v3 = vadd.f32 %v3238_v60, %v3237_v58  ;;  %v3070_v62 = vadd.f32 %v3069_v59, %v7899_v36  ;;  %v3076_v18 = vsel %vm3065_vm15, %v3062_v21, 0.0  ;;  %v3101_v45 = vsel %vm3065_vm15, %v3094_v16, 0.0  ;;  %v3302_v16 = vpop.permute.xlu1 %3301 }
 0x380   : > { %v7976_v6 = vld [vmem:[#allocation2 + $0x6b] sm:$0xff]  ;;  %9447 = vst [vmem:[#allocation116_spill] sm:$0xff] %v7996_v22  ;;  %v3077_v56 = vadd.f32 %v3076_v18, %v7935_v29  ;;  %v3102_v7 = vadd.f32 %v3101_v45, %v7901_v11  ;;  %v3108_v38 = vsel %vm3065_vm15, %v3095_v10, 0.0  ;;  %v3133_v31 = vsel %vm3065_vm15, %v3126_v24, 0.0  ;;  %v3300_v10 = vpop.permute.xlu0 %3299 }
 0x381   : > { %v7984_v61 = vld [vmem:[#allocation2 + $0x69] sm:$0xff]  ;;  %v8007_v33 = vld [vmem:[#allocation2 + $0x11] sm:$0xff]  ;;  %v8016_v28 = vld [vmem:[#allocation2] sm:$0xff]  ;;  %v8033_v58 = vadd.f32 %v3108_v38, %v7949_v46  ;;  %v8036_v0 = vadd.f32 %v3133_v31, %v7903_v47  ;;  %v3192_v29 = vmul.f32 %v7954_v57, %v7941_v5  ;;  %v3224_v11 = vmul.f32 %v7956_v23, %v7941_v5 }
 0x382   : > { %v7986_v25 = vld [vmem:[#allocation2 + $0x6c] sm:$0xff]  ;;  %v8009_v35 = vld [vmem:[#allocation2 + $0x14] sm:$0xff]  ;;  %v8020_v27 = vld [vmem:[#allocation2 + $0x3] sm:$0xff]  ;;  %v3129_v46 = vmul.f32 %v3121_v51, %v7993_v50  ;;  %v3195_v8 = vmul.f32 %v3187_v52, %v7993_v50  ;;  %v3227_v47 = vmul.f32 %v3219_v12, %v7993_v50  ;;  %v3063_v1 = vmul.f32 %v3055_v13, %v7996_v22 }
 0x383   : > { %3269 = vst.msk [vmem:[#allocation2 + $0x66] sm:$0xff] %vm3262_vm0, %v9225_v63  ;;  %3270 = vst.msk [vmem:[#allocation2 + $0x6e] sm:$0xff] %vm3262_vm0, %v9225_v63  ;;  %v8005_v37 = vld [vmem:[#allocation2 + $0xe] sm:$0xff]  ;;  %v8028_v36 = vld [vmem:[#allocation2 + $0x6] sm:$0xff]  ;;  %v3199_v51 = vsel %vm3065_vm15, %v3192_v29, 0.0  ;;  %v3231_v52 = vsel %vm3065_vm15, %v3224_v11, 0.0 }
 0x384   : > { %v8018_v30 = vld [vmem:[#allocation2 + $0x8] sm:$0xff]  ;;  %v8046_v21 = vld [vmem:[#allocation2 + $0x31] sm:$0xff]  ;;  %v8058_v23 = vld [vmem:[#allocation2 + $0x20] sm:$0xff]  ;;  %3319 = vst.msk [vmem:[#allocation2 + $0x6e] sm:$0xff] %vm3311_vm2, %v3302_v16  ;;  %v8077_v24 = vadd.f32 %v3199_v51, %v7958_v44  ;;  %v8080_v18 = vadd.f32 %v3231_v52, %v7967_v32  ;;  %v3142_v45 = vsel %vm3065_vm15, %v3129_v46, 0.0  ;;  %v3240_v11 = vsel %vm3065_vm15, %v3227_v47, 0.0 }
 0x385   : > { %v8026_v39 = vld [vmem:[#allocation2 + $0xb] sm:$0xff]  ;;  %v8056_v57 = vld [vmem:[#allocation2 + $0x34] sm:$0xff]  ;;  %3318 = vst.msk [vmem:[#allocation2 + $0x66] sm:$0xff] %vm3311_vm2, %v3300_v10  ;;  %v8070_v12 = vld [vmem:[#allocation2 + $0x23] sm:$0xff]  ;;  %v3143_v31 = vadd.f32 %v3142_v45, %v7978_v54  ;;  %v3071_v44 = vsel %vm3065_vm15, %v3063_v1, 0.0  ;;  %v3241_v32 = vadd.f32 %v3240_v11, %v3239_v3  ;;  %v3097_v46 = vmul.f32 %v7976_v6, %v7993_v50 }
 0x386   : > { %v8030_v4 = vld [vmem:[#allocation2 + $0x9] sm:$0xff]  ;;  %v3072_v16 = vadd.f32 %v3071_v44, %v3070_v62 }
 0x387   : > { %v8042_v34 = vld [vmem:[#allocation2 + $0xc] sm:$0xff]  ;;  %vm3164_vm6 = vcmp.ge.f32.partialorder %v3143_v31, 0.0  ;;  %v3166_v54 = vmul.f32 0.1, %v3143_v31  ;;  %vm3254_vm8 = vcmp.ge.f32.partialorder %v3241_v32, 0.0  ;;  %v3110_v62 = vsel %vm3065_vm15, %v3097_v46, 0.0 }
 0x388   : > { %v8044_v17 = vld [vmem:[#allocation2 + $0x2e] sm:$0xff]  ;;  %3549 = vst.msk [vmem:[#allocation2 + $0x6] sm:$0xff] %vm3065_vm15, %v7797_v2  ;;  %3550 = vst.msk [vmem:[#allocation2 + $0xe] sm:$0xff] %vm3065_vm15, %v7807_v42  ;;  %v3064_v2 = vmul.f32 %v7972_v43, %v7993_v50  ;;  %v3096_v42 = vmul.f32 %v7974_v19, %v7996_v22  ;;  %v8074_v59 = vld [vmem:[#allocation2 + $0x26] sm:$0xff]  ;;  %v3208_v43 = vsel %vm3065_vm15, %v3195_v8, 0.0  ;;  %vm3146_vm9 = vcmp.ge.f32.partialorder %v3072_v16, 0.0 }
 0x389   : > { %v8060_v60 = vld [vmem:[#allocation2 + $0x28] sm:$0xff]  ;;  %v3209_v29 = vadd.f32 %v3208_v43, %v3207_v53  ;;  %v3256_v8 = vmul.f32 0.1, %v3241_v32  ;;  %v3168_v1 = vsel %vm3164_vm6, %v3143_v31, %v3166_v54  ;;  %v3806_v31 = vpop.permute.xlu1 %3805  ;;  %v3148_v11 = vmul.f32 0.1, %v3072_v16 }
 0x38a   : > { %v8072_v13 = vld [vmem:[#allocation2 + $0x2b] sm:$0xff]  ;;  %v3078_v10 = vsel %vm3065_vm15, %v3064_v2, 0.0  ;;  %4583 = vst.msk [vmem:[%s5148_s5 + $0xa8] sm:$0xff] %vm3065_vm15, %v3168_v1 }
 0x38b   : > { %v8084_v38 = vld [vmem:[#allocation2 + $0x29] sm:$0xff]  ;;  %vm3245_vm7 = vcmp.ge.f32.partialorder %v3209_v29, 0.0  ;;  %v3247_v53 = vmul.f32 0.1, %v3209_v29  ;;  %v3079_v47 = vadd.f32 %v3078_v10, %v3077_v56  ;;  %v3258_v2 = vsel %vm3254_vm8, %v3241_v32, %v3256_v8 }
 0x38c   : > { %v8086_v19 = vld [vmem:[#allocation2 + $0x2c] sm:$0xff]  ;;  %v3111_v56 = vadd.f32 %v3110_v62, %v8033_v58  ;;  %4587 = vst.msk [vmem:[%s5148_s5 + $0x148] sm:$0xff] %vm3065_vm15, %v3258_v2  ;;  %v3150_v46 = vsel %vm3146_vm9, %v3072_v16, %v3148_v11  ;;  %v8154_v11 = vld [vmem:[#allocation2 + $0x40] sm:$0xff] }
 0x38d   : > { %3551 = vst.msk [vmem:[#allocation2 + $0x26] sm:$0xff] %vm3065_vm15, %v7794_v15  ;;  %3552 = vst.msk [vmem:[#allocation2 + $0x2e] sm:$0xff] %vm3065_vm15, %v7804_v55  ;;  %v3103_v15 = vsel %vm3065_vm15, %v3096_v42, 0.0  ;;  %v3249_v55 = vsel %vm3245_vm7, %v3209_v29, %v3247_v53  ;;  %v3128_v42 = vmul.f32 %v7982_v26, %v7996_v22  ;;  %v3804_v29 = vpop.permute.xlu0 %3803  ;;  %vm3147_vm10 = vcmp.ge.f32.partialorder %v3079_v47, 0.0 }
 0x38e   : > { %v3104_v3 = vadd.f32 %v3103_v15, %v3102_v7  ;;  %4585 = vst.msk [vmem:[%s5148_s5 + $0xf8] sm:$0xff] %vm3065_vm15, %v3249_v55  ;;  %v3149_v44 = vmul.f32 0.1, %v3079_v47  ;;  %vm3155_vm12 = vcmp.ge.f32.partialorder %v3111_v56, 0.0  ;;  %v3157_v32 = vmul.f32 0.1, %v3111_v56 }
 0x38f   : > { %v8100_v51 = vld [vmem:[#allocation2] sm:$0xff]  ;;  %v8102_v6 = vld [vmem:[#allocation2 + $0x8] sm:$0xff]  ;;  %v3135_v58 = vsel %vm3065_vm15, %v3128_v42, 0.0  ;;  %v3194_v53 = vmul.f32 %v7984_v61, %v7996_v22  ;;  %v8128_v15 = vld [vmem:[#allocation2 + $0x11] sm:$0xff]  ;;  %3152 = vst.msk [vmem:[%s5148_s5] sm:$0xff] %vm3065_vm15, %v3150_v46  ;;  %v3401_v61 = vmul.f32 %v8005_v37, %v7894_v49  ;;  %v3468_v46 = vmul.f32 %v8007_v33, %v7894_v49 }
 0x390   : > { %v8104_v52 = vld [vmem:[#allocation2 + $0x3] sm:$0xff]  ;;  %v8113_v7 = vld [vmem:[#allocation2 + $0xb] sm:$0xff]  ;;  %vm3154_vm11 = vcmp.ge.f32.partialorder %v3104_v3, 0.0  ;;  %v3156_v26 = vmul.f32 0.1, %v3104_v3  ;;  %v3136_v10 = vadd.f32 %v3135_v58, %v8036_v0  ;;  %v3151_v54 = vsel %vm3147_vm10, %v3079_v47, %v3149_v44  ;;  %v8140_v16 = vld [vmem:[#allocation2 + $0x14] sm:$0xff] }
 0x391   : > { %v8115_v45 = vld [vmem:[#allocation2 + $0x6] sm:$0xff]  ;;  %v8117_v43 = vld [vmem:[#allocation2 + $0xe] sm:$0xff]  ;;  %3153 = vst.msk [vmem:[%s5148_s5 + $0x8] sm:$0xff] %vm3065_vm15, %v3151_v54  ;;  %v3159_v62 = vsel %vm3155_vm12, %v3111_v56, %v3157_v32  ;;  %v3226_v0 = vmul.f32 %v7986_v25, %v7996_v22  ;;  %9448 = vst [vmem:[#allocation117_spill] sm:$0xff] %v8154_v11  ;;  %v3201_v32 = vsel %vm3065_vm15, %v3194_v53, 0.0  ;;  %v8181_v53 = vsel %vm3065_vm15, %v3401_v61, 0.0 }
 0x392   : > { %v8126_v8 = vld [vmem:[#allocation2 + $0x9] sm:$0xff]  ;;  %v3158_v55 = vsel %vm3154_vm11, %v3104_v3, %v3156_v26  ;;  %v8150_v3 = vld [vmem:[#allocation2 + $0x51] sm:$0xff]  ;;  %4581 = vst.msk [vmem:[%s5148_s5 + $0x58] sm:$0xff] %vm3065_vm15, %v3159_v62  ;;  %vm3163_vm13 = vcmp.ge.f32.partialorder %v3136_v10, 0.0  ;;  %v3165_v26 = vmul.f32 0.1, %v3136_v10  ;;  %v3500_v33 = vmul.f32 %v8009_v35, %v7894_v49 }
 0x393   : > { %v8130_v1 = vld [vmem:[#allocation2 + $0xc] sm:$0xff]  ;;  %v8152_v56 = vld [vmem:[#allocation2 + $0x54] sm:$0xff]  ;;  %v8158_v37 = vld [vmem:[#allocation2 + $0x43] sm:$0xff]  ;;  %4580 = vst.msk [vmem:[%s5148_s5 + $0x50] sm:$0xff] %vm3065_vm15, %v3158_v55  ;;  %v3202_v55 = vadd.f32 %v3201_v32, %v8077_v24  ;;  %v3233_v62 = vsel %vm3065_vm15, %v3226_v0, 0.0  ;;  %v8195_v61 = vsel %vm3065_vm15, %v3468_v46, 0.0  ;;  %v3336_v35 = vmul.f32 %v8016_v28, %v7877_v41 }
 0x394   : > { %3779 = vst.msk [vmem:[#allocation2 + $0x6] sm:$0xff] %vm3778_vm4, %v9225_v63  ;;  %v8144_v47 = vld [vmem:[#allocation2 + $0x20] sm:$0xff]  ;;  %v8146_v2 = vld [vmem:[#allocation2 + $0x28] sm:$0xff]  ;;  %9450 = vst [vmem:[#allocation119_spill] sm:$0xff] %v8158_v37  ;;  %v3167_v24 = vsel %vm3163_vm13, %v3136_v10, %v3165_v26  ;;  %v3234_v0 = vadd.f32 %v3233_v62, %v8080_v18  ;;  %v8208_v10 = vsel %vm3065_vm15, %v3500_v33, 0.0  ;;  %v3337_v18 = vmul.f32 %v8018_v30, %v7894_v49 }
 0x395   : > { %v8148_v42 = vld [vmem:[#allocation2 + $0x4e] sm:$0xff]  ;;  %v8162_v58 = vld [vmem:[#allocation2 + $0x46] sm:$0xff]  ;;  %3780 = vst.msk [vmem:[#allocation2 + $0xe] sm:$0xff] %vm3778_vm4, %v9225_v63  ;;  %vm3244_vm14 = vcmp.ge.f32.partialorder %v3202_v55, 0.0  ;;  %v9453_v26 = vmov 0.0   ;;  %v8223_v33 = vsel %vm3065_vm15, %v3336_v35, 0.0  ;;  %v3368_v30 = vmul.f32 %v8020_v27, %v7877_v41 }
 0x396   : > { %v8156_v25 = vld [vmem:[#allocation2 + $0x48] sm:$0xff]  ;;  %9452 = vst [vmem:[#allocation121_spill] sm:$0xff] %v8162_v58  ;;  %3828 = vst.msk [vmem:[#allocation2 + $0x6] sm:$0xff] %vm3827_vm5, %v3804_v29  ;;  %v3810_v29 = vpop.permute.xlu1 %3809  ;;  %v8199_v32 = vld [vmem:[#allocation2 + $0x31] sm:$0xff]  ;;  %vm3253_vm3 = vcmp.ge.f32.partialorder %v3234_v0, 0.0  ;;  %v8239_v5 = vsel %vm3065_vm15, %v3337_v18, 0.0 }
 0x397   : > { %9449 = vst [vmem:[#allocation118_spill] sm:$0xff] %v8156_v25  ;;  %v8160_v44 = vld [vmem:[#allocation2 + $0x4b] sm:$0xff]  ;;  %v8173_v54 = vld [vmem:[#allocation2 + $0x23] sm:$0xff]  ;;  %3829 = vst.msk [vmem:[#allocation2 + $0xe] sm:$0xff] %vm3827_vm5, %v3806_v31  ;;  %v3246_v31 = vmul.f32 0.1, %v3202_v55 }
 0x398   : > { %9451 = vst [vmem:[#allocation120_spill] sm:$0xff] %v8160_v44  ;;  %v8175_v22 = vld [vmem:[#allocation2 + $0x2b] sm:$0xff]  ;;  %v3808_v44 = vpop.permute.xlu0 %3807  ;;  %v8203_v25 = vld [vmem:[#allocation2 + $0x34] sm:$0xff]  ;;  %4582 = vst.msk [vmem:[%s5148_s5 + $0xa0] sm:$0xff] %vm3065_vm15, %v3167_v24  ;;  %v3255_v11 = vmul.f32 0.1, %v3234_v0 }
 0x399   : > { %v8185_v50 = vld [vmem:[#allocation2 + $0x26] sm:$0xff]  ;;  %v8187_v63 = vld [vmem:[#allocation2 + $0x2e] sm:$0xff]  ;;  %v3548_v24 = vld [vmem:[%s5139_s30 + $0x38] sm:$0xff]  ;;  %v3248_v35 = vsel %vm3244_vm14, %v3202_v55, %v3246_v31  ;;  %v8255_v55 = vsel %vm3065_vm15, %v3368_v30, 0.0 }
 0x39a   : > { %v8189_v58 = vld [vmem:[#allocation2 + $0x29] sm:$0xff]  ;;  %v8245_v27 = vld [vmem:[#allocation2 + $0x74] sm:$0xff]  ;;  %4584 = vst.msk [vmem:[%s5148_s5 + $0xf0] sm:$0xff] %vm3065_vm15, %v3248_v35 }
 0x39b   : > { %v8201_v37 = vld [vmem:[#allocation2 + $0x2c] sm:$0xff]  ;;  %9458 = vst [vmem:[#allocation126_spill] sm:$0xff] %v8245_v27  ;;  %v3370_v27 = vmul.f32 %v8070_v12, %v7874_v40 }
 0x39c   : > { %3781 = vst.msk [vmem:[#allocation2 + $0x26] sm:$0xff] %vm3778_vm4, %v9453_v26  ;;  %3782 = vst.msk [vmem:[#allocation2 + $0x2e] sm:$0xff] %vm3778_vm4, %v9453_v26  ;;  %v8216_v28 = vld [vmem:[#allocation2 + $0x49] sm:$0xff] }
 0x39d   : > { %9454 = vst [vmem:[#allocation122_spill] sm:$0xff] %v8216_v28  ;;  %v8218_v46 = vld [vmem:[#allocation2 + $0x4c] sm:$0xff]  ;;  %3831 = vst.msk [vmem:[#allocation2 + $0x2e] sm:$0xff] %vm3827_vm5, %v3810_v29  ;;  %v3467_v29 = vmul.f32 %v8030_v4, %v7877_v41  ;;  %v3573_v4 = vmul.f32 %v8100_v51, %v7877_v41 }
 0x39e   : > { %9455 = vst [vmem:[#allocation123_spill] sm:$0xff] %v8218_v46  ;;  %v3547_v62 = vld [vmem:[%s5139_s30 + $0x30] sm:$0xff]  ;;  %3553 = vst.msk [vmem:[#allocation2 + $0x46] sm:$0xff] %vm3065_vm15, %v7841_v20  ;;  %v3369_v20 = vmul.f32 %v8026_v39, %v7894_v49  ;;  %v3499_v39 = vmul.f32 %v8042_v34, %v7877_v41  ;;  %v8265_v18 = vld [vmem:[#allocation2 + $0x66] sm:$0xff]  ;;  %v3574_v34 = vmul.f32 %v8102_v6, %v7894_v49 }
 0x39f   : > { %3554 = vst.msk [vmem:[#allocation2 + $0x4e] sm:$0xff] %vm3065_vm15, %v7838_v14  ;;  %v8231_v28 = vld [vmem:[#allocation2 + $0x6e] sm:$0xff]  ;;  %v3400_v14 = vmul.f32 %v8028_v36, %v7877_v41  ;;  %v8261_v36 = vld [vmem:[#allocation2 + $0x63] sm:$0xff]  ;;  %9463 = vst [vmem:[#allocation131_spill] sm:$0xff] %v8265_v18  ;;  %v8284_v18 = vsel %vm3065_vm15, %v3467_v29, 0.0 }
 0x3a0   : > { %9456 = vst [vmem:[#allocation124_spill] sm:$0xff] %v8231_v28  ;;  %v8233_v46 = vld [vmem:[#allocation2 + $0x71] sm:$0xff]  ;;  %3830 = vst.msk [vmem:[#allocation2 + $0x26] sm:$0xff] %vm3827_vm5, %v3808_v44  ;;  %v8247_v28 = vld [vmem:[#allocation2 + $0x60] sm:$0xff]  ;;  %v3257_v44 = vsel %vm3253_vm3, %v3234_v0, %v3255_v11  ;;  %v8270_v35 = vsel %vm3065_vm15, %v3369_v20, 0.0  ;;  %v3605_v20 = vmul.f32 %v8104_v52, %v7877_v41  ;;  %v8307_v52 = vsel %vm3065_vm15, %v3574_v34, 0.0 }
 0x3a1   : > { %9457 = vst [vmem:[#allocation125_spill] sm:$0xff] %v8233_v46  ;;  %9459 = vst [vmem:[#allocation127_spill] sm:$0xff] %v8247_v28  ;;  %v8249_v46 = vld [vmem:[#allocation2 + $0x68] sm:$0xff]  ;;  %v8273_v11 = vsel %vm3065_vm15, %v3400_v14, 0.0  ;;  %v3606_v14 = vmul.f32 %v8113_v7, %v7894_v49  ;;  %v8297_v6 = vld [vmem:[#allocation2 + $0x11] sm:$0xff]  ;;  %v3637_v7 = vmul.f32 %v8115_v45, %v7877_v41  ;;  %v3704_v34 = vmul.f32 %v8126_v8, %v7877_v41 }
 0x3a2   : > { %9460 = vst [vmem:[#allocation128_spill] sm:$0xff] %v8249_v46  ;;  %9461 = vst [vmem:[#allocation129_spill] sm:$0xff] %v8261_v36  ;;  %v8263_v31 = vld [vmem:[#allocation2 + $0x6b] sm:$0xff]  ;;  %v8301_v29 = vld [vmem:[#allocation2] sm:$0xff]  ;;  %v3705_v45 = vmul.f32 %v8128_v15, %v7894_v49  ;;  %v3737_v8 = vmul.f32 %v8140_v16, %v7894_v49 }
 0x3a3   : > { %9462 = vst [vmem:[#allocation130_spill] sm:$0xff] %v8263_v31  ;;  %4586 = vst.msk [vmem:[%s5148_s5 + $0x140] sm:$0xff] %vm3065_vm15, %v3257_v44  ;;  %v8279_v0 = vld [vmem:[#allocation2 + $0x69] sm:$0xff]  ;;  %v8287_v44 = vsel %vm3065_vm15, %v3499_v39, 0.0  ;;  %v8304_v39 = vsel %vm3065_vm15, %v3573_v4, 0.0  ;;  %v8323_v4 = vsel %vm3065_vm15, %v3606_v14, 0.0  ;;  %v3736_v14 = vmul.f32 %v8130_v1, %v7877_v41 }
 0x3a4   : > { %9464 = vst [vmem:[#allocation132_spill] sm:$0xff] %v8279_v0  ;;  %v8281_v30 = vld [vmem:[#allocation2 + $0x6c] sm:$0xff]  ;;  %9467 = vst [vmem:[#allocation135_spill] sm:$0xff] %v8297_v6  ;;  %v8359_v41 = vsel %vm3065_vm15, %v3705_v45, 0.0  ;;  %v3470_v1 = vmul.f32 %v8046_v21, %v7888_v48  ;;  %v3502_v45 = vmul.f32 %v8056_v57, %v7888_v48 }
 0x3a5   : > { %9465 = vst [vmem:[#allocation133_spill] sm:$0xff] %v8281_v30  ;;  %3555 = vst.msk [vmem:[#allocation2 + $0x66] sm:$0xff] %vm3065_vm15, %v3547_v62  ;;  %v8295_v51 = vld [vmem:[#allocation2 + $0xe] sm:$0xff]  ;;  %v3638_v62 = vmul.f32 %v8117_v43, %v7894_v49  ;;  %v8345_v15 = vld [vmem:[#allocation2 + $0x40] sm:$0xff]  ;;  %v3403_v49 = vmul.f32 %v8044_v17, %v7888_v48  ;;  %v8372_v31 = vsel %vm3065_vm15, %v3736_v14, 0.0  ;;  %v3338_v17 = vmul.f32 %v8058_v23, %v7874_v40 }
 0x3a6   : > { %3556 = vst.msk [vmem:[#allocation2 + $0x6e] sm:$0xff] %vm3065_vm15, %v3548_v24  ;;  %9466 = vst [vmem:[#allocation134_spill] sm:$0xff] %v8295_v51  ;;  %v8299_v30 = vld [vmem:[#allocation2 + $0x14] sm:$0xff]  ;;  %v8313_v24 = vld [vmem:[#allocation2 + $0x8] sm:$0xff]  ;;  %v3483_v14 = vsel %vm3065_vm15, %v3470_v1, 0.0 }
 0x3a7   : > { %9468 = vst [vmem:[#allocation136_spill] sm:$0xff] %v8299_v30  ;;  %9469 = vst [vmem:[#allocation137_spill] sm:$0xff] %v8301_v29  ;;  %v8315_v51 = vld [vmem:[#allocation2 + $0x3] sm:$0xff]  ;;  %v8317_v6 = vld [vmem:[#allocation2 + $0xb] sm:$0xff]  ;;  %v8320_v29 = vsel %vm3065_vm15, %v3605_v20, 0.0  ;;  %v8339_v20 = vsel %vm3065_vm15, %v3638_v62, 0.0 }
 0x3a8   : > { %9470 = vst [vmem:[#allocation138_spill] sm:$0xff] %v8313_v24  ;;  %9471 = vst [vmem:[#allocation139_spill] sm:$0xff] %v8315_v51  ;;  %v8329_v30 = vld [vmem:[#allocation2 + $0x6] sm:$0xff]  ;;  %v3812_v51 = vpop.permute.xlu0 %3811  ;;  %v8356_v62 = vsel %vm3065_vm15, %v3704_v34, 0.0  ;;  %v8369_v0 = vld [vmem:[#allocation2 + $0x4e] sm:$0xff]  ;;  %v8375_v34 = vsel %vm3065_vm15, %v3737_v8, 0.0  ;;  %v3339_v8 = vmul.f32 %v8060_v60, %v7888_v48 }
 0x3a9   : > { %9472 = vst [vmem:[#allocation140_spill] sm:$0xff] %v8317_v6  ;;  %9473 = vst [vmem:[#allocation141_spill] sm:$0xff] %v8329_v30  ;;  %v8331_v43 = vld [vmem:[#allocation2 + $0x9] sm:$0xff]  ;;  %v8336_v6 = vsel %vm3065_vm15, %v3637_v7, 0.0  ;;  %v3814_v7 = vpop.permute.xlu1 %3813  ;;  %v8383_v21 = vld [vmem:[#allocation2 + $0x51] sm:$0xff]  ;;  %v3416_v28 = vsel %vm3065_vm15, %v3403_v49, 0.0 }
 0x3aa   : > { %9474 = vst [vmem:[#allocation142_spill] sm:$0xff] %v8331_v43  ;;  %v8333_v24 = vld [vmem:[#allocation2 + $0xc] sm:$0xff]  ;;  %v8349_v43 = vld [vmem:[#allocation2 + $0x43] sm:$0xff]  ;;  %v8393_v57 = vld [vmem:[#allocation2 + $0x54] sm:$0xff]  ;;  %v8398_v23 = vadd.f32 %v3416_v28, %v8181_v53  ;;  %v3515_v49 = vsel %vm3065_vm15, %v3502_v45, 0.0  ;;  %v3345_v1 = vsel %vm3065_vm15, %v3338_v17, 0.0  ;;  %v3371_v45 = vmul.f32 %v8072_v13, %v7888_v48 }
 0x3ab   : > { %9475 = vst [vmem:[#allocation143_spill] sm:$0xff] %v8333_v24  ;;  %v8347_v30 = vld [vmem:[#allocation2 + $0x48] sm:$0xff]  ;;  %4058 = vst.msk [vmem:[#allocation2 + $0x6] sm:$0xff] %vm4057_vm1, %v9453_v26  ;;  %v8415_v53 = vadd.f32 %v3515_v49, %v8208_v10  ;;  %v3352_v28 = vsel %vm3065_vm15, %v3339_v8, 0.0  ;;  %v3402_v8 = vmul.f32 %v8074_v59, %v7874_v40  ;;  %v3469_v13 = vmul.f32 %v8084_v38, %v7874_v40 }
 0x3ac   : > { %4059 = vst.msk [vmem:[#allocation2 + $0xe] sm:$0xff] %vm4057_vm1, %v9453_v26  ;;  %v8365_v16 = vld [vmem:[#allocation2 + $0x4b] sm:$0xff]  ;;  %9477 = vst [vmem:[#allocation145_spill] sm:$0xff] %v8393_v57  ;;  %v8407_v60 = vld [vmem:[#allocation2 + $0x60] sm:$0xff]  ;;  %v8431_v10 = vadd.f32 %v3352_v28, %v8239_v5  ;;  %v3384_v5 = vsel %vm3065_vm15, %v3371_v45, 0.0  ;;  %v3575_v59 = vmul.f32 %v8144_v47, %v7874_v40 }
 0x3ad   : > { %v8367_v24 = vld [vmem:[#allocation2 + $0x46] sm:$0xff]  ;;  %v8452_v28 = vld [vmem:[#allocation2 + $0x74] sm:$0xff]  ;;  %v8465_v45 = vadd.f32 %v3384_v5, %v8270_v35  ;;  %v3476_v47 = vsel %vm3065_vm15, %v3469_v13, 0.0 }
 0x3ae   : > { %v8381_v36 = vld [vmem:[#allocation2 + $0x49] sm:$0xff] }
 0x3af   : > { %v8385_v46 = vld [vmem:[#allocation2 + $0x4c] sm:$0xff]  ;;  %v8411_v57 = vld [vmem:[#allocation2 + $0x63] sm:$0xff] }
 0x3b0   : > { %9476 = vst [vmem:[#allocation144_spill] sm:$0xff] %v8385_v46  ;;  %3783 = vst.msk [vmem:[#allocation2 + $0x46] sm:$0xff] %vm3778_vm4, %v9453_v26  ;;  %v8401_v46 = vadd.f32 %v3483_v14, %v8195_v61  ;;  %v8409_v12 = vld [vmem:[#allocation2 + $0x68] sm:$0xff]  ;;  %v8418_v61 = vadd.f32 %v3345_v1, %v8223_v33  ;;  %v3377_v33 = vsel %vm3065_vm15, %v3370_v27, 0.0  ;;  %v8440_v1 = vld [vmem:[#allocation2 + $0x71] sm:$0xff]  ;;  %v3501_v27 = vmul.f32 %v8086_v19, %v7874_v40 }
 0x3b1   : > { %3784 = vst.msk [vmem:[#allocation2 + $0x4e] sm:$0xff] %vm3778_vm4, %v9453_v26  ;;  %9478 = vst [vmem:[#allocation146_spill] sm:$0xff] %v8409_v12  ;;  %v8423_v17 = vld [vmem:[#allocation2 + $0x6b] sm:$0xff]  ;;  %v3409_v19 = vsel %vm3065_vm15, %v3402_v8, 0.0  ;;  %v8484_v8 = vadd.f32 %v3476_v47, %v8284_v18  ;;  %v3707_v47 = vmul.f32 %v8199_v32, %v7888_v48 }
 0x3b2   : > { %3832 = vst.msk [vmem:[#allocation2 + $0x46] sm:$0xff] %vm3827_vm5, %v3812_v51  ;;  %v8425_v14 = vld [vmem:[#allocation2 + $0x66] sm:$0xff]  ;;  %v8427_v12 = vld [vmem:[#allocation2 + $0x6e] sm:$0xff]  ;;  %3833 = vst.msk [vmem:[#allocation2 + $0x4e] sm:$0xff] %vm3827_vm5, %v3814_v7  ;;  %v3816_v51 = vpop.permute.xlu0 %3815  ;;  %v8445_v7 = vadd.f32 %v3377_v33, %v8255_v55  ;;  %v3576_v33 = vmul.f32 %v8146_v2, %v7888_v48  ;;  %v8481_v35 = vadd.f32 %v3409_v19, %v8273_v11  ;;  %v3508_v13 = vsel %vm3065_vm15, %v3501_v27, 0.0 }
 0x3b3   : > { %9479 = vst [vmem:[#allocation147_spill] sm:$0xff] %v8425_v14  ;;  %9480 = vst [vmem:[#allocation148_spill] sm:$0xff] %v8427_v12  ;;  %v8438_v49 = vld [vmem:[#allocation2 + $0x69] sm:$0xff]  ;;  %v3818_v12 = vpop.permute.xlu1 %3817  ;;  %v8462_v55 = vld [vmem:[#allocation2 + $0x20] sm:$0xff]  ;;  %v3582_v2 = vsel %vm3065_vm15, %v3575_v59, 0.0  ;;  %v3607_v27 = vmul.f32 %v8173_v54, %v7874_v40  ;;  %v3706_v19 = vmul.f32 %v8189_v58, %v7874_v40 }
 0x3b4   : > { %9481 = vst [vmem:[#allocation149_spill] sm:$0xff] %v8440_v1  ;;  %v8442_v14 = vld [vmem:[#allocation2 + $0x6c] sm:$0xff]  ;;  %v8460_v1 = vld [vmem:[#allocation2 + $0x34] sm:$0xff]  ;;  %9486 = vst [vmem:[#allocation154_spill] sm:$0xff] %v8462_v55  ;;  %v8499_v11 = vadd.f32 %v3582_v2, %v8304_v39  ;;  %v3589_v18 = vsel %vm3065_vm15, %v3576_v33, 0.0  ;;  %v3639_v39 = vmul.f32 %v8185_v50, %v7874_v40 }
 0x3b5   : > { %9482 = vst [vmem:[#allocation150_spill] sm:$0xff] %v8442_v14  ;;  %3785 = vst.msk [vmem:[#allocation2 + $0x66] sm:$0xff] %vm3778_vm4, %v9453_v26  ;;  %v8456_v38 = vld [vmem:[#allocation2 + $0x2e] sm:$0xff]  ;;  %v8488_v5 = vld [vmem:[#allocation2 + $0x26] sm:$0xff]  ;;  %v8509_v59 = vadd.f32 %v3589_v18, %v8307_v52  ;;  %v3614_v54 = vsel %vm3065_vm15, %v3607_v27, 0.0  ;;  %v3738_v52 = vmul.f32 %v8201_v37, %v7874_v40 }
 0x3b6   : > { %9483 = vst [vmem:[#allocation151_spill] sm:$0xff] %v8456_v38  ;;  %v8458_v14 = vld [vmem:[#allocation2 + $0x31] sm:$0xff]  ;;  %9485 = vst [vmem:[#allocation153_spill] sm:$0xff] %v8460_v1  ;;  %v8473_v38 = vld [vmem:[#allocation2 + $0x28] sm:$0xff]  ;;  %v3646_v58 = vsel %vm3065_vm15, %v3639_v39, 0.0 }
 0x3b7   : > { %9484 = vst [vmem:[#allocation152_spill] sm:$0xff] %v8458_v14  ;;  %3786 = vst.msk [vmem:[#allocation2 + $0x6e] sm:$0xff] %vm3778_vm4, %v9453_v26  ;;  %v8475_v14 = vld [vmem:[#allocation2 + $0x23] sm:$0xff]  ;;  %v8477_v1 = vld [vmem:[#allocation2 + $0x2b] sm:$0xff] }
 0x3b8   : > { %9487 = vst [vmem:[#allocation155_spill] sm:$0xff] %v8473_v38  ;;  %3834 = vst.msk [vmem:[#allocation2 + $0x66] sm:$0xff] %vm3827_vm5, %v3816_v51  ;;  %v8490_v55 = vld [vmem:[#allocation2 + $0x29] sm:$0xff]  ;;  %v8496_v51 = vadd.f32 %v3508_v13, %v8287_v44  ;;  %v3608_v44 = vmul.f32 %v8175_v22, %v7888_v48 }
 0x3b9   : > { %v8492_v38 = vld [vmem:[#allocation2 + $0x2c] sm:$0xff]  ;;  %3835 = vst.msk [vmem:[#allocation2 + $0x6e] sm:$0xff] %vm3827_vm5, %v3818_v12  ;;  %v3640_v12 = vmul.f32 %v8187_v63, %v7888_v48  ;;  %v8526_v22 = vld [vmem:[#allocation2 + $0x40] sm:$0xff]  ;;  %v8533_v63 = vadd.f32 %v3614_v54, %v8320_v29  ;;  %v8540_v40 = vld [vmem:[#allocation2 + $0x54] sm:$0xff] }
 0x3ba   : > { %4060 = vst.msk [vmem:[#allocation2 + $0x26] sm:$0xff] %vm4057_vm1, %v9453_v26  ;;  %4061 = vst.msk [vmem:[#allocation2 + $0x2e] sm:$0xff] %vm4057_vm1, %v9453_v26  ;;  %v8524_v33 = vld [vmem:[#allocation2 + $0x4e] sm:$0xff]  ;;  %v8528_v13 = vld [vmem:[#allocation2 + $0x43] sm:$0xff]  ;;  %v3621_v2 = vsel %vm3065_vm15, %v3608_v44, 0.0  ;;  %v3713_v44 = vsel %vm3065_vm15, %v3706_v19, 0.0 }
 0x3bb   : > { %9488 = vst [vmem:[#allocation156_spill] sm:$0xff] %v8528_v13  ;;  %v8530_v50 = vld [vmem:[#allocation2 + $0x46] sm:$0xff]  ;;  %v3653_v32 = vsel %vm3065_vm15, %v3640_v12, 0.0  ;;  %v8538_v18 = vld [vmem:[#allocation2 + $0x51] sm:$0xff]  ;;  %v8545_v27 = vadd.f32 %v3621_v2, %v8323_v4  ;;  %v8561_v13 = vadd.f32 %v3713_v44, %v8356_v62  ;;  %v3720_v4 = vsel %vm3065_vm15, %v3707_v47, 0.0 }
 0x3bc   : > { %9489 = vst [vmem:[#allocation157_spill] sm:$0xff] %v8530_v50  ;;  %v8542_v37 = vld [vmem:[#allocation2 + $0x48] sm:$0xff]  ;;  %v8548_v50 = vadd.f32 %v3646_v58, %v8336_v6  ;;  %v8551_v29 = vadd.f32 %v3653_v32, %v8339_v20  ;;  %v3739_v6 = vmul.f32 %v8203_v25, %v7888_v48  ;;  %v3745_v2 = vsel %vm3065_vm15, %v3738_v52, 0.0  ;;  %v9496_v32 = vld [vmem:[#allocation114_spill] sm:$0xff]  ;;  %v9497_v44 = vld [vmem:[#allocation117_spill] sm:$0xff] }
 0x3bd   : > { %v8554_v39 = vld [vmem:[#allocation2 + $0x4b] sm:$0xff]  ;;  %v8572_v20 = vadd.f32 %v3720_v4, %v8359_v41  ;;  %v8575_v19 = vadd.f32 %v3745_v2, %v8372_v31  ;;  %v3405_v62 = vmul.f32 %v8148_v42, %v7915_v9  ;;  %v3472_v48 = vmul.f32 %v8150_v3, %v7915_v9  ;;  %v9498_v42 = vld [vmem:[#allocation118_spill] sm:$0xff] }
 0x3be   : > { %v8556_v12 = vld [vmem:[#allocation2 + $0x49] sm:$0xff]  ;;  %v3752_v41 = vsel %vm3065_vm15, %v3739_v6, 0.0  ;;  %v3504_v31 = vmul.f32 %v8152_v56, %v7915_v9  ;;  %v3340_v4 = vmul.f32 %v9497_v44, %v9496_v32  ;;  %v3341_v2 = vmul.f32 %v9498_v42, %v7915_v9 }
 0x3bf   : > { %9490 = vst [vmem:[#allocation158_spill] sm:$0xff] %v8556_v12  ;;  %v8558_v54 = vld [vmem:[#allocation2 + $0x4c] sm:$0xff]  ;;  %v8583_v47 = vld [vmem:[#allocation2 + $0x60] sm:$0xff]  ;;  %v3418_v6 = vsel %vm3065_vm15, %v3405_v62, 0.0 }
 0x3c0   : > { %9491 = vst [vmem:[#allocation159_spill] sm:$0xff] %v8558_v54  ;;  %4062 = vst.msk [vmem:[#allocation2 + $0x46] sm:$0xff] %vm4057_vm1, %v9453_v26  ;;  %v8581_v25 = vld [vmem:[#allocation2 + $0x6e] sm:$0xff]  ;;  %v8585_v52 = vld [vmem:[#allocation2 + $0x63] sm:$0xff] }
 0x3c1   : > { %4063 = vst.msk [vmem:[#allocation2 + $0x4e] sm:$0xff] %vm4057_vm1, %v9453_v26  ;;  %9492 = vst [vmem:[#allocation160_spill] sm:$0xff] %v8581_v25  ;;  %v8587_v58 = vld [vmem:[#allocation2 + $0x66] sm:$0xff]  ;;  %v8596_v3 = vld [vmem:[#allocation2 + $0x71] sm:$0xff] }
 0x3c2   : > { %9493 = vst [vmem:[#allocation161_spill] sm:$0xff] %v8583_v47  ;;  %9494 = vst [vmem:[#allocation162_spill] sm:$0xff] %v8585_v52  ;;  %v8598_v25 = vld [vmem:[#allocation2 + $0x74] sm:$0xff]  ;;  %v8600_v47 = vld [vmem:[#allocation2 + $0x68] sm:$0xff]  ;;  %v8603_v52 = vadd.f32 %v3752_v41, %v8375_v34  ;;  %v3517_v34 = vsel %vm3065_vm15, %v3504_v31, 0.0  ;;  %v3347_v41 = vsel %vm3065_vm15, %v3340_v4, 0.0 }
 0x3c3   : > { %9495 = vst [vmem:[#allocation163_spill] sm:$0xff] %v8587_v58  ;;  %9499 = vst [vmem:[#allocation114_spill] sm:$0xff] %v8598_v25  ;;  %v3485_v58 = vsel %vm3065_vm15, %v3472_v48, 0.0  ;;  %v9501_v56 = vld [vmem:[#allocation119_spill] sm:$0xff]  ;;  %v3419_v25 = vadd.f32 %v3418_v6, %v8398_v23  ;;  %v3518_v62 = vadd.f32 %v3517_v34, %v8415_v53  ;;  %v3348_v48 = vadd.f32 %v3347_v41, %v8418_v61  ;;  %v9503_v23 = vld [vmem:[#allocation120_spill] sm:$0xff] }
 0x3c4   : > { %9500 = vst [vmem:[#allocation117_spill] sm:$0xff] %v8600_v47  ;;  %v3372_v54 = vmul.f32 %v9501_v56, %v9496_v32  ;;  %v8609_v44 = vld [vmem:[#allocation2 + $0x6b] sm:$0xff]  ;;  %v3486_v47 = vadd.f32 %v3485_v58, %v8401_v46  ;;  %v3354_v56 = vsel %vm3065_vm15, %v3341_v2, 0.0  ;;  %v3373_v6 = vmul.f32 %v9503_v23, %v7915_v9  ;;  %v9504_v31 = vld [vmem:[#allocation121_spill] sm:$0xff] }
 0x3c5   : > { %v8611_v12 = vld [vmem:[#allocation2 + $0x69] sm:$0xff]  ;;  %v8629_v46 = vadd.f32 %v3354_v56, %v8431_v10  ;;  %v3404_v4 = vmul.f32 %v9504_v31, %v9496_v32  ;;  %v3577_v10 = vmul.f32 %v8345_v15, %v9496_v32 }
 0x3c6   : > { %v8613_v42 = vld [vmem:[#allocation2 + $0x6c] sm:$0xff]  ;;  %v3379_v58 = vsel %vm3065_vm15, %v3372_v54, 0.0  ;;  %v3386_v61 = vsel %vm3065_vm15, %v3373_v6, 0.0 }
 0x3c7   : > { %9502 = vst [vmem:[#allocation118_spill] sm:$0xff] %v8613_v42  ;;  %4064 = vst.msk [vmem:[#allocation2 + $0x66] sm:$0xff] %vm4057_vm1, %v9453_v26  ;;  %v9505_v42 = vld [vmem:[#allocation122_spill] sm:$0xff]  ;;  %v8637_v53 = vadd.f32 %v3379_v58, %v8445_v7  ;;  %v9506_v2 = vld [vmem:[#allocation123_spill] sm:$0xff]  ;;  %v8645_v41 = vadd.f32 %v3386_v61, %v8465_v45  ;;  %v3411_v54 = vsel %vm3065_vm15, %v3404_v4, 0.0  ;;  %v3584_v15 = vsel %vm3065_vm15, %v3577_v10, 0.0 }
 0x3c8   : > { %4065 = vst.msk [vmem:[#allocation2 + $0x6e] sm:$0xff] %vm4057_vm1, %v9453_v26  ;;  %v3471_v26 = vmul.f32 %v9505_v42, %v9496_v32  ;;  %v3503_v34 = vmul.f32 %v9506_v2, %v9496_v32  ;;  %v3578_v42 = vmul.f32 %v8347_v30, %v7915_v9  ;;  %v8652_v7 = vadd.f32 %v3411_v54, %v8481_v35  ;;  %v9508_v54 = vld [vmem:[#allocation145_spill] sm:$0xff] }
 0x3c9   : > { %v8663_v58 = vadd.f32 %v3584_v15, %v8499_v11  ;;  %v3609_v30 = vmul.f32 %v8349_v43, %v9496_v32  ;;  %v3641_v4 = vmul.f32 %v8367_v24, %v9496_v32  ;;  %v3709_v43 = vmul.f32 %v8383_v21, %v7915_v9 }
 0x3ca   : > { %v3478_v56 = vsel %vm3065_vm15, %v3471_v26, 0.0  ;;  %v3510_v6 = vsel %vm3065_vm15, %v3503_v34, 0.0  ;;  %v3591_v31 = vsel %vm3065_vm15, %v3578_v42, 0.0  ;;  %v3708_v26 = vmul.f32 %v8381_v36, %v9496_v32 }
 0x3cb   : > { %v8655_v23 = vadd.f32 %v3478_v56, %v8484_v8  ;;  %v8660_v45 = vadd.f32 %v3510_v6, %v8496_v51  ;;  %v8669_v35 = vadd.f32 %v3591_v31, %v8509_v59  ;;  %v3610_v8 = vmul.f32 %v8365_v16, %v7915_v9  ;;  %v9507_v59 = vld [vmem:[#allocation144_spill] sm:$0xff]  ;;  %v9511_v31 = vld [vmem:[#allocation125_spill] sm:$0xff] }
 0x3cc   : > { %v3642_v51 = vmul.f32 %v8369_v0, %v7915_v9  ;;  %v3616_v11 = vsel %vm3065_vm15, %v3609_v30, 0.0  ;;  %v3740_v61 = vmul.f32 %v9507_v59, %v9496_v32  ;;  %v3648_v24 = vsel %vm3065_vm15, %v3641_v4, 0.0  ;;  %v9510_v6 = vld [vmem:[#allocation124_spill] sm:$0xff] }
 0x3cd   : > { %v8685_v2 = vadd.f32 %v3616_v11, %v8533_v63  ;;  %v3623_v16 = vsel %vm3065_vm15, %v3610_v8, 0.0  ;;  %v8694_v36 = vadd.f32 %v3648_v24, %v8548_v50  ;;  %v3715_v32 = vsel %vm3065_vm15, %v3708_v26, 0.0  ;;  %v9512_v8 = vld [vmem:[#allocation126_spill] sm:$0xff] }
 0x3ce   : > { %v3655_v0 = vsel %vm3065_vm15, %v3642_v51, 0.0  ;;  %v8691_v34 = vadd.f32 %v3623_v16, %v8545_v27  ;;  %v8701_v63 = vadd.f32 %v3715_v32, %v8561_v13  ;;  %v3722_v10 = vsel %vm3065_vm15, %v3709_v43, 0.0  ;;  %v9514_v51 = vld [vmem:[#allocation127_spill] sm:$0xff] }
 0x3cf   : > { %v8697_v21 = vadd.f32 %v3655_v0, %v8551_v29  ;;  %v3741_v56 = vmul.f32 %v9508_v54, %v7915_v9  ;;  %v3747_v42 = vsel %vm3065_vm15, %v3740_v61, 0.0  ;;  %v8708_v27 = vadd.f32 %v3722_v10, %v8572_v20  ;;  %v9509_v29 = vld [vmem:[#allocation115_spill] sm:$0xff]  ;;  %v9513_v9 = vld [vmem:[#allocation116_spill] sm:$0xff]  ;;  %v9516_v61 = vld [vmem:[#allocation129_spill] sm:$0xff] }
 0x3d0   : > { %v8711_v50 = vadd.f32 %v3747_v42, %v8575_v19  ;;  %v3407_v15 = vmul.f32 %v9510_v6, %v9509_v29  ;;  %v3474_v13 = vmul.f32 %v9511_v31, %v9509_v29  ;;  %v3506_v4 = vmul.f32 %v9512_v8, %v9509_v29  ;;  %v9515_v20 = vld [vmem:[#allocation128_spill] sm:$0xff]  ;;  %v9517_v42 = vld [vmem:[#allocation130_spill] sm:$0xff] }
 0x3d1   : > { %v3754_v30 = vsel %vm3065_vm15, %v3741_v56, 0.0  ;;  %v3342_v11 = vmul.f32 %v9514_v51, %v9513_v9  ;;  %v3343_v26 = vmul.f32 %v9515_v20, %v9509_v29  ;;  %v3374_v16 = vmul.f32 %v9516_v61, %v9513_v9 }
 0x3d2   : > { %v8725_v19 = vadd.f32 %v3754_v30, %v8603_v52  ;;  %v3420_v43 = vsel %vm3065_vm15, %v3407_v15, 0.0  ;;  %v3487_v59 = vsel %vm3065_vm15, %v3474_v13, 0.0  ;;  %v3519_v32 = vsel %vm3065_vm15, %v3506_v4, 0.0 }
 0x3d3   : > { %v3421_v24 = vadd.f32 %v3420_v43, %v3419_v25  ;;  %v3488_v0 = vadd.f32 %v3487_v59, %v3486_v47  ;;  %v3349_v10 = vsel %vm3065_vm15, %v3342_v11, 0.0  ;;  %v3520_v54 = vadd.f32 %v3519_v32, %v3518_v62  ;;  %v9518_v11 = vld [vmem:[#allocation131_spill] sm:$0xff] }
 0x3d4   : > { %v3350_v56 = vadd.f32 %v3349_v10, %v3348_v48  ;;  %v3356_v52 = vsel %vm3065_vm15, %v3343_v26, 0.0  ;;  %v3375_v6 = vmul.f32 %v9517_v42, %v9509_v29  ;;  %v3381_v13 = vsel %vm3065_vm15, %v3374_v16, 0.0 }
 0x3d5   : > { %vm3443_vm0 = vcmp.ge.f32.partialorder %v3421_v24, 0.0  ;;  %v3445_v15 = vmul.f32 0.1, %v3421_v24  ;;  %vm3524_vm2 = vcmp.ge.f32.partialorder %v3488_v0, 0.0  ;;  %v3526_v31 = vmul.f32 0.1, %v3488_v0 }
 0x3d6   : > { %vm3533_vm4 = vcmp.ge.f32.partialorder %v3520_v54, 0.0  ;;  %v3535_v25 = vmul.f32 0.1, %v3520_v54  ;;  %v3357_v47 = vadd.f32 %v3356_v52, %v8629_v46  ;;  %v3382_v48 = vadd.f32 %v3381_v13, %v8637_v53 }
 0x3d7   : > { %v3447_v62 = vsel %vm3443_vm0, %v3421_v24, %v3445_v15  ;;  %v3528_v30 = vsel %vm3524_vm2, %v3488_v0, %v3526_v31  ;;  %v3388_v8 = vsel %vm3065_vm15, %v3375_v6, 0.0  ;;  %v3406_v20 = vmul.f32 %v9518_v11, %v9513_v9  ;;  %v9519_v24 = vld [vmem:[#allocation132_spill] sm:$0xff]  ;;  %v9521_v6 = vld [vmem:[#allocation146_spill] sm:$0xff] }
 0x3d8   : > { %4593 = vst.msk [vmem:[%s5148_s5 + $0xb8] sm:$0xff] %vm3065_vm15, %v3447_v62  ;;  %4595 = vst.msk [vmem:[%s5148_s5 + $0x108] sm:$0xff] %vm3065_vm15, %v3528_v30  ;;  %v3537_v4 = vsel %vm3533_vm4, %v3520_v54, %v3535_v25  ;;  %v3389_v51 = vadd.f32 %v3388_v8, %v8645_v41  ;;  %vm3424_vm5 = vcmp.ge.f32.partialorder %v3350_v56, 0.0  ;;  %vm3425_vm6 = vcmp.ge.f32.partialorder %v3357_v47, 0.0  ;;  %v9520_v54 = vld [vmem:[#allocation133_spill] sm:$0xff] }
 0x3d9   : > { %4597 = vst.msk [vmem:[%s5148_s5 + $0x158] sm:$0xff] %vm3065_vm15, %v3537_v4  ;;  %v3426_v46 = vmul.f32 0.1, %v3350_v56  ;;  %v3427_v53 = vmul.f32 0.1, %v3357_v47  ;;  %vm3433_vm7 = vcmp.ge.f32.partialorder %v3382_v48, 0.0  ;;  %v3473_v0 = vmul.f32 %v9519_v24, %v9513_v9 }
 0x3da   : > { %v3413_v26 = vsel %vm3065_vm15, %v3406_v20, 0.0  ;;  %vm3434_vm8 = vcmp.ge.f32.partialorder %v3389_v51, 0.0  ;;  %v3435_v43 = vmul.f32 0.1, %v3382_v48  ;;  %v3436_v59 = vmul.f32 0.1, %v3389_v51 }
 0x3db   : > { %v3414_v41 = vadd.f32 %v3413_v26, %v8652_v7  ;;  %v3428_v61 = vsel %vm3424_vm5, %v3350_v56, %v3426_v46  ;;  %v3429_v16 = vsel %vm3425_vm6, %v3357_v47, %v3427_v53  ;;  %v3505_v52 = vmul.f32 %v9520_v54, %v9513_v9  ;;  %v9523_v53 = vld [vmem:[#allocation148_spill] sm:$0xff] }
 0x3dc   : > { %4588 = vst.msk [vmem:[%s5148_s5 + $0x10] sm:$0xff] %vm3065_vm15, %v3428_v61  ;;  %4589 = vst.msk [vmem:[%s5148_s5 + $0x18] sm:$0xff] %vm3065_vm15, %v3429_v16  ;;  %v3437_v32 = vsel %vm3433_vm7, %v3382_v48, %v3435_v43  ;;  %v3438_v10 = vsel %vm3434_vm8, %v3389_v51, %v3436_v59  ;;  %v3579_v42 = vmul.f32 %v8407_v60, %v9513_v9  ;;  %v3480_v56 = vsel %vm3065_vm15, %v3473_v0, 0.0  ;;  %v4765_v54 = vld [vmem:[%s5133_s23 + $0x30] sm:$0xff] }
 0x3dd   : > { %4590 = vst.msk [vmem:[%s5148_s5 + $0x60] sm:$0xff] %vm3065_vm15, %v3437_v32  ;;  %4591 = vst.msk [vmem:[%s5148_s5 + $0x68] sm:$0xff] %vm3065_vm15, %v3438_v10  ;;  %vm3442_vm9 = vcmp.ge.f32.partialorder %v3414_v41, 0.0  ;;  %v3444_v7 = vmul.f32 0.1, %v3414_v41  ;;  %v3580_v15 = vmul.f32 %v9521_v6, %v9509_v29  ;;  %v3481_v31 = vadd.f32 %v3480_v56, %v8655_v23 }
 0x3de   : > { %v3512_v25 = vsel %vm3065_vm15, %v3505_v52, 0.0  ;;  %v3586_v47 = vsel %vm3065_vm15, %v3579_v42, 0.0  ;;  %v3611_v60 = vmul.f32 %v8411_v57, %v9513_v9  ;;  %v3612_v4 = vmul.f32 %v8423_v17, %v9509_v29  ;;  %v4766_v42 = vld [vmem:[%s5133_s23 + $0x38] sm:$0xff] }
 0x3df   : > { %v3446_v13 = vsel %vm3442_vm9, %v3414_v41, %v3444_v7  ;;  %v3513_v62 = vadd.f32 %v3512_v25, %v8660_v45  ;;  %v3587_v30 = vadd.f32 %v3586_v47, %v8663_v58  ;;  %v3593_v48 = vsel %vm3065_vm15, %v3580_v15, 0.0  ;;  %v9522_v45 = vld [vmem:[#allocation147_spill] sm:$0xff]  ;;  %v9524_v7 = vld [vmem:[#allocation149_spill] sm:$0xff] }
 0x3e0   : > { %4592 = vst.msk [vmem:[%s5148_s5 + $0xb0] sm:$0xff] %vm3065_vm15, %v3446_v13  ;;  %vm3523_vm10 = vcmp.ge.f32.partialorder %v3481_v31, 0.0  ;;  %v3525_v8 = vmul.f32 0.1, %v3481_v31  ;;  %v3594_v23 = vadd.f32 %v3593_v48, %v8669_v35  ;;  %v3618_v51 = vsel %vm3065_vm15, %v3611_v60, 0.0  ;;  %v9526_v13 = vld [vmem:[#allocation134_spill] sm:$0xff] }
 0x3e1   : > { %vm3532_vm11 = vcmp.ge.f32.partialorder %v3513_v62, 0.0  ;;  %v3534_v57 = vmul.f32 0.1, %v3513_v62  ;;  %v3643_v11 = vmul.f32 %v9522_v45, %v9513_v9  ;;  %v3619_v20 = vadd.f32 %v3618_v51, %v8685_v2  ;;  %v9527_v51 = vld [vmem:[#allocation135_spill] sm:$0xff] }
 0x3e2   : > { %v3527_v58 = vsel %vm3523_vm10, %v3481_v31, %v3525_v8  ;;  %v3625_v46 = vsel %vm3065_vm15, %v3612_v4, 0.0  ;;  %v3644_v26 = vmul.f32 %v9523_v53, %v9509_v29  ;;  %vm3661_vm12 = vcmp.ge.f32.partialorder %v3587_v30, 0.0  ;;  %v9525_v31 = vld [vmem:[#allocation150_spill] sm:$0xff] }
 0x3e3   : > { %4594 = vst.msk [vmem:[%s5148_s5 + $0x100] sm:$0xff] %vm3065_vm15, %v3527_v58  ;;  %v3536_v35 = vsel %vm3532_vm11, %v3513_v62, %v3534_v57  ;;  %v3626_v17 = vadd.f32 %v3625_v46, %v8691_v34  ;;  %v3650_v43 = vsel %vm3065_vm15, %v3643_v11, 0.0  ;;  %vm3662_vm13 = vcmp.ge.f32.partialorder %v3594_v23, 0.0  ;;  %v8833_v11 = vld [vmem:[%s5133_s23] sm:$0xff]  ;;  %v9528_v46 = vld [vmem:[#allocation136_spill] sm:$0xff] }
 0x3e4   : > { %4596 = vst.msk [vmem:[%s5148_s5 + $0x150] sm:$0xff] %vm3065_vm15, %v3536_v35  ;;  %v3651_v9 = vadd.f32 %v3650_v43, %v8694_v36  ;;  %v3657_v2 = vsel %vm3065_vm15, %v3644_v26, 0.0  ;;  %v3663_v59 = vmul.f32 0.1, %v3587_v30  ;;  %v3664_v41 = vmul.f32 0.1, %v3594_v23 }
 0x3e5   : > { %v3658_v29 = vadd.f32 %v3657_v2, %v8697_v21  ;;  %vm3670_vm1 = vcmp.ge.f32.partialorder %v3619_v20, 0.0  ;;  %vm3671_vm14 = vcmp.ge.f32.partialorder %v3626_v17, 0.0  ;;  %v3672_v61 = vmul.f32 0.1, %v3619_v20  ;;  %v8800_v21 = vld [vmem:[%s5133_s23 + $0x8] sm:$0xff]  ;;  %v9529_v26 = vld [vmem:[#allocation137_spill] sm:$0xff] }
 0x3e6   : > { %v3665_v34 = vsel %vm3661_vm12, %v3587_v30, %v3663_v59  ;;  %v3673_v16 = vmul.f32 0.1, %v3626_v17  ;;  %vm3679_vm3 = vcmp.ge.f32.partialorder %v3651_v9, 0.0  ;;  %v3666_v36 = vsel %vm3662_vm13, %v3594_v23, %v3664_v41  ;;  %v9531_v59 = vld [vmem:[#allocation139_spill] sm:$0xff]  ;;  %v8848_v41 = vld [vmem:[%s5133_s23 + $0x18] sm:$0xff] }
 0x3e7   : > { %4598 = vst.msk [vmem:[%s5148_s5 + $0x20] sm:$0xff] %vm3065_vm15, %v3665_v34  ;;  %vm3680_vm0 = vcmp.ge.f32.partialorder %v3658_v29, 0.0  ;;  %v3681_v24 = vmul.f32 0.1, %v3651_v9  ;;  %v3682_v0 = vmul.f32 0.1, %v3658_v29  ;;  %v3674_v32 = vsel %vm3670_vm1, %v3619_v20, %v3672_v61 }
 0x3e8   : > { %4599 = vst.msk [vmem:[%s5148_s5 + $0x28] sm:$0xff] %vm3065_vm15, %v3666_v36  ;;  %v3675_v10 = vsel %vm3671_vm14, %v3626_v17, %v3673_v16  ;;  %v3710_v52 = vmul.f32 %v4765_v54, %v8438_v49  ;;  %v3711_v56 = vmul.f32 %v4766_v42, %v9524_v7  ;;  %4600 = vst.msk [vmem:[%s5148_s5 + $0x70] sm:$0xff] %vm3065_vm15, %v3674_v32  ;;  %v9532_v16 = vld [vmem:[#allocation140_spill] sm:$0xff]  ;;  %v9535_v7 = vld [vmem:[#allocation143_spill] sm:$0xff]  ;;  %vm4106_vm1 = vcmask 80896  }
 0x3e9   : > { %4601 = vst.msk [vmem:[%s5148_s5 + $0x78] sm:$0xff] %vm3065_vm15, %v3675_v10  ;;  %v3683_v6 = vsel %vm3679_vm3, %v3651_v9, %v3681_v24  ;;  %v3684_v15 = vsel %vm3680_vm0, %v3658_v29, %v3682_v0  ;;  %v3742_v25 = vmul.f32 %v4765_v54, %v9525_v31  ;;  %v3743_v47 = vmul.f32 %v4766_v42, %v8452_v28  ;;  %v9530_v9 = vld [vmem:[#allocation138_spill] sm:$0xff]  ;;  %v9533_v24 = vld [vmem:[#allocation141_spill] sm:$0xff]  ;;  %v8861_v32 = vld [vmem:[%s5133_s23 + $0x10] sm:$0xff] }
 0x3ea   : > { %4602 = vst.msk [vmem:[%s5148_s5 + $0xc0] sm:$0xff] %vm3065_vm15, %v3683_v6  ;;  %4603 = vst.msk [vmem:[%s5148_s5 + $0xc8] sm:$0xff] %vm3065_vm15, %v3684_v15  ;;  %v3717_v49 = vsel %vm3065_vm15, %v3710_v52, 0.0  ;;  %v3724_v60 = vsel %vm3065_vm15, %v3711_v56, 0.0  ;;  %v3917_v62 = vmul.f32 %v9526_v13, %v8800_v21  ;;  %v3984_v45 = vmul.f32 %v9527_v51, %v8800_v21  ;;  %v9534_v52 = vld [vmem:[#allocation142_spill] sm:$0xff]  ;;  %v9536_v31 = vld [vmem:[#allocation151_spill] sm:$0xff] }
 0x3eb   : > { %v3718_v30 = vadd.f32 %v3717_v49, %v8701_v63  ;;  %v3725_v48 = vadd.f32 %v3724_v60, %v8708_v27  ;;  %v3749_v8 = vsel %vm3065_vm15, %v3742_v25, 0.0  ;;  %v3756_v23 = vsel %vm3065_vm15, %v3743_v47, 0.0  ;;  %v9537_v47 = vld [vmem:[#allocation152_spill] sm:$0xff] }
 0x3ec   : > { %v3750_v28 = vadd.f32 %v3749_v8, %v8711_v50  ;;  %v3757_v4 = vadd.f32 %v3756_v23, %v8725_v19  ;;  %v3931_v57 = vsel %vm3065_vm15, %v3917_v62, 0.0  ;;  %v4016_v53 = vmul.f32 %v9528_v46, %v8800_v21  ;;  %v9538_v62 = vld [vmem:[#allocation153_spill] sm:$0xff] }
 0x3ed   : > { %vm3760_vm2 = vcmp.ge.f32.partialorder %v3718_v30, 0.0  ;;  %vm3761_vm4 = vcmp.ge.f32.partialorder %v3725_v48, 0.0  ;;  %v3762_v63 = vmul.f32 0.1, %v3718_v30  ;;  %v3763_v27 = vmul.f32 0.1, %v3725_v48 }
 0x3ee   : > { %vm3769_vm5 = vcmp.ge.f32.partialorder %v3750_v28, 0.0  ;;  %vm3770_vm6 = vcmp.ge.f32.partialorder %v3757_v4, 0.0  ;;  %v3771_v50 = vmul.f32 0.1, %v3750_v28  ;;  %v3772_v19 = vmul.f32 0.1, %v3757_v4 }
 0x3ef   : > { %v3764_v58 = vsel %vm3760_vm2, %v3718_v30, %v3762_v63  ;;  %v3765_v20 = vsel %vm3761_vm4, %v3725_v48, %v3763_v27  ;;  %v3852_v35 = vmul.f32 %v9529_v26, %v8833_v11  ;;  %v3853_v2 = vmul.f32 %v9530_v9, %v8800_v21  ;;  %v9539_v48 = vld [vmem:[#allocation154_spill] sm:$0xff] }
 0x3f0   : > { %4604 = vst.msk [vmem:[%s5148_s5 + $0x110] sm:$0xff] %vm3065_vm15, %v3764_v58  ;;  %4605 = vst.msk [vmem:[%s5148_s5 + $0x118] sm:$0xff] %vm3065_vm15, %v3765_v20  ;;  %v3773_v17 = vsel %vm3769_vm5, %v3750_v28, %v3771_v50  ;;  %v3774_v43 = vsel %vm3770_vm6, %v3757_v4, %v3772_v19  ;;  %v3884_v29 = vmul.f32 %v9531_v59, %v8833_v11  ;;  %v3998_v34 = vsel %vm3065_vm15, %v3984_v45, 0.0  ;;  %v9540_v4 = vld [vmem:[#allocation155_spill] sm:$0xff] }
 0x3f1   : > { %4606 = vst.msk [vmem:[%s5148_s5 + $0x160] sm:$0xff] %vm3065_vm15, %v3773_v17  ;;  %4607 = vst.msk [vmem:[%s5148_s5 + $0x168] sm:$0xff] %vm3065_vm15, %v3774_v43  ;;  %v4030_v61 = vsel %vm3065_vm15, %v4016_v53, 0.0  ;;  %v3885_v36 = vmul.f32 %v9532_v16, %v8800_v21  ;;  %v3916_v0 = vmul.f32 %v9533_v24, %v8833_v11  ;;  %v3860_v10 = vsel %vm3065_vm15, %v3852_v35, 0.0  ;;  %v8891_v58 = vld [vmem:[%s5133_s23 + $0x28] sm:$0xff]  ;;  %v8915_v16 = vpop.permute.xlu0 %4082 }
 0x3f2   : > { %v3867_v54 = vsel %vm3065_vm15, %v3853_v2, 0.0  ;;  %v3983_v42 = vmul.f32 %v9534_v52, %v8833_v11  ;;  %v4015_v56 = vmul.f32 %v9535_v7, %v8833_v11  ;;  %v3892_v6 = vsel %vm3065_vm15, %v3884_v29, 0.0  ;;  %4107 = vst.msk [vmem:[#allocation2 + $0x6] sm:$0xff] %vm4106_vm1, %v8915_v16 }
 0x3f3   : > { %v3899_v15 = vsel %vm3065_vm15, %v3885_v36, 0.0  ;;  %v3919_v25 = vmul.f32 %v9536_v31, %v8848_v41  ;;  %v3986_v49 = vmul.f32 %v9537_v47, %v8848_v41  ;;  %v3924_v60 = vsel %vm3065_vm15, %v3916_v0, 0.0  ;;  %v9543_v47 = vld [vmem:[#allocation158_spill] sm:$0xff] }
 0x3f4   : > { %v3991_v13 = vsel %vm3065_vm15, %v3983_v42, 0.0  ;;  %v4018_v30 = vmul.f32 %v9538_v62, %v8848_v41  ;;  %v3854_v8 = vmul.f32 %v9539_v48, %v8861_v32  ;;  %v3855_v51 = vmul.f32 %v9540_v4, %v8848_v41  ;;  %v8941_v62 = vld [vmem:[%s5133_s23 + $0x38] sm:$0xff] }
 0x3f5   : > { %v3932_v23 = vsel %vm3065_vm15, %v3919_v25, 0.0  ;;  %v3999_v28 = vsel %vm3065_vm15, %v3986_v49, 0.0  ;;  %v3886_v45 = vmul.f32 %v8475_v14, %v8861_v32  ;;  %v4023_v63 = vsel %vm3065_vm15, %v4015_v56, 0.0  ;;  %v9541_v56 = vld [vmem:[#allocation156_spill] sm:$0xff]  ;;  %v9542_v25 = vld [vmem:[#allocation157_spill] sm:$0xff]  ;;  %v8949_v4 = vpop.permute.xlu0 %4086 }
 0x3f6   : > { %v3933_v27 = vadd.f32 %v3932_v23, %v3931_v57  ;;  %v4031_v50 = vsel %vm3065_vm15, %v4018_v30, 0.0  ;;  %v3861_v19 = vsel %vm3065_vm15, %v3854_v8, 0.0  ;;  %v4000_v20 = vadd.f32 %v3999_v28, %v3998_v34  ;;  %v8945_v23 = vld [vmem:[%s5133_s23 + $0x30] sm:$0xff]  ;;  %4109 = vst.msk [vmem:[#allocation2 + $0x26] sm:$0xff] %vm4106_vm1, %v8949_v4 }
 0x3f7   : > { %v4032_v46 = vadd.f32 %v4031_v50, %v4030_v61  ;;  %v3868_v53 = vsel %vm3065_vm15, %v3855_v51, 0.0  ;;  %v3887_v26 = vmul.f32 %v8477_v1, %v8848_v41  ;;  %v3862_v35 = vadd.f32 %v3861_v19, %v3860_v10  ;;  %v8911_v61 = vld [vmem:[%s5133_s23 + $0x20] sm:$0xff] }
 0x3f8   : > { %v3893_v14 = vsel %vm3065_vm15, %v3886_v45, 0.0  ;;  %v3918_v57 = vmul.f32 %v8488_v5, %v8861_v32  ;;  %v3985_v17 = vmul.f32 %v8490_v55, %v8861_v32  ;;  %v3869_v43 = vadd.f32 %v3868_v53, %v3867_v54  ;;  %v8913_v55 = vpop.permute.xlu1 %4084 }
 0x3f9   : > { %v3900_v9 = vsel %vm3065_vm15, %v3887_v26, 0.0  ;;  %v4017_v2 = vmul.f32 %v8492_v38, %v8861_v32  ;;  %v3921_v59 = vmul.f32 %v8524_v33, %v8891_v58  ;;  %v3894_v29 = vadd.f32 %v3893_v14, %v3892_v6  ;;  %v9546_v14 = vld [vmem:[#allocation114_spill] sm:$0xff]  ;;  %4108 = vst.msk [vmem:[#allocation2 + $0xe] sm:$0xff] %vm4106_vm1, %v8913_v55 }
 0x3fa   : > { %v3925_v1 = vsel %vm3065_vm15, %v3918_v57, 0.0  ;;  %v3992_v34 = vsel %vm3065_vm15, %v3985_v17, 0.0  ;;  %v3988_v5 = vmul.f32 %v8538_v18, %v8891_v58  ;;  %v3901_v36 = vadd.f32 %v3900_v9, %v3899_v15  ;;  %v9547_v17 = vld [vmem:[#allocation161_spill] sm:$0xff] }
 0x3fb   : > { %v3926_v24 = vadd.f32 %v3925_v1, %v3924_v60  ;;  %v4024_v38 = vsel %vm3065_vm15, %v4017_v2, 0.0  ;;  %v3934_v33 = vsel %vm3065_vm15, %v3921_v59, 0.0  ;;  %v3993_v0 = vadd.f32 %v3992_v34, %v3991_v13  ;;  %v9548_v9 = vld [vmem:[#allocation117_spill] sm:$0xff]  ;;  %v9549_v34 = vld [vmem:[#allocation162_spill] sm:$0xff] }
 0x3fc   : > { %v3935_v10 = vadd.f32 %v3934_v33, %v3933_v27  ;;  %v4001_v54 = vsel %vm3065_vm15, %v3988_v5, 0.0  ;;  %v4020_v18 = vmul.f32 %v8540_v40, %v8891_v58  ;;  %v8922_v52 = vadd.f32 %v4024_v38, %v4023_v63  ;;  %v8947_v28 = vpop.permute.xlu1 %4088  ;;  %v9544_v27 = vld [vmem:[#allocation159_spill] sm:$0xff] }
 0x3fd   : > { %v3856_v42 = vmul.f32 %v8526_v22, %v8911_v61  ;;  %v3857_v7 = vmul.f32 %v8542_v37, %v8891_v58  ;;  %v3888_v6 = vmul.f32 %v9541_v56, %v8911_v61  ;;  %v3889_v31 = vmul.f32 %v8554_v39, %v8891_v58  ;;  %4110 = vst.msk [vmem:[#allocation2 + $0x2e] sm:$0xff] %vm4106_vm1, %v8947_v28 }
 0x3fe   : > { %v4033_v15 = vsel %vm3065_vm15, %v4020_v18, 0.0  ;;  %v3920_v40 = vmul.f32 %v9542_v25, %v8911_v61  ;;  %v3987_v49 = vmul.f32 %v9543_v47, %v8911_v61  ;;  %v4002_v60 = vadd.f32 %v4001_v54, %v4000_v20 }
 0x3ff   : > { %v3863_v22 = vsel %vm3065_vm15, %v3856_v42, 0.0  ;;  %v3870_v13 = vsel %vm3065_vm15, %v3857_v7, 0.0  ;;  %v3895_v37 = vsel %vm3065_vm15, %v3888_v6, 0.0  ;;  %v4034_v30 = vadd.f32 %v4033_v15, %v4032_v46  ;;  %v9545_v46 = vld [vmem:[#allocation160_spill] sm:$0xff]  ;;  %v4091_v7 = vpop.permute.xlu0 %4090 }
 0x400   : > { %v3864_v48 = vadd.f32 %v3863_v22, %v3862_v35  ;;  %v3871_v8 = vadd.f32 %v3870_v13, %v3869_v43  ;;  %v3902_v39 = vsel %vm3065_vm15, %v3889_v31, 0.0  ;;  %v3896_v51 = vadd.f32 %v3895_v37, %v3894_v29  ;;  %v4093_v42 = vpop.permute.xlu1 %4092  ;;  %v9550_v22 = vld [vmem:[#allocation163_spill] sm:$0xff]  ;;  %4111 = vst.msk [vmem:[#allocation2 + $0x46] sm:$0xff] %vm4106_vm1, %v4091_v7 }
 0x401   : > { %v3927_v45 = vsel %vm3065_vm15, %v3920_v40, 0.0  ;;  %v3994_v63 = vsel %vm3065_vm15, %v3987_v49, 0.0  ;;  %v4019_v50 = vmul.f32 %v9544_v27, %v8911_v61  ;;  %v3903_v19 = vadd.f32 %v3902_v39, %v3901_v36  ;;  %4112 = vst.msk [vmem:[#allocation2 + $0x4e] sm:$0xff] %vm4106_vm1, %v4093_v42 }
 0x402   : > { %v3928_v20 = vadd.f32 %v3927_v45, %v3926_v24  ;;  %v3923_v53 = vmul.f32 %v9545_v46, %v8941_v62  ;;  %v3990_v26 = vmul.f32 %v8596_v3, %v8941_v62  ;;  %v8959_v35 = vadd.f32 %v3994_v63, %v3993_v0 }
 0x403   : > { %v4022_v57 = vmul.f32 %v9546_v14, %v8941_v62  ;;  %v3858_v43 = vmul.f32 %v9547_v17, %v8945_v23  ;;  %v3859_v2 = vmul.f32 %v9548_v9, %v8941_v62  ;;  %v4026_v59 = vsel %vm3065_vm15, %v4019_v50, 0.0  ;;  %v4095_v45 = vpop.permute.xlu0 %4094 }
 0x404   : > { %v3936_v29 = vsel %vm3065_vm15, %v3923_v53, 0.0  ;;  %v4003_v1 = vsel %vm3065_vm15, %v3990_v26, 0.0  ;;  %v3890_v3 = vmul.f32 %v9549_v34, %v8945_v23  ;;  %v3891_v18 = vmul.f32 %v8609_v44, %v8941_v62  ;;  %v9551_v26 = vld [vmem:[#allocation118_spill] sm:$0xff]  ;;  %4113 = vst.msk [vmem:[#allocation2 + $0x66] sm:$0xff] %vm4106_vm1, %v4095_v45 }
 0x405   : > { %v3937_v5 = vadd.f32 %v3936_v29, %v3935_v10  ;;  %v4004_v36 = vadd.f32 %v4003_v1, %v4002_v60  ;;  %v4035_v24 = vsel %vm3065_vm15, %v4022_v57, 0.0  ;;  %v3865_v38 = vsel %vm3065_vm15, %v3858_v43, 0.0  ;;  %v4287_v29 = vld [vmem:[#allocation2 + $0x14] sm:$0xff] }
 0x406   : > { %v4036_v33 = vadd.f32 %v4035_v24, %v4034_v30  ;;  %v3866_v0 = vadd.f32 %v3865_v38, %v3864_v48  ;;  %v3872_v54 = vsel %vm3065_vm15, %v3859_v2, 0.0  ;;  %v3897_v31 = vsel %vm3065_vm15, %v3890_v3, 0.0  ;;  %v4188_v2 = vld [vmem:[#allocation2 + $0xe] sm:$0xff]  ;;  %v4123_v3 = vld [vmem:[#allocation2] sm:$0xff] }
 0x407   : > { %vm3959_vm7 = vcmp.ge.f32.partialorder %v3937_v5, 0.0  ;;  %v3961_v56 = vmul.f32 0.1, %v3937_v5  ;;  %vm4040_vm8 = vcmp.ge.f32.partialorder %v4004_v36, 0.0  ;;  %v4042_v10 = vmul.f32 0.1, %v4004_v36 }
 0x408   : > { %vm4049_vm9 = vcmp.ge.f32.partialorder %v4036_v33, 0.0  ;;  %v4051_v6 = vmul.f32 0.1, %v4036_v33  ;;  %v3873_v15 = vadd.f32 %v3872_v54, %v3871_v8  ;;  %v3898_v47 = vadd.f32 %v3897_v31, %v3896_v51  ;;  %v4097_v51 = vpop.permute.xlu1 %4096  ;;  %v4187_v54 = vld [vmem:[#allocation2 + $0x6] sm:$0xff] }
 0x409   : > { %v3963_v25 = vsel %vm3959_vm7, %v3937_v5, %v3961_v56  ;;  %v4044_v40 = vsel %vm4040_vm8, %v4004_v36, %v4042_v10  ;;  %v3904_v49 = vsel %vm3065_vm15, %v3891_v18, 0.0  ;;  %v3922_v13 = vmul.f32 %v9550_v22, %v8945_v23  ;;  %4114 = vst.msk [vmem:[#allocation2 + $0x6e] sm:$0xff] %vm4106_vm1, %v4097_v51  ;;  %v4124_v5 = vld [vmem:[#allocation2 + $0x8] sm:$0xff] }
 0x40a   : > { %4613 = vst.msk [vmem:[%s5148_s5 + $0xd8] sm:$0xff] %vm3065_vm15, %v3963_v25  ;;  %4615 = vst.msk [vmem:[%s5148_s5 + $0x128] sm:$0xff] %vm3065_vm15, %v4044_v40  ;;  %v4053_v44 = vsel %vm4049_vm9, %v4036_v33, %v4051_v6  ;;  %v3905_v60 = vadd.f32 %v3904_v49, %v3903_v19  ;;  %vm3940_vm10 = vcmp.ge.f32.partialorder %v3866_v0, 0.0  ;;  %vm3941_vm11 = vcmp.ge.f32.partialorder %v3873_v15, 0.0  ;;  %v4155_v36 = vld [vmem:[#allocation2 + $0x3] sm:$0xff]  ;;  %v4156_v33 = vld [vmem:[#allocation2 + $0xb] sm:$0xff] }
 0x40b   : > { %4617 = vst.msk [vmem:[%s5148_s5 + $0x178] sm:$0xff] %vm3065_vm15, %v4053_v44  ;;  %v3942_v37 = vmul.f32 0.1, %v3866_v0  ;;  %v3943_v30 = vmul.f32 0.1, %v3873_v15  ;;  %vm3949_vm12 = vcmp.ge.f32.partialorder %v3898_v47, 0.0  ;;  %v3989_v19 = vmul.f32 %v8611_v12, %v8945_v23 }
 0x40c   : > { %v3929_v48 = vsel %vm3065_vm15, %v3922_v13, 0.0  ;;  %vm3950_vm13 = vcmp.ge.f32.partialorder %v3905_v60, 0.0  ;;  %v3951_v8 = vmul.f32 0.1, %v3898_v47  ;;  %v3952_v39 = vmul.f32 0.1, %v3905_v60 }
 0x40d   : > { %v3930_v63 = vadd.f32 %v3929_v48, %v3928_v20  ;;  %v3944_v27 = vsel %vm3940_vm10, %v3866_v0, %v3942_v37  ;;  %v3945_v50 = vsel %vm3941_vm11, %v3873_v15, %v3943_v30  ;;  %v4021_v14 = vmul.f32 %v9551_v26, %v8945_v23  ;;  %v4254_v18 = vld [vmem:[#allocation2 + $0x9] sm:$0xff]  ;;  %v4257_v6 = vld [vmem:[#allocation2 + $0x31] sm:$0xff]  ;;  %v4125_v49 = vld [vmem:[#allocation2 + $0x20] sm:$0xff] }
 0x40e   : > { %4608 = vst.msk [vmem:[%s5148_s5 + $0x30] sm:$0xff] %vm3065_vm15, %v3944_v27  ;;  %4609 = vst.msk [vmem:[%s5148_s5 + $0x38] sm:$0xff] %vm3065_vm15, %v3945_v50  ;;  %v3953_v46 = vsel %vm3949_vm12, %v3898_v47, %v3951_v8  ;;  %v3954_v53 = vsel %vm3950_vm13, %v3905_v60, %v3952_v39  ;;  %v4027_v57 = vadd.f32 %v4026_v59, %v8922_v52  ;;  %v3996_v12 = vsel %vm3065_vm15, %v3989_v19, 0.0  ;;  %v4255_v59 = vld [vmem:[#allocation2 + $0x11] sm:$0xff]  ;;  %v4126_v44 = vld [vmem:[#allocation2 + $0x28] sm:$0xff] }
 0x40f   : > { %4610 = vst.msk [vmem:[%s5148_s5 + $0x80] sm:$0xff] %vm3065_vm15, %v3953_v46  ;;  %4611 = vst.msk [vmem:[%s5148_s5 + $0x88] sm:$0xff] %vm3065_vm15, %v3954_v53  ;;  %vm3958_vm14 = vcmp.ge.f32.partialorder %v3930_v63, 0.0  ;;  %v3960_v20 = vmul.f32 0.1, %v3930_v63  ;;  %v3997_v52 = vadd.f32 %v3996_v12, %v8959_v35  ;;  %v4028_v17 = vsel %vm3065_vm15, %v4021_v14, 0.0 }
 0x410   : > { %v4029_v9 = vadd.f32 %v4028_v17, %v4027_v57  ;;  %v4196_v35 = vmul.f32 %v4188_v2, %v8800_v21  ;;  %v4263_v1 = vmul.f32 %v4255_v59, %v8800_v21  ;;  %v4295_v34 = vmul.f32 %v4287_v29, %v8800_v21  ;;  %v4286_v56 = vld [vmem:[#allocation2 + $0xc] sm:$0xff]  ;;  %v4289_v47 = vld [vmem:[#allocation2 + $0x34] sm:$0xff]  ;;  %v4157_v39 = vld [vmem:[#allocation2 + $0x23] sm:$0xff] }
 0x411   : > { %v3962_v43 = vsel %vm3958_vm14, %v3930_v63, %v3960_v20  ;;  %vm4039_vm3 = vcmp.ge.f32.partialorder %v3997_v52, 0.0  ;;  %v4041_v55 = vmul.f32 0.1, %v3997_v52  ;;  %v4131_v24 = vmul.f32 %v4123_v3, %v8833_v11  ;;  %v4190_v10 = vld [vmem:[#allocation2 + $0x2e] sm:$0xff]  ;;  %v4189_v50 = vld [vmem:[#allocation2 + $0x26] sm:$0xff] }
 0x412   : > { %4612 = vst.msk [vmem:[%s5148_s5 + $0xd0] sm:$0xff] %vm3065_vm15, %v3962_v43  ;;  %vm4048_vm0 = vcmp.ge.f32.partialorder %v4029_v9, 0.0  ;;  %v4050_v16 = vmul.f32 0.1, %v4029_v9  ;;  %v4132_v38 = vmul.f32 %v4124_v5, %v8800_v21  ;;  %v4163_v0 = vmul.f32 %v4155_v36, %v8833_v11  ;;  %v4158_v51 = vld [vmem:[#allocation2 + $0x2b] sm:$0xff] }
 0x413   : > { %v4043_v28 = vsel %vm4039_vm3, %v3997_v52, %v4041_v55  ;;  %v4210_v42 = vsel %vm3065_vm15, %v4196_v35, 0.0  ;;  %v4164_v7 = vmul.f32 %v4156_v33, %v8800_v21  ;;  %v4277_v15 = vsel %vm3065_vm15, %v4263_v1, 0.0  ;;  %v4256_v19 = vld [vmem:[#allocation2 + $0x29] sm:$0xff]  ;;  %v4259_v12 = vld [vmem:[#allocation2 + $0x51] sm:$0xff] }
 0x414   : > { %4614 = vst.msk [vmem:[%s5148_s5 + $0x120] sm:$0xff] %vm3065_vm15, %v4043_v28  ;;  %v4052_v4 = vsel %vm4048_vm0, %v4029_v9, %v4050_v16  ;;  %v4309_v31 = vsel %vm3065_vm15, %v4295_v34, 0.0  ;;  %v4139_v25 = vsel %vm3065_vm15, %v4131_v24, 0.0  ;;  %v4195_v40 = vmul.f32 %v4187_v54, %v8833_v11  ;;  %v4288_v46 = vld [vmem:[#allocation2 + $0x2c] sm:$0xff]  ;;  %v4291_v55 = vld [vmem:[#allocation2 + $0x54] sm:$0xff]  ;;  %v4127_v24 = vld [vmem:[#allocation2 + $0x40] sm:$0xff] }
 0x415   : > { %4616 = vst.msk [vmem:[%s5148_s5 + $0x170] sm:$0xff] %vm3065_vm15, %v4052_v4  ;;  %v4146_v60 = vsel %vm3065_vm15, %v4132_v38, 0.0  ;;  %v4262_v22 = vmul.f32 %v4254_v18, %v8833_v11  ;;  %v4294_v21 = vmul.f32 %v4286_v56, %v8833_v11  ;;  %v4198_v13 = vmul.f32 %v4190_v10, %v8848_v41  ;;  %v4192_v20 = vld [vmem:[#allocation2 + $0x4e] sm:$0xff] }
 0x416   : > { %v4171_v37 = vsel %vm3065_vm15, %v4163_v0, 0.0  ;;  %v4265_v30 = vmul.f32 %v4257_v6, %v8848_v41  ;;  %v4297_v48 = vmul.f32 %v4289_v47, %v8848_v41  ;;  %v4133_v8 = vmul.f32 %v4125_v49, %v8861_v32  ;;  %v4128_v54 = vld [vmem:[#allocation2 + $0x48] sm:$0xff] }
 0x417   : > { %v4178_v45 = vsel %vm3065_vm15, %v4164_v7, 0.0  ;;  %v4203_v63 = vsel %vm3065_vm15, %v4195_v40, 0.0  ;;  %v4211_v27 = vsel %vm3065_vm15, %v4198_v13, 0.0  ;;  %v4134_v11 = vmul.f32 %v4126_v44, %v8848_v41  ;;  %v4160_v18 = vld [vmem:[#allocation2 + $0x4b] sm:$0xff] }
 0x418   : > { %v4270_v53 = vsel %vm3065_vm15, %v4262_v22, 0.0  ;;  %v4302_v26 = vsel %vm3065_vm15, %v4294_v21, 0.0  ;;  %v4278_v14 = vsel %vm3065_vm15, %v4265_v30, 0.0  ;;  %v4310_v57 = vsel %vm3065_vm15, %v4297_v48, 0.0  ;;  %v4191_v6 = vld [vmem:[#allocation2 + $0x46] sm:$0xff]  ;;  %v4194_v44 = vld [vmem:[#allocation2 + $0x6e] sm:$0xff] }
 0x419   : > { %v4212_v52 = vadd.f32 %v4211_v27, %v4210_v42  ;;  %v4279_v17 = vadd.f32 %v4278_v14, %v4277_v15  ;;  %v4311_v43 = vadd.f32 %v4310_v57, %v4309_v31  ;;  %v4140_v9 = vsel %vm3065_vm15, %v4133_v8, 0.0  ;;  %v4258_v15 = vld [vmem:[#allocation2 + $0x49] sm:$0xff]  ;;  %v4261_v27 = vld [vmem:[#allocation2 + $0x71] sm:$0xff] }
 0x41a   : > { %v4147_v16 = vsel %vm3065_vm15, %v4134_v11, 0.0  ;;  %v4165_v28 = vmul.f32 %v4157_v39, %v8861_v32  ;;  %v4166_v4 = vmul.f32 %v4158_v51, %v8848_v41  ;;  %v4197_v2 = vmul.f32 %v4189_v50, %v8861_v32  ;;  %v4290_v31 = vld [vmem:[#allocation2 + $0x4c] sm:$0xff] }
 0x41b   : > { %v4264_v59 = vmul.f32 %v4256_v19, %v8861_v32  ;;  %v4296_v29 = vmul.f32 %v4288_v46, %v8861_v32  ;;  %v4200_v35 = vmul.f32 %v4192_v20, %v8891_v58  ;;  %v4267_v1 = vmul.f32 %v4259_v12, %v8891_v58  ;;  %v4159_v32 = vld [vmem:[#allocation2 + $0x43] sm:$0xff]  ;;  %v4293_v46 = vld [vmem:[#allocation2 + $0x74] sm:$0xff] }
 0x41c   : > { %v4172_v34 = vsel %vm3065_vm15, %v4165_v28, 0.0  ;;  %v4179_v3 = vsel %vm3065_vm15, %v4166_v4, 0.0  ;;  %v4204_v5 = vsel %vm3065_vm15, %v4197_v2, 0.0  ;;  %v4299_v36 = vmul.f32 %v4291_v55, %v8891_v58  ;;  %v4161_v12 = vld [vmem:[#allocation2 + $0x63] sm:$0xff] }
 0x41d   : > { %v4141_v41 = vadd.f32 %v4140_v9, %v4139_v25  ;;  %v4148_v38 = vadd.f32 %v4147_v16, %v4146_v60  ;;  %v4173_v33 = vadd.f32 %v4172_v34, %v4171_v37  ;;  %v4271_v0 = vsel %vm3065_vm15, %v4264_v59, 0.0  ;;  %v4193_v9 = vld [vmem:[#allocation2 + $0x66] sm:$0xff] }
 0x41e   : > { %v4180_v42 = vadd.f32 %v4179_v3, %v4178_v45  ;;  %v4205_v7 = vadd.f32 %v4204_v5, %v4203_v63  ;;  %v4303_v56 = vsel %vm3065_vm15, %v4296_v29, 0.0  ;;  %v4213_v10 = vsel %vm3065_vm15, %v4200_v35, 0.0 }
 0x41f   : > { %v9058_v40 = vadd.f32 %v4271_v0, %v4270_v53  ;;  %v9060_v47 = vadd.f32 %v4303_v56, %v4302_v26  ;;  %v4214_v25 = vadd.f32 %v4213_v10, %v4212_v52  ;;  %v4280_v49 = vsel %vm3065_vm15, %v4267_v1, 0.0  ;;  %v4129_v53 = vld [vmem:[#allocation2 + $0x60] sm:$0xff]  ;;  %v4130_v26 = vld [vmem:[#allocation2 + $0x68] sm:$0xff] }
 0x420   : > { %v4312_v60 = vsel %vm3065_vm15, %v4299_v36, 0.0  ;;  %v4135_v22 = vmul.f32 %v4127_v24, %v8911_v61  ;;  %v4136_v21 = vmul.f32 %v4128_v54, %v8891_v58  ;;  %v4167_v13 = vmul.f32 %v4159_v32, %v8911_v61  ;;  %v4162_v52 = vld [vmem:[#allocation2 + $0x6b] sm:$0xff] }
 0x421   : > { %v4168_v37 = vmul.f32 %v4160_v18, %v8891_v58  ;;  %v4199_v30 = vmul.f32 %v4191_v6, %v8911_v61  ;;  %v4266_v48 = vmul.f32 %v4258_v15, %v8911_v61  ;;  %v4298_v8 = vmul.f32 %v4290_v31, %v8911_v61 }
 0x422   : > { %v4142_v39 = vsel %vm3065_vm15, %v4135_v22, 0.0  ;;  %v4149_v51 = vsel %vm3065_vm15, %v4136_v21, 0.0  ;;  %v4174_v45 = vsel %vm3065_vm15, %v4167_v13, 0.0  ;;  %v4202_v63 = vmul.f32 %v4194_v44, %v8941_v62  ;;  %v4292_v44 = vld [vmem:[#allocation2 + $0x6c] sm:$0xff] }
 0x423   : > { %v4281_v11 = vadd.f32 %v4280_v49, %v4279_v17  ;;  %v4313_v50 = vadd.f32 %v4312_v60, %v4311_v43  ;;  %v4143_v19 = vadd.f32 %v4142_v39, %v4141_v41  ;;  %v4181_v58 = vsel %vm3065_vm15, %v4168_v37, 0.0  ;;  %v4260_v49 = vld [vmem:[#allocation2 + $0x69] sm:$0xff] }
 0x424   : > { %v4150_v14 = vadd.f32 %v4149_v51, %v4148_v38  ;;  %v4175_v57 = vadd.f32 %v4174_v45, %v4173_v33  ;;  %v4182_v61 = vadd.f32 %v4181_v58, %v4180_v42  ;;  %v4206_v20 = vsel %vm3065_vm15, %v4199_v30, 0.0 }
 0x425   : > { %v4207_v55 = vadd.f32 %v4206_v20, %v4205_v7  ;;  %v4273_v16 = vsel %vm3065_vm15, %v4266_v48, 0.0  ;;  %v4305_v17 = vsel %vm3065_vm15, %v4298_v8, 0.0  ;;  %v4215_v43 = vsel %vm3065_vm15, %v4202_v63, 0.0 }
 0x426   : > { %v4216_v28 = vadd.f32 %v4215_v43, %v4214_v25  ;;  %v4269_v4 = vmul.f32 %v4261_v27, %v8941_v62  ;;  %v4301_v2 = vmul.f32 %v4293_v46, %v8941_v62  ;;  %v4137_v59 = vmul.f32 %v4129_v53, %v8945_v23 }
 0x427   : > { %v4138_v29 = vmul.f32 %v4130_v26, %v8941_v62  ;;  %v4169_v35 = vmul.f32 %v4161_v12, %v8945_v23  ;;  %v4170_v1 = vmul.f32 %v4162_v52, %v8941_v62  ;;  %v4201_v34 = vmul.f32 %v4193_v9, %v8945_v23 }
 0x428   : > { %vm4238_vm2 = vcmp.ge.f32.partialorder %v4216_v28, 0.0  ;;  %v4240_v3 = vmul.f32 0.1, %v4216_v28  ;;  %v4282_v5 = vsel %vm3065_vm15, %v4269_v4, 0.0  ;;  %v4314_v36 = vsel %vm3065_vm15, %v4301_v2, 0.0 }
 0x429   : > { %v4283_v24 = vadd.f32 %v4282_v5, %v4281_v11  ;;  %v4315_v41 = vadd.f32 %v4314_v36, %v4313_v50  ;;  %v4144_v38 = vsel %vm3065_vm15, %v4137_v59, 0.0  ;;  %v4151_v33 = vsel %vm3065_vm15, %v4138_v29, 0.0 }
 0x42a   : > { %v4242_v0 = vsel %vm4238_vm2, %v4216_v28, %v4240_v3  ;;  %v4145_v54 = vadd.f32 %v4144_v38, %v4143_v19  ;;  %v4152_v32 = vadd.f32 %v4151_v33, %v4150_v14  ;;  %v4176_v18 = vsel %vm3065_vm15, %v4169_v35, 0.0 }
 0x42b   : > { %4623 = vst.msk [vmem:[%s5148_s5 + $0xe8] sm:$0xff] %vm3065_vm15, %v4242_v0  ;;  %vm4319_vm4 = vcmp.ge.f32.partialorder %v4283_v24, 0.0  ;;  %v4321_v62 = vmul.f32 0.1, %v4283_v24  ;;  %vm4328_vm5 = vcmp.ge.f32.partialorder %v4315_v41, 0.0  ;;  %v4177_v7 = vadd.f32 %v4176_v18, %v4175_v57 }
 0x42c   : > { %v4330_v42 = vmul.f32 0.1, %v4315_v41  ;;  %v4183_v56 = vsel %vm3065_vm15, %v4170_v1, 0.0  ;;  %v4208_v10 = vsel %vm3065_vm15, %v4201_v34, 0.0  ;;  %vm4219_vm6 = vcmp.ge.f32.partialorder %v4145_v54, 0.0 }
 0x42d   : > { %v4323_v6 = vsel %vm4319_vm4, %v4283_v24, %v4321_v62  ;;  %v4184_v31 = vadd.f32 %v4183_v56, %v4182_v61  ;;  %v4209_v25 = vadd.f32 %v4208_v10, %v4207_v55  ;;  %vm4220_vm7 = vcmp.ge.f32.partialorder %v4152_v32, 0.0 }
 0x42e   : > { %v4332_v15 = vsel %vm4328_vm5, %v4315_v41, %v4330_v42  ;;  %4625 = vst.msk [vmem:[%s5148_s5 + $0x138] sm:$0xff] %vm3065_vm15, %v4323_v6  ;;  %v4221_v60 = vmul.f32 0.1, %v4145_v54  ;;  %v4222_v22 = vmul.f32 0.1, %v4152_v32  ;;  %vm4228_vm8 = vcmp.ge.f32.partialorder %v4177_v7, 0.0 }
 0x42f   : > { %4627 = vst.msk [vmem:[%s5148_s5 + $0x188] sm:$0xff] %vm3065_vm15, %v4332_v15  ;;  %vm4229_vm9 = vcmp.ge.f32.partialorder %v4184_v31, 0.0  ;;  %v4230_v21 = vmul.f32 0.1, %v4177_v7  ;;  %v4231_v13 = vmul.f32 0.1, %v4184_v31  ;;  %v4268_v8 = vmul.f32 %v4260_v49, %v8945_v23 }
 0x430   : > { %vm4237_vm10 = vcmp.ge.f32.partialorder %v4209_v25, 0.0  ;;  %v4223_v37 = vsel %vm4219_vm6, %v4145_v54, %v4221_v60  ;;  %v4224_v30 = vsel %vm4220_vm7, %v4152_v32, %v4222_v22  ;;  %v4239_v48 = vmul.f32 0.1, %v4209_v25 }
 0x431   : > { %v4274_v39 = vadd.f32 %v4273_v16, %v9058_v40  ;;  %4618 = vst.msk [vmem:[%s5148_s5 + $0x40] sm:$0xff] %vm3065_vm15, %v4223_v37  ;;  %4619 = vst.msk [vmem:[%s5148_s5 + $0x48] sm:$0xff] %vm3065_vm15, %v4224_v30  ;;  %v4232_v51 = vsel %vm4228_vm8, %v4177_v7, %v4230_v21  ;;  %v4233_v45 = vsel %vm4229_vm9, %v4184_v31, %v4231_v13  ;;  %v4275_v50 = vsel %vm3065_vm15, %v4268_v8, 0.0 }
 0x432   : > { %v4300_v63 = vmul.f32 %v4292_v44, %v8945_v23  ;;  %v4306_v27 = vadd.f32 %v4305_v17, %v9060_v47  ;;  %4620 = vst.msk [vmem:[%s5148_s5 + $0x90] sm:$0xff] %vm3065_vm15, %v4232_v51  ;;  %4621 = vst.msk [vmem:[%s5148_s5 + $0x98] sm:$0xff] %vm3065_vm15, %v4233_v45  ;;  %v4241_v11 = vsel %vm4237_vm10, %v4209_v25, %v4239_v48 }
 0x433   : > { %4622 = vst.msk [vmem:[%s5148_s5 + $0xe0] sm:$0xff] %vm3065_vm15, %v4241_v11  ;;  %v4276_v40 = vadd.f32 %v4275_v50, %v4274_v39 }
 0x434   : > { %v4307_v19 = vsel %vm3065_vm15, %v4300_v63, 0.0 }
 0x435   : > { %v4308_v58 = vadd.f32 %v4307_v19, %v4306_v27  ;;  %vm4318_vm11 = vcmp.ge.f32.partialorder %v4276_v40, 0.0  ;;  %v4320_v46 = vmul.f32 0.1, %v4276_v40 }
 0x437   : > { %vm4327_vm12 = vcmp.ge.f32.partialorder %v4308_v58, 0.0  ;;  %v4329_v23 = vmul.f32 0.1, %v4308_v58  ;;  %v4322_v53 = vsel %vm4318_vm11, %v4276_v40, %v4320_v46 }
 0x438   : > { %4624 = vst.msk [vmem:[%s5148_s5 + $0x130] sm:$0xff] %vm3065_vm15, %v4322_v53 }
 0x439   : > { %v4331_v47 = vsel %vm4327_vm12, %v4308_v58, %v4329_v23 }
 0x43a   : > { %4626 = vst.msk [vmem:[%s5148_s5 + $0x180] sm:$0xff] %vm3065_vm15, %v4331_v47 }
 0x43b PF: > { %s4344_s23 = smul.u32 3, %s4935_s16  ;;  %s4353_s14 = sshll.u32 %s5148_s5, 4  ;;  %s9124_s14 = int_to_ptr.vmem [resolvable:$true] %s4353_s14 }
 0x43c   : > { %s9133_s4 = scalar_lea.sflag [#allocation5], %s230_s0  ;;  %s4823_s29 = scalar_lea.vmem %s9124_s14, 6400 }
 0x43d   : > { %s4345_s30 = sadd.s32 %s4931_s15, %s4344_s23  ;;  %p4824_p2 = scmp.ne.s32.totalorder %s9124_s14, %s4823_s29 }
 0x43e   : > { %s4634_s17 = smul.u32 6400, %s4345_s30  ;;  %s4968_s15 = smov [#allocation8]  }
 0x43f   : > { %p4825_p6 = pnand %p4824_p2, %p5073_p11  ;;  %s4827_s16 = sshll.u32 %s4968_s15, 4  ;;  %s4828_s16 = int_to_ptr.vmem [resolvable:$false] %s4827_s16 }
 0x440   : > { %s9129_s27 = scalar_lea.hbm %s9195_s2, %s4634_s17  ;;  %s4829_s5 = scalar_lea.vmem %s4828_s16, 12800 }
 0x441   : > { %p4826_p8 = pneg %p4825_p6  ;;  %p4830_p9 = scmp.lt.s32.totalorder %s9124_s14, %s4828_s16 }
 0x442   : > { %p4831_p3 = scmp.lt.s32.totalorder %s4829_s5, %s4823_s29 }
 0x444   : > { %p4832_p10 = por %p4831_p3, %p4830_p9 }
 0x446   : > { %p4833_p12 = pnand %p4832_p10, %p4826_p8 }
 0x448   : > { %4836 = shalt.err (!%p4833_p12)
}
 0x449   : > { %s4837_s0 = scalar_lea.hbm %s9129_s27, 6400  ;;  %s4841_s21 = scalar_lea.hbm %s9195_s2, 38400 }
 0x44a   : > { %p4838_p13 = scmp.ne.s32.totalorder %s9129_s27, %s4837_s0  ;;  %p4842_p7 = scmp.lt.s32.totalorder %s9129_s27, %s9195_s2 }
 0x44b   : > { %p4843_p5 = scmp.lt.s32.totalorder %s4841_s21, %s4837_s0 }
 0x44c   : > { %p4839_p0 = pnand %p4838_p13, %p5073_p11 }
 0x44d   : > { %p4844_p2 = por %p4843_p5, %p4842_p7 }
 0x44e   : > { %p4840_p4 = pneg %p4839_p0 }
 0x450   : > { %p4845_p6 = pnand %p4844_p2, %p4840_p4 }
 0x452   : > { %4848 = shalt.err (!%p4845_p6)
}
 0x453   : > { %s4969_s20 = smov 128   ;;  %s4970_s26 = smov 8  }
 0x454   : > { %4639 = dma.vmem_to_hbm [thread:$0]  (%p5073_p11), %s9124_s14, 6400, %s9129_s27, %s9133_s4, %s4969_s20, %s4969_s20, %s4970_s26  }
 0x455 PF: > { %p4653_p8 = scmp.ge.s32.totalorder %s4947_s19, 2  ;;  %s4368_s23 = sand.u32 1, %s4907_s9  }
 0x456   : > { %s4369_s30 = scalar_lea.sflag [#allocation5], %s4368_s23 }
 0x457   : > { %p4649_p9 = pnand %p4653_p8, %p5084_p1 }
 0x459   : > { %p4650_p3 = pneg %p4649_p9 }
 0x45b   : > { %4902 = dma.done.wait (%p4650_p3), %s4369_s30, 6400  }
 0x45c   : > { %4904 = vsyncadd (%p4650_p3), %s4369_s30, 4294960896  ;;  %s21_s19 = sadd.s32 1, %s4947_s19   ;;  %s9552_s7 = sld [smem:[#allocation12_spill]] }
 0x45d   : > { %p18_p10 = scmp.ge.s32.totalorder %s21_s19, 8   ;;  %s9553_s14 = sld [smem:[#allocation16_spill]] }
 0x45e   : > { %s9554_s15 = sld [smem:[#allocation13_spill]]  ;;  %s9557_s9 = smov %s4911_s10 }
 0x45f   : > { %s9555_s17 = sld [smem:[#allocation14_spill]]  ;;  %s9558_s10 = smov %s4915_s11 }
 0x460   : > { %s9556_s28 = sld [smem:[#allocation15_spill]]  ;;  %s9559_s11 = smov %s5082_s8 }
 0x461   : > { %s9560_s12 = smov %s4923_s13  ;;  %s9562_s16 = smov %s4943_s18 }
 0x462   : > { %s9561_s13 = smov %s9552_s7  ;;  %20 = sbr.rel (!%p18_p10) target bundleno = 13 (0xd), region = 170 }
 0x466   : > { %s9563_s18 = smov %s9556_s28 }
 0x467   :  { %4374 = vsyncpa [#allocation4], 1 }
 0x468   :  { %4376 = vsyncpa [#allocation4 + $0x1], 1 }
 0x469   :  { %4377 = vsyncpa [#allocation7], 1 }
 0x46a   :  { %4379 = vsyncpa [#allocation7 + $0x1], 1 }
 0x46b   :  { %4380 = vsyncpa [#allocation5], 1 }
 0x46c   :  { %4382 = vsyncpa [#allocation5 + $0x1], 1 }

</bundles_post_ra>
